<compile_context>
chip_gen: v7x
topology: tpu7x:2x2x1
jax: 0.10.0
libtpu: 0.0.40
codegen_flags: <defaults>
</compile_context>

<pallas_src>
import jax
import jax.numpy as jnp
from jax.experimental import pallas as pl
from jax.experimental.pallas import tpu as pltpu

BB = 8  # images per grid step (exactly one sublane tile)


# ----------------------------------------------------------------------------
# Fused kernel
# ----------------------------------------------------------------------------
def _simple_cnn_kernel(x_ref,      # (1, 30, 30, BB, 1)  spatially pre-padded input
                       w1_ref,     # (9, BB, 32)         conv1 taps (pre-broadcast rows)
                       b1_ref,     # (BB, 32)
                       w2_ref,     # (9, 32, 64)         conv2 taps (ki*3+kj, c_in, c_out)
                       b2_ref,     # (BB, 64)
                       wf1_ref,    # (49, 64, 128)       fc1, rows permuted for NHWC order
                       bf1_ref,    # (BB, 128)
                       wf2_ref,    # (128, 128)          fc2, zero-padded 10 -> 128
                       bf2_ref,    # (BB, 128)
                       out_ref,    # (1, BB, 128)
                       xb_ref,     # VMEM (30, 30, BB, 32)  lane-broadcast input
                       pad2_ref,   # VMEM (16, 16*BB, 32)   padded conv2 input
                       p2_ref):    # VMEM (49, BB, 64)      pooled conv2 output
    f32 = jnp.float32

    # Broadcast the single input channel across the 32 conv1 output lanes once,
    # so the stencil loop below works on full (8, 32) tiles with no per-tile
    # lane broadcasts.
    @pl.loop(0, 30)
    def _bcast_row(h):
        xb_ref[h] = jnp.broadcast_to(x_ref[0, h], (30, BB, 32))

    # Padded conv2 input: borders must be zero, interior is rewritten below.
    pad2_ref[...] = jnp.zeros(pad2_ref.shape, f32)

    # ---- conv1 (1->32, 3x3, pad 1) + bias + relu + 2x2 max-pool (VPU) ------
    # One pooled output row per step, in two half-width chunks so the
    # accumulator (2, 14, BB, 32) = 28 vregs stays register-resident.
    @pl.loop(0, 14)
    def _conv1_pool1_row(io):
        for half in range(2):                      # static
            w0 = 14 * half
            acc = None
            for k in range(9):
                ki, kj = divmod(k, 3)
                xin = xb_ref[pl.ds(2 * io + ki, 2), pl.ds(w0 + kj, 14), :, :]
                term = xin * w1_ref[k]             # (2, 14, BB, 32) full-tile FMA
                acc = term if acc is None else acc + term
            m = jnp.maximum(acc[0], acc[1])        # pool over the H pair -> (14, BB, 32)
            m = m.reshape(7, 2, BB, 32)            # layout-preserving split
            p = jnp.maximum(m[:, 0], m[:, 1])      # pool over the W pair -> (7, BB, 32)
            p = jnp.maximum(p + b1_ref[...], 0.0)  # bias + relu
            # one aligned store of the half-row into the padded conv2 input
            pad2_ref[1 + io, pl.ds((1 + 7 * half) * BB, 7 * BB), :] = \
                p.reshape(7 * BB, 32)

    # ---- conv2 (32->64, 3x3, pad 1) + bias + relu + 2x2 max-pool (MXU) -----
    # Both conv rows of a pooled pair share one (224, 32) @ (32, 64) matmul per
    # tap: 9 matmuls per pooled row, accumulator (224, 64) stays in registers.
    @pl.loop(0, 7)
    def _conv2_pool2_row(io2):
        acc = None
        for k in range(9):
            ki, kj = divmod(k, 3)
            lhs = pad2_ref[pl.ds(2 * io2 + ki, 2), pl.ds(kj * BB, 14 * BB), :]
            d = jnp.dot(lhs.reshape(2 * 14 * BB, 32), w2_ref[k],
                        preferred_element_type=f32)
            acc = d if acc is None else acc + d
        mh = jnp.maximum(acc[:14 * BB], acc[14 * BB:])   # H-pool -> (112, 64)
        mh = mh.reshape(7, 2, BB, 64)                    # layout-preserving split
        pw = jnp.maximum(mh[:, 0], mh[:, 1])             # W-pool -> (7, BB, 64)
        p2_ref[pl.ds(io2 * 7, 7)] = jnp.maximum(pw + b2_ref[...], 0.0)

    # ---- fc1 (3136->128) + relu, then fc2 (128->10, padded to 128) ---------
    acc = jnp.dot(p2_ref[0], wf1_ref[0], preferred_element_type=f32)
    for t in range(1, 49):                          # t = i*7 + j (spatial position)
        acc = acc + jnp.dot(p2_ref[t], wf1_ref[t], preferred_element_type=f32)
    h = jnp.maximum(acc + bf1_ref[...], 0.0)        # (BB, 128)
    logits = jnp.dot(h, wf2_ref[...], preferred_element_type=f32) + bf2_ref[...]
    out_ref[0] = logits                             # (BB, 128); columns >= 10 are zero


# ----------------------------------------------------------------------------
# Parameter setup / repacking (PyTorch layouts -> kernel layouts)
# ----------------------------------------------------------------------------
def init_params(key):
    """Deterministic synthetic parameters with PyTorch-module shapes."""
    ks = jax.random.split(key, 8)

    def w(k, shape, fan_in):
        return jax.random.normal(k, shape, jnp.float32) / jnp.sqrt(fan_in)

    return dict(
        conv1_w=w(ks[0], (32, 1, 3, 3), 9),
        conv1_b=w(ks[1], (32,), 9),
        conv2_w=w(ks[2], (64, 32, 3, 3), 288),
        conv2_b=w(ks[3], (64,), 288),
        fc1_w=w(ks[4], (128, 64 * 7 * 7), 64 * 7 * 7),
        fc1_b=w(ks[5], (128,), 64 * 7 * 7),
        fc2_w=w(ks[6], (10, 128), 128),
        fc2_b=w(ks[7], (10,), 128),
    )


def pack_params(p):
    """Rearrange PyTorch-layout parameters into the kernel's VMEM layouts."""
    # conv1: (co, 1, ki, kj) -> (ki*3+kj, BB, co)   (pre-broadcast over sublanes)
    w1 = jnp.transpose(p["conv1_w"][:, 0], (1, 2, 0)).reshape(9, 1, 32)
    w1 = jnp.broadcast_to(w1, (9, BB, 32))
    b1 = jnp.broadcast_to(p["conv1_b"].reshape(1, 32), (BB, 32))
    # conv2: (co, ci, ki, kj) -> (ki*3+kj, ci, co)
    w2 = jnp.transpose(p["conv2_w"], (2, 3, 1, 0)).reshape(9, 32, 64)
    b2 = jnp.broadcast_to(p["conv2_b"].reshape(1, 64), (BB, 64))
    # fc1: fold PyTorch's x.view(-1, 64*7*7) (NCHW order, f = c*49 + i*7 + j)
    # into the weight: wf1[t=i*7+j, c, n] = W_fc1[n, c*49 + i*7 + j]
    wf1 = jnp.transpose(p["fc1_w"].reshape(128, 64, 7, 7),
                        (2, 3, 1, 0)).reshape(49, 64, 128)
    bf1 = jnp.broadcast_to(p["fc1_b"].reshape(1, 128), (BB, 128))
    # fc2: transpose and zero-pad 10 -> 128 output lanes (lane-dense output)
    wf2 = jnp.zeros((128, 128), jnp.float32).at[:, :10].set(p["fc2_w"].T)
    bf2 = jnp.broadcast_to(
        jnp.zeros((1, 128), jnp.float32).at[0, :10].set(p["fc2_b"]), (BB, 128))
    return tuple(jnp.asarray(a, jnp.float32)
                 for a in (w1, b1, w2, b2, wf1, bf1, wf2, bf2))


# ----------------------------------------------------------------------------
# Forward pass
# ----------------------------------------------------------------------------
@jax.jit
def simple_cnn_forward(x_nchw, packed):
    """x_nchw: (B, 1, 28, 28) float32 -> logits (B, 10)."""
    w1, b1, w2, b2, wf1, bf1, wf2, bf2 = packed
    B = x_nchw.shape[0]
    nb = -(-B // BB)
    Bp = nb * BB

    # NCHW -> per-grid-step (30, 30, BB, 1) blocks (zero-padded spatially and
    # in batch); tiny one-time layout glue on the raw input only.
    x = x_nchw[:, 0]
    x = jnp.pad(x, ((0, Bp - B), (1, 1), (1, 1)))              # (Bp, 30, 30)
    x = jnp.transpose(x, (1, 2, 0)).reshape(30, 30, nb, BB)
    x = jnp.transpose(x, (2, 0, 1, 3))[..., None]              # (nb, 30, 30, BB, 1)

    const3 = lambda g: (0, 0, 0)
    const2 = lambda g: (0, 0)

    out = pl.pallas_call(
        _simple_cnn_kernel,
        out_shape=jax.ShapeDtypeStruct((nb, BB, 128), jnp.float32),
        grid=(nb,),
        in_specs=[
            pl.BlockSpec((1, 30, 30, BB, 1), lambda g: (g, 0, 0, 0, 0)),
            pl.BlockSpec((9, BB, 32), const3),    # weights: constant index_maps
            pl.BlockSpec((BB, 32), const2),       # -> stay resident in VMEM
            pl.BlockSpec((9, 32, 64), const3),
            pl.BlockSpec((BB, 64), const2),
            pl.BlockSpec((49, 64, 128), const3),
            pl.BlockSpec((BB, 128), const2),
            pl.BlockSpec((128, 128), const2),
            pl.BlockSpec((BB, 128), const2),
        ],
        out_specs=pl.BlockSpec((1, BB, 128), lambda g: (g, 0, 0)),
        scratch_shapes=[
            pltpu.VMEM((30, 30, BB, 32), jnp.float32),    # lane-broadcast input
            pltpu.VMEM((16, 16 * BB, 32), jnp.float32),   # padded conv2 input
            pltpu.VMEM((49, BB, 64), jnp.float32),        # pooled conv2 output
        ],
        compiler_params=pltpu.CompilerParams(
            dimension_semantics=("parallel",),            # megacore / 2 TCs on v7x
            vmem_limit_bytes=32 * 1024 * 1024,            # ~6 MiB used; portable to v7x
        ),
    )(x, w1, b1, w2, b2, wf1, bf1, wf2, bf2)

    return out.reshape(Bp, 128)[:B, :10]


# ----------------------------------------------------------------------------
# Pure-JAX reference (for correctness only)
# ----------------------------------------------------------------------------
def reference_forward(x, p):
    hp = jax.lax.Precision.HIGHEST
    dn = ("NCHW", "OIHW", "NCHW")
    B = x.shape[0]
    y = jax.lax.conv_general_dilated(x, p["conv1_w"], (1, 1), ((1, 1), (1, 1)),
                                     dimension_numbers=dn, precision=hp)
    y = jax.nn.relu(y + p["conv1_b"][None, :, None, None])
    y = y.reshape(B, 32, 14, 2, 14, 2).max(axis=(3, 5))
    y = jax.lax.conv_general_dilated(y, p["conv2_w"], (1, 1), ((1, 1), (1, 1)),
                                     dimension_numbers=dn, precision=hp)
    y = jax.nn.relu(y + p["conv2_b"][None, :, None, None])
    y = y.reshape(B, 64, 7, 2, 7, 2).max(axis=(3, 5))
    y = y.reshape(B, 64 * 7 * 7)
    y = jax.nn.relu(jnp.dot(y, p["fc1_w"].T, precision=hp) + p["fc1_b"])
    return jnp.dot(y, p["fc2_w"].T, precision=hp) + p["fc2_b"]


if __name__ == "__main__":
    key = jax.random.PRNGKey(0)
    kx, kp = jax.random.split(key)

    # MNIST-like input implied by fc1 = Linear(64*7*7, ...): (B, 1, 28, 28)
    x = jax.random.normal(kx, (2, 1, 28, 28), jnp.float32)
    params = init_params(kp)
    packed = pack_params(params)

    logits = simple_cnn_forward(x, packed)
    jax.block_until_ready(logits)
    assert logits.shape == (2, 10) and logits.dtype == jnp.float32

    ref = reference_forward(x, params)
    err = float(jnp.max(jnp.abs(logits - ref)))
    assert err < 1e-2, f"mismatch vs reference: max abs err = {err}"
    print("KERNEL_OK")
</pallas_src>

<mosaic_0001>
module attributes {stable_mosaic.version = 11 : i64} {
  func.func @_simple_cnn_kernel(%arg0: i32, %arg1: memref<1x30x30x8x1xf32, #tpu.memory_space<vmem>>, %arg2: memref<9x8x32xf32, #tpu.memory_space<vmem>>, %arg3: memref<8x32xf32, #tpu.memory_space<vmem>>, %arg4: memref<9x32x64xf32, #tpu.memory_space<vmem>>, %arg5: memref<8x64xf32, #tpu.memory_space<vmem>>, %arg6: memref<49x64x128xf32, #tpu.memory_space<vmem>>, %arg7: memref<8x128xf32, #tpu.memory_space<vmem>>, %arg8: memref<128x128xf32, #tpu.memory_space<vmem>>, %arg9: memref<8x128xf32, #tpu.memory_space<vmem>>, %arg10: memref<1x8x128xf32, #tpu.memory_space<vmem>>, %arg11: memref<30x30x8x32xf32, #tpu.memory_space<vmem>>, %arg12: memref<16x128x32xf32, #tpu.memory_space<vmem>>, %arg13: memref<49x8x64xf32, #tpu.memory_space<vmem>>) attributes {dimension_semantics = [#tpu.dimension_semantics<parallel>], iteration_bounds = array<i64: 1>, scalar_prefetch = 0 : i64, scratch_operands = 3 : i64, tpu.core_type = #tpu.core_type<tc>, window_params = [{transform_indices = @transform_0, window_bounds = array<i64: 1, 30, 30, 8, 1>}, {pipeline_mode = #tpu.pipeline_mode<synchronous>, transform_indices = @transform_1, window_bounds = array<i64: 9, 8, 32>}, {pipeline_mode = #tpu.pipeline_mode<synchronous>, transform_indices = @transform_2, window_bounds = array<i64: 8, 32>}, {pipeline_mode = #tpu.pipeline_mode<synchronous>, transform_indices = @transform_3, window_bounds = array<i64: 9, 32, 64>}, {pipeline_mode = #tpu.pipeline_mode<synchronous>, transform_indices = @transform_4, window_bounds = array<i64: 8, 64>}, {pipeline_mode = #tpu.pipeline_mode<synchronous>, transform_indices = @transform_5, window_bounds = array<i64: 49, 64, 128>}, {pipeline_mode = #tpu.pipeline_mode<synchronous>, transform_indices = @transform_6, window_bounds = array<i64: 8, 128>}, {pipeline_mode = #tpu.pipeline_mode<synchronous>, transform_indices = @transform_7, window_bounds = array<i64: 128, 128>}, {pipeline_mode = #tpu.pipeline_mode<synchronous>, transform_indices = @transform_8, window_bounds = array<i64: 8, 128>}, {transform_indices = @transform_9, window_bounds = array<i64: 1, 8, 128>}]} {
    %c0_i32 = arith.constant 0 : i32
    %c30_i32 = arith.constant 30 : i32
    %0 = arith.addi %c0_i32, %c30_i32 : i32
    %c1_i32 = arith.constant 1 : i32
    scf.for %arg14 = %c0_i32 to %0 step %c1_i32  : i32 {
      %c1_i32_315 = arith.constant 1 : i32
      %309 = arith.muli %arg14, %c1_i32_315 : i32
      %c0_i32_316 = arith.constant 0 : i32
      %310 = arith.addi %c0_i32_316, %309 : i32
      %c0_317 = arith.constant 0 : index
      %311 = arith.index_cast %310 : i32 to index
      %c0_318 = arith.constant 0 : index
      %c0_319 = arith.constant 0 : index
      %c0_320 = arith.constant 0 : index
      %312 = vector.load %arg1[%c0_317, %311, %c0_318, %c0_319, %c0_320] : memref<1x30x30x8x1xf32, #tpu.memory_space<vmem>>, vector<1x1x30x8x1xf32>
      %313 = vector.shape_cast %312 : vector<1x1x30x8x1xf32> to vector<30x8x1xf32>
      %314 = vector.shape_cast %313 : vector<30x8x1xf32> to vector<30x8x1xf32>
      %315 = vector.broadcast %314 : vector<30x8x1xf32> to vector<30x8x32xf32>
      %316 = arith.index_cast %310 : i32 to index
      %c0_321 = arith.constant 0 : index
      %c0_322 = arith.constant 0 : index
      %c0_323 = arith.constant 0 : index
      %317 = vector.load %arg11[%316, %c0_321, %c0_322, %c0_323] : memref<30x30x8x32xf32, #tpu.memory_space<vmem>>, vector<1x30x8x32xf32>
      %318 = vector.shape_cast %317 : vector<1x30x8x32xf32> to vector<30x8x32xf32>
      %319 = vector.shape_cast %315 : vector<30x8x32xf32> to vector<1x30x8x32xf32>
      tpu.vector_store %arg11[%316, %c0_321, %c0_322, %c0_323], %319 {strides = array<i32>} : memref<30x30x8x32xf32, #tpu.memory_space<vmem>>, vector<1x30x8x32xf32>,
    }
    %c30_i32_0 = arith.constant 30 : i32
    %cst = arith.constant 0.000000e+00 : f32
    %1 = vector.broadcast %cst : f32 to vector<16x128x32xf32>
    %c0 = arith.constant 0 : index
    %c0_1 = arith.constant 0 : index
    %c0_2 = arith.constant 0 : index
    %2 = vector.load %arg12[%c0, %c0_1, %c0_2] : memref<16x128x32xf32, #tpu.memory_space<vmem>>, vector<16x128x32xf32>
    tpu.vector_store %arg12[%c0, %c0_1, %c0_2], %1 {strides = array<i32>} : memref<16x128x32xf32, #tpu.memory_space<vmem>>, vector<16x128x32xf32>,
    %c0_i32_3 = arith.constant 0 : i32
    %c14_i32 = arith.constant 14 : i32
    %3 = arith.addi %c0_i32_3, %c14_i32 : i32
    %c1_i32_4 = arith.constant 1 : i32
    scf.for %arg14 = %c0_i32_3 to %3 step %c1_i32_4  : i32 {
      %c1_i32_315 = arith.constant 1 : i32
      %309 = arith.muli %arg14, %c1_i32_315 : i32
      %c0_i32_316 = arith.constant 0 : i32
      %310 = arith.addi %c0_i32_316, %309 : i32
      %c2_i32 = arith.constant 2 : i32
      %311 = arith.muli %c2_i32, %310 : i32
      %c0_i32_317 = arith.constant 0 : i32
      %312 = arith.addi %311, %c0_i32_317 : i32
      %313 = arith.index_cast %312 : i32 to index
      %c0_318 = arith.constant 0 : index
      %c0_319 = arith.constant 0 : index
      %c0_320 = arith.constant 0 : index
      %314 = vector.load %arg11[%313, %c0_318, %c0_319, %c0_320] : memref<30x30x8x32xf32, #tpu.memory_space<vmem>>, vector<2x14x8x32xf32>
      %c0_321 = arith.constant 0 : index
      %c0_322 = arith.constant 0 : index
      %c0_323 = arith.constant 0 : index
      %315 = vector.load %arg2[%c0_321, %c0_322, %c0_323] : memref<9x8x32xf32, #tpu.memory_space<vmem>>, vector<1x8x32xf32>
      %316 = vector.shape_cast %315 : vector<1x8x32xf32> to vector<8x32xf32>
      %317 = vector.shape_cast %316 : vector<8x32xf32> to vector<1x1x8x32xf32>
      %318 = vector.broadcast %317 : vector<1x1x8x32xf32> to vector<2x14x8x32xf32>
      %319 = arith.mulf %314, %318 : vector<2x14x8x32xf32>
      %c2_i32_324 = arith.constant 2 : i32
      %320 = arith.muli %c2_i32_324, %310 : i32
      %c0_i32_325 = arith.constant 0 : i32
      %321 = arith.addi %320, %c0_i32_325 : i32
      %322 = arith.index_cast %321 : i32 to index
      %c1_326 = arith.constant 1 : index
      %c0_327 = arith.constant 0 : index
      %c0_328 = arith.constant 0 : index
      %323 = vector.load %arg11[%322, %c1_326, %c0_327, %c0_328] : memref<30x30x8x32xf32, #tpu.memory_space<vmem>>, vector<2x14x8x32xf32>
      %c1_329 = arith.constant 1 : index
      %c0_330 = arith.constant 0 : index
      %c0_331 = arith.constant 0 : index
      %324 = vector.load %arg2[%c1_329, %c0_330, %c0_331] : memref<9x8x32xf32, #tpu.memory_space<vmem>>, vector<1x8x32xf32>
      %325 = vector.shape_cast %324 : vector<1x8x32xf32> to vector<8x32xf32>
      %326 = vector.shape_cast %325 : vector<8x32xf32> to vector<1x1x8x32xf32>
      %327 = vector.broadcast %326 : vector<1x1x8x32xf32> to vector<2x14x8x32xf32>
      %328 = arith.mulf %323, %327 : vector<2x14x8x32xf32>
      %329 = arith.addf %319, %328 : vector<2x14x8x32xf32>
      %c2_i32_332 = arith.constant 2 : i32
      %330 = arith.muli %c2_i32_332, %310 : i32
      %c0_i32_333 = arith.constant 0 : i32
      %331 = arith.addi %330, %c0_i32_333 : i32
      %332 = arith.index_cast %331 : i32 to index
      %c2_334 = arith.constant 2 : index
      %c0_335 = arith.constant 0 : index
      %c0_336 = arith.constant 0 : index
      %333 = vector.load %arg11[%332, %c2_334, %c0_335, %c0_336] : memref<30x30x8x32xf32, #tpu.memory_space<vmem>>, vector<2x14x8x32xf32>
      %c2_337 = arith.constant 2 : index
      %c0_338 = arith.constant 0 : index
      %c0_339 = arith.constant 0 : index
      %334 = vector.load %arg2[%c2_337, %c0_338, %c0_339] : memref<9x8x32xf32, #tpu.memory_space<vmem>>, vector<1x8x32xf32>
      %335 = vector.shape_cast %334 : vector<1x8x32xf32> to vector<8x32xf32>
      %336 = vector.shape_cast %335 : vector<8x32xf32> to vector<1x1x8x32xf32>
      %337 = vector.broadcast %336 : vector<1x1x8x32xf32> to vector<2x14x8x32xf32>
      %338 = arith.mulf %333, %337 : vector<2x14x8x32xf32>
      %339 = arith.addf %329, %338 : vector<2x14x8x32xf32>
      %c2_i32_340 = arith.constant 2 : i32
      %340 = arith.muli %c2_i32_340, %310 : i32
      %c1_i32_341 = arith.constant 1 : i32
      %341 = arith.addi %340, %c1_i32_341 : i32
      %342 = arith.index_cast %341 : i32 to index
      %c0_342 = arith.constant 0 : index
      %c0_343 = arith.constant 0 : index
      %c0_344 = arith.constant 0 : index
      %343 = vector.load %arg11[%342, %c0_342, %c0_343, %c0_344] : memref<30x30x8x32xf32, #tpu.memory_space<vmem>>, vector<2x14x8x32xf32>
      %c3_345 = arith.constant 3 : index
      %c0_346 = arith.constant 0 : index
      %c0_347 = arith.constant 0 : index
      %344 = vector.load %arg2[%c3_345, %c0_346, %c0_347] : memref<9x8x32xf32, #tpu.memory_space<vmem>>, vector<1x8x32xf32>
      %345 = vector.shape_cast %344 : vector<1x8x32xf32> to vector<8x32xf32>
      %346 = vector.shape_cast %345 : vector<8x32xf32> to vector<1x1x8x32xf32>
      %347 = vector.broadcast %346 : vector<1x1x8x32xf32> to vector<2x14x8x32xf32>
      %348 = arith.mulf %343, %347 : vector<2x14x8x32xf32>
      %349 = arith.addf %339, %348 : vector<2x14x8x32xf32>
      %c2_i32_348 = arith.constant 2 : i32
      %350 = arith.muli %c2_i32_348, %310 : i32
      %c1_i32_349 = arith.constant 1 : i32
      %351 = arith.addi %350, %c1_i32_349 : i32
      %352 = arith.index_cast %351 : i32 to index
      %c1_350 = arith.constant 1 : index
      %c0_351 = arith.constant 0 : index
      %c0_352 = arith.constant 0 : index
      %353 = vector.load %arg11[%352, %c1_350, %c0_351, %c0_352] : memref<30x30x8x32xf32, #tpu.memory_space<vmem>>, vector<2x14x8x32xf32>
      %c4_353 = arith.constant 4 : index
      %c0_354 = arith.constant 0 : index
      %c0_355 = arith.constant 0 : index
      %354 = vector.load %arg2[%c4_353, %c0_354, %c0_355] : memref<9x8x32xf32, #tpu.memory_space<vmem>>, vector<1x8x32xf32>
      %355 = vector.shape_cast %354 : vector<1x8x32xf32> to vector<8x32xf32>
      %356 = vector.shape_cast %355 : vector<8x32xf32> to vector<1x1x8x32xf32>
      %357 = vector.broadcast %356 : vector<1x1x8x32xf32> to vector<2x14x8x32xf32>
      %358 = arith.mulf %353, %357 : vector<2x14x8x32xf32>
      %359 = arith.addf %349, %358 : vector<2x14x8x32xf32>
      %c2_i32_356 = arith.constant 2 : i32
      %360 = arith.muli %c2_i32_356, %310 : i32
      %c1_i32_357 = arith.constant 1 : i32
      %361 = arith.addi %360, %c1_i32_357 : i32
      %362 = arith.index_cast %361 : i32 to index
      %c2_358 = arith.constant 2 : index
      %c0_359 = arith.constant 0 : index
      %c0_360 = arith.constant 0 : index
      %363 = vector.load %arg11[%362, %c2_358, %c0_359, %c0_360] : memref<30x30x8x32xf32, #tpu.memory_space<vmem>>, vector<2x14x8x32xf32>
      %c5_361 = arith.constant 5 : index
      %c0_362 = arith.constant 0 : index
      %c0_363 = arith.constant 0 : index
      %364 = vector.load %arg2[%c5_361, %c0_362, %c0_363] : memref<9x8x32xf32, #tpu.memory_space<vmem>>, vector<1x8x32xf32>
      %365 = vector.shape_cast %364 : vector<1x8x32xf32> to vector<8x32xf32>
      %366 = vector.shape_cast %365 : vector<8x32xf32> to vector<1x1x8x32xf32>
      %367 = vector.broadcast %366 : vector<1x1x8x32xf32> to vector<2x14x8x32xf32>
      %368 = arith.mulf %363, %367 : vector<2x14x8x32xf32>
      %369 = arith.addf %359, %368 : vector<2x14x8x32xf32>
      %c2_i32_364 = arith.constant 2 : i32
      %370 = arith.muli %c2_i32_364, %310 : i32
      %c2_i32_365 = arith.constant 2 : i32
      %371 = arith.addi %370, %c2_i32_365 : i32
      %372 = arith.index_cast %371 : i32 to index
      %c0_366 = arith.constant 0 : index
      %c0_367 = arith.constant 0 : index
      %c0_368 = arith.constant 0 : index
      %373 = vector.load %arg11[%372, %c0_366, %c0_367, %c0_368] : memref<30x30x8x32xf32, #tpu.memory_space<vmem>>, vector<2x14x8x32xf32>
      %c6_369 = arith.constant 6 : index
      %c0_370 = arith.constant 0 : index
      %c0_371 = arith.constant 0 : index
      %374 = vector.load %arg2[%c6_369, %c0_370, %c0_371] : memref<9x8x32xf32, #tpu.memory_space<vmem>>, vector<1x8x32xf32>
      %375 = vector.shape_cast %374 : vector<1x8x32xf32> to vector<8x32xf32>
      %376 = vector.shape_cast %375 : vector<8x32xf32> to vector<1x1x8x32xf32>
      %377 = vector.broadcast %376 : vector<1x1x8x32xf32> to vector<2x14x8x32xf32>
      %378 = arith.mulf %373, %377 : vector<2x14x8x32xf32>
      %379 = arith.addf %369, %378 : vector<2x14x8x32xf32>
      %c2_i32_372 = arith.constant 2 : i32
      %380 = arith.muli %c2_i32_372, %310 : i32
      %c2_i32_373 = arith.constant 2 : i32
      %381 = arith.addi %380, %c2_i32_373 : i32
      %382 = arith.index_cast %381 : i32 to index
      %c1_374 = arith.constant 1 : index
      %c0_375 = arith.constant 0 : index
      %c0_376 = arith.constant 0 : index
      %383 = vector.load %arg11[%382, %c1_374, %c0_375, %c0_376] : memref<30x30x8x32xf32, #tpu.memory_space<vmem>>, vector<2x14x8x32xf32>
      %c7_377 = arith.constant 7 : index
      %c0_378 = arith.constant 0 : index
      %c0_379 = arith.constant 0 : index
      %384 = vector.load %arg2[%c7_377, %c0_378, %c0_379] : memref<9x8x32xf32, #tpu.memory_space<vmem>>, vector<1x8x32xf32>
      %385 = vector.shape_cast %384 : vector<1x8x32xf32> to vector<8x32xf32>
      %386 = vector.shape_cast %385 : vector<8x32xf32> to vector<1x1x8x32xf32>
      %387 = vector.broadcast %386 : vector<1x1x8x32xf32> to vector<2x14x8x32xf32>
      %388 = arith.mulf %383, %387 : vector<2x14x8x32xf32>
      %389 = arith.addf %379, %388 : vector<2x14x8x32xf32>
      %c2_i32_380 = arith.constant 2 : i32
      %390 = arith.muli %c2_i32_380, %310 : i32
      %c2_i32_381 = arith.constant 2 : i32
      %391 = arith.addi %390, %c2_i32_381 : i32
      %392 = arith.index_cast %391 : i32 to index
      %c2_382 = arith.constant 2 : index
      %c0_383 = arith.constant 0 : index
      %c0_384 = arith.constant 0 : index
      %393 = vector.load %arg11[%392, %c2_382, %c0_383, %c0_384] : memref<30x30x8x32xf32, #tpu.memory_space<vmem>>, vector<2x14x8x32xf32>
      %c8_385 = arith.constant 8 : index
      %c0_386 = arith.constant 0 : index
      %c0_387 = arith.constant 0 : index
      %394 = vector.load %arg2[%c8_385, %c0_386, %c0_387] : memref<9x8x32xf32, #tpu.memory_space<vmem>>, vector<1x8x32xf32>
      %395 = vector.shape_cast %394 : vector<1x8x32xf32> to vector<8x32xf32>
      %396 = vector.shape_cast %395 : vector<8x32xf32> to vector<1x1x8x32xf32>
      %397 = vector.broadcast %396 : vector<1x1x8x32xf32> to vector<2x14x8x32xf32>
      %398 = arith.mulf %393, %397 : vector<2x14x8x32xf32>
      %399 = arith.addf %389, %398 : vector<2x14x8x32xf32>
      %400 = vector.extract_strided_slice %399 {offsets = [0, 0, 0, 0], sizes = [1, 14, 8, 32], strides = [1, 1, 1, 1]} : vector<2x14x8x32xf32> to vector<1x14x8x32xf32>
      %401 = vector.shape_cast %400 : vector<1x14x8x32xf32> to vector<14x8x32xf32>
      %402 = vector.extract_strided_slice %399 {offsets = [1, 0, 0, 0], sizes = [1, 14, 8, 32], strides = [1, 1, 1, 1]} : vector<2x14x8x32xf32> to vector<1x14x8x32xf32>
      %403 = vector.shape_cast %402 : vector<1x14x8x32xf32> to vector<14x8x32xf32>
      %404 = arith.maximumf %401, %403 : vector<14x8x32xf32>
      %405 = vector.shape_cast %404 : vector<14x8x32xf32> to vector<7x2x8x32xf32>
      %406 = vector.extract_strided_slice %405 {offsets = [0, 0, 0, 0], sizes = [7, 1, 8, 32], strides = [1, 1, 1, 1]} : vector<7x2x8x32xf32> to vector<7x1x8x32xf32>
      %407 = vector.shape_cast %406 : vector<7x1x8x32xf32> to vector<7x8x32xf32>
      %408 = vector.extract_strided_slice %405 {offsets = [0, 1, 0, 0], sizes = [7, 1, 8, 32], strides = [1, 1, 1, 1]} : vector<7x2x8x32xf32> to vector<7x1x8x32xf32>
      %409 = vector.shape_cast %408 : vector<7x1x8x32xf32> to vector<7x8x32xf32>
      %410 = arith.maximumf %407, %409 : vector<7x8x32xf32>
      %c0_388 = arith.constant 0 : index
      %c0_389 = arith.constant 0 : index
      %411 = vector.load %arg3[%c0_388, %c0_389] : memref<8x32xf32, #tpu.memory_space<vmem>>, vector<8x32xf32>
      %412 = vector.shape_cast %411 : vector<8x32xf32> to vector<1x8x32xf32>
      %413 = vector.broadcast %412 : vector<1x8x32xf32> to vector<7x8x32xf32>
      %414 = arith.addf %410, %413 : vector<7x8x32xf32>
      %cst_390 = arith.constant 0.000000e+00 : f32
      %415 = vector.broadcast %cst_390 : f32 to vector<7x8x32xf32>
      %416 = arith.maximumf %414, %415 : vector<7x8x32xf32>
      %417 = vector.shape_cast %416 : vector<7x8x32xf32> to vector<56x32xf32>
      %c1_i32_391 = arith.constant 1 : i32
      %418 = arith.addi %c1_i32_391, %310 : i32
      %419 = arith.index_cast %418 : i32 to index
      %c8_392 = arith.constant 8 : index
      %c0_393 = arith.constant 0 : index
      %420 = vector.load %arg12[%419, %c8_392, %c0_393] : memref<16x128x32xf32, #tpu.memory_space<vmem>>, vector<1x56x32xf32>
      %421 = vector.shape_cast %420 : vector<1x56x32xf32> to vector<56x32xf32>
      %422 = vector.shape_cast %417 : vector<56x32xf32> to vector<1x56x32xf32>
      tpu.vector_store %arg12[%419, %c8_392, %c0_393], %422 {strides = array<i32>} : memref<16x128x32xf32, #tpu.memory_space<vmem>>, vector<1x56x32xf32>,
      %c2_i32_394 = arith.constant 2 : i32
      %423 = arith.muli %c2_i32_394, %310 : i32
      %c0_i32_395 = arith.constant 0 : i32
      %424 = arith.addi %423, %c0_i32_395 : i32
      %425 = arith.index_cast %424 : i32 to index
      %c14_396 = arith.constant 14 : index
      %c0_397 = arith.constant 0 : index
      %c0_398 = arith.constant 0 : index
      %426 = vector.load %arg11[%425, %c14_396, %c0_397, %c0_398] : memref<30x30x8x32xf32, #tpu.memory_space<vmem>>, vector<2x14x8x32xf32>
      %c0_399 = arith.constant 0 : index
      %c0_400 = arith.constant 0 : index
      %c0_401 = arith.constant 0 : index
      %427 = vector.load %arg2[%c0_399, %c0_400, %c0_401] : memref<9x8x32xf32, #tpu.memory_space<vmem>>, vector<1x8x32xf32>
      %428 = vector.shape_cast %427 : vector<1x8x32xf32> to vector<8x32xf32>
      %429 = vector.shape_cast %428 : vector<8x32xf32> to vector<1x1x8x32xf32>
      %430 = vector.broadcast %429 : vector<1x1x8x32xf32> to vector<2x14x8x32xf32>
      %431 = arith.mulf %426, %430 : vector<2x14x8x32xf32>
      %c2_i32_402 = arith.constant 2 : i32
      %432 = arith.muli %c2_i32_402, %310 : i32
      %c0_i32_403 = arith.constant 0 : i32
      %433 = arith.addi %432, %c0_i32_403 : i32
      %434 = arith.index_cast %433 : i32 to index
      %c15_404 = arith.constant 15 : index
      %c0_405 = arith.constant 0 : index
      %c0_406 = arith.constant 0 : index
      %435 = vector.load %arg11[%434, %c15_404, %c0_405, %c0_406] : memref<30x30x8x32xf32, #tpu.memory_space<vmem>>, vector<2x14x8x32xf32>
      %c1_407 = arith.constant 1 : index
      %c0_408 = arith.constant 0 : index
      %c0_409 = arith.constant 0 : index
      %436 = vector.load %arg2[%c1_407, %c0_408, %c0_409] : memref<9x8x32xf32, #tpu.memory_space<vmem>>, vector<1x8x32xf32>
      %437 = vector.shape_cast %436 : vector<1x8x32xf32> to vector<8x32xf32>
      %438 = vector.shape_cast %437 : vector<8x32xf32> to vector<1x1x8x32xf32>
      %439 = vector.broadcast %438 : vector<1x1x8x32xf32> to vector<2x14x8x32xf32>
      %440 = arith.mulf %435, %439 : vector<2x14x8x32xf32>
      %441 = arith.addf %431, %440 : vector<2x14x8x32xf32>
      %c2_i32_410 = arith.constant 2 : i32
      %442 = arith.muli %c2_i32_410, %310 : i32
      %c0_i32_411 = arith.constant 0 : i32
      %443 = arith.addi %442, %c0_i32_411 : i32
      %444 = arith.index_cast %443 : i32 to index
      %c16_412 = arith.constant 16 : index
      %c0_413 = arith.constant 0 : index
      %c0_414 = arith.constant 0 : index
      %445 = vector.load %arg11[%444, %c16_412, %c0_413, %c0_414] : memref<30x30x8x32xf32, #tpu.memory_space<vmem>>, vector<2x14x8x32xf32>
      %c2_415 = arith.constant 2 : index
      %c0_416 = arith.constant 0 : index
      %c0_417 = arith.constant 0 : index
      %446 = vector.load %arg2[%c2_415, %c0_416, %c0_417] : memref<9x8x32xf32, #tpu.memory_space<vmem>>, vector<1x8x32xf32>
      %447 = vector.shape_cast %446 : vector<1x8x32xf32> to vector<8x32xf32>
      %448 = vector.shape_cast %447 : vector<8x32xf32> to vector<1x1x8x32xf32>
      %449 = vector.broadcast %448 : vector<1x1x8x32xf32> to vector<2x14x8x32xf32>
      %450 = arith.mulf %445, %449 : vector<2x14x8x32xf32>
      %451 = arith.addf %441, %450 : vector<2x14x8x32xf32>
      %c2_i32_418 = arith.constant 2 : i32
      %452 = arith.muli %c2_i32_418, %310 : i32
      %c1_i32_419 = arith.constant 1 : i32
      %453 = arith.addi %452, %c1_i32_419 : i32
      %454 = arith.index_cast %453 : i32 to index
      %c14_420 = arith.constant 14 : index
      %c0_421 = arith.constant 0 : index
      %c0_422 = arith.constant 0 : index
      %455 = vector.load %arg11[%454, %c14_420, %c0_421, %c0_422] : memref<30x30x8x32xf32, #tpu.memory_space<vmem>>, vector<2x14x8x32xf32>
      %c3_423 = arith.constant 3 : index
      %c0_424 = arith.constant 0 : index
      %c0_425 = arith.constant 0 : index
      %456 = vector.load %arg2[%c3_423, %c0_424, %c0_425] : memref<9x8x32xf32, #tpu.memory_space<vmem>>, vector<1x8x32xf32>
      %457 = vector.shape_cast %456 : vector<1x8x32xf32> to vector<8x32xf32>
      %458 = vector.shape_cast %457 : vector<8x32xf32> to vector<1x1x8x32xf32>
      %459 = vector.broadcast %458 : vector<1x1x8x32xf32> to vector<2x14x8x32xf32>
      %460 = arith.mulf %455, %459 : vector<2x14x8x32xf32>
      %461 = arith.addf %451, %460 : vector<2x14x8x32xf32>
      %c2_i32_426 = arith.constant 2 : i32
      %462 = arith.muli %c2_i32_426, %310 : i32
      %c1_i32_427 = arith.constant 1 : i32
      %463 = arith.addi %462, %c1_i32_427 : i32
      %464 = arith.index_cast %463 : i32 to index
      %c15_428 = arith.constant 15 : index
      %c0_429 = arith.constant 0 : index
      %c0_430 = arith.constant 0 : index
      %465 = vector.load %arg11[%464, %c15_428, %c0_429, %c0_430] : memref<30x30x8x32xf32, #tpu.memory_space<vmem>>, vector<2x14x8x32xf32>
      %c4_431 = arith.constant 4 : index
      %c0_432 = arith.constant 0 : index
      %c0_433 = arith.constant 0 : index
      %466 = vector.load %arg2[%c4_431, %c0_432, %c0_433] : memref<9x8x32xf32, #tpu.memory_space<vmem>>, vector<1x8x32xf32>
      %467 = vector.shape_cast %466 : vector<1x8x32xf32> to vector<8x32xf32>
      %468 = vector.shape_cast %467 : vector<8x32xf32> to vector<1x1x8x32xf32>
      %469 = vector.broadcast %468 : vector<1x1x8x32xf32> to vector<2x14x8x32xf32>
      %470 = arith.mulf %465, %469 : vector<2x14x8x32xf32>
      %471 = arith.addf %461, %470 : vector<2x14x8x32xf32>
      %c2_i32_434 = arith.constant 2 : i32
      %472 = arith.muli %c2_i32_434, %310 : i32
      %c1_i32_435 = arith.constant 1 : i32
      %473 = arith.addi %472, %c1_i32_435 : i32
      %474 = arith.index_cast %473 : i32 to index
      %c16_436 = arith.constant 16 : index
      %c0_437 = arith.constant 0 : index
      %c0_438 = arith.constant 0 : index
      %475 = vector.load %arg11[%474, %c16_436, %c0_437, %c0_438] : memref<30x30x8x32xf32, #tpu.memory_space<vmem>>, vector<2x14x8x32xf32>
      %c5_439 = arith.constant 5 : index
      %c0_440 = arith.constant 0 : index
      %c0_441 = arith.constant 0 : index
      %476 = vector.load %arg2[%c5_439, %c0_440, %c0_441] : memref<9x8x32xf32, #tpu.memory_space<vmem>>, vector<1x8x32xf32>
      %477 = vector.shape_cast %476 : vector<1x8x32xf32> to vector<8x32xf32>
      %478 = vector.shape_cast %477 : vector<8x32xf32> to vector<1x1x8x32xf32>
      %479 = vector.broadcast %478 : vector<1x1x8x32xf32> to vector<2x14x8x32xf32>
      %480 = arith.mulf %475, %479 : vector<2x14x8x32xf32>
      %481 = arith.addf %471, %480 : vector<2x14x8x32xf32>
      %c2_i32_442 = arith.constant 2 : i32
      %482 = arith.muli %c2_i32_442, %310 : i32
      %c2_i32_443 = arith.constant 2 : i32
      %483 = arith.addi %482, %c2_i32_443 : i32
      %484 = arith.index_cast %483 : i32 to index
      %c14_444 = arith.constant 14 : index
      %c0_445 = arith.constant 0 : index
      %c0_446 = arith.constant 0 : index
      %485 = vector.load %arg11[%484, %c14_444, %c0_445, %c0_446] : memref<30x30x8x32xf32, #tpu.memory_space<vmem>>, vector<2x14x8x32xf32>
      %c6_447 = arith.constant 6 : index
      %c0_448 = arith.constant 0 : index
      %c0_449 = arith.constant 0 : index
      %486 = vector.load %arg2[%c6_447, %c0_448, %c0_449] : memref<9x8x32xf32, #tpu.memory_space<vmem>>, vector<1x8x32xf32>
      %487 = vector.shape_cast %486 : vector<1x8x32xf32> to vector<8x32xf32>
      %488 = vector.shape_cast %487 : vector<8x32xf32> to vector<1x1x8x32xf32>
      %489 = vector.broadcast %488 : vector<1x1x8x32xf32> to vector<2x14x8x32xf32>
      %490 = arith.mulf %485, %489 : vector<2x14x8x32xf32>
      %491 = arith.addf %481, %490 : vector<2x14x8x32xf32>
      %c2_i32_450 = arith.constant 2 : i32
      %492 = arith.muli %c2_i32_450, %310 : i32
      %c2_i32_451 = arith.constant 2 : i32
      %493 = arith.addi %492, %c2_i32_451 : i32
      %494 = arith.index_cast %493 : i32 to index
      %c15_452 = arith.constant 15 : index
      %c0_453 = arith.constant 0 : index
      %c0_454 = arith.constant 0 : index
      %495 = vector.load %arg11[%494, %c15_452, %c0_453, %c0_454] : memref<30x30x8x32xf32, #tpu.memory_space<vmem>>, vector<2x14x8x32xf32>
      %c7_455 = arith.constant 7 : index
      %c0_456 = arith.constant 0 : index
      %c0_457 = arith.constant 0 : index
      %496 = vector.load %arg2[%c7_455, %c0_456, %c0_457] : memref<9x8x32xf32, #tpu.memory_space<vmem>>, vector<1x8x32xf32>
      %497 = vector.shape_cast %496 : vector<1x8x32xf32> to vector<8x32xf32>
      %498 = vector.shape_cast %497 : vector<8x32xf32> to vector<1x1x8x32xf32>
      %499 = vector.broadcast %498 : vector<1x1x8x32xf32> to vector<2x14x8x32xf32>
      %500 = arith.mulf %495, %499 : vector<2x14x8x32xf32>
      %501 = arith.addf %491, %500 : vector<2x14x8x32xf32>
      %c2_i32_458 = arith.constant 2 : i32
      %502 = arith.muli %c2_i32_458, %310 : i32
      %c2_i32_459 = arith.constant 2 : i32
      %503 = arith.addi %502, %c2_i32_459 : i32
      %504 = arith.index_cast %503 : i32 to index
      %c16_460 = arith.constant 16 : index
      %c0_461 = arith.constant 0 : index
      %c0_462 = arith.constant 0 : index
      %505 = vector.load %arg11[%504, %c16_460, %c0_461, %c0_462] : memref<30x30x8x32xf32, #tpu.memory_space<vmem>>, vector<2x14x8x32xf32>
      %c8_463 = arith.constant 8 : index
      %c0_464 = arith.constant 0 : index
      %c0_465 = arith.constant 0 : index
      %506 = vector.load %arg2[%c8_463, %c0_464, %c0_465] : memref<9x8x32xf32, #tpu.memory_space<vmem>>, vector<1x8x32xf32>
      %507 = vector.shape_cast %506 : vector<1x8x32xf32> to vector<8x32xf32>
      %508 = vector.shape_cast %507 : vector<8x32xf32> to vector<1x1x8x32xf32>
      %509 = vector.broadcast %508 : vector<1x1x8x32xf32> to vector<2x14x8x32xf32>
      %510 = arith.mulf %505, %509 : vector<2x14x8x32xf32>
      %511 = arith.addf %501, %510 : vector<2x14x8x32xf32>
      %512 = vector.extract_strided_slice %511 {offsets = [0, 0, 0, 0], sizes = [1, 14, 8, 32], strides = [1, 1, 1, 1]} : vector<2x14x8x32xf32> to vector<1x14x8x32xf32>
      %513 = vector.shape_cast %512 : vector<1x14x8x32xf32> to vector<14x8x32xf32>
      %514 = vector.extract_strided_slice %511 {offsets = [1, 0, 0, 0], sizes = [1, 14, 8, 32], strides = [1, 1, 1, 1]} : vector<2x14x8x32xf32> to vector<1x14x8x32xf32>
      %515 = vector.shape_cast %514 : vector<1x14x8x32xf32> to vector<14x8x32xf32>
      %516 = arith.maximumf %513, %515 : vector<14x8x32xf32>
      %517 = vector.shape_cast %516 : vector<14x8x32xf32> to vector<7x2x8x32xf32>
      %518 = vector.extract_strided_slice %517 {offsets = [0, 0, 0, 0], sizes = [7, 1, 8, 32], strides = [1, 1, 1, 1]} : vector<7x2x8x32xf32> to vector<7x1x8x32xf32>
      %519 = vector.shape_cast %518 : vector<7x1x8x32xf32> to vector<7x8x32xf32>
      %520 = vector.extract_strided_slice %517 {offsets = [0, 1, 0, 0], sizes = [7, 1, 8, 32], strides = [1, 1, 1, 1]} : vector<7x2x8x32xf32> to vector<7x1x8x32xf32>
      %521 = vector.shape_cast %520 : vector<7x1x8x32xf32> to vector<7x8x32xf32>
      %522 = arith.maximumf %519, %521 : vector<7x8x32xf32>
      %c0_466 = arith.constant 0 : index
      %c0_467 = arith.constant 0 : index
      %523 = vector.load %arg3[%c0_466, %c0_467] : memref<8x32xf32, #tpu.memory_space<vmem>>, vector<8x32xf32>
      %524 = vector.shape_cast %523 : vector<8x32xf32> to vector<1x8x32xf32>
      %525 = vector.broadcast %524 : vector<1x8x32xf32> to vector<7x8x32xf32>
      %526 = arith.addf %522, %525 : vector<7x8x32xf32>
      %cst_468 = arith.constant 0.000000e+00 : f32
      %527 = vector.broadcast %cst_468 : f32 to vector<7x8x32xf32>
      %528 = arith.maximumf %526, %527 : vector<7x8x32xf32>
      %529 = vector.shape_cast %528 : vector<7x8x32xf32> to vector<56x32xf32>
      %c1_i32_469 = arith.constant 1 : i32
      %530 = arith.addi %c1_i32_469, %310 : i32
      %531 = arith.index_cast %530 : i32 to index
      %c64 = arith.constant 64 : index
      %c0_470 = arith.constant 0 : index
      %532 = vector.load %arg12[%531, %c64, %c0_470] : memref<16x128x32xf32, #tpu.memory_space<vmem>>, vector<1x56x32xf32>
      %533 = vector.shape_cast %532 : vector<1x56x32xf32> to vector<56x32xf32>
      %534 = vector.shape_cast %529 : vector<56x32xf32> to vector<1x56x32xf32>
      tpu.vector_store %arg12[%531, %c64, %c0_470], %534 {strides = array<i32>} : memref<16x128x32xf32, #tpu.memory_space<vmem>>, vector<1x56x32xf32>,
    }
    %c14_i32_5 = arith.constant 14 : i32
    %c0_i32_6 = arith.constant 0 : i32
    %c7_i32 = arith.constant 7 : i32
    %4 = arith.addi %c0_i32_6, %c7_i32 : i32
    %c1_i32_7 = arith.constant 1 : i32
    scf.for %arg14 = %c0_i32_6 to %4 step %c1_i32_7  : i32 {
      %c1_i32_315 = arith.constant 1 : i32
      %309 = arith.muli %arg14, %c1_i32_315 : i32
      %c0_i32_316 = arith.constant 0 : i32
      %310 = arith.addi %c0_i32_316, %309 : i32
      %c2_i32 = arith.constant 2 : i32
      %311 = arith.muli %c2_i32, %310 : i32
      %c0_i32_317 = arith.constant 0 : i32
      %312 = arith.addi %311, %c0_i32_317 : i32
      %313 = arith.index_cast %312 : i32 to index
      %c0_318 = arith.constant 0 : index
      %c0_319 = arith.constant 0 : index
      %314 = vector.load %arg12[%313, %c0_318, %c0_319] : memref<16x128x32xf32, #tpu.memory_space<vmem>>, vector<2x112x32xf32>
      %315 = vector.shape_cast %314 : vector<2x112x32xf32> to vector<224x32xf32>
      %c0_320 = arith.constant 0 : index
      %c0_321 = arith.constant 0 : index
      %c0_322 = arith.constant 0 : index
      %316 = vector.load %arg4[%c0_320, %c0_321, %c0_322] : memref<9x32x64xf32, #tpu.memory_space<vmem>>, vector<1x32x64xf32>
      %317 = vector.shape_cast %316 : vector<1x32x64xf32> to vector<32x64xf32>
      %cst_323 = arith.constant dense<0.000000e+00> : vector<224x64xf32>
      %318 = tpu.matmul %315, %317, %cst_323 {dimension_numbers = #tpu.dot_dimension_numbers<[1], [0], [0], [1], [0, 0, 1, 1], [], []>} : vector<224x32xf32>, vector<32x64xf32>, vector<224x64xf32> -> vector<224x64xf32>
      %c2_i32_324 = arith.constant 2 : i32
      %319 = arith.muli %c2_i32_324, %310 : i32
      %c0_i32_325 = arith.constant 0 : i32
      %320 = arith.addi %319, %c0_i32_325 : i32
      %321 = arith.index_cast %320 : i32 to index
      %c8_326 = arith.constant 8 : index
      %c0_327 = arith.constant 0 : index
      %322 = vector.load %arg12[%321, %c8_326, %c0_327] : memref<16x128x32xf32, #tpu.memory_space<vmem>>, vector<2x112x32xf32>
      %323 = vector.shape_cast %322 : vector<2x112x32xf32> to vector<224x32xf32>
      %c1_328 = arith.constant 1 : index
      %c0_329 = arith.constant 0 : index
      %c0_330 = arith.constant 0 : index
      %324 = vector.load %arg4[%c1_328, %c0_329, %c0_330] : memref<9x32x64xf32, #tpu.memory_space<vmem>>, vector<1x32x64xf32>
      %325 = vector.shape_cast %324 : vector<1x32x64xf32> to vector<32x64xf32>
      %cst_331 = arith.constant dense<0.000000e+00> : vector<224x64xf32>
      %326 = tpu.matmul %323, %325, %cst_331 {dimension_numbers = #tpu.dot_dimension_numbers<[1], [0], [0], [1], [0, 0, 1, 1], [], []>} : vector<224x32xf32>, vector<32x64xf32>, vector<224x64xf32> -> vector<224x64xf32>
      %327 = arith.addf %318, %326 : vector<224x64xf32>
      %c2_i32_332 = arith.constant 2 : i32
      %328 = arith.muli %c2_i32_332, %310 : i32
      %c0_i32_333 = arith.constant 0 : i32
      %329 = arith.addi %328, %c0_i32_333 : i32
      %330 = arith.index_cast %329 : i32 to index
      %c16_334 = arith.constant 16 : index
      %c0_335 = arith.constant 0 : index
      %331 = vector.load %arg12[%330, %c16_334, %c0_335] : memref<16x128x32xf32, #tpu.memory_space<vmem>>, vector<2x112x32xf32>
      %332 = vector.shape_cast %331 : vector<2x112x32xf32> to vector<224x32xf32>
      %c2_336 = arith.constant 2 : index
      %c0_337 = arith.constant 0 : index
      %c0_338 = arith.constant 0 : index
      %333 = vector.load %arg4[%c2_336, %c0_337, %c0_338] : memref<9x32x64xf32, #tpu.memory_space<vmem>>, vector<1x32x64xf32>
      %334 = vector.shape_cast %333 : vector<1x32x64xf32> to vector<32x64xf32>
      %cst_339 = arith.constant dense<0.000000e+00> : vector<224x64xf32>
      %335 = tpu.matmul %332, %334, %cst_339 {dimension_numbers = #tpu.dot_dimension_numbers<[1], [0], [0], [1], [0, 0, 1, 1], [], []>} : vector<224x32xf32>, vector<32x64xf32>, vector<224x64xf32> -> vector<224x64xf32>
      %336 = arith.addf %327, %335 : vector<224x64xf32>
      %c2_i32_340 = arith.constant 2 : i32
      %337 = arith.muli %c2_i32_340, %310 : i32
      %c1_i32_341 = arith.constant 1 : i32
      %338 = arith.addi %337, %c1_i32_341 : i32
      %339 = arith.index_cast %338 : i32 to index
      %c0_342 = arith.constant 0 : index
      %c0_343 = arith.constant 0 : index
      %340 = vector.load %arg12[%339, %c0_342, %c0_343] : memref<16x128x32xf32, #tpu.memory_space<vmem>>, vector<2x112x32xf32>
      %341 = vector.shape_cast %340 : vector<2x112x32xf32> to vector<224x32xf32>
      %c3_344 = arith.constant 3 : index
      %c0_345 = arith.constant 0 : index
      %c0_346 = arith.constant 0 : index
      %342 = vector.load %arg4[%c3_344, %c0_345, %c0_346] : memref<9x32x64xf32, #tpu.memory_space<vmem>>, vector<1x32x64xf32>
      %343 = vector.shape_cast %342 : vector<1x32x64xf32> to vector<32x64xf32>
      %cst_347 = arith.constant dense<0.000000e+00> : vector<224x64xf32>
      %344 = tpu.matmul %341, %343, %cst_347 {dimension_numbers = #tpu.dot_dimension_numbers<[1], [0], [0], [1], [0, 0, 1, 1], [], []>} : vector<224x32xf32>, vector<32x64xf32>, vector<224x64xf32> -> vector<224x64xf32>
      %345 = arith.addf %336, %344 : vector<224x64xf32>
      %c2_i32_348 = arith.constant 2 : i32
      %346 = arith.muli %c2_i32_348, %310 : i32
      %c1_i32_349 = arith.constant 1 : i32
      %347 = arith.addi %346, %c1_i32_349 : i32
      %348 = arith.index_cast %347 : i32 to index
      %c8_350 = arith.constant 8 : index
      %c0_351 = arith.constant 0 : index
      %349 = vector.load %arg12[%348, %c8_350, %c0_351] : memref<16x128x32xf32, #tpu.memory_space<vmem>>, vector<2x112x32xf32>
      %350 = vector.shape_cast %349 : vector<2x112x32xf32> to vector<224x32xf32>
      %c4_352 = arith.constant 4 : index
      %c0_353 = arith.constant 0 : index
      %c0_354 = arith.constant 0 : index
      %351 = vector.load %arg4[%c4_352, %c0_353, %c0_354] : memref<9x32x64xf32, #tpu.memory_space<vmem>>, vector<1x32x64xf32>
      %352 = vector.shape_cast %351 : vector<1x32x64xf32> to vector<32x64xf32>
      %cst_355 = arith.constant dense<0.000000e+00> : vector<224x64xf32>
      %353 = tpu.matmul %350, %352, %cst_355 {dimension_numbers = #tpu.dot_dimension_numbers<[1], [0], [0], [1], [0, 0, 1, 1], [], []>} : vector<224x32xf32>, vector<32x64xf32>, vector<224x64xf32> -> vector<224x64xf32>
      %354 = arith.addf %345, %353 : vector<224x64xf32>
      %c2_i32_356 = arith.constant 2 : i32
      %355 = arith.muli %c2_i32_356, %310 : i32
      %c1_i32_357 = arith.constant 1 : i32
      %356 = arith.addi %355, %c1_i32_357 : i32
      %357 = arith.index_cast %356 : i32 to index
      %c16_358 = arith.constant 16 : index
      %c0_359 = arith.constant 0 : index
      %358 = vector.load %arg12[%357, %c16_358, %c0_359] : memref<16x128x32xf32, #tpu.memory_space<vmem>>, vector<2x112x32xf32>
      %359 = vector.shape_cast %358 : vector<2x112x32xf32> to vector<224x32xf32>
      %c5_360 = arith.constant 5 : index
      %c0_361 = arith.constant 0 : index
      %c0_362 = arith.constant 0 : index
      %360 = vector.load %arg4[%c5_360, %c0_361, %c0_362] : memref<9x32x64xf32, #tpu.memory_space<vmem>>, vector<1x32x64xf32>
      %361 = vector.shape_cast %360 : vector<1x32x64xf32> to vector<32x64xf32>
      %cst_363 = arith.constant dense<0.000000e+00> : vector<224x64xf32>
      %362 = tpu.matmul %359, %361, %cst_363 {dimension_numbers = #tpu.dot_dimension_numbers<[1], [0], [0], [1], [0, 0, 1, 1], [], []>} : vector<224x32xf32>, vector<32x64xf32>, vector<224x64xf32> -> vector<224x64xf32>
      %363 = arith.addf %354, %362 : vector<224x64xf32>
      %c2_i32_364 = arith.constant 2 : i32
      %364 = arith.muli %c2_i32_364, %310 : i32
      %c2_i32_365 = arith.constant 2 : i32
      %365 = arith.addi %364, %c2_i32_365 : i32
      %366 = arith.index_cast %365 : i32 to index
      %c0_366 = arith.constant 0 : index
      %c0_367 = arith.constant 0 : index
      %367 = vector.load %arg12[%366, %c0_366, %c0_367] : memref<16x128x32xf32, #tpu.memory_space<vmem>>, vector<2x112x32xf32>
      %368 = vector.shape_cast %367 : vector<2x112x32xf32> to vector<224x32xf32>
      %c6_368 = arith.constant 6 : index
      %c0_369 = arith.constant 0 : index
      %c0_370 = arith.constant 0 : index
      %369 = vector.load %arg4[%c6_368, %c0_369, %c0_370] : memref<9x32x64xf32, #tpu.memory_space<vmem>>, vector<1x32x64xf32>
      %370 = vector.shape_cast %369 : vector<1x32x64xf32> to vector<32x64xf32>
      %cst_371 = arith.constant dense<0.000000e+00> : vector<224x64xf32>
      %371 = tpu.matmul %368, %370, %cst_371 {dimension_numbers = #tpu.dot_dimension_numbers<[1], [0], [0], [1], [0, 0, 1, 1], [], []>} : vector<224x32xf32>, vector<32x64xf32>, vector<224x64xf32> -> vector<224x64xf32>
      %372 = arith.addf %363, %371 : vector<224x64xf32>
      %c2_i32_372 = arith.constant 2 : i32
      %373 = arith.muli %c2_i32_372, %310 : i32
      %c2_i32_373 = arith.constant 2 : i32
      %374 = arith.addi %373, %c2_i32_373 : i32
      %375 = arith.index_cast %374 : i32 to index
      %c8_374 = arith.constant 8 : index
      %c0_375 = arith.constant 0 : index
      %376 = vector.load %arg12[%375, %c8_374, %c0_375] : memref<16x128x32xf32, #tpu.memory_space<vmem>>, vector<2x112x32xf32>
      %377 = vector.shape_cast %376 : vector<2x112x32xf32> to vector<224x32xf32>
      %c7_376 = arith.constant 7 : index
      %c0_377 = arith.constant 0 : index
      %c0_378 = arith.constant 0 : index
      %378 = vector.load %arg4[%c7_376, %c0_377, %c0_378] : memref<9x32x64xf32, #tpu.memory_space<vmem>>, vector<1x32x64xf32>
      %379 = vector.shape_cast %378 : vector<1x32x64xf32> to vector<32x64xf32>
      %cst_379 = arith.constant dense<0.000000e+00> : vector<224x64xf32>
      %380 = tpu.matmul %377, %379, %cst_379 {dimension_numbers = #tpu.dot_dimension_numbers<[1], [0], [0], [1], [0, 0, 1, 1], [], []>} : vector<224x32xf32>, vector<32x64xf32>, vector<224x64xf32> -> vector<224x64xf32>
      %381 = arith.addf %372, %380 : vector<224x64xf32>
      %c2_i32_380 = arith.constant 2 : i32
      %382 = arith.muli %c2_i32_380, %310 : i32
      %c2_i32_381 = arith.constant 2 : i32
      %383 = arith.addi %382, %c2_i32_381 : i32
      %384 = arith.index_cast %383 : i32 to index
      %c16_382 = arith.constant 16 : index
      %c0_383 = arith.constant 0 : index
      %385 = vector.load %arg12[%384, %c16_382, %c0_383] : memref<16x128x32xf32, #tpu.memory_space<vmem>>, vector<2x112x32xf32>
      %386 = vector.shape_cast %385 : vector<2x112x32xf32> to vector<224x32xf32>
      %c8_384 = arith.constant 8 : index
      %c0_385 = arith.constant 0 : index
      %c0_386 = arith.constant 0 : index
      %387 = vector.load %arg4[%c8_384, %c0_385, %c0_386] : memref<9x32x64xf32, #tpu.memory_space<vmem>>, vector<1x32x64xf32>
      %388 = vector.shape_cast %387 : vector<1x32x64xf32> to vector<32x64xf32>
      %cst_387 = arith.constant dense<0.000000e+00> : vector<224x64xf32>
      %389 = tpu.matmul %386, %388, %cst_387 {dimension_numbers = #tpu.dot_dimension_numbers<[1], [0], [0], [1], [0, 0, 1, 1], [], []>} : vector<224x32xf32>, vector<32x64xf32>, vector<224x64xf32> -> vector<224x64xf32>
      %390 = arith.addf %381, %389 : vector<224x64xf32>
      %391 = vector.extract_strided_slice %390 {offsets = [0, 0], sizes = [112, 64], strides = [1, 1]} : vector<224x64xf32> to vector<112x64xf32>
      %392 = vector.extract_strided_slice %390 {offsets = [112, 0], sizes = [112, 64], strides = [1, 1]} : vector<224x64xf32> to vector<112x64xf32>
      %393 = arith.maximumf %391, %392 : vector<112x64xf32>
      %394 = vector.shape_cast %393 : vector<112x64xf32> to vector<7x2x8x64xf32>
      %395 = vector.extract_strided_slice %394 {offsets = [0, 0, 0, 0], sizes = [7, 1, 8, 64], strides = [1, 1, 1, 1]} : vector<7x2x8x64xf32> to vector<7x1x8x64xf32>
      %396 = vector.shape_cast %395 : vector<7x1x8x64xf32> to vector<7x8x64xf32>
      %397 = vector.extract_strided_slice %394 {offsets = [0, 1, 0, 0], sizes = [7, 1, 8, 64], strides = [1, 1, 1, 1]} : vector<7x2x8x64xf32> to vector<7x1x8x64xf32>
      %398 = vector.shape_cast %397 : vector<7x1x8x64xf32> to vector<7x8x64xf32>
      %399 = arith.maximumf %396, %398 : vector<7x8x64xf32>
      %c0_388 = arith.constant 0 : index
      %c0_389 = arith.constant 0 : index
      %400 = vector.load %arg5[%c0_388, %c0_389] : memref<8x64xf32, #tpu.memory_space<vmem>>, vector<8x64xf32>
      %401 = vector.shape_cast %400 : vector<8x64xf32> to vector<1x8x64xf32>
      %402 = vector.broadcast %401 : vector<1x8x64xf32> to vector<7x8x64xf32>
      %403 = arith.addf %399, %402 : vector<7x8x64xf32>
      %cst_390 = arith.constant 0.000000e+00 : f32
      %404 = vector.broadcast %cst_390 : f32 to vector<7x8x64xf32>
      %405 = arith.maximumf %403, %404 : vector<7x8x64xf32>
      %c7_i32_391 = arith.constant 7 : i32
      %406 = arith.muli %310, %c7_i32_391 : i32
      %407 = arith.index_cast %406 : i32 to index
      %c0_392 = arith.constant 0 : index
      %c0_393 = arith.constant 0 : index
      %408 = vector.load %arg13[%407, %c0_392, %c0_393] : memref<49x8x64xf32, #tpu.memory_space<vmem>>, vector<7x8x64xf32>
      tpu.vector_store %arg13[%407, %c0_392, %c0_393], %405 {strides = array<i32>} : memref<49x8x64xf32, #tpu.memory_space<vmem>>, vector<7x8x64xf32>,
    }
    %c7_i32_8 = arith.constant 7 : i32
    %c0_9 = arith.constant 0 : index
    %c0_10 = arith.constant 0 : index
    %c0_11 = arith.constant 0 : index
    %5 = vector.load %arg13[%c0_9, %c0_10, %c0_11] : memref<49x8x64xf32, #tpu.memory_space<vmem>>, vector<1x8x64xf32>
    %6 = vector.shape_cast %5 : vector<1x8x64xf32> to vector<8x64xf32>
    %c0_12 = arith.constant 0 : index
    %c0_13 = arith.constant 0 : index
    %c0_14 = arith.constant 0 : index
    %7 = vector.load %arg6[%c0_12, %c0_13, %c0_14] : memref<49x64x128xf32, #tpu.memory_space<vmem>>, vector<1x64x128xf32>
    %8 = vector.shape_cast %7 : vector<1x64x128xf32> to vector<64x128xf32>
    %cst_15 = arith.constant dense<0.000000e+00> : vector<8x128xf32>
    %9 = tpu.matmul %6, %8, %cst_15 {dimension_numbers = #tpu.dot_dimension_numbers<[1], [0], [0], [1], [0, 0, 1, 1], [], []>} : vector<8x64xf32>, vector<64x128xf32>, vector<8x128xf32> -> vector<8x128xf32>
    %c1 = arith.constant 1 : index
    %c0_16 = arith.constant 0 : index
    %c0_17 = arith.constant 0 : index
    %10 = vector.load %arg13[%c1, %c0_16, %c0_17] : memref<49x8x64xf32, #tpu.memory_space<vmem>>, vector<1x8x64xf32>
    %11 = vector.shape_cast %10 : vector<1x8x64xf32> to vector<8x64xf32>
    %c1_18 = arith.constant 1 : index
    %c0_19 = arith.constant 0 : index
    %c0_20 = arith.constant 0 : index
    %12 = vector.load %arg6[%c1_18, %c0_19, %c0_20] : memref<49x64x128xf32, #tpu.memory_space<vmem>>, vector<1x64x128xf32>
    %13 = vector.shape_cast %12 : vector<1x64x128xf32> to vector<64x128xf32>
    %cst_21 = arith.constant dense<0.000000e+00> : vector<8x128xf32>
    %14 = tpu.matmul %11, %13, %cst_21 {dimension_numbers = #tpu.dot_dimension_numbers<[1], [0], [0], [1], [0, 0, 1, 1], [], []>} : vector<8x64xf32>, vector<64x128xf32>, vector<8x128xf32> -> vector<8x128xf32>
    %15 = arith.addf %9, %14 : vector<8x128xf32>
    %c2 = arith.constant 2 : index
    %c0_22 = arith.constant 0 : index
    %c0_23 = arith.constant 0 : index
    %16 = vector.load %arg13[%c2, %c0_22, %c0_23] : memref<49x8x64xf32, #tpu.memory_space<vmem>>, vector<1x8x64xf32>
    %17 = vector.shape_cast %16 : vector<1x8x64xf32> to vector<8x64xf32>
    %c2_24 = arith.constant 2 : index
    %c0_25 = arith.constant 0 : index
    %c0_26 = arith.constant 0 : index
    %18 = vector.load %arg6[%c2_24, %c0_25, %c0_26] : memref<49x64x128xf32, #tpu.memory_space<vmem>>, vector<1x64x128xf32>
    %19 = vector.shape_cast %18 : vector<1x64x128xf32> to vector<64x128xf32>
    %cst_27 = arith.constant dense<0.000000e+00> : vector<8x128xf32>
    %20 = tpu.matmul %17, %19, %cst_27 {dimension_numbers = #tpu.dot_dimension_numbers<[1], [0], [0], [1], [0, 0, 1, 1], [], []>} : vector<8x64xf32>, vector<64x128xf32>, vector<8x128xf32> -> vector<8x128xf32>
    %21 = arith.addf %15, %20 : vector<8x128xf32>
    %c3 = arith.constant 3 : index
    %c0_28 = arith.constant 0 : index
    %c0_29 = arith.constant 0 : index
    %22 = vector.load %arg13[%c3, %c0_28, %c0_29] : memref<49x8x64xf32, #tpu.memory_space<vmem>>, vector<1x8x64xf32>
    %23 = vector.shape_cast %22 : vector<1x8x64xf32> to vector<8x64xf32>
    %c3_30 = arith.constant 3 : index
    %c0_31 = arith.constant 0 : index
    %c0_32 = arith.constant 0 : index
    %24 = vector.load %arg6[%c3_30, %c0_31, %c0_32] : memref<49x64x128xf32, #tpu.memory_space<vmem>>, vector<1x64x128xf32>
    %25 = vector.shape_cast %24 : vector<1x64x128xf32> to vector<64x128xf32>
    %cst_33 = arith.constant dense<0.000000e+00> : vector<8x128xf32>
    %26 = tpu.matmul %23, %25, %cst_33 {dimension_numbers = #tpu.dot_dimension_numbers<[1], [0], [0], [1], [0, 0, 1, 1], [], []>} : vector<8x64xf32>, vector<64x128xf32>, vector<8x128xf32> -> vector<8x128xf32>
    %27 = arith.addf %21, %26 : vector<8x128xf32>
    %c4 = arith.constant 4 : index
    %c0_34 = arith.constant 0 : index
    %c0_35 = arith.constant 0 : index
    %28 = vector.load %arg13[%c4, %c0_34, %c0_35] : memref<49x8x64xf32, #tpu.memory_space<vmem>>, vector<1x8x64xf32>
    %29 = vector.shape_cast %28 : vector<1x8x64xf32> to vector<8x64xf32>
    %c4_36 = arith.constant 4 : index
    %c0_37 = arith.constant 0 : index
    %c0_38 = arith.constant 0 : index
    %30 = vector.load %arg6[%c4_36, %c0_37, %c0_38] : memref<49x64x128xf32, #tpu.memory_space<vmem>>, vector<1x64x128xf32>
    %31 = vector.shape_cast %30 : vector<1x64x128xf32> to vector<64x128xf32>
    %cst_39 = arith.constant dense<0.000000e+00> : vector<8x128xf32>
    %32 = tpu.matmul %29, %31, %cst_39 {dimension_numbers = #tpu.dot_dimension_numbers<[1], [0], [0], [1], [0, 0, 1, 1], [], []>} : vector<8x64xf32>, vector<64x128xf32>, vector<8x128xf32> -> vector<8x128xf32>
    %33 = arith.addf %27, %32 : vector<8x128xf32>
    %c5 = arith.constant 5 : index
    %c0_40 = arith.constant 0 : index
    %c0_41 = arith.constant 0 : index
    %34 = vector.load %arg13[%c5, %c0_40, %c0_41] : memref<49x8x64xf32, #tpu.memory_space<vmem>>, vector<1x8x64xf32>
    %35 = vector.shape_cast %34 : vector<1x8x64xf32> to vector<8x64xf32>
    %c5_42 = arith.constant 5 : index
    %c0_43 = arith.constant 0 : index
    %c0_44 = arith.constant 0 : index
    %36 = vector.load %arg6[%c5_42, %c0_43, %c0_44] : memref<49x64x128xf32, #tpu.memory_space<vmem>>, vector<1x64x128xf32>
    %37 = vector.shape_cast %36 : vector<1x64x128xf32> to vector<64x128xf32>
    %cst_45 = arith.constant dense<0.000000e+00> : vector<8x128xf32>
    %38 = tpu.matmul %35, %37, %cst_45 {dimension_numbers = #tpu.dot_dimension_numbers<[1], [0], [0], [1], [0, 0, 1, 1], [], []>} : vector<8x64xf32>, vector<64x128xf32>, vector<8x128xf32> -> vector<8x128xf32>
    %39 = arith.addf %33, %38 : vector<8x128xf32>
    %c6 = arith.constant 6 : index
    %c0_46 = arith.constant 0 : index
    %c0_47 = arith.constant 0 : index
    %40 = vector.load %arg13[%c6, %c0_46, %c0_47] : memref<49x8x64xf32, #tpu.memory_space<vmem>>, vector<1x8x64xf32>
    %41 = vector.shape_cast %40 : vector<1x8x64xf32> to vector<8x64xf32>
    %c6_48 = arith.constant 6 : index
    %c0_49 = arith.constant 0 : index
    %c0_50 = arith.constant 0 : index
    %42 = vector.load %arg6[%c6_48, %c0_49, %c0_50] : memref<49x64x128xf32, #tpu.memory_space<vmem>>, vector<1x64x128xf32>
    %43 = vector.shape_cast %42 : vector<1x64x128xf32> to vector<64x128xf32>
    %cst_51 = arith.constant dense<0.000000e+00> : vector<8x128xf32>
    %44 = tpu.matmul %41, %43, %cst_51 {dimension_numbers = #tpu.dot_dimension_numbers<[1], [0], [0], [1], [0, 0, 1, 1], [], []>} : vector<8x64xf32>, vector<64x128xf32>, vector<8x128xf32> -> vector<8x128xf32>
    %45 = arith.addf %39, %44 : vector<8x128xf32>
    %c7 = arith.constant 7 : index
    %c0_52 = arith.constant 0 : index
    %c0_53 = arith.constant 0 : index
    %46 = vector.load %arg13[%c7, %c0_52, %c0_53] : memref<49x8x64xf32, #tpu.memory_space<vmem>>, vector<1x8x64xf32>
    %47 = vector.shape_cast %46 : vector<1x8x64xf32> to vector<8x64xf32>
    %c7_54 = arith.constant 7 : index
    %c0_55 = arith.constant 0 : index
    %c0_56 = arith.constant 0 : index
    %48 = vector.load %arg6[%c7_54, %c0_55, %c0_56] : memref<49x64x128xf32, #tpu.memory_space<vmem>>, vector<1x64x128xf32>
    %49 = vector.shape_cast %48 : vector<1x64x128xf32> to vector<64x128xf32>
    %cst_57 = arith.constant dense<0.000000e+00> : vector<8x128xf32>
    %50 = tpu.matmul %47, %49, %cst_57 {dimension_numbers = #tpu.dot_dimension_numbers<[1], [0], [0], [1], [0, 0, 1, 1], [], []>} : vector<8x64xf32>, vector<64x128xf32>, vector<8x128xf32> -> vector<8x128xf32>
    %51 = arith.addf %45, %50 : vector<8x128xf32>
    %c8 = arith.constant 8 : index
    %c0_58 = arith.constant 0 : index
    %c0_59 = arith.constant 0 : index
    %52 = vector.load %arg13[%c8, %c0_58, %c0_59] : memref<49x8x64xf32, #tpu.memory_space<vmem>>, vector<1x8x64xf32>
    %53 = vector.shape_cast %52 : vector<1x8x64xf32> to vector<8x64xf32>
    %c8_60 = arith.constant 8 : index
    %c0_61 = arith.constant 0 : index
    %c0_62 = arith.constant 0 : index
    %54 = vector.load %arg6[%c8_60, %c0_61, %c0_62] : memref<49x64x128xf32, #tpu.memory_space<vmem>>, vector<1x64x128xf32>
    %55 = vector.shape_cast %54 : vector<1x64x128xf32> to vector<64x128xf32>
    %cst_63 = arith.constant dense<0.000000e+00> : vector<8x128xf32>
    %56 = tpu.matmul %53, %55, %cst_63 {dimension_numbers = #tpu.dot_dimension_numbers<[1], [0], [0], [1], [0, 0, 1, 1], [], []>} : vector<8x64xf32>, vector<64x128xf32>, vector<8x128xf32> -> vector<8x128xf32>
    %57 = arith.addf %51, %56 : vector<8x128xf32>
    %c9 = arith.constant 9 : index
    %c0_64 = arith.constant 0 : index
    %c0_65 = arith.constant 0 : index
    %58 = vector.load %arg13[%c9, %c0_64, %c0_65] : memref<49x8x64xf32, #tpu.memory_space<vmem>>, vector<1x8x64xf32>
    %59 = vector.shape_cast %58 : vector<1x8x64xf32> to vector<8x64xf32>
    %c9_66 = arith.constant 9 : index
    %c0_67 = arith.constant 0 : index
    %c0_68 = arith.constant 0 : index
    %60 = vector.load %arg6[%c9_66, %c0_67, %c0_68] : memref<49x64x128xf32, #tpu.memory_space<vmem>>, vector<1x64x128xf32>
    %61 = vector.shape_cast %60 : vector<1x64x128xf32> to vector<64x128xf32>
    %cst_69 = arith.constant dense<0.000000e+00> : vector<8x128xf32>
    %62 = tpu.matmul %59, %61, %cst_69 {dimension_numbers = #tpu.dot_dimension_numbers<[1], [0], [0], [1], [0, 0, 1, 1], [], []>} : vector<8x64xf32>, vector<64x128xf32>, vector<8x128xf32> -> vector<8x128xf32>
    %63 = arith.addf %57, %62 : vector<8x128xf32>
    %c10 = arith.constant 10 : index
    %c0_70 = arith.constant 0 : index
    %c0_71 = arith.constant 0 : index
    %64 = vector.load %arg13[%c10, %c0_70, %c0_71] : memref<49x8x64xf32, #tpu.memory_space<vmem>>, vector<1x8x64xf32>
    %65 = vector.shape_cast %64 : vector<1x8x64xf32> to vector<8x64xf32>
    %c10_72 = arith.constant 10 : index
    %c0_73 = arith.constant 0 : index
    %c0_74 = arith.constant 0 : index
    %66 = vector.load %arg6[%c10_72, %c0_73, %c0_74] : memref<49x64x128xf32, #tpu.memory_space<vmem>>, vector<1x64x128xf32>
    %67 = vector.shape_cast %66 : vector<1x64x128xf32> to vector<64x128xf32>
    %cst_75 = arith.constant dense<0.000000e+00> : vector<8x128xf32>
    %68 = tpu.matmul %65, %67, %cst_75 {dimension_numbers = #tpu.dot_dimension_numbers<[1], [0], [0], [1], [0, 0, 1, 1], [], []>} : vector<8x64xf32>, vector<64x128xf32>, vector<8x128xf32> -> vector<8x128xf32>
    %69 = arith.addf %63, %68 : vector<8x128xf32>
    %c11 = arith.constant 11 : index
    %c0_76 = arith.constant 0 : index
    %c0_77 = arith.constant 0 : index
    %70 = vector.load %arg13[%c11, %c0_76, %c0_77] : memref<49x8x64xf32, #tpu.memory_space<vmem>>, vector<1x8x64xf32>
    %71 = vector.shape_cast %70 : vector<1x8x64xf32> to vector<8x64xf32>
    %c11_78 = arith.constant 11 : index
    %c0_79 = arith.constant 0 : index
    %c0_80 = arith.constant 0 : index
    %72 = vector.load %arg6[%c11_78, %c0_79, %c0_80] : memref<49x64x128xf32, #tpu.memory_space<vmem>>, vector<1x64x128xf32>
    %73 = vector.shape_cast %72 : vector<1x64x128xf32> to vector<64x128xf32>
    %cst_81 = arith.constant dense<0.000000e+00> : vector<8x128xf32>
    %74 = tpu.matmul %71, %73, %cst_81 {dimension_numbers = #tpu.dot_dimension_numbers<[1], [0], [0], [1], [0, 0, 1, 1], [], []>} : vector<8x64xf32>, vector<64x128xf32>, vector<8x128xf32> -> vector<8x128xf32>
    %75 = arith.addf %69, %74 : vector<8x128xf32>
    %c12 = arith.constant 12 : index
    %c0_82 = arith.constant 0 : index
    %c0_83 = arith.constant 0 : index
    %76 = vector.load %arg13[%c12, %c0_82, %c0_83] : memref<49x8x64xf32, #tpu.memory_space<vmem>>, vector<1x8x64xf32>
    %77 = vector.shape_cast %76 : vector<1x8x64xf32> to vector<8x64xf32>
    %c12_84 = arith.constant 12 : index
    %c0_85 = arith.constant 0 : index
    %c0_86 = arith.constant 0 : index
    %78 = vector.load %arg6[%c12_84, %c0_85, %c0_86] : memref<49x64x128xf32, #tpu.memory_space<vmem>>, vector<1x64x128xf32>
    %79 = vector.shape_cast %78 : vector<1x64x128xf32> to vector<64x128xf32>
    %cst_87 = arith.constant dense<0.000000e+00> : vector<8x128xf32>
    %80 = tpu.matmul %77, %79, %cst_87 {dimension_numbers = #tpu.dot_dimension_numbers<[1], [0], [0], [1], [0, 0, 1, 1], [], []>} : vector<8x64xf32>, vector<64x128xf32>, vector<8x128xf32> -> vector<8x128xf32>
    %81 = arith.addf %75, %80 : vector<8x128xf32>
    %c13 = arith.constant 13 : index
    %c0_88 = arith.constant 0 : index
    %c0_89 = arith.constant 0 : index
    %82 = vector.load %arg13[%c13, %c0_88, %c0_89] : memref<49x8x64xf32, #tpu.memory_space<vmem>>, vector<1x8x64xf32>
    %83 = vector.shape_cast %82 : vector<1x8x64xf32> to vector<8x64xf32>
    %c13_90 = arith.constant 13 : index
    %c0_91 = arith.constant 0 : index
    %c0_92 = arith.constant 0 : index
    %84 = vector.load %arg6[%c13_90, %c0_91, %c0_92] : memref<49x64x128xf32, #tpu.memory_space<vmem>>, vector<1x64x128xf32>
    %85 = vector.shape_cast %84 : vector<1x64x128xf32> to vector<64x128xf32>
    %cst_93 = arith.constant dense<0.000000e+00> : vector<8x128xf32>
    %86 = tpu.matmul %83, %85, %cst_93 {dimension_numbers = #tpu.dot_dimension_numbers<[1], [0], [0], [1], [0, 0, 1, 1], [], []>} : vector<8x64xf32>, vector<64x128xf32>, vector<8x128xf32> -> vector<8x128xf32>
    %87 = arith.addf %81, %86 : vector<8x128xf32>
    %c14 = arith.constant 14 : index
    %c0_94 = arith.constant 0 : index
    %c0_95 = arith.constant 0 : index
    %88 = vector.load %arg13[%c14, %c0_94, %c0_95] : memref<49x8x64xf32, #tpu.memory_space<vmem>>, vector<1x8x64xf32>
    %89 = vector.shape_cast %88 : vector<1x8x64xf32> to vector<8x64xf32>
    %c14_96 = arith.constant 14 : index
    %c0_97 = arith.constant 0 : index
    %c0_98 = arith.constant 0 : index
    %90 = vector.load %arg6[%c14_96, %c0_97, %c0_98] : memref<49x64x128xf32, #tpu.memory_space<vmem>>, vector<1x64x128xf32>
    %91 = vector.shape_cast %90 : vector<1x64x128xf32> to vector<64x128xf32>
    %cst_99 = arith.constant dense<0.000000e+00> : vector<8x128xf32>
    %92 = tpu.matmul %89, %91, %cst_99 {dimension_numbers = #tpu.dot_dimension_numbers<[1], [0], [0], [1], [0, 0, 1, 1], [], []>} : vector<8x64xf32>, vector<64x128xf32>, vector<8x128xf32> -> vector<8x128xf32>
    %93 = arith.addf %87, %92 : vector<8x128xf32>
    %c15 = arith.constant 15 : index
    %c0_100 = arith.constant 0 : index
    %c0_101 = arith.constant 0 : index
    %94 = vector.load %arg13[%c15, %c0_100, %c0_101] : memref<49x8x64xf32, #tpu.memory_space<vmem>>, vector<1x8x64xf32>
    %95 = vector.shape_cast %94 : vector<1x8x64xf32> to vector<8x64xf32>
    %c15_102 = arith.constant 15 : index
    %c0_103 = arith.constant 0 : index
    %c0_104 = arith.constant 0 : index
    %96 = vector.load %arg6[%c15_102, %c0_103, %c0_104] : memref<49x64x128xf32, #tpu.memory_space<vmem>>, vector<1x64x128xf32>
    %97 = vector.shape_cast %96 : vector<1x64x128xf32> to vector<64x128xf32>
    %cst_105 = arith.constant dense<0.000000e+00> : vector<8x128xf32>
    %98 = tpu.matmul %95, %97, %cst_105 {dimension_numbers = #tpu.dot_dimension_numbers<[1], [0], [0], [1], [0, 0, 1, 1], [], []>} : vector<8x64xf32>, vector<64x128xf32>, vector<8x128xf32> -> vector<8x128xf32>
    %99 = arith.addf %93, %98 : vector<8x128xf32>
    %c16 = arith.constant 16 : index
    %c0_106 = arith.constant 0 : index
    %c0_107 = arith.constant 0 : index
    %100 = vector.load %arg13[%c16, %c0_106, %c0_107] : memref<49x8x64xf32, #tpu.memory_space<vmem>>, vector<1x8x64xf32>
    %101 = vector.shape_cast %100 : vector<1x8x64xf32> to vector<8x64xf32>
    %c16_108 = arith.constant 16 : index
    %c0_109 = arith.constant 0 : index
    %c0_110 = arith.constant 0 : index
    %102 = vector.load %arg6[%c16_108, %c0_109, %c0_110] : memref<49x64x128xf32, #tpu.memory_space<vmem>>, vector<1x64x128xf32>
    %103 = vector.shape_cast %102 : vector<1x64x128xf32> to vector<64x128xf32>
    %cst_111 = arith.constant dense<0.000000e+00> : vector<8x128xf32>
    %104 = tpu.matmul %101, %103, %cst_111 {dimension_numbers = #tpu.dot_dimension_numbers<[1], [0], [0], [1], [0, 0, 1, 1], [], []>} : vector<8x64xf32>, vector<64x128xf32>, vector<8x128xf32> -> vector<8x128xf32>
    %105 = arith.addf %99, %104 : vector<8x128xf32>
    %c17 = arith.constant 17 : index
    %c0_112 = arith.constant 0 : index
    %c0_113 = arith.constant 0 : index
    %106 = vector.load %arg13[%c17, %c0_112, %c0_113] : memref<49x8x64xf32, #tpu.memory_space<vmem>>, vector<1x8x64xf32>
    %107 = vector.shape_cast %106 : vector<1x8x64xf32> to vector<8x64xf32>
    %c17_114 = arith.constant 17 : index
    %c0_115 = arith.constant 0 : index
    %c0_116 = arith.constant 0 : index
    %108 = vector.load %arg6[%c17_114, %c0_115, %c0_116] : memref<49x64x128xf32, #tpu.memory_space<vmem>>, vector<1x64x128xf32>
    %109 = vector.shape_cast %108 : vector<1x64x128xf32> to vector<64x128xf32>
    %cst_117 = arith.constant dense<0.000000e+00> : vector<8x128xf32>
    %110 = tpu.matmul %107, %109, %cst_117 {dimension_numbers = #tpu.dot_dimension_numbers<[1], [0], [0], [1], [0, 0, 1, 1], [], []>} : vector<8x64xf32>, vector<64x128xf32>, vector<8x128xf32> -> vector<8x128xf32>
    %111 = arith.addf %105, %110 : vector<8x128xf32>
    %c18 = arith.constant 18 : index
    %c0_118 = arith.constant 0 : index
    %c0_119 = arith.constant 0 : index
    %112 = vector.load %arg13[%c18, %c0_118, %c0_119] : memref<49x8x64xf32, #tpu.memory_space<vmem>>, vector<1x8x64xf32>
    %113 = vector.shape_cast %112 : vector<1x8x64xf32> to vector<8x64xf32>
    %c18_120 = arith.constant 18 : index
    %c0_121 = arith.constant 0 : index
    %c0_122 = arith.constant 0 : index
    %114 = vector.load %arg6[%c18_120, %c0_121, %c0_122] : memref<49x64x128xf32, #tpu.memory_space<vmem>>, vector<1x64x128xf32>
    %115 = vector.shape_cast %114 : vector<1x64x128xf32> to vector<64x128xf32>
    %cst_123 = arith.constant dense<0.000000e+00> : vector<8x128xf32>
    %116 = tpu.matmul %113, %115, %cst_123 {dimension_numbers = #tpu.dot_dimension_numbers<[1], [0], [0], [1], [0, 0, 1, 1], [], []>} : vector<8x64xf32>, vector<64x128xf32>, vector<8x128xf32> -> vector<8x128xf32>
    %117 = arith.addf %111, %116 : vector<8x128xf32>
    %c19 = arith.constant 19 : index
    %c0_124 = arith.constant 0 : index
    %c0_125 = arith.constant 0 : index
    %118 = vector.load %arg13[%c19, %c0_124, %c0_125] : memref<49x8x64xf32, #tpu.memory_space<vmem>>, vector<1x8x64xf32>
    %119 = vector.shape_cast %118 : vector<1x8x64xf32> to vector<8x64xf32>
    %c19_126 = arith.constant 19 : index
    %c0_127 = arith.constant 0 : index
    %c0_128 = arith.constant 0 : index
    %120 = vector.load %arg6[%c19_126, %c0_127, %c0_128] : memref<49x64x128xf32, #tpu.memory_space<vmem>>, vector<1x64x128xf32>
    %121 = vector.shape_cast %120 : vector<1x64x128xf32> to vector<64x128xf32>
    %cst_129 = arith.constant dense<0.000000e+00> : vector<8x128xf32>
    %122 = tpu.matmul %119, %121, %cst_129 {dimension_numbers = #tpu.dot_dimension_numbers<[1], [0], [0], [1], [0, 0, 1, 1], [], []>} : vector<8x64xf32>, vector<64x128xf32>, vector<8x128xf32> -> vector<8x128xf32>
    %123 = arith.addf %117, %122 : vector<8x128xf32>
    %c20 = arith.constant 20 : index
    %c0_130 = arith.constant 0 : index
    %c0_131 = arith.constant 0 : index
    %124 = vector.load %arg13[%c20, %c0_130, %c0_131] : memref<49x8x64xf32, #tpu.memory_space<vmem>>, vector<1x8x64xf32>
    %125 = vector.shape_cast %124 : vector<1x8x64xf32> to vector<8x64xf32>
    %c20_132 = arith.constant 20 : index
    %c0_133 = arith.constant 0 : index
    %c0_134 = arith.constant 0 : index
    %126 = vector.load %arg6[%c20_132, %c0_133, %c0_134] : memref<49x64x128xf32, #tpu.memory_space<vmem>>, vector<1x64x128xf32>
    %127 = vector.shape_cast %126 : vector<1x64x128xf32> to vector<64x128xf32>
    %cst_135 = arith.constant dense<0.000000e+00> : vector<8x128xf32>
    %128 = tpu.matmul %125, %127, %cst_135 {dimension_numbers = #tpu.dot_dimension_numbers<[1], [0], [0], [1], [0, 0, 1, 1], [], []>} : vector<8x64xf32>, vector<64x128xf32>, vector<8x128xf32> -> vector<8x128xf32>
    %129 = arith.addf %123, %128 : vector<8x128xf32>
    %c21 = arith.constant 21 : index
    %c0_136 = arith.constant 0 : index
    %c0_137 = arith.constant 0 : index
    %130 = vector.load %arg13[%c21, %c0_136, %c0_137] : memref<49x8x64xf32, #tpu.memory_space<vmem>>, vector<1x8x64xf32>
    %131 = vector.shape_cast %130 : vector<1x8x64xf32> to vector<8x64xf32>
    %c21_138 = arith.constant 21 : index
    %c0_139 = arith.constant 0 : index
    %c0_140 = arith.constant 0 : index
    %132 = vector.load %arg6[%c21_138, %c0_139, %c0_140] : memref<49x64x128xf32, #tpu.memory_space<vmem>>, vector<1x64x128xf32>
    %133 = vector.shape_cast %132 : vector<1x64x128xf32> to vector<64x128xf32>
    %cst_141 = arith.constant dense<0.000000e+00> : vector<8x128xf32>
    %134 = tpu.matmul %131, %133, %cst_141 {dimension_numbers = #tpu.dot_dimension_numbers<[1], [0], [0], [1], [0, 0, 1, 1], [], []>} : vector<8x64xf32>, vector<64x128xf32>, vector<8x128xf32> -> vector<8x128xf32>
    %135 = arith.addf %129, %134 : vector<8x128xf32>
    %c22 = arith.constant 22 : index
    %c0_142 = arith.constant 0 : index
    %c0_143 = arith.constant 0 : index
    %136 = vector.load %arg13[%c22, %c0_142, %c0_143] : memref<49x8x64xf32, #tpu.memory_space<vmem>>, vector<1x8x64xf32>
    %137 = vector.shape_cast %136 : vector<1x8x64xf32> to vector<8x64xf32>
    %c22_144 = arith.constant 22 : index
    %c0_145 = arith.constant 0 : index
    %c0_146 = arith.constant 0 : index
    %138 = vector.load %arg6[%c22_144, %c0_145, %c0_146] : memref<49x64x128xf32, #tpu.memory_space<vmem>>, vector<1x64x128xf32>
    %139 = vector.shape_cast %138 : vector<1x64x128xf32> to vector<64x128xf32>
    %cst_147 = arith.constant dense<0.000000e+00> : vector<8x128xf32>
    %140 = tpu.matmul %137, %139, %cst_147 {dimension_numbers = #tpu.dot_dimension_numbers<[1], [0], [0], [1], [0, 0, 1, 1], [], []>} : vector<8x64xf32>, vector<64x128xf32>, vector<8x128xf32> -> vector<8x128xf32>
    %141 = arith.addf %135, %140 : vector<8x128xf32>
    %c23 = arith.constant 23 : index
    %c0_148 = arith.constant 0 : index
    %c0_149 = arith.constant 0 : index
    %142 = vector.load %arg13[%c23, %c0_148, %c0_149] : memref<49x8x64xf32, #tpu.memory_space<vmem>>, vector<1x8x64xf32>
    %143 = vector.shape_cast %142 : vector<1x8x64xf32> to vector<8x64xf32>
    %c23_150 = arith.constant 23 : index
    %c0_151 = arith.constant 0 : index
    %c0_152 = arith.constant 0 : index
    %144 = vector.load %arg6[%c23_150, %c0_151, %c0_152] : memref<49x64x128xf32, #tpu.memory_space<vmem>>, vector<1x64x128xf32>
    %145 = vector.shape_cast %144 : vector<1x64x128xf32> to vector<64x128xf32>
    %cst_153 = arith.constant dense<0.000000e+00> : vector<8x128xf32>
    %146 = tpu.matmul %143, %145, %cst_153 {dimension_numbers = #tpu.dot_dimension_numbers<[1], [0], [0], [1], [0, 0, 1, 1], [], []>} : vector<8x64xf32>, vector<64x128xf32>, vector<8x128xf32> -> vector<8x128xf32>
    %147 = arith.addf %141, %146 : vector<8x128xf32>
    %c24 = arith.constant 24 : index
    %c0_154 = arith.constant 0 : index
    %c0_155 = arith.constant 0 : index
    %148 = vector.load %arg13[%c24, %c0_154, %c0_155] : memref<49x8x64xf32, #tpu.memory_space<vmem>>, vector<1x8x64xf32>
    %149 = vector.shape_cast %148 : vector<1x8x64xf32> to vector<8x64xf32>
    %c24_156 = arith.constant 24 : index
    %c0_157 = arith.constant 0 : index
    %c0_158 = arith.constant 0 : index
    %150 = vector.load %arg6[%c24_156, %c0_157, %c0_158] : memref<49x64x128xf32, #tpu.memory_space<vmem>>, vector<1x64x128xf32>
    %151 = vector.shape_cast %150 : vector<1x64x128xf32> to vector<64x128xf32>
    %cst_159 = arith.constant dense<0.000000e+00> : vector<8x128xf32>
    %152 = tpu.matmul %149, %151, %cst_159 {dimension_numbers = #tpu.dot_dimension_numbers<[1], [0], [0], [1], [0, 0, 1, 1], [], []>} : vector<8x64xf32>, vector<64x128xf32>, vector<8x128xf32> -> vector<8x128xf32>
    %153 = arith.addf %147, %152 : vector<8x128xf32>
    %c25 = arith.constant 25 : index
    %c0_160 = arith.constant 0 : index
    %c0_161 = arith.constant 0 : index
    %154 = vector.load %arg13[%c25, %c0_160, %c0_161] : memref<49x8x64xf32, #tpu.memory_space<vmem>>, vector<1x8x64xf32>
    %155 = vector.shape_cast %154 : vector<1x8x64xf32> to vector<8x64xf32>
    %c25_162 = arith.constant 25 : index
    %c0_163 = arith.constant 0 : index
    %c0_164 = arith.constant 0 : index
    %156 = vector.load %arg6[%c25_162, %c0_163, %c0_164] : memref<49x64x128xf32, #tpu.memory_space<vmem>>, vector<1x64x128xf32>
    %157 = vector.shape_cast %156 : vector<1x64x128xf32> to vector<64x128xf32>
    %cst_165 = arith.constant dense<0.000000e+00> : vector<8x128xf32>
    %158 = tpu.matmul %155, %157, %cst_165 {dimension_numbers = #tpu.dot_dimension_numbers<[1], [0], [0], [1], [0, 0, 1, 1], [], []>} : vector<8x64xf32>, vector<64x128xf32>, vector<8x128xf32> -> vector<8x128xf32>
    %159 = arith.addf %153, %158 : vector<8x128xf32>
    %c26 = arith.constant 26 : index
    %c0_166 = arith.constant 0 : index
    %c0_167 = arith.constant 0 : index
    %160 = vector.load %arg13[%c26, %c0_166, %c0_167] : memref<49x8x64xf32, #tpu.memory_space<vmem>>, vector<1x8x64xf32>
    %161 = vector.shape_cast %160 : vector<1x8x64xf32> to vector<8x64xf32>
    %c26_168 = arith.constant 26 : index
    %c0_169 = arith.constant 0 : index
    %c0_170 = arith.constant 0 : index
    %162 = vector.load %arg6[%c26_168, %c0_169, %c0_170] : memref<49x64x128xf32, #tpu.memory_space<vmem>>, vector<1x64x128xf32>
    %163 = vector.shape_cast %162 : vector<1x64x128xf32> to vector<64x128xf32>
    %cst_171 = arith.constant dense<0.000000e+00> : vector<8x128xf32>
    %164 = tpu.matmul %161, %163, %cst_171 {dimension_numbers = #tpu.dot_dimension_numbers<[1], [0], [0], [1], [0, 0, 1, 1], [], []>} : vector<8x64xf32>, vector<64x128xf32>, vector<8x128xf32> -> vector<8x128xf32>
    %165 = arith.addf %159, %164 : vector<8x128xf32>
    %c27 = arith.constant 27 : index
    %c0_172 = arith.constant 0 : index
    %c0_173 = arith.constant 0 : index
    %166 = vector.load %arg13[%c27, %c0_172, %c0_173] : memref<49x8x64xf32, #tpu.memory_space<vmem>>, vector<1x8x64xf32>
    %167 = vector.shape_cast %166 : vector<1x8x64xf32> to vector<8x64xf32>
    %c27_174 = arith.constant 27 : index
    %c0_175 = arith.constant 0 : index
    %c0_176 = arith.constant 0 : index
    %168 = vector.load %arg6[%c27_174, %c0_175, %c0_176] : memref<49x64x128xf32, #tpu.memory_space<vmem>>, vector<1x64x128xf32>
    %169 = vector.shape_cast %168 : vector<1x64x128xf32> to vector<64x128xf32>
    %cst_177 = arith.constant dense<0.000000e+00> : vector<8x128xf32>
    %170 = tpu.matmul %167, %169, %cst_177 {dimension_numbers = #tpu.dot_dimension_numbers<[1], [0], [0], [1], [0, 0, 1, 1], [], []>} : vector<8x64xf32>, vector<64x128xf32>, vector<8x128xf32> -> vector<8x128xf32>
    %171 = arith.addf %165, %170 : vector<8x128xf32>
    %c28 = arith.constant 28 : index
    %c0_178 = arith.constant 0 : index
    %c0_179 = arith.constant 0 : index
    %172 = vector.load %arg13[%c28, %c0_178, %c0_179] : memref<49x8x64xf32, #tpu.memory_space<vmem>>, vector<1x8x64xf32>
    %173 = vector.shape_cast %172 : vector<1x8x64xf32> to vector<8x64xf32>
    %c28_180 = arith.constant 28 : index
    %c0_181 = arith.constant 0 : index
    %c0_182 = arith.constant 0 : index
    %174 = vector.load %arg6[%c28_180, %c0_181, %c0_182] : memref<49x64x128xf32, #tpu.memory_space<vmem>>, vector<1x64x128xf32>
    %175 = vector.shape_cast %174 : vector<1x64x128xf32> to vector<64x128xf32>
    %cst_183 = arith.constant dense<0.000000e+00> : vector<8x128xf32>
    %176 = tpu.matmul %173, %175, %cst_183 {dimension_numbers = #tpu.dot_dimension_numbers<[1], [0], [0], [1], [0, 0, 1, 1], [], []>} : vector<8x64xf32>, vector<64x128xf32>, vector<8x128xf32> -> vector<8x128xf32>
    %177 = arith.addf %171, %176 : vector<8x128xf32>
    %c29 = arith.constant 29 : index
    %c0_184 = arith.constant 0 : index
    %c0_185 = arith.constant 0 : index
    %178 = vector.load %arg13[%c29, %c0_184, %c0_185] : memref<49x8x64xf32, #tpu.memory_space<vmem>>, vector<1x8x64xf32>
    %179 = vector.shape_cast %178 : vector<1x8x64xf32> to vector<8x64xf32>
    %c29_186 = arith.constant 29 : index
    %c0_187 = arith.constant 0 : index
    %c0_188 = arith.constant 0 : index
    %180 = vector.load %arg6[%c29_186, %c0_187, %c0_188] : memref<49x64x128xf32, #tpu.memory_space<vmem>>, vector<1x64x128xf32>
    %181 = vector.shape_cast %180 : vector<1x64x128xf32> to vector<64x128xf32>
    %cst_189 = arith.constant dense<0.000000e+00> : vector<8x128xf32>
    %182 = tpu.matmul %179, %181, %cst_189 {dimension_numbers = #tpu.dot_dimension_numbers<[1], [0], [0], [1], [0, 0, 1, 1], [], []>} : vector<8x64xf32>, vector<64x128xf32>, vector<8x128xf32> -> vector<8x128xf32>
    %183 = arith.addf %177, %182 : vector<8x128xf32>
    %c30 = arith.constant 30 : index
    %c0_190 = arith.constant 0 : index
    %c0_191 = arith.constant 0 : index
    %184 = vector.load %arg13[%c30, %c0_190, %c0_191] : memref<49x8x64xf32, #tpu.memory_space<vmem>>, vector<1x8x64xf32>
    %185 = vector.shape_cast %184 : vector<1x8x64xf32> to vector<8x64xf32>
    %c30_192 = arith.constant 30 : index
    %c0_193 = arith.constant 0 : index
    %c0_194 = arith.constant 0 : index
    %186 = vector.load %arg6[%c30_192, %c0_193, %c0_194] : memref<49x64x128xf32, #tpu.memory_space<vmem>>, vector<1x64x128xf32>
    %187 = vector.shape_cast %186 : vector<1x64x128xf32> to vector<64x128xf32>
    %cst_195 = arith.constant dense<0.000000e+00> : vector<8x128xf32>
    %188 = tpu.matmul %185, %187, %cst_195 {dimension_numbers = #tpu.dot_dimension_numbers<[1], [0], [0], [1], [0, 0, 1, 1], [], []>} : vector<8x64xf32>, vector<64x128xf32>, vector<8x128xf32> -> vector<8x128xf32>
    %189 = arith.addf %183, %188 : vector<8x128xf32>
    %c31 = arith.constant 31 : index
    %c0_196 = arith.constant 0 : index
    %c0_197 = arith.constant 0 : index
    %190 = vector.load %arg13[%c31, %c0_196, %c0_197] : memref<49x8x64xf32, #tpu.memory_space<vmem>>, vector<1x8x64xf32>
    %191 = vector.shape_cast %190 : vector<1x8x64xf32> to vector<8x64xf32>
    %c31_198 = arith.constant 31 : index
    %c0_199 = arith.constant 0 : index
    %c0_200 = arith.constant 0 : index
    %192 = vector.load %arg6[%c31_198, %c0_199, %c0_200] : memref<49x64x128xf32, #tpu.memory_space<vmem>>, vector<1x64x128xf32>
    %193 = vector.shape_cast %192 : vector<1x64x128xf32> to vector<64x128xf32>
    %cst_201 = arith.constant dense<0.000000e+00> : vector<8x128xf32>
    %194 = tpu.matmul %191, %193, %cst_201 {dimension_numbers = #tpu.dot_dimension_numbers<[1], [0], [0], [1], [0, 0, 1, 1], [], []>} : vector<8x64xf32>, vector<64x128xf32>, vector<8x128xf32> -> vector<8x128xf32>
    %195 = arith.addf %189, %194 : vector<8x128xf32>
    %c32 = arith.constant 32 : index
    %c0_202 = arith.constant 0 : index
    %c0_203 = arith.constant 0 : index
    %196 = vector.load %arg13[%c32, %c0_202, %c0_203] : memref<49x8x64xf32, #tpu.memory_space<vmem>>, vector<1x8x64xf32>
    %197 = vector.shape_cast %196 : vector<1x8x64xf32> to vector<8x64xf32>
    %c32_204 = arith.constant 32 : index
    %c0_205 = arith.constant 0 : index
    %c0_206 = arith.constant 0 : index
    %198 = vector.load %arg6[%c32_204, %c0_205, %c0_206] : memref<49x64x128xf32, #tpu.memory_space<vmem>>, vector<1x64x128xf32>
    %199 = vector.shape_cast %198 : vector<1x64x128xf32> to vector<64x128xf32>
    %cst_207 = arith.constant dense<0.000000e+00> : vector<8x128xf32>
    %200 = tpu.matmul %197, %199, %cst_207 {dimension_numbers = #tpu.dot_dimension_numbers<[1], [0], [0], [1], [0, 0, 1, 1], [], []>} : vector<8x64xf32>, vector<64x128xf32>, vector<8x128xf32> -> vector<8x128xf32>
    %201 = arith.addf %195, %200 : vector<8x128xf32>
    %c33 = arith.constant 33 : index
    %c0_208 = arith.constant 0 : index
    %c0_209 = arith.constant 0 : index
    %202 = vector.load %arg13[%c33, %c0_208, %c0_209] : memref<49x8x64xf32, #tpu.memory_space<vmem>>, vector<1x8x64xf32>
    %203 = vector.shape_cast %202 : vector<1x8x64xf32> to vector<8x64xf32>
    %c33_210 = arith.constant 33 : index
    %c0_211 = arith.constant 0 : index
    %c0_212 = arith.constant 0 : index
    %204 = vector.load %arg6[%c33_210, %c0_211, %c0_212] : memref<49x64x128xf32, #tpu.memory_space<vmem>>, vector<1x64x128xf32>
    %205 = vector.shape_cast %204 : vector<1x64x128xf32> to vector<64x128xf32>
    %cst_213 = arith.constant dense<0.000000e+00> : vector<8x128xf32>
    %206 = tpu.matmul %203, %205, %cst_213 {dimension_numbers = #tpu.dot_dimension_numbers<[1], [0], [0], [1], [0, 0, 1, 1], [], []>} : vector<8x64xf32>, vector<64x128xf32>, vector<8x128xf32> -> vector<8x128xf32>
    %207 = arith.addf %201, %206 : vector<8x128xf32>
    %c34 = arith.constant 34 : index
    %c0_214 = arith.constant 0 : index
    %c0_215 = arith.constant 0 : index
    %208 = vector.load %arg13[%c34, %c0_214, %c0_215] : memref<49x8x64xf32, #tpu.memory_space<vmem>>, vector<1x8x64xf32>
    %209 = vector.shape_cast %208 : vector<1x8x64xf32> to vector<8x64xf32>
    %c34_216 = arith.constant 34 : index
    %c0_217 = arith.constant 0 : index
    %c0_218 = arith.constant 0 : index
    %210 = vector.load %arg6[%c34_216, %c0_217, %c0_218] : memref<49x64x128xf32, #tpu.memory_space<vmem>>, vector<1x64x128xf32>
    %211 = vector.shape_cast %210 : vector<1x64x128xf32> to vector<64x128xf32>
    %cst_219 = arith.constant dense<0.000000e+00> : vector<8x128xf32>
    %212 = tpu.matmul %209, %211, %cst_219 {dimension_numbers = #tpu.dot_dimension_numbers<[1], [0], [0], [1], [0, 0, 1, 1], [], []>} : vector<8x64xf32>, vector<64x128xf32>, vector<8x128xf32> -> vector<8x128xf32>
    %213 = arith.addf %207, %212 : vector<8x128xf32>
    %c35 = arith.constant 35 : index
    %c0_220 = arith.constant 0 : index
    %c0_221 = arith.constant 0 : index
    %214 = vector.load %arg13[%c35, %c0_220, %c0_221] : memref<49x8x64xf32, #tpu.memory_space<vmem>>, vector<1x8x64xf32>
    %215 = vector.shape_cast %214 : vector<1x8x64xf32> to vector<8x64xf32>
    %c35_222 = arith.constant 35 : index
    %c0_223 = arith.constant 0 : index
    %c0_224 = arith.constant 0 : index
    %216 = vector.load %arg6[%c35_222, %c0_223, %c0_224] : memref<49x64x128xf32, #tpu.memory_space<vmem>>, vector<1x64x128xf32>
    %217 = vector.shape_cast %216 : vector<1x64x128xf32> to vector<64x128xf32>
    %cst_225 = arith.constant dense<0.000000e+00> : vector<8x128xf32>
    %218 = tpu.matmul %215, %217, %cst_225 {dimension_numbers = #tpu.dot_dimension_numbers<[1], [0], [0], [1], [0, 0, 1, 1], [], []>} : vector<8x64xf32>, vector<64x128xf32>, vector<8x128xf32> -> vector<8x128xf32>
    %219 = arith.addf %213, %218 : vector<8x128xf32>
    %c36 = arith.constant 36 : index
    %c0_226 = arith.constant 0 : index
    %c0_227 = arith.constant 0 : index
    %220 = vector.load %arg13[%c36, %c0_226, %c0_227] : memref<49x8x64xf32, #tpu.memory_space<vmem>>, vector<1x8x64xf32>
    %221 = vector.shape_cast %220 : vector<1x8x64xf32> to vector<8x64xf32>
    %c36_228 = arith.constant 36 : index
    %c0_229 = arith.constant 0 : index
    %c0_230 = arith.constant 0 : index
    %222 = vector.load %arg6[%c36_228, %c0_229, %c0_230] : memref<49x64x128xf32, #tpu.memory_space<vmem>>, vector<1x64x128xf32>
    %223 = vector.shape_cast %222 : vector<1x64x128xf32> to vector<64x128xf32>
    %cst_231 = arith.constant dense<0.000000e+00> : vector<8x128xf32>
    %224 = tpu.matmul %221, %223, %cst_231 {dimension_numbers = #tpu.dot_dimension_numbers<[1], [0], [0], [1], [0, 0, 1, 1], [], []>} : vector<8x64xf32>, vector<64x128xf32>, vector<8x128xf32> -> vector<8x128xf32>
    %225 = arith.addf %219, %224 : vector<8x128xf32>
    %c37 = arith.constant 37 : index
    %c0_232 = arith.constant 0 : index
    %c0_233 = arith.constant 0 : index
    %226 = vector.load %arg13[%c37, %c0_232, %c0_233] : memref<49x8x64xf32, #tpu.memory_space<vmem>>, vector<1x8x64xf32>
    %227 = vector.shape_cast %226 : vector<1x8x64xf32> to vector<8x64xf32>
    %c37_234 = arith.constant 37 : index
    %c0_235 = arith.constant 0 : index
    %c0_236 = arith.constant 0 : index
    %228 = vector.load %arg6[%c37_234, %c0_235, %c0_236] : memref<49x64x128xf32, #tpu.memory_space<vmem>>, vector<1x64x128xf32>
    %229 = vector.shape_cast %228 : vector<1x64x128xf32> to vector<64x128xf32>
    %cst_237 = arith.constant dense<0.000000e+00> : vector<8x128xf32>
    %230 = tpu.matmul %227, %229, %cst_237 {dimension_numbers = #tpu.dot_dimension_numbers<[1], [0], [0], [1], [0, 0, 1, 1], [], []>} : vector<8x64xf32>, vector<64x128xf32>, vector<8x128xf32> -> vector<8x128xf32>
    %231 = arith.addf %225, %230 : vector<8x128xf32>
    %c38 = arith.constant 38 : index
    %c0_238 = arith.constant 0 : index
    %c0_239 = arith.constant 0 : index
    %232 = vector.load %arg13[%c38, %c0_238, %c0_239] : memref<49x8x64xf32, #tpu.memory_space<vmem>>, vector<1x8x64xf32>
    %233 = vector.shape_cast %232 : vector<1x8x64xf32> to vector<8x64xf32>
    %c38_240 = arith.constant 38 : index
    %c0_241 = arith.constant 0 : index
    %c0_242 = arith.constant 0 : index
    %234 = vector.load %arg6[%c38_240, %c0_241, %c0_242] : memref<49x64x128xf32, #tpu.memory_space<vmem>>, vector<1x64x128xf32>
    %235 = vector.shape_cast %234 : vector<1x64x128xf32> to vector<64x128xf32>
    %cst_243 = arith.constant dense<0.000000e+00> : vector<8x128xf32>
    %236 = tpu.matmul %233, %235, %cst_243 {dimension_numbers = #tpu.dot_dimension_numbers<[1], [0], [0], [1], [0, 0, 1, 1], [], []>} : vector<8x64xf32>, vector<64x128xf32>, vector<8x128xf32> -> vector<8x128xf32>
    %237 = arith.addf %231, %236 : vector<8x128xf32>
    %c39 = arith.constant 39 : index
    %c0_244 = arith.constant 0 : index
    %c0_245 = arith.constant 0 : index
    %238 = vector.load %arg13[%c39, %c0_244, %c0_245] : memref<49x8x64xf32, #tpu.memory_space<vmem>>, vector<1x8x64xf32>
    %239 = vector.shape_cast %238 : vector<1x8x64xf32> to vector<8x64xf32>
    %c39_246 = arith.constant 39 : index
    %c0_247 = arith.constant 0 : index
    %c0_248 = arith.constant 0 : index
    %240 = vector.load %arg6[%c39_246, %c0_247, %c0_248] : memref<49x64x128xf32, #tpu.memory_space<vmem>>, vector<1x64x128xf32>
    %241 = vector.shape_cast %240 : vector<1x64x128xf32> to vector<64x128xf32>
    %cst_249 = arith.constant dense<0.000000e+00> : vector<8x128xf32>
    %242 = tpu.matmul %239, %241, %cst_249 {dimension_numbers = #tpu.dot_dimension_numbers<[1], [0], [0], [1], [0, 0, 1, 1], [], []>} : vector<8x64xf32>, vector<64x128xf32>, vector<8x128xf32> -> vector<8x128xf32>
    %243 = arith.addf %237, %242 : vector<8x128xf32>
    %c40 = arith.constant 40 : index
    %c0_250 = arith.constant 0 : index
    %c0_251 = arith.constant 0 : index
    %244 = vector.load %arg13[%c40, %c0_250, %c0_251] : memref<49x8x64xf32, #tpu.memory_space<vmem>>, vector<1x8x64xf32>
    %245 = vector.shape_cast %244 : vector<1x8x64xf32> to vector<8x64xf32>
    %c40_252 = arith.constant 40 : index
    %c0_253 = arith.constant 0 : index
    %c0_254 = arith.constant 0 : index
    %246 = vector.load %arg6[%c40_252, %c0_253, %c0_254] : memref<49x64x128xf32, #tpu.memory_space<vmem>>, vector<1x64x128xf32>
    %247 = vector.shape_cast %246 : vector<1x64x128xf32> to vector<64x128xf32>
    %cst_255 = arith.constant dense<0.000000e+00> : vector<8x128xf32>
    %248 = tpu.matmul %245, %247, %cst_255 {dimension_numbers = #tpu.dot_dimension_numbers<[1], [0], [0], [1], [0, 0, 1, 1], [], []>} : vector<8x64xf32>, vector<64x128xf32>, vector<8x128xf32> -> vector<8x128xf32>
    %249 = arith.addf %243, %248 : vector<8x128xf32>
    %c41 = arith.constant 41 : index
    %c0_256 = arith.constant 0 : index
    %c0_257 = arith.constant 0 : index
    %250 = vector.load %arg13[%c41, %c0_256, %c0_257] : memref<49x8x64xf32, #tpu.memory_space<vmem>>, vector<1x8x64xf32>
    %251 = vector.shape_cast %250 : vector<1x8x64xf32> to vector<8x64xf32>
    %c41_258 = arith.constant 41 : index
    %c0_259 = arith.constant 0 : index
    %c0_260 = arith.constant 0 : index
    %252 = vector.load %arg6[%c41_258, %c0_259, %c0_260] : memref<49x64x128xf32, #tpu.memory_space<vmem>>, vector<1x64x128xf32>
    %253 = vector.shape_cast %252 : vector<1x64x128xf32> to vector<64x128xf32>
    %cst_261 = arith.constant dense<0.000000e+00> : vector<8x128xf32>
    %254 = tpu.matmul %251, %253, %cst_261 {dimension_numbers = #tpu.dot_dimension_numbers<[1], [0], [0], [1], [0, 0, 1, 1], [], []>} : vector<8x64xf32>, vector<64x128xf32>, vector<8x128xf32> -> vector<8x128xf32>
    %255 = arith.addf %249, %254 : vector<8x128xf32>
    %c42 = arith.constant 42 : index
    %c0_262 = arith.constant 0 : index
    %c0_263 = arith.constant 0 : index
    %256 = vector.load %arg13[%c42, %c0_262, %c0_263] : memref<49x8x64xf32, #tpu.memory_space<vmem>>, vector<1x8x64xf32>
    %257 = vector.shape_cast %256 : vector<1x8x64xf32> to vector<8x64xf32>
    %c42_264 = arith.constant 42 : index
    %c0_265 = arith.constant 0 : index
    %c0_266 = arith.constant 0 : index
    %258 = vector.load %arg6[%c42_264, %c0_265, %c0_266] : memref<49x64x128xf32, #tpu.memory_space<vmem>>, vector<1x64x128xf32>
    %259 = vector.shape_cast %258 : vector<1x64x128xf32> to vector<64x128xf32>
    %cst_267 = arith.constant dense<0.000000e+00> : vector<8x128xf32>
    %260 = tpu.matmul %257, %259, %cst_267 {dimension_numbers = #tpu.dot_dimension_numbers<[1], [0], [0], [1], [0, 0, 1, 1], [], []>} : vector<8x64xf32>, vector<64x128xf32>, vector<8x128xf32> -> vector<8x128xf32>
    %261 = arith.addf %255, %260 : vector<8x128xf32>
    %c43 = arith.constant 43 : index
    %c0_268 = arith.constant 0 : index
    %c0_269 = arith.constant 0 : index
    %262 = vector.load %arg13[%c43, %c0_268, %c0_269] : memref<49x8x64xf32, #tpu.memory_space<vmem>>, vector<1x8x64xf32>
    %263 = vector.shape_cast %262 : vector<1x8x64xf32> to vector<8x64xf32>
    %c43_270 = arith.constant 43 : index
    %c0_271 = arith.constant 0 : index
    %c0_272 = arith.constant 0 : index
    %264 = vector.load %arg6[%c43_270, %c0_271, %c0_272] : memref<49x64x128xf32, #tpu.memory_space<vmem>>, vector<1x64x128xf32>
    %265 = vector.shape_cast %264 : vector<1x64x128xf32> to vector<64x128xf32>
    %cst_273 = arith.constant dense<0.000000e+00> : vector<8x128xf32>
    %266 = tpu.matmul %263, %265, %cst_273 {dimension_numbers = #tpu.dot_dimension_numbers<[1], [0], [0], [1], [0, 0, 1, 1], [], []>} : vector<8x64xf32>, vector<64x128xf32>, vector<8x128xf32> -> vector<8x128xf32>
    %267 = arith.addf %261, %266 : vector<8x128xf32>
    %c44 = arith.constant 44 : index
    %c0_274 = arith.constant 0 : index
    %c0_275 = arith.constant 0 : index
    %268 = vector.load %arg13[%c44, %c0_274, %c0_275] : memref<49x8x64xf32, #tpu.memory_space<vmem>>, vector<1x8x64xf32>
    %269 = vector.shape_cast %268 : vector<1x8x64xf32> to vector<8x64xf32>
    %c44_276 = arith.constant 44 : index
    %c0_277 = arith.constant 0 : index
    %c0_278 = arith.constant 0 : index
    %270 = vector.load %arg6[%c44_276, %c0_277, %c0_278] : memref<49x64x128xf32, #tpu.memory_space<vmem>>, vector<1x64x128xf32>
    %271 = vector.shape_cast %270 : vector<1x64x128xf32> to vector<64x128xf32>
    %cst_279 = arith.constant dense<0.000000e+00> : vector<8x128xf32>
    %272 = tpu.matmul %269, %271, %cst_279 {dimension_numbers = #tpu.dot_dimension_numbers<[1], [0], [0], [1], [0, 0, 1, 1], [], []>} : vector<8x64xf32>, vector<64x128xf32>, vector<8x128xf32> -> vector<8x128xf32>
    %273 = arith.addf %267, %272 : vector<8x128xf32>
    %c45 = arith.constant 45 : index
    %c0_280 = arith.constant 0 : index
    %c0_281 = arith.constant 0 : index
    %274 = vector.load %arg13[%c45, %c0_280, %c0_281] : memref<49x8x64xf32, #tpu.memory_space<vmem>>, vector<1x8x64xf32>
    %275 = vector.shape_cast %274 : vector<1x8x64xf32> to vector<8x64xf32>
    %c45_282 = arith.constant 45 : index
    %c0_283 = arith.constant 0 : index
    %c0_284 = arith.constant 0 : index
    %276 = vector.load %arg6[%c45_282, %c0_283, %c0_284] : memref<49x64x128xf32, #tpu.memory_space<vmem>>, vector<1x64x128xf32>
    %277 = vector.shape_cast %276 : vector<1x64x128xf32> to vector<64x128xf32>
    %cst_285 = arith.constant dense<0.000000e+00> : vector<8x128xf32>
    %278 = tpu.matmul %275, %277, %cst_285 {dimension_numbers = #tpu.dot_dimension_numbers<[1], [0], [0], [1], [0, 0, 1, 1], [], []>} : vector<8x64xf32>, vector<64x128xf32>, vector<8x128xf32> -> vector<8x128xf32>
    %279 = arith.addf %273, %278 : vector<8x128xf32>
    %c46 = arith.constant 46 : index
    %c0_286 = arith.constant 0 : index
    %c0_287 = arith.constant 0 : index
    %280 = vector.load %arg13[%c46, %c0_286, %c0_287] : memref<49x8x64xf32, #tpu.memory_space<vmem>>, vector<1x8x64xf32>
    %281 = vector.shape_cast %280 : vector<1x8x64xf32> to vector<8x64xf32>
    %c46_288 = arith.constant 46 : index
    %c0_289 = arith.constant 0 : index
    %c0_290 = arith.constant 0 : index
    %282 = vector.load %arg6[%c46_288, %c0_289, %c0_290] : memref<49x64x128xf32, #tpu.memory_space<vmem>>, vector<1x64x128xf32>
    %283 = vector.shape_cast %282 : vector<1x64x128xf32> to vector<64x128xf32>
    %cst_291 = arith.constant dense<0.000000e+00> : vector<8x128xf32>
    %284 = tpu.matmul %281, %283, %cst_291 {dimension_numbers = #tpu.dot_dimension_numbers<[1], [0], [0], [1], [0, 0, 1, 1], [], []>} : vector<8x64xf32>, vector<64x128xf32>, vector<8x128xf32> -> vector<8x128xf32>
    %285 = arith.addf %279, %284 : vector<8x128xf32>
    %c47 = arith.constant 47 : index
    %c0_292 = arith.constant 0 : index
    %c0_293 = arith.constant 0 : index
    %286 = vector.load %arg13[%c47, %c0_292, %c0_293] : memref<49x8x64xf32, #tpu.memory_space<vmem>>, vector<1x8x64xf32>
    %287 = vector.shape_cast %286 : vector<1x8x64xf32> to vector<8x64xf32>
    %c47_294 = arith.constant 47 : index
    %c0_295 = arith.constant 0 : index
    %c0_296 = arith.constant 0 : index
    %288 = vector.load %arg6[%c47_294, %c0_295, %c0_296] : memref<49x64x128xf32, #tpu.memory_space<vmem>>, vector<1x64x128xf32>
    %289 = vector.shape_cast %288 : vector<1x64x128xf32> to vector<64x128xf32>
    %cst_297 = arith.constant dense<0.000000e+00> : vector<8x128xf32>
    %290 = tpu.matmul %287, %289, %cst_297 {dimension_numbers = #tpu.dot_dimension_numbers<[1], [0], [0], [1], [0, 0, 1, 1], [], []>} : vector<8x64xf32>, vector<64x128xf32>, vector<8x128xf32> -> vector<8x128xf32>
    %291 = arith.addf %285, %290 : vector<8x128xf32>
    %c48 = arith.constant 48 : index
    %c0_298 = arith.constant 0 : index
    %c0_299 = arith.constant 0 : index
    %292 = vector.load %arg13[%c48, %c0_298, %c0_299] : memref<49x8x64xf32, #tpu.memory_space<vmem>>, vector<1x8x64xf32>
    %293 = vector.shape_cast %292 : vector<1x8x64xf32> to vector<8x64xf32>
    %c48_300 = arith.constant 48 : index
    %c0_301 = arith.constant 0 : index
    %c0_302 = arith.constant 0 : index
    %294 = vector.load %arg6[%c48_300, %c0_301, %c0_302] : memref<49x64x128xf32, #tpu.memory_space<vmem>>, vector<1x64x128xf32>
    %295 = vector.shape_cast %294 : vector<1x64x128xf32> to vector<64x128xf32>
    %cst_303 = arith.constant dense<0.000000e+00> : vector<8x128xf32>
    %296 = tpu.matmul %293, %295, %cst_303 {dimension_numbers = #tpu.dot_dimension_numbers<[1], [0], [0], [1], [0, 0, 1, 1], [], []>} : vector<8x64xf32>, vector<64x128xf32>, vector<8x128xf32> -> vector<8x128xf32>
    %297 = arith.addf %291, %296 : vector<8x128xf32>
    %c0_304 = arith.constant 0 : index
    %c0_305 = arith.constant 0 : index
    %298 = vector.load %arg7[%c0_304, %c0_305] : memref<8x128xf32, #tpu.memory_space<vmem>>, vector<8x128xf32>
    %299 = arith.addf %297, %298 : vector<8x128xf32>
    %cst_306 = arith.constant 0.000000e+00 : f32
    %300 = vector.broadcast %cst_306 : f32 to vector<8x128xf32>
    %301 = arith.maximumf %299, %300 : vector<8x128xf32>
    %c0_307 = arith.constant 0 : index
    %c0_308 = arith.constant 0 : index
    %302 = vector.load %arg8[%c0_307, %c0_308] : memref<128x128xf32, #tpu.memory_space<vmem>>, vector<128x128xf32>
    %cst_309 = arith.constant dense<0.000000e+00> : vector<8x128xf32>
    %303 = tpu.matmul %301, %302, %cst_309 {dimension_numbers = #tpu.dot_dimension_numbers<[1], [0], [0], [1], [0, 0, 1, 1], [], []>} : vector<8x128xf32>, vector<128x128xf32>, vector<8x128xf32> -> vector<8x128xf32>
    %c0_310 = arith.constant 0 : index
    %c0_311 = arith.constant 0 : index
    %304 = vector.load %arg9[%c0_310, %c0_311] : memref<8x128xf32, #tpu.memory_space<vmem>>, vector<8x128xf32>
    %305 = arith.addf %303, %304 : vector<8x128xf32>
    %c0_312 = arith.constant 0 : index
    %c0_313 = arith.constant 0 : index
    %c0_314 = arith.constant 0 : index
    %306 = vector.load %arg10[%c0_312, %c0_313, %c0_314] : memref<1x8x128xf32, #tpu.memory_space<vmem>>, vector<1x8x128xf32>
    %307 = vector.shape_cast %306 : vector<1x8x128xf32> to vector<8x128xf32>
    %308 = vector.shape_cast %305 : vector<8x128xf32> to vector<1x8x128xf32>
    tpu.vector_store %arg10[%c0_312, %c0_313, %c0_314], %308 {strides = array<i32>} : memref<1x8x128xf32, #tpu.memory_space<vmem>>, vector<1x8x128xf32>,
    return
  }
  func.func @transform_0(%arg0: i32) -> (i32, i32, i32, i32, i32) {
    %c0_i32 = arith.constant 0 : i32
    %c0_i32_0 = arith.constant 0 : i32
    %c0_i32_1 = arith.constant 0 : i32
    %c0_i32_2 = arith.constant 0 : i32
    %c0_i32_3 = arith.constant 0 : i32
    return %arg0, %c0_i32, %c0_i32_0, %c0_i32_1, %c0_i32_2 : i32, i32, i32, i32, i32
  }
  func.func @transform_1(%arg0: i32) -> (i32, i32, i32) {
    %c0_i32 = arith.constant 0 : i32
    %c0_i32_0 = arith.constant 0 : i32
    %c0_i32_1 = arith.constant 0 : i32
    %c0_i32_2 = arith.constant 0 : i32
    return %c0_i32, %c0_i32_0, %c0_i32_1 : i32, i32, i32
  }
  func.func @transform_2(%arg0: i32) -> (i32, i32) {
    %c0_i32 = arith.constant 0 : i32
    %c0_i32_0 = arith.constant 0 : i32
    %c0_i32_1 = arith.constant 0 : i32
    return %c0_i32, %c0_i32_0 : i32, i32
  }
  func.func @transform_3(%arg0: i32) -> (i32, i32, i32) {
    %c0_i32 = arith.constant 0 : i32
    %c0_i32_0 = arith.constant 0 : i32
    %c0_i32_1 = arith.constant 0 : i32
    %c0_i32_2 = arith.constant 0 : i32
    return %c0_i32, %c0_i32_0, %c0_i32_1 : i32, i32, i32
  }
  func.func @transform_4(%arg0: i32) -> (i32, i32) {
    %c0_i32 = arith.constant 0 : i32
    %c0_i32_0 = arith.constant 0 : i32
    %c0_i32_1 = arith.constant 0 : i32
    return %c0_i32, %c0_i32_0 : i32, i32
  }
  func.func @transform_5(%arg0: i32) -> (i32, i32, i32) {
    %c0_i32 = arith.constant 0 : i32
    %c0_i32_0 = arith.constant 0 : i32
    %c0_i32_1 = arith.constant 0 : i32
    %c0_i32_2 = arith.constant 0 : i32
    return %c0_i32, %c0_i32_0, %c0_i32_1 : i32, i32, i32
  }
  func.func @transform_6(%arg0: i32) -> (i32, i32) {
    %c0_i32 = arith.constant 0 : i32
    %c0_i32_0 = arith.constant 0 : i32
    %c0_i32_1 = arith.constant 0 : i32
    return %c0_i32, %c0_i32_0 : i32, i32
  }
  func.func @transform_7(%arg0: i32) -> (i32, i32) {
    %c0_i32 = arith.constant 0 : i32
    %c0_i32_0 = arith.constant 0 : i32
    %c0_i32_1 = arith.constant 0 : i32
    return %c0_i32, %c0_i32_0 : i32, i32
  }
  func.func @transform_8(%arg0: i32) -> (i32, i32) {
    %c0_i32 = arith.constant 0 : i32
    %c0_i32_0 = arith.constant 0 : i32
    %c0_i32_1 = arith.constant 0 : i32
    return %c0_i32, %c0_i32_0 : i32, i32
  }
  func.func @transform_9(%arg0: i32) -> (i32, i32, i32) {
    %c0_i32 = arith.constant 0 : i32
    %c0_i32_0 = arith.constant 0 : i32
    %c0_i32_1 = arith.constant 0 : i32
    return %arg0, %c0_i32, %c0_i32_0 : i32, i32, i32
  }
}

</mosaic_0001>

<bundles_post_ra>
// kernel: simple_cnn_forward.1
= control target key start
LH: loop header
LB: loop body
LE: loop exit
PB: predicated region body
PF: predicated region fallthrough
CT: control target
= control target key end

     0   :  { %s14142_s30 = smov 0   ;;  %s18701_s0 = inlined_call_operand.vmem [shape: f32[1,30,30,8,1], index: 0, kind: input, shape index: {}]   ;;  %s18702_s1 = inlined_call_operand.vmem [shape: f32[9,8,32], index: 1, kind: input, shape index: {}]   ;;  %s18703_s2 = inlined_call_operand.vmem [shape: f32[8,32], index: 2, kind: input, shape index: {}]   ;;  %s18704_s3 = inlined_call_operand.vmem [shape: f32[9,32,64], index: 3, kind: input, shape index: {}]   ;;  %s18705_s4 = inlined_call_operand.vmem [shape: f32[8,64], index: 4, kind: input, shape index: {}]   ;;  %s18706_s5 = inlined_call_operand.vmem [shape: f32[49,64,128], index: 5, kind: input, shape index: {}]   ;;  %s18707_s6 = inlined_call_operand.vmem [shape: f32[8,128], index: 6, kind: input, shape index: {}]   ;;  %s18708_s7 = inlined_call_operand.vmem [shape: f32[128,128], index: 7, kind: input, shape index: {}]   ;;  %s18709_s8 = inlined_call_operand.vmem [shape: f32[8,128], index: 8, kind: input, shape index: {}]   ;;  %s18710_s9 = inlined_call_operand.vmem [shape: f32[1,8,128], index: 9, kind: output, shape index: {}]  }
   0x1 LB: > { %v14088_v0 = vmov 0   ;;  %s38_s10 = smul.u32 240, %s14078_s30  ;;  %vm221_vm0 = vcmask 261120   ;;  %s37_s30 = sadd.s32 1, %s14078_s30   ;;  %s14078_s30 = sphi %s14142_s30, %s37_s30  }
   0x2   : > { %14063 = vset.pattern.permute.xlu1 %v14088_v0  ;;  %14062 = vset.pattern.permute.xlu0 %v14088_v0  ;;  %p34_p0 = scmp.ge.s32.totalorder %s37_s30, 30  }
   0x3   : > { %s14153_s13 = scalar_lea.vmem %s18701_s0, %s38_s10  ;;  %s14187_s14 = scalar_lea.vmem [#allocation2], %s38_s10  ;;  %v18711_v61 = vmov (%p34_p0), 0.0  }
   0x4   : > { %v42_v1 = vld [vmem:[%s14153_s13 + $0x10] sm:$0xff]  ;;  %v40_v2 = vld [vmem:[%s14153_s13] sm:$0xff]  ;;  %v43_v3 = vld [vmem:[%s14153_s13 + $0x18] sm:$0xff]  ;;  %253 = vst.msk [vmem:[#allocation3] sm:$0xff] (%p34_p0), %vm221_vm0, %v18711_v61  ;;  %s14764_s0 = smov (%p34_p0), 0  }
   0x5   : > { %82 = vperm.xlu1 %14063, %v42_v1   ;;  %72 = vperm.xlu0 %14062, %v40_v2   ;;  %v41_v4 = vld [vmem:[%s14153_s13 + $0x8] sm:$0xff]  ;;  %v44_v6 = vld [vmem:[%s14153_s13 + $0x20] sm:$0xff]  ;;  %v47_v7 = vld [vmem:[%s14153_s13 + $0x38] sm:$0xff]  ;;  %254 = vst.msk [vmem:[#allocation3 + $0x8] sm:$0xff] (%p34_p0), %vm221_vm0, %v18711_v61 }
   0x6   : > { %v45_v5 = vld [vmem:[%s14153_s13 + $0x28] sm:$0xff]  ;;  %v46_v8 = vld [vmem:[%s14153_s13 + $0x30] sm:$0xff]  ;;  %v48_v10 = vld [vmem:[%s14153_s13 + $0x40] sm:$0xff]  ;;  %255 = vst.msk [vmem:[#allocation3 + $0x10] sm:$0xff] (%p34_p0), %vm221_vm0, %v18711_v61 }
   0x7   : > { %v49_v9 = vld [vmem:[%s14153_s13 + $0x48] sm:$0xff]  ;;  %v51_v11 = vld [vmem:[%s14153_s13 + $0x58] sm:$0xff]  ;;  %v50_v12 = vld [vmem:[%s14153_s13 + $0x50] sm:$0xff]  ;;  %256 = vst.msk [vmem:[#allocation3 + $0x18] sm:$0xff] (%p34_p0), %vm221_vm0, %v18711_v61 }
   0x8   : > { %v53_v13 = vld [vmem:[%s14153_s13 + $0x68] sm:$0xff]  ;;  %v52_v14 = vld [vmem:[%s14153_s13 + $0x60] sm:$0xff]  ;;  %v55_v15 = vld [vmem:[%s14153_s13 + $0x78] sm:$0xff]  ;;  %257 = vst.msk [vmem:[#allocation3 + $0x20] sm:$0xff] (%p34_p0), %vm221_vm0, %v18711_v61 }
   0x9   : > { %87 = vperm.xlu1 %14063, %v43_v3   ;;  %77 = vperm.xlu0 %14062, %v41_v4   ;;  %v54_v16 = vld [vmem:[%s14153_s13 + $0x70] sm:$0xff]  ;;  %v57_v17 = vld [vmem:[%s14153_s13 + $0x88] sm:$0xff]  ;;  %v56_v18 = vld [vmem:[%s14153_s13 + $0x80] sm:$0xff]  ;;  %258 = vst.msk [vmem:[#allocation3 + $0x28] sm:$0xff] (%p34_p0), %vm221_vm0, %v18711_v61 }
   0xa   : > { %v59_v19 = vld [vmem:[%s14153_s13 + $0x98] sm:$0xff]  ;;  %v58_v20 = vld [vmem:[%s14153_s13 + $0x90] sm:$0xff]  ;;  %v61_v21 = vld [vmem:[%s14153_s13 + $0xa8] sm:$0xff]  ;;  %259 = vst.msk [vmem:[#allocation3 + $0x30] sm:$0xff] (%p34_p0), %vm221_vm0, %v18711_v61 }
   0xb   : > { %v60_v22 = vld [vmem:[%s14153_s13 + $0xa0] sm:$0xff]  ;;  %v63_v23 = vld [vmem:[%s14153_s13 + $0xb8] sm:$0xff]  ;;  %v62_v24 = vld [vmem:[%s14153_s13 + $0xb0] sm:$0xff]  ;;  %260 = vst.msk [vmem:[#allocation3 + $0x38] sm:$0xff] (%p34_p0), %vm221_vm0, %v18711_v61 }
   0xc   : > { %v65_v25 = vld [vmem:[%s14153_s13 + $0xc8] sm:$0xff]  ;;  %v64_v26 = vld [vmem:[%s14153_s13 + $0xc0] sm:$0xff]  ;;  %v67_v27 = vld [vmem:[%s14153_s13 + $0xd8] sm:$0xff]  ;;  %261 = vst.msk [vmem:[#allocation3 + $0x40] sm:$0xff] (%p34_p0), %vm221_vm0, %v18711_v61 }
   0xd   : > { %97 = vperm.xlu1 %14063, %v45_v5   ;;  %92 = vperm.xlu0 %14062, %v44_v6   ;;  %v66_v28 = vld [vmem:[%s14153_s13 + $0xd0] sm:$0xff]  ;;  %v69_v29 = vld [vmem:[%s14153_s13 + $0xe8] sm:$0xff]  ;;  %v68_v30 = vld [vmem:[%s14153_s13 + $0xe0] sm:$0xff]  ;;  %262 = vst.msk [vmem:[#allocation3 + $0x48] sm:$0xff] (%p34_p0), %vm221_vm0, %v18711_v61 }
   0xe   :  { %263 = vst.msk [vmem:[#allocation3 + $0x50] sm:$0xff] (%p34_p0), %vm221_vm0, %v18711_v61  ;;  %264 = vst.msk [vmem:[#allocation3 + $0x58] sm:$0xff] (%p34_p0), %vm221_vm0, %v18711_v61 }
   0xf   :  { %265 = vst.msk [vmem:[#allocation3 + $0x60] sm:$0xff] (%p34_p0), %vm221_vm0, %v18711_v61  ;;  %266 = vst.msk [vmem:[#allocation3 + $0x68] sm:$0xff] (%p34_p0), %vm221_vm0, %v18711_v61 }
  0x10   :  { %267 = vst.msk [vmem:[#allocation3 + $0x70] sm:$0xff] (%p34_p0), %vm221_vm0, %v18711_v61  ;;  %268 = vst.msk [vmem:[#allocation3 + $0x78] sm:$0xff] (%p34_p0), %vm221_vm0, %v18711_v61 }
  0x11   : > { %107 = vperm.xlu1 %14063, %v47_v7   ;;  %102 = vperm.xlu0 %14062, %v46_v8   ;;  %269 = vst.msk [vmem:[#allocation3 + $0x80] sm:$0xff] (%p34_p0), %vm221_vm0, %v18711_v61  ;;  %270 = vst.msk [vmem:[#allocation3 + $0x88] sm:$0xff] (%p34_p0), %vm221_vm0, %v18711_v61 }
  0x12   :  { %271 = vst.msk [vmem:[#allocation3 + $0x90] sm:$0xff] (%p34_p0), %vm221_vm0, %v18711_v61  ;;  %272 = vst.msk [vmem:[#allocation3 + $0x98] sm:$0xff] (%p34_p0), %vm221_vm0, %v18711_v61 }
  0x13   :  { %273 = vst.msk [vmem:[#allocation3 + $0xa0] sm:$0xff] (%p34_p0), %vm221_vm0, %v18711_v61  ;;  %274 = vst.msk [vmem:[#allocation3 + $0xa8] sm:$0xff] (%p34_p0), %vm221_vm0, %v18711_v61 }
  0x14   :  { %275 = vst.msk [vmem:[#allocation3 + $0xb0] sm:$0xff] (%p34_p0), %vm221_vm0, %v18711_v61  ;;  %276 = vst.msk [vmem:[#allocation3 + $0xb8] sm:$0xff] (%p34_p0), %vm221_vm0, %v18711_v61 }
  0x15   : > { %117 = vperm.xlu1 %14063, %v49_v9   ;;  %112 = vperm.xlu0 %14062, %v48_v10   ;;  %277 = vst.msk [vmem:[#allocation3 + $0xc0] sm:$0xff] (%p34_p0), %vm221_vm0, %v18711_v61  ;;  %278 = vst.msk [vmem:[#allocation3 + $0xc8] sm:$0xff] (%p34_p0), %vm221_vm0, %v18711_v61 }
  0x16   :  { %279 = vst.msk [vmem:[#allocation3 + $0xd0] sm:$0xff] (%p34_p0), %vm221_vm0, %v18711_v61  ;;  %280 = vst.msk [vmem:[#allocation3 + $0xd8] sm:$0xff] (%p34_p0), %vm221_vm0, %v18711_v61 }
  0x17   :  { %281 = vst.msk [vmem:[#allocation3 + $0xe0] sm:$0xff] (%p34_p0), %vm221_vm0, %v18711_v61  ;;  %282 = vst.msk [vmem:[#allocation3 + $0xe8] sm:$0xff] (%p34_p0), %vm221_vm0, %v18711_v61 }
  0x18   :  { %283 = vst.msk [vmem:[#allocation3 + $0xf0] sm:$0xff] (%p34_p0), %vm221_vm0, %v18711_v61  ;;  %284 = vst.msk [vmem:[#allocation3 + $0xf8] sm:$0xff] (%p34_p0), %vm221_vm0, %v18711_v61 }
  0x19   : > { %127 = vperm.xlu1 %14063, %v51_v11   ;;  %122 = vperm.xlu0 %14062, %v50_v12   ;;  %285 = vst.msk [vmem:[#allocation3 + $0x100] sm:$0xff] (%p34_p0), %vm221_vm0, %v18711_v61  ;;  %286 = vst.msk [vmem:[#allocation3 + $0x108] sm:$0xff] (%p34_p0), %vm221_vm0, %v18711_v61 }
  0x1a   :  { %287 = vst.msk [vmem:[#allocation3 + $0x110] sm:$0xff] (%p34_p0), %vm221_vm0, %v18711_v61  ;;  %288 = vst.msk [vmem:[#allocation3 + $0x118] sm:$0xff] (%p34_p0), %vm221_vm0, %v18711_v61 }
  0x1b   :  { %289 = vst.msk [vmem:[#allocation3 + $0x120] sm:$0xff] (%p34_p0), %vm221_vm0, %v18711_v61  ;;  %290 = vst.msk [vmem:[#allocation3 + $0x128] sm:$0xff] (%p34_p0), %vm221_vm0, %v18711_v61 }
  0x1c   :  { %291 = vst.msk [vmem:[#allocation3 + $0x130] sm:$0xff] (%p34_p0), %vm221_vm0, %v18711_v61  ;;  %292 = vst.msk [vmem:[#allocation3 + $0x138] sm:$0xff] (%p34_p0), %vm221_vm0, %v18711_v61 }
  0x1d   : > { %137 = vperm.xlu1 %14063, %v53_v13   ;;  %132 = vperm.xlu0 %14062, %v52_v14   ;;  %293 = vst.msk [vmem:[#allocation3 + $0x140] sm:$0xff] (%p34_p0), %vm221_vm0, %v18711_v61  ;;  %294 = vst.msk [vmem:[#allocation3 + $0x148] sm:$0xff] (%p34_p0), %vm221_vm0, %v18711_v61 }
  0x1e   :  { %295 = vst.msk [vmem:[#allocation3 + $0x150] sm:$0xff] (%p34_p0), %vm221_vm0, %v18711_v61  ;;  %296 = vst.msk [vmem:[#allocation3 + $0x158] sm:$0xff] (%p34_p0), %vm221_vm0, %v18711_v61 }
  0x1f   :  { %297 = vst.msk [vmem:[#allocation3 + $0x160] sm:$0xff] (%p34_p0), %vm221_vm0, %v18711_v61  ;;  %298 = vst.msk [vmem:[#allocation3 + $0x168] sm:$0xff] (%p34_p0), %vm221_vm0, %v18711_v61 }
  0x20   :  { %299 = vst.msk [vmem:[#allocation3 + $0x170] sm:$0xff] (%p34_p0), %vm221_vm0, %v18711_v61  ;;  %300 = vst.msk [vmem:[#allocation3 + $0x178] sm:$0xff] (%p34_p0), %vm221_vm0, %v18711_v61 }
  0x21   : > { %147 = vperm.xlu1 %14063, %v55_v15   ;;  %142 = vperm.xlu0 %14062, %v54_v16   ;;  %301 = vst.msk [vmem:[#allocation3 + $0x180] sm:$0xff] (%p34_p0), %vm221_vm0, %v18711_v61  ;;  %302 = vst.msk [vmem:[#allocation3 + $0x188] sm:$0xff] (%p34_p0), %vm221_vm0, %v18711_v61 }
  0x22   :  { %303 = vst.msk [vmem:[#allocation3 + $0x190] sm:$0xff] (%p34_p0), %vm221_vm0, %v18711_v61  ;;  %304 = vst.msk [vmem:[#allocation3 + $0x198] sm:$0xff] (%p34_p0), %vm221_vm0, %v18711_v61 }
  0x23   :  { %305 = vst.msk [vmem:[#allocation3 + $0x1a0] sm:$0xff] (%p34_p0), %vm221_vm0, %v18711_v61  ;;  %306 = vst.msk [vmem:[#allocation3 + $0x1a8] sm:$0xff] (%p34_p0), %vm221_vm0, %v18711_v61 }
  0x24   :  { %307 = vst.msk [vmem:[#allocation3 + $0x1b0] sm:$0xff] (%p34_p0), %vm221_vm0, %v18711_v61  ;;  %308 = vst.msk [vmem:[#allocation3 + $0x1b8] sm:$0xff] (%p34_p0), %vm221_vm0, %v18711_v61 }
  0x25   : > { %157 = vperm.xlu1 %14063, %v57_v17   ;;  %152 = vperm.xlu0 %14062, %v56_v18   ;;  %309 = vst.msk [vmem:[#allocation3 + $0x1c0] sm:$0xff] (%p34_p0), %vm221_vm0, %v18711_v61  ;;  %310 = vst.msk [vmem:[#allocation3 + $0x1c8] sm:$0xff] (%p34_p0), %vm221_vm0, %v18711_v61 }
  0x26   :  { %311 = vst.msk [vmem:[#allocation3 + $0x1d0] sm:$0xff] (%p34_p0), %vm221_vm0, %v18711_v61  ;;  %312 = vst.msk [vmem:[#allocation3 + $0x1d8] sm:$0xff] (%p34_p0), %vm221_vm0, %v18711_v61 }
  0x27   :  { %313 = vst.msk [vmem:[#allocation3 + $0x1e0] sm:$0xff] (%p34_p0), %vm221_vm0, %v18711_v61  ;;  %314 = vst.msk [vmem:[#allocation3 + $0x1e8] sm:$0xff] (%p34_p0), %vm221_vm0, %v18711_v61 }
  0x28   :  { %315 = vst.msk [vmem:[#allocation3 + $0x1f0] sm:$0xff] (%p34_p0), %vm221_vm0, %v18711_v61  ;;  %316 = vst.msk [vmem:[#allocation3 + $0x1f8] sm:$0xff] (%p34_p0), %vm221_vm0, %v18711_v61 }
  0x29   : > { %167 = vperm.xlu1 %14063, %v59_v19   ;;  %162 = vperm.xlu0 %14062, %v58_v20   ;;  %317 = vst.msk [vmem:[#allocation3 + $0x200] sm:$0xff] (%p34_p0), %vm221_vm0, %v18711_v61  ;;  %318 = vst.msk [vmem:[#allocation3 + $0x208] sm:$0xff] (%p34_p0), %vm221_vm0, %v18711_v61 }
  0x2a   :  { %319 = vst.msk [vmem:[#allocation3 + $0x210] sm:$0xff] (%p34_p0), %vm221_vm0, %v18711_v61  ;;  %320 = vst.msk [vmem:[#allocation3 + $0x218] sm:$0xff] (%p34_p0), %vm221_vm0, %v18711_v61 }
  0x2b   :  { %321 = vst.msk [vmem:[#allocation3 + $0x220] sm:$0xff] (%p34_p0), %vm221_vm0, %v18711_v61  ;;  %322 = vst.msk [vmem:[#allocation3 + $0x228] sm:$0xff] (%p34_p0), %vm221_vm0, %v18711_v61 }
  0x2c   :  { %323 = vst.msk [vmem:[#allocation3 + $0x230] sm:$0xff] (%p34_p0), %vm221_vm0, %v18711_v61  ;;  %324 = vst.msk [vmem:[#allocation3 + $0x238] sm:$0xff] (%p34_p0), %vm221_vm0, %v18711_v61 }
  0x2d   : > { %177 = vperm.xlu1 %14063, %v61_v21   ;;  %172 = vperm.xlu0 %14062, %v60_v22   ;;  %325 = vst.msk [vmem:[#allocation3 + $0x240] sm:$0xff] (%p34_p0), %vm221_vm0, %v18711_v61  ;;  %326 = vst.msk [vmem:[#allocation3 + $0x248] sm:$0xff] (%p34_p0), %vm221_vm0, %v18711_v61 }
  0x2e   :  { %327 = vst.msk [vmem:[#allocation3 + $0x250] sm:$0xff] (%p34_p0), %vm221_vm0, %v18711_v61  ;;  %328 = vst.msk [vmem:[#allocation3 + $0x258] sm:$0xff] (%p34_p0), %vm221_vm0, %v18711_v61 }
  0x2f   :  { %329 = vst.msk [vmem:[#allocation3 + $0x260] sm:$0xff] (%p34_p0), %vm221_vm0, %v18711_v61  ;;  %330 = vst.msk [vmem:[#allocation3 + $0x268] sm:$0xff] (%p34_p0), %vm221_vm0, %v18711_v61 }
  0x30   :  { %331 = vst.msk [vmem:[#allocation3 + $0x270] sm:$0xff] (%p34_p0), %vm221_vm0, %v18711_v61  ;;  %332 = vst.msk [vmem:[#allocation3 + $0x278] sm:$0xff] (%p34_p0), %vm221_vm0, %v18711_v61 }
  0x31   : > { %187 = vperm.xlu1 %14063, %v63_v23   ;;  %182 = vperm.xlu0 %14062, %v62_v24   ;;  %333 = vst.msk [vmem:[#allocation3 + $0x280] sm:$0xff] (%p34_p0), %vm221_vm0, %v18711_v61  ;;  %334 = vst.msk [vmem:[#allocation3 + $0x288] sm:$0xff] (%p34_p0), %vm221_vm0, %v18711_v61 }
  0x32   :  { %335 = vst.msk [vmem:[#allocation3 + $0x290] sm:$0xff] (%p34_p0), %vm221_vm0, %v18711_v61  ;;  %336 = vst.msk [vmem:[#allocation3 + $0x298] sm:$0xff] (%p34_p0), %vm221_vm0, %v18711_v61 }
  0x33   :  { %337 = vst.msk [vmem:[#allocation3 + $0x2a0] sm:$0xff] (%p34_p0), %vm221_vm0, %v18711_v61  ;;  %338 = vst.msk [vmem:[#allocation3 + $0x2a8] sm:$0xff] (%p34_p0), %vm221_vm0, %v18711_v61 }
  0x34   :  { %339 = vst.msk [vmem:[#allocation3 + $0x2b0] sm:$0xff] (%p34_p0), %vm221_vm0, %v18711_v61  ;;  %340 = vst.msk [vmem:[#allocation3 + $0x2b8] sm:$0xff] (%p34_p0), %vm221_vm0, %v18711_v61 }
  0x35   : > { %197 = vperm.xlu1 %14063, %v65_v25   ;;  %192 = vperm.xlu0 %14062, %v64_v26   ;;  %341 = vst.msk [vmem:[#allocation3 + $0x2c0] sm:$0xff] (%p34_p0), %vm221_vm0, %v18711_v61  ;;  %342 = vst.msk [vmem:[#allocation3 + $0x2c8] sm:$0xff] (%p34_p0), %vm221_vm0, %v18711_v61 }
  0x36   :  { %343 = vst.msk [vmem:[#allocation3 + $0x2d0] sm:$0xff] (%p34_p0), %vm221_vm0, %v18711_v61  ;;  %344 = vst.msk [vmem:[#allocation3 + $0x2d8] sm:$0xff] (%p34_p0), %vm221_vm0, %v18711_v61 }
  0x37   :  { %345 = vst.msk [vmem:[#allocation3 + $0x2e0] sm:$0xff] (%p34_p0), %vm221_vm0, %v18711_v61  ;;  %346 = vst.msk [vmem:[#allocation3 + $0x2e8] sm:$0xff] (%p34_p0), %vm221_vm0, %v18711_v61 }
  0x38   :  { %347 = vst.msk [vmem:[#allocation3 + $0x2f0] sm:$0xff] (%p34_p0), %vm221_vm0, %v18711_v61  ;;  %348 = vst.msk [vmem:[#allocation3 + $0x2f8] sm:$0xff] (%p34_p0), %vm221_vm0, %v18711_v61 }
  0x39   : > { %207 = vperm.xlu1 %14063, %v67_v27   ;;  %202 = vperm.xlu0 %14062, %v66_v28   ;;  %349 = vst.msk [vmem:[#allocation3 + $0x300] sm:$0xff] (%p34_p0), %vm221_vm0, %v18711_v61  ;;  %350 = vst.msk [vmem:[#allocation3 + $0x308] sm:$0xff] (%p34_p0), %vm221_vm0, %v18711_v61 }
  0x3a   :  { %351 = vst.msk [vmem:[#allocation3 + $0x310] sm:$0xff] (%p34_p0), %vm221_vm0, %v18711_v61  ;;  %352 = vst.msk [vmem:[#allocation3 + $0x318] sm:$0xff] (%p34_p0), %vm221_vm0, %v18711_v61 }
  0x3b   :  { %353 = vst.msk [vmem:[#allocation3 + $0x320] sm:$0xff] (%p34_p0), %vm221_vm0, %v18711_v61  ;;  %354 = vst.msk [vmem:[#allocation3 + $0x328] sm:$0xff] (%p34_p0), %vm221_vm0, %v18711_v61 }
  0x3c   :  { %355 = vst.msk [vmem:[#allocation3 + $0x330] sm:$0xff] (%p34_p0), %vm221_vm0, %v18711_v61  ;;  %356 = vst.msk [vmem:[#allocation3 + $0x338] sm:$0xff] (%p34_p0), %vm221_vm0, %v18711_v61 }
  0x3d   : > { %217 = vperm.xlu1 %14063, %v69_v29   ;;  %212 = vperm.xlu0 %14062, %v68_v30   ;;  %357 = vst.msk [vmem:[#allocation3 + $0x340] sm:$0xff] (%p34_p0), %vm221_vm0, %v18711_v61  ;;  %358 = vst.msk [vmem:[#allocation3 + $0x348] sm:$0xff] (%p34_p0), %vm221_vm0, %v18711_v61 }
  0x3e   :  { %359 = vst.msk [vmem:[#allocation3 + $0x350] sm:$0xff] (%p34_p0), %vm221_vm0, %v18711_v61  ;;  %360 = vst.msk [vmem:[#allocation3 + $0x358] sm:$0xff] (%p34_p0), %vm221_vm0, %v18711_v61 }
  0x3f   :  { %361 = vst.msk [vmem:[#allocation3 + $0x360] sm:$0xff] (%p34_p0), %vm221_vm0, %v18711_v61  ;;  %362 = vst.msk [vmem:[#allocation3 + $0x368] sm:$0xff] (%p34_p0), %vm221_vm0, %v18711_v61 }
  0x40   :  { %363 = vst.msk [vmem:[#allocation3 + $0x370] sm:$0xff] (%p34_p0), %vm221_vm0, %v18711_v61  ;;  %364 = vst.msk [vmem:[#allocation3 + $0x378] sm:$0xff] (%p34_p0), %vm221_vm0, %v18711_v61 }
  0x41   :  { %365 = vst.msk [vmem:[#allocation3 + $0x380] sm:$0xff] (%p34_p0), %vm221_vm0, %v18711_v61  ;;  %366 = vst.msk [vmem:[#allocation3 + $0x388] sm:$0xff] (%p34_p0), %vm221_vm0, %v18711_v61 }
  0x42   :  { %367 = vst.msk [vmem:[#allocation3 + $0x390] sm:$0xff] (%p34_p0), %vm221_vm0, %v18711_v61  ;;  %368 = vst.msk [vmem:[#allocation3 + $0x398] sm:$0xff] (%p34_p0), %vm221_vm0, %v18711_v61 }
  0x43   :  { %369 = vst.msk [vmem:[#allocation3 + $0x3a0] sm:$0xff] (%p34_p0), %vm221_vm0, %v18711_v61  ;;  %370 = vst.msk [vmem:[#allocation3 + $0x3a8] sm:$0xff] (%p34_p0), %vm221_vm0, %v18711_v61 }
  0x44   :  { %371 = vst.msk [vmem:[#allocation3 + $0x3b0] sm:$0xff] (%p34_p0), %vm221_vm0, %v18711_v61  ;;  %372 = vst.msk [vmem:[#allocation3 + $0x3b8] sm:$0xff] (%p34_p0), %vm221_vm0, %v18711_v61 }
  0x45   :  { %373 = vst.msk [vmem:[#allocation3 + $0x3c0] sm:$0xff] (%p34_p0), %vm221_vm0, %v18711_v61  ;;  %374 = vst.msk [vmem:[#allocation3 + $0x3c8] sm:$0xff] (%p34_p0), %vm221_vm0, %v18711_v61 }
  0x46   :  { %375 = vst.msk [vmem:[#allocation3 + $0x3d0] sm:$0xff] (%p34_p0), %vm221_vm0, %v18711_v61  ;;  %376 = vst.msk [vmem:[#allocation3 + $0x3d8] sm:$0xff] (%p34_p0), %vm221_vm0, %v18711_v61 }
  0x47   :  { %377 = vst.msk [vmem:[#allocation3 + $0x3e0] sm:$0xff] (%p34_p0), %vm221_vm0, %v18711_v61  ;;  %378 = vst.msk [vmem:[#allocation3 + $0x3e8] sm:$0xff] (%p34_p0), %vm221_vm0, %v18711_v61 }
  0x48   :  { %379 = vst.msk [vmem:[#allocation3 + $0x3f0] sm:$0xff] (%p34_p0), %vm221_vm0, %v18711_v61  ;;  %380 = vst.msk [vmem:[#allocation3 + $0x3f8] sm:$0xff] (%p34_p0), %vm221_vm0, %v18711_v61 }
  0x49   :  { %381 = vst.msk [vmem:[#allocation3 + $0x400] sm:$0xff] (%p34_p0), %vm221_vm0, %v18711_v61  ;;  %382 = vst.msk [vmem:[#allocation3 + $0x408] sm:$0xff] (%p34_p0), %vm221_vm0, %v18711_v61 }
  0x4a   :  { %383 = vst.msk [vmem:[#allocation3 + $0x410] sm:$0xff] (%p34_p0), %vm221_vm0, %v18711_v61  ;;  %384 = vst.msk [vmem:[#allocation3 + $0x418] sm:$0xff] (%p34_p0), %vm221_vm0, %v18711_v61 }
  0x4b   :  { %385 = vst.msk [vmem:[#allocation3 + $0x420] sm:$0xff] (%p34_p0), %vm221_vm0, %v18711_v61  ;;  %386 = vst.msk [vmem:[#allocation3 + $0x428] sm:$0xff] (%p34_p0), %vm221_vm0, %v18711_v61 }
  0x4c   :  { %387 = vst.msk [vmem:[#allocation3 + $0x430] sm:$0xff] (%p34_p0), %vm221_vm0, %v18711_v61  ;;  %388 = vst.msk [vmem:[#allocation3 + $0x438] sm:$0xff] (%p34_p0), %vm221_vm0, %v18711_v61 }
  0x4d   :  { %389 = vst.msk [vmem:[#allocation3 + $0x440] sm:$0xff] (%p34_p0), %vm221_vm0, %v18711_v61  ;;  %390 = vst.msk [vmem:[#allocation3 + $0x448] sm:$0xff] (%p34_p0), %vm221_vm0, %v18711_v61 }
  0x4e   :  { %391 = vst.msk [vmem:[#allocation3 + $0x450] sm:$0xff] (%p34_p0), %vm221_vm0, %v18711_v61  ;;  %392 = vst.msk [vmem:[#allocation3 + $0x458] sm:$0xff] (%p34_p0), %vm221_vm0, %v18711_v61 }
  0x4f   :  { %393 = vst.msk [vmem:[#allocation3 + $0x460] sm:$0xff] (%p34_p0), %vm221_vm0, %v18711_v61  ;;  %394 = vst.msk [vmem:[#allocation3 + $0x468] sm:$0xff] (%p34_p0), %vm221_vm0, %v18711_v61 }
  0x50   :  { %395 = vst.msk [vmem:[#allocation3 + $0x470] sm:$0xff] (%p34_p0), %vm221_vm0, %v18711_v61  ;;  %396 = vst.msk [vmem:[#allocation3 + $0x478] sm:$0xff] (%p34_p0), %vm221_vm0, %v18711_v61 }
  0x51   :  { %397 = vst.msk [vmem:[#allocation3 + $0x480] sm:$0xff] (%p34_p0), %vm221_vm0, %v18711_v61  ;;  %398 = vst.msk [vmem:[#allocation3 + $0x488] sm:$0xff] (%p34_p0), %vm221_vm0, %v18711_v61 }
  0x52   :  { %399 = vst.msk [vmem:[#allocation3 + $0x490] sm:$0xff] (%p34_p0), %vm221_vm0, %v18711_v61  ;;  %400 = vst.msk [vmem:[#allocation3 + $0x498] sm:$0xff] (%p34_p0), %vm221_vm0, %v18711_v61 }
  0x53   :  { %401 = vst.msk [vmem:[#allocation3 + $0x4a0] sm:$0xff] (%p34_p0), %vm221_vm0, %v18711_v61  ;;  %402 = vst.msk [vmem:[#allocation3 + $0x4a8] sm:$0xff] (%p34_p0), %vm221_vm0, %v18711_v61 }
  0x54   :  { %403 = vst.msk [vmem:[#allocation3 + $0x4b0] sm:$0xff] (%p34_p0), %vm221_vm0, %v18711_v61  ;;  %404 = vst.msk [vmem:[#allocation3 + $0x4b8] sm:$0xff] (%p34_p0), %vm221_vm0, %v18711_v61 }
  0x55   :  { %405 = vst.msk [vmem:[#allocation3 + $0x4c0] sm:$0xff] (%p34_p0), %vm221_vm0, %v18711_v61  ;;  %406 = vst.msk [vmem:[#allocation3 + $0x4c8] sm:$0xff] (%p34_p0), %vm221_vm0, %v18711_v61 }
  0x56   :  { %407 = vst.msk [vmem:[#allocation3 + $0x4d0] sm:$0xff] (%p34_p0), %vm221_vm0, %v18711_v61  ;;  %408 = vst.msk [vmem:[#allocation3 + $0x4d8] sm:$0xff] (%p34_p0), %vm221_vm0, %v18711_v61 }
  0x57   :  { %409 = vst.msk [vmem:[#allocation3 + $0x4e0] sm:$0xff] (%p34_p0), %vm221_vm0, %v18711_v61  ;;  %410 = vst.msk [vmem:[#allocation3 + $0x4e8] sm:$0xff] (%p34_p0), %vm221_vm0, %v18711_v61 }
  0x58   :  { %411 = vst.msk [vmem:[#allocation3 + $0x4f0] sm:$0xff] (%p34_p0), %vm221_vm0, %v18711_v61  ;;  %412 = vst.msk [vmem:[#allocation3 + $0x4f8] sm:$0xff] (%p34_p0), %vm221_vm0, %v18711_v61 }
  0x59   :  { %413 = vst.msk [vmem:[#allocation3 + $0x500] sm:$0xff] (%p34_p0), %vm221_vm0, %v18711_v61  ;;  %414 = vst.msk [vmem:[#allocation3 + $0x508] sm:$0xff] (%p34_p0), %vm221_vm0, %v18711_v61 }
  0x5a   :  { %415 = vst.msk [vmem:[#allocation3 + $0x510] sm:$0xff] (%p34_p0), %vm221_vm0, %v18711_v61  ;;  %416 = vst.msk [vmem:[#allocation3 + $0x518] sm:$0xff] (%p34_p0), %vm221_vm0, %v18711_v61 }
  0x5b   :  { %417 = vst.msk [vmem:[#allocation3 + $0x520] sm:$0xff] (%p34_p0), %vm221_vm0, %v18711_v61  ;;  %418 = vst.msk [vmem:[#allocation3 + $0x528] sm:$0xff] (%p34_p0), %vm221_vm0, %v18711_v61 }
  0x5c   :  { %419 = vst.msk [vmem:[#allocation3 + $0x530] sm:$0xff] (%p34_p0), %vm221_vm0, %v18711_v61  ;;  %420 = vst.msk [vmem:[#allocation3 + $0x538] sm:$0xff] (%p34_p0), %vm221_vm0, %v18711_v61 }
  0x5d   :  { %421 = vst.msk [vmem:[#allocation3 + $0x540] sm:$0xff] (%p34_p0), %vm221_vm0, %v18711_v61  ;;  %422 = vst.msk [vmem:[#allocation3 + $0x548] sm:$0xff] (%p34_p0), %vm221_vm0, %v18711_v61 }
  0x5e   :  { %423 = vst.msk [vmem:[#allocation3 + $0x550] sm:$0xff] (%p34_p0), %vm221_vm0, %v18711_v61  ;;  %424 = vst.msk [vmem:[#allocation3 + $0x558] sm:$0xff] (%p34_p0), %vm221_vm0, %v18711_v61 }
  0x5f   :  { %425 = vst.msk [vmem:[#allocation3 + $0x560] sm:$0xff] (%p34_p0), %vm221_vm0, %v18711_v61  ;;  %426 = vst.msk [vmem:[#allocation3 + $0x568] sm:$0xff] (%p34_p0), %vm221_vm0, %v18711_v61 }
  0x60   :  { %427 = vst.msk [vmem:[#allocation3 + $0x570] sm:$0xff] (%p34_p0), %vm221_vm0, %v18711_v61  ;;  %428 = vst.msk [vmem:[#allocation3 + $0x578] sm:$0xff] (%p34_p0), %vm221_vm0, %v18711_v61 }
  0x61   :  { %429 = vst.msk [vmem:[#allocation3 + $0x580] sm:$0xff] (%p34_p0), %vm221_vm0, %v18711_v61  ;;  %430 = vst.msk [vmem:[#allocation3 + $0x588] sm:$0xff] (%p34_p0), %vm221_vm0, %v18711_v61 }
  0x62   :  { %431 = vst.msk [vmem:[#allocation3 + $0x590] sm:$0xff] (%p34_p0), %vm221_vm0, %v18711_v61  ;;  %432 = vst.msk [vmem:[#allocation3 + $0x598] sm:$0xff] (%p34_p0), %vm221_vm0, %v18711_v61 }
  0x63   :  { %433 = vst.msk [vmem:[#allocation3 + $0x5a0] sm:$0xff] (%p34_p0), %vm221_vm0, %v18711_v61  ;;  %434 = vst.msk [vmem:[#allocation3 + $0x5a8] sm:$0xff] (%p34_p0), %vm221_vm0, %v18711_v61 }
  0x64   :  { %435 = vst.msk [vmem:[#allocation3 + $0x5b0] sm:$0xff] (%p34_p0), %vm221_vm0, %v18711_v61  ;;  %436 = vst.msk [vmem:[#allocation3 + $0x5b8] sm:$0xff] (%p34_p0), %vm221_vm0, %v18711_v61 }
  0x65   :  { %437 = vst.msk [vmem:[#allocation3 + $0x5c0] sm:$0xff] (%p34_p0), %vm221_vm0, %v18711_v61  ;;  %438 = vst.msk [vmem:[#allocation3 + $0x5c8] sm:$0xff] (%p34_p0), %vm221_vm0, %v18711_v61 }
  0x66   :  { %439 = vst.msk [vmem:[#allocation3 + $0x5d0] sm:$0xff] (%p34_p0), %vm221_vm0, %v18711_v61  ;;  %440 = vst.msk [vmem:[#allocation3 + $0x5d8] sm:$0xff] (%p34_p0), %vm221_vm0, %v18711_v61 }
  0x67   :  { %441 = vst.msk [vmem:[#allocation3 + $0x5e0] sm:$0xff] (%p34_p0), %vm221_vm0, %v18711_v61  ;;  %442 = vst.msk [vmem:[#allocation3 + $0x5e8] sm:$0xff] (%p34_p0), %vm221_vm0, %v18711_v61 }
  0x68   :  { %443 = vst.msk [vmem:[#allocation3 + $0x5f0] sm:$0xff] (%p34_p0), %vm221_vm0, %v18711_v61  ;;  %444 = vst.msk [vmem:[#allocation3 + $0x5f8] sm:$0xff] (%p34_p0), %vm221_vm0, %v18711_v61 }
  0x69   :  { %445 = vst.msk [vmem:[#allocation3 + $0x600] sm:$0xff] (%p34_p0), %vm221_vm0, %v18711_v61  ;;  %446 = vst.msk [vmem:[#allocation3 + $0x608] sm:$0xff] (%p34_p0), %vm221_vm0, %v18711_v61 }
  0x6a   :  { %447 = vst.msk [vmem:[#allocation3 + $0x610] sm:$0xff] (%p34_p0), %vm221_vm0, %v18711_v61  ;;  %448 = vst.msk [vmem:[#allocation3 + $0x618] sm:$0xff] (%p34_p0), %vm221_vm0, %v18711_v61 }
  0x6b   :  { %449 = vst.msk [vmem:[#allocation3 + $0x620] sm:$0xff] (%p34_p0), %vm221_vm0, %v18711_v61  ;;  %450 = vst.msk [vmem:[#allocation3 + $0x628] sm:$0xff] (%p34_p0), %vm221_vm0, %v18711_v61 }
  0x6c   :  { %451 = vst.msk [vmem:[#allocation3 + $0x630] sm:$0xff] (%p34_p0), %vm221_vm0, %v18711_v61  ;;  %452 = vst.msk [vmem:[#allocation3 + $0x638] sm:$0xff] (%p34_p0), %vm221_vm0, %v18711_v61 }
  0x6d   :  { %453 = vst.msk [vmem:[#allocation3 + $0x640] sm:$0xff] (%p34_p0), %vm221_vm0, %v18711_v61  ;;  %454 = vst.msk [vmem:[#allocation3 + $0x648] sm:$0xff] (%p34_p0), %vm221_vm0, %v18711_v61 }
  0x6e   :  { %455 = vst.msk [vmem:[#allocation3 + $0x650] sm:$0xff] (%p34_p0), %vm221_vm0, %v18711_v61  ;;  %456 = vst.msk [vmem:[#allocation3 + $0x658] sm:$0xff] (%p34_p0), %vm221_vm0, %v18711_v61 }
  0x6f   :  { %457 = vst.msk [vmem:[#allocation3 + $0x660] sm:$0xff] (%p34_p0), %vm221_vm0, %v18711_v61  ;;  %458 = vst.msk [vmem:[#allocation3 + $0x668] sm:$0xff] (%p34_p0), %vm221_vm0, %v18711_v61 }
  0x70   :  { %459 = vst.msk [vmem:[#allocation3 + $0x670] sm:$0xff] (%p34_p0), %vm221_vm0, %v18711_v61  ;;  %460 = vst.msk [vmem:[#allocation3 + $0x678] sm:$0xff] (%p34_p0), %vm221_vm0, %v18711_v61 }
  0x71   :  { %461 = vst.msk [vmem:[#allocation3 + $0x680] sm:$0xff] (%p34_p0), %vm221_vm0, %v18711_v61  ;;  %462 = vst.msk [vmem:[#allocation3 + $0x688] sm:$0xff] (%p34_p0), %vm221_vm0, %v18711_v61 }
  0x72   :  { %463 = vst.msk [vmem:[#allocation3 + $0x690] sm:$0xff] (%p34_p0), %vm221_vm0, %v18711_v61  ;;  %464 = vst.msk [vmem:[#allocation3 + $0x698] sm:$0xff] (%p34_p0), %vm221_vm0, %v18711_v61 }
  0x73   :  { %465 = vst.msk [vmem:[#allocation3 + $0x6a0] sm:$0xff] (%p34_p0), %vm221_vm0, %v18711_v61  ;;  %466 = vst.msk [vmem:[#allocation3 + $0x6a8] sm:$0xff] (%p34_p0), %vm221_vm0, %v18711_v61 }
  0x74   :  { %467 = vst.msk [vmem:[#allocation3 + $0x6b0] sm:$0xff] (%p34_p0), %vm221_vm0, %v18711_v61  ;;  %468 = vst.msk [vmem:[#allocation3 + $0x6b8] sm:$0xff] (%p34_p0), %vm221_vm0, %v18711_v61 }
  0x75   :  { %469 = vst.msk [vmem:[#allocation3 + $0x6c0] sm:$0xff] (%p34_p0), %vm221_vm0, %v18711_v61  ;;  %470 = vst.msk [vmem:[#allocation3 + $0x6c8] sm:$0xff] (%p34_p0), %vm221_vm0, %v18711_v61 }
  0x76   :  { %471 = vst.msk [vmem:[#allocation3 + $0x6d0] sm:$0xff] (%p34_p0), %vm221_vm0, %v18711_v61  ;;  %472 = vst.msk [vmem:[#allocation3 + $0x6d8] sm:$0xff] (%p34_p0), %vm221_vm0, %v18711_v61 }
  0x77   :  { %473 = vst.msk [vmem:[#allocation3 + $0x6e0] sm:$0xff] (%p34_p0), %vm221_vm0, %v18711_v61  ;;  %474 = vst.msk [vmem:[#allocation3 + $0x6e8] sm:$0xff] (%p34_p0), %vm221_vm0, %v18711_v61 }
  0x78   :  { %475 = vst.msk [vmem:[#allocation3 + $0x6f0] sm:$0xff] (%p34_p0), %vm221_vm0, %v18711_v61  ;;  %476 = vst.msk [vmem:[#allocation3 + $0x6f8] sm:$0xff] (%p34_p0), %vm221_vm0, %v18711_v61 }
  0x79   :  { %477 = vst.msk [vmem:[#allocation3 + $0x700] sm:$0xff] (%p34_p0), %vm221_vm0, %v18711_v61  ;;  %478 = vst.msk [vmem:[#allocation3 + $0x708] sm:$0xff] (%p34_p0), %vm221_vm0, %v18711_v61 }
  0x7a   :  { %479 = vst.msk [vmem:[#allocation3 + $0x710] sm:$0xff] (%p34_p0), %vm221_vm0, %v18711_v61  ;;  %480 = vst.msk [vmem:[#allocation3 + $0x718] sm:$0xff] (%p34_p0), %vm221_vm0, %v18711_v61 }
  0x7b   :  { %481 = vst.msk [vmem:[#allocation3 + $0x720] sm:$0xff] (%p34_p0), %vm221_vm0, %v18711_v61  ;;  %482 = vst.msk [vmem:[#allocation3 + $0x728] sm:$0xff] (%p34_p0), %vm221_vm0, %v18711_v61 }
  0x7c   :  { %483 = vst.msk [vmem:[#allocation3 + $0x730] sm:$0xff] (%p34_p0), %vm221_vm0, %v18711_v61  ;;  %484 = vst.msk [vmem:[#allocation3 + $0x738] sm:$0xff] (%p34_p0), %vm221_vm0, %v18711_v61 }
  0x7d   :  { %485 = vst.msk [vmem:[#allocation3 + $0x740] sm:$0xff] (%p34_p0), %vm221_vm0, %v18711_v61  ;;  %486 = vst.msk [vmem:[#allocation3 + $0x748] sm:$0xff] (%p34_p0), %vm221_vm0, %v18711_v61 }
  0x7e   :  { %487 = vst.msk [vmem:[#allocation3 + $0x750] sm:$0xff] (%p34_p0), %vm221_vm0, %v18711_v61  ;;  %488 = vst.msk [vmem:[#allocation3 + $0x758] sm:$0xff] (%p34_p0), %vm221_vm0, %v18711_v61 }
  0x7f   :  { %489 = vst.msk [vmem:[#allocation3 + $0x760] sm:$0xff] (%p34_p0), %vm221_vm0, %v18711_v61  ;;  %490 = vst.msk [vmem:[#allocation3 + $0x768] sm:$0xff] (%p34_p0), %vm221_vm0, %v18711_v61 }
  0x80   :  { %491 = vst.msk [vmem:[#allocation3 + $0x770] sm:$0xff] (%p34_p0), %vm221_vm0, %v18711_v61  ;;  %492 = vst.msk [vmem:[#allocation3 + $0x778] sm:$0xff] (%p34_p0), %vm221_vm0, %v18711_v61 }
  0x81   :  { %493 = vst.msk [vmem:[#allocation3 + $0x780] sm:$0xff] (%p34_p0), %vm221_vm0, %v18711_v61  ;;  %494 = vst.msk [vmem:[#allocation3 + $0x788] sm:$0xff] (%p34_p0), %vm221_vm0, %v18711_v61 }
  0x82   :  { %495 = vst.msk [vmem:[#allocation3 + $0x790] sm:$0xff] (%p34_p0), %vm221_vm0, %v18711_v61  ;;  %496 = vst.msk [vmem:[#allocation3 + $0x798] sm:$0xff] (%p34_p0), %vm221_vm0, %v18711_v61 }
  0x83   :  { %497 = vst.msk [vmem:[#allocation3 + $0x7a0] sm:$0xff] (%p34_p0), %vm221_vm0, %v18711_v61  ;;  %498 = vst.msk [vmem:[#allocation3 + $0x7a8] sm:$0xff] (%p34_p0), %vm221_vm0, %v18711_v61 }
  0x84   : > { %v83_v31 = vpop.permute.xlu1 %82  ;;  %v73_v32 = vpop.permute.xlu0 %72  ;;  %499 = vst.msk [vmem:[#allocation3 + $0x7b0] sm:$0xff] (%p34_p0), %vm221_vm0, %v18711_v61  ;;  %500 = vst.msk [vmem:[#allocation3 + $0x7b8] sm:$0xff] (%p34_p0), %vm221_vm0, %v18711_v61 }
  0x85   : > { %224 = vst.msk [vmem:[%s14187_s14 + $0x10] sm:$0xff] %vm221_vm0, %v83_v31  ;;  %222 = vst.msk [vmem:[%s14187_s14] sm:$0xff] %vm221_vm0, %v73_v32 }
  0x86   :  { %501 = vst.msk [vmem:[#allocation3 + $0x7c0] sm:$0xff] (%p34_p0), %vm221_vm0, %v18711_v61  ;;  %502 = vst.msk [vmem:[#allocation3 + $0x7c8] sm:$0xff] (%p34_p0), %vm221_vm0, %v18711_v61 }
  0x87   :  { %503 = vst.msk [vmem:[#allocation3 + $0x7d0] sm:$0xff] (%p34_p0), %vm221_vm0, %v18711_v61  ;;  %504 = vst.msk [vmem:[#allocation3 + $0x7d8] sm:$0xff] (%p34_p0), %vm221_vm0, %v18711_v61 }
  0x88   : > { %v88_v33 = vpop.permute.xlu1 %87  ;;  %v78_v34 = vpop.permute.xlu0 %77  ;;  %505 = vst.msk [vmem:[#allocation3 + $0x7e0] sm:$0xff] (%p34_p0), %vm221_vm0, %v18711_v61  ;;  %506 = vst.msk [vmem:[#allocation3 + $0x7e8] sm:$0xff] (%p34_p0), %vm221_vm0, %v18711_v61 }
  0x89   : > { %225 = vst.msk [vmem:[%s14187_s14 + $0x18] sm:$0xff] %vm221_vm0, %v88_v33  ;;  %223 = vst.msk [vmem:[%s14187_s14 + $0x8] sm:$0xff] %vm221_vm0, %v78_v34 }
  0x8a   :  { %507 = vst.msk [vmem:[#allocation3 + $0x7f0] sm:$0xff] (%p34_p0), %vm221_vm0, %v18711_v61  ;;  %508 = vst.msk [vmem:[#allocation3 + $0x7f8] sm:$0xff] (%p34_p0), %vm221_vm0, %v18711_v61 }
  0x8c   : > { %v98_v35 = vpop.permute.xlu1 %97  ;;  %v93_v36 = vpop.permute.xlu0 %92 }
  0x8d   : > { %227 = vst.msk [vmem:[%s14187_s14 + $0x28] sm:$0xff] %vm221_vm0, %v98_v35  ;;  %226 = vst.msk [vmem:[%s14187_s14 + $0x20] sm:$0xff] %vm221_vm0, %v93_v36 }
  0x90   : > { %v108_v37 = vpop.permute.xlu1 %107  ;;  %v103_v38 = vpop.permute.xlu0 %102 }
  0x91   : > { %229 = vst.msk [vmem:[%s14187_s14 + $0x38] sm:$0xff] %vm221_vm0, %v108_v37  ;;  %228 = vst.msk [vmem:[%s14187_s14 + $0x30] sm:$0xff] %vm221_vm0, %v103_v38 }
  0x94   : > { %v118_v39 = vpop.permute.xlu1 %117  ;;  %v113_v40 = vpop.permute.xlu0 %112 }
  0x95   : > { %231 = vst.msk [vmem:[%s14187_s14 + $0x48] sm:$0xff] %vm221_vm0, %v118_v39  ;;  %230 = vst.msk [vmem:[%s14187_s14 + $0x40] sm:$0xff] %vm221_vm0, %v113_v40 }
  0x98   : > { %v128_v41 = vpop.permute.xlu1 %127  ;;  %v123_v42 = vpop.permute.xlu0 %122 }
  0x99   : > { %233 = vst.msk [vmem:[%s14187_s14 + $0x58] sm:$0xff] %vm221_vm0, %v128_v41  ;;  %232 = vst.msk [vmem:[%s14187_s14 + $0x50] sm:$0xff] %vm221_vm0, %v123_v42 }
  0x9c   : > { %v138_v43 = vpop.permute.xlu1 %137  ;;  %v133_v44 = vpop.permute.xlu0 %132 }
  0x9d   : > { %235 = vst.msk [vmem:[%s14187_s14 + $0x68] sm:$0xff] %vm221_vm0, %v138_v43  ;;  %234 = vst.msk [vmem:[%s14187_s14 + $0x60] sm:$0xff] %vm221_vm0, %v133_v44 }
  0xa0   : > { %v148_v45 = vpop.permute.xlu1 %147  ;;  %v143_v46 = vpop.permute.xlu0 %142 }
  0xa1   : > { %237 = vst.msk [vmem:[%s14187_s14 + $0x78] sm:$0xff] %vm221_vm0, %v148_v45  ;;  %236 = vst.msk [vmem:[%s14187_s14 + $0x70] sm:$0xff] %vm221_vm0, %v143_v46 }
  0xa4   : > { %v158_v47 = vpop.permute.xlu1 %157  ;;  %v153_v48 = vpop.permute.xlu0 %152 }
  0xa5   : > { %239 = vst.msk [vmem:[%s14187_s14 + $0x88] sm:$0xff] %vm221_vm0, %v158_v47  ;;  %238 = vst.msk [vmem:[%s14187_s14 + $0x80] sm:$0xff] %vm221_vm0, %v153_v48 }
  0xa8   : > { %v168_v49 = vpop.permute.xlu1 %167  ;;  %v163_v50 = vpop.permute.xlu0 %162 }
  0xa9   : > { %241 = vst.msk [vmem:[%s14187_s14 + $0x98] sm:$0xff] %vm221_vm0, %v168_v49  ;;  %240 = vst.msk [vmem:[%s14187_s14 + $0x90] sm:$0xff] %vm221_vm0, %v163_v50 }
  0xac   : > { %v178_v51 = vpop.permute.xlu1 %177  ;;  %v173_v52 = vpop.permute.xlu0 %172 }
  0xad   : > { %243 = vst.msk [vmem:[%s14187_s14 + $0xa8] sm:$0xff] %vm221_vm0, %v178_v51  ;;  %242 = vst.msk [vmem:[%s14187_s14 + $0xa0] sm:$0xff] %vm221_vm0, %v173_v52 }
  0xb0   : > { %v188_v53 = vpop.permute.xlu1 %187  ;;  %v183_v54 = vpop.permute.xlu0 %182 }
  0xb1   : > { %245 = vst.msk [vmem:[%s14187_s14 + $0xb8] sm:$0xff] %vm221_vm0, %v188_v53  ;;  %244 = vst.msk [vmem:[%s14187_s14 + $0xb0] sm:$0xff] %vm221_vm0, %v183_v54 }
  0xb4   : > { %v198_v55 = vpop.permute.xlu1 %197  ;;  %v193_v56 = vpop.permute.xlu0 %192 }
  0xb5   : > { %247 = vst.msk [vmem:[%s14187_s14 + $0xc8] sm:$0xff] %vm221_vm0, %v198_v55  ;;  %246 = vst.msk [vmem:[%s14187_s14 + $0xc0] sm:$0xff] %vm221_vm0, %v193_v56 }
  0xb7   :  { %36 = sbr.rel (!%p34_p0) target bundleno = 1 (0x1), region = 214 }
  0xb8   : > { %v208_v57 = vpop.permute.xlu1 %207  ;;  %v203_v58 = vpop.permute.xlu0 %202 }
  0xb9   : > { %249 = vst.msk [vmem:[%s14187_s14 + $0xd8] sm:$0xff] %vm221_vm0, %v208_v57  ;;  %248 = vst.msk [vmem:[%s14187_s14 + $0xd0] sm:$0xff] %vm221_vm0, %v203_v58 }
  0xbc   : > { %v218_v59 = vpop.permute.xlu1 %217  ;;  %v213_v60 = vpop.permute.xlu0 %212 }
  0xbd   : > { %251 = vst.msk [vmem:[%s14187_s14 + $0xe8] sm:$0xff] %vm221_vm0, %v218_v59  ;;  %250 = vst.msk [vmem:[%s14187_s14 + $0xe0] sm:$0xff] %vm221_vm0, %v213_v60 }
  0xbe LB: > { %s9533_s15 = smul.u32 480, %s14082_s0  ;;  %v14773_v62 = vld [vmem:[%s18702_s1] sm:$0xff]  ;;  %v14778_v63 = vld [vmem:[%s18702_s1 + $0x8] sm:$0xff]  ;;  %s9778_s18 = sshll.u32 %s14082_s0, 7  ;;  %s14082_s0 = sphi %s14764_s0, %s514_s0  }
  0xbf   : > { %s15576_s19 = scalar_lea.vmem [#allocation3], %s9778_s18  ;;  %s514_s0 = sadd.s32 1, %s14082_s0  }
  0xc0   : > { %s14780_s20 = scalar_lea.vmem [#allocation2], %s9533_s15  ;;  %p511_p1 = scmp.ge.s32.totalorder %s514_s0, 14  }
  0xc1   :  { %s16235_s17 = smov (%p511_p1), 0  }
  0xc4   : > { %v518_v0 = vld [vmem:[%s14780_s20] sm:$0xff]  ;;  %v519_v1 = vld [vmem:[%s14780_s20 + $0x8] sm:$0xff]  ;;  %v14785_v2 = vld [vmem:[%s14780_s20 + $0x10] sm:$0xff] }
  0xc5   : > { %18909 = vst [vmem:[#allocation5_spill] sm:$0xff] %v14785_v2  ;;  %v14788_v3 = vld [vmem:[%s14780_s20 + $0x18] sm:$0xff]  ;;  %v14791_v4 = vld [vmem:[%s14780_s20 + $0x20] sm:$0xff]  ;;  %v14794_v5 = vld [vmem:[%s14780_s20 + $0x28] sm:$0xff]  ;;  %v14797_v6 = vmul.f32 %v14773_v62, %v518_v0  ;;  %v14800_v7 = vmul.f32 %v14773_v62, %v519_v1  ;;  %v14804_v8 = vmul.f32 %v14773_v62, %v14785_v2  ;;  %v14807_v9 = vmul.f32 %v14778_v63, %v519_v1 }
  0xc6   : > { %18910 = vst [vmem:[#allocation6_spill] sm:$0xff] %v14788_v3  ;;  %18911 = vst [vmem:[#allocation7_spill] sm:$0xff] %v14791_v4  ;;  %v14810_v10 = vld [vmem:[%s14780_s20 + $0x30] sm:$0xff]  ;;  %v14813_v11 = vld [vmem:[%s14780_s20 + $0x38] sm:$0xff]  ;;  %v14820_v13 = vmul.f32 %v14773_v62, %v14788_v3  ;;  %v14824_v14 = vmul.f32 %v14773_v62, %v14791_v4  ;;  %v14828_v15 = vmul.f32 %v14773_v62, %v14794_v5 }
  0xc7   : > { %18912 = vst [vmem:[#allocation8_spill] sm:$0xff] %v14794_v5  ;;  %18913 = vst [vmem:[#allocation9_spill] sm:$0xff] %v14810_v10  ;;  %v14816_v12 = vld [vmem:[%s14780_s20 + $0x40] sm:$0xff]  ;;  %v14832_v16 = vmul.f32 %v14778_v63, %v14785_v2  ;;  %v14835_v17 = vld [vmem:[%s14780_s20 + $0x48] sm:$0xff]  ;;  %v14845_v20 = vmul.f32 %v14773_v62, %v14810_v10  ;;  %v14849_v21 = vmul.f32 %v14773_v62, %v14813_v11 }
  0xc8   : > { %18914 = vst [vmem:[#allocation10_spill] sm:$0xff] %v14813_v11  ;;  %18915 = vst [vmem:[#allocation11_spill] sm:$0xff] %v14816_v12  ;;  %v14838_v18 = vld [vmem:[%s14780_s20 + $0x50] sm:$0xff]  ;;  %v14841_v19 = vld [vmem:[%s14780_s20 + $0x58] sm:$0xff]  ;;  %v14853_v22 = vmul.f32 %v14773_v62, %v14816_v12  ;;  %v14857_v23 = vmul.f32 %v14778_v63, %v14788_v3  ;;  %v14870_v27 = vmul.f32 %v14773_v62, %v14835_v17 }
  0xc9   : > { %18916 = vst [vmem:[#allocation12_spill] sm:$0xff] %v14835_v17  ;;  %18917 = vst [vmem:[#allocation13_spill] sm:$0xff] %v14838_v18  ;;  %v14860_v24 = vld [vmem:[%s14780_s20 + $0x60] sm:$0xff]  ;;  %v14863_v25 = vld [vmem:[%s14780_s20 + $0x68] sm:$0xff]  ;;  %v14874_v28 = vmul.f32 %v14773_v62, %v14838_v18  ;;  %v14878_v29 = vmul.f32 %v14773_v62, %v14841_v19  ;;  %v610_v30 = vmul.f32 %v14778_v63, %v14791_v4 }
  0xca   : > { %18918 = vst [vmem:[#allocation14_spill] sm:$0xff] %v14841_v19  ;;  %18919 = vst [vmem:[#allocation15_spill] sm:$0xff] %v14860_v24  ;;  %v14866_v26 = vld [vmem:[%s14780_s20 + $0xf0] sm:$0xff]  ;;  %v14883_v31 = vld [vmem:[%s14780_s20 + $0xf8] sm:$0xff]  ;;  %v14893_v34 = vmul.f32 %v14773_v62, %v14860_v24  ;;  %v14897_v35 = vmul.f32 %v14773_v62, %v14863_v25  ;;  %v611_v37 = vmul.f32 %v14778_v63, %v14794_v5 }
  0xcb   : > { %18920 = vst [vmem:[#allocation16_spill] sm:$0xff] %v14863_v25  ;;  %18921 = vst [vmem:[#allocation17_spill] sm:$0xff] %v14866_v26  ;;  %v14886_v32 = vld [vmem:[%s14780_s20 + $0x100] sm:$0xff]  ;;  %v14889_v33 = vld [vmem:[%s14780_s20 + $0x108] sm:$0xff]  ;;  %v14901_v36 = vmul.f32 %v14773_v62, %v14866_v26  ;;  %v562_v41 = vmul.f32 %v14773_v62, %v14883_v31  ;;  %v612_v44 = vmul.f32 %v14778_v63, %v14810_v10 }
  0xcc   : > { %18922 = vst [vmem:[#allocation18_spill] sm:$0xff] %v14883_v31  ;;  %18923 = vst [vmem:[#allocation19_spill] sm:$0xff] %v14886_v32  ;;  %v14906_v38 = vld [vmem:[%s14780_s20 + $0x110] sm:$0xff]  ;;  %v14909_v39 = vld [vmem:[%s14780_s20 + $0x118] sm:$0xff]  ;;  %v563_v42 = vmul.f32 %v14773_v62, %v14886_v32  ;;  %v564_v43 = vmul.f32 %v14773_v62, %v14889_v33  ;;  %v613_v51 = vmul.f32 %v14778_v63, %v14813_v11 }
  0xcd   : > { %18924 = vst [vmem:[#allocation20_spill] sm:$0xff] %v14889_v33  ;;  %18925 = vst [vmem:[#allocation21_spill] sm:$0xff] %v14897_v35  ;;  %v14912_v40 = vld [vmem:[%s14780_s20 + $0x120] sm:$0xff]  ;;  %v14923_v45 = vld [vmem:[%s14780_s20 + $0x128] sm:$0xff]  ;;  %v565_v48 = vmul.f32 %v14773_v62, %v14906_v38  ;;  %v566_v49 = vmul.f32 %v14773_v62, %v14909_v39  ;;  %v614_v58 = vmul.f32 %v14778_v63, %v14816_v12 }
  0xce   : > { %18926 = vst [vmem:[#allocation22_spill] sm:$0xff] %v14901_v36  ;;  %18927 = vst [vmem:[#allocation23_spill] sm:$0xff] %v14906_v38  ;;  %v14926_v46 = vld [vmem:[%s14780_s20 + $0x130] sm:$0xff]  ;;  %v14929_v47 = vld [vmem:[%s14780_s20 + $0x138] sm:$0xff]  ;;  %v567_v50 = vmul.f32 %v14773_v62, %v14912_v40  ;;  %v568_v55 = vmul.f32 %v14773_v62, %v14923_v45  ;;  %v615_v26 = vmul.f32 %v14778_v63, %v14835_v17 }
  0xcf   : > { %18928 = vst [vmem:[#allocation24_spill] sm:$0xff] %v14909_v39  ;;  %18929 = vst [vmem:[#allocation25_spill] sm:$0xff] %v14912_v40  ;;  %v14940_v52 = vld [vmem:[%s14780_s20 + $0x140] sm:$0xff]  ;;  %v14943_v53 = vld [vmem:[%s14780_s20 + $0x148] sm:$0xff]  ;;  %v569_v56 = vmul.f32 %v14773_v62, %v14926_v46  ;;  %v570_v57 = vmul.f32 %v14773_v62, %v14929_v47  ;;  %v616_v12 = vmul.f32 %v14778_v63, %v14838_v18 }
  0xd0   : > { %18930 = vst [vmem:[#allocation26_spill] sm:$0xff] %v14923_v45  ;;  %18931 = vst [vmem:[#allocation27_spill] sm:$0xff] %v14926_v46  ;;  %v14946_v54 = vld [vmem:[%s14780_s20 + $0x150] sm:$0xff]  ;;  %v14957_v59 = vld [vmem:[%s14780_s20 + $0x158] sm:$0xff]  ;;  %v571_v60 = vmul.f32 %v14773_v62, %v14940_v52  ;;  %v572_v0 = vmul.f32 %v14773_v62, %v14943_v53  ;;  %v617_v10 = vmul.f32 %v14778_v63, %v14841_v19 }
  0xd1   : > { %18932 = vst [vmem:[#allocation28_spill] sm:$0xff] %v14929_v47  ;;  %18933 = vst [vmem:[#allocation29_spill] sm:$0xff] %v14940_v52  ;;  %v573_v1 = vmul.f32 %v14773_v62, %v14946_v54  ;;  %v14966_v61 = vld [vmem:[%s14780_s20 + $0x70] sm:$0xff]  ;;  %v574_v11 = vmul.f32 %v14773_v62, %v14957_v59  ;;  %v618_v5 = vmul.f32 %v14778_v63, %v14860_v24  ;;  %v14979_v4 = vld [vmem:[%s14780_s20 + $0x160] sm:$0xff] }
  0xd2   : > { %18934 = vst [vmem:[#allocation30_spill] sm:$0xff] %v14943_v53  ;;  %18935 = vst [vmem:[#allocation31_spill] sm:$0xff] %v14946_v54  ;;  %v619_v3 = vmul.f32 %v14778_v63, %v14863_v25  ;;  %v620_v17 = vmul.f32 %v14778_v63, %v14966_v61  ;;  %v621_v62 = vmul.f32 %v14778_v63, %v14883_v31 }
  0xd3   : > { %18936 = vst [vmem:[#allocation32_spill] sm:$0xff] %v14957_v59  ;;  %18937 = vst [vmem:[#allocation33_spill] sm:$0xff] %v14966_v61  ;;  %v622_v18 = vmul.f32 %v14778_v63, %v14886_v32  ;;  %v623_v19 = vmul.f32 %v14778_v63, %v14889_v33  ;;  %v624_v24 = vmul.f32 %v14778_v63, %v14906_v38 }
  0xd4   : > { %18938 = vst [vmem:[#allocation34_spill] sm:$0xff] %v14979_v4  ;;  %v625_v2 = vmul.f32 %v14778_v63, %v14909_v39  ;;  %v626_v25 = vmul.f32 %v14778_v63, %v14912_v40  ;;  %v627_v61 = vmul.f32 %v14778_v63, %v14923_v45  ;;  %v628_v31 = vmul.f32 %v14778_v63, %v14926_v46 }
  0xd5   : > { %v629_v32 = vmul.f32 %v14778_v63, %v14929_v47  ;;  %v630_v33 = vmul.f32 %v14778_v63, %v14940_v52  ;;  %v631_v38 = vmul.f32 %v14778_v63, %v14943_v53  ;;  %v632_v39 = vmul.f32 %v14778_v63, %v14946_v54 }
  0xd6   : > { %v633_v40 = vmul.f32 %v14778_v63, %v14957_v59  ;;  %v634_v45 = vmul.f32 %v14778_v63, %v14979_v4  ;;  %v635_v46 = vadd.f32 %v14807_v9, %v14797_v6  ;;  %v636_v47 = vadd.f32 %v14832_v16, %v14800_v7  ;;  %v18939_v16 = vld [vmem:[#allocation21_spill] sm:$0xff] }
  0xd7   : > { %v637_v52 = vadd.f32 %v14857_v23, %v14804_v8  ;;  %v638_v53 = vadd.f32 %v610_v30, %v14820_v13  ;;  %v639_v36 = vadd.f32 %v611_v37, %v14824_v14  ;;  %v640_v54 = vadd.f32 %v612_v44, %v14828_v15  ;;  %v18940_v23 = vld [vmem:[#allocation22_spill] sm:$0xff] }
  0xd8   : > { %v641_v59 = vadd.f32 %v613_v51, %v14845_v20  ;;  %v642_v35 = vadd.f32 %v614_v58, %v14849_v21  ;;  %v643_v63 = vadd.f32 %v615_v26, %v14853_v22  ;;  %v644_v6 = vadd.f32 %v616_v12, %v14870_v27  ;;  %v9591_v12 = vld [vmem:[%s18702_s1 + $0x10] sm:$0xff]  ;;  %v18952_v51 = vld [vmem:[#allocation16_spill] sm:$0xff] }
  0xd9   : > { %v645_v9 = vadd.f32 %v617_v10, %v14874_v28  ;;  %v646_v7 = vadd.f32 %v618_v5, %v14878_v29  ;;  %v647_v8 = vadd.f32 %v619_v3, %v14893_v34  ;;  %v648_v13 = vadd.f32 %v620_v17, %v18939_v16  ;;  %v9576_v29 = vld [vmem:[%s14780_s20 + $0x78] sm:$0xff]  ;;  %v18941_v34 = vld [vmem:[#allocation5_spill] sm:$0xff]  ;;  %v18965_v4 = vld [vmem:[#allocation31_spill] sm:$0xff] }
  0xda   : > { %v649_v14 = vadd.f32 %v621_v62, %v18940_v23  ;;  %v650_v15 = vadd.f32 %v622_v18, %v562_v41  ;;  %v651_v30 = vadd.f32 %v623_v19, %v563_v42  ;;  %v652_v20 = vadd.f32 %v624_v24, %v564_v43  ;;  %v18942_v19 = vld [vmem:[#allocation6_spill] sm:$0xff]  ;;  %v18944_v41 = vld [vmem:[#allocation8_spill] sm:$0xff]  ;;  %v18945_v43 = vld [vmem:[#allocation9_spill] sm:$0xff] }
  0xdb   : > { %v653_v37 = vadd.f32 %v625_v2, %v565_v48  ;;  %v654_v21 = vadd.f32 %v626_v25, %v566_v49  ;;  %v655_v22 = vadd.f32 %v627_v61, %v567_v50  ;;  %v656_v10 = vadd.f32 %v628_v31, %v568_v55  ;;  %v18943_v2 = vld [vmem:[#allocation7_spill] sm:$0xff]  ;;  %v18946_v61 = vld [vmem:[#allocation10_spill] sm:$0xff]  ;;  %v18949_v48 = vld [vmem:[#allocation13_spill] sm:$0xff] }
  0xdc   : > { %v657_v26 = vadd.f32 %v629_v32, %v569_v56  ;;  %v658_v5 = vadd.f32 %v630_v33, %v570_v57  ;;  %v659_v27 = vadd.f32 %v631_v38, %v571_v60  ;;  %v660_v3 = vadd.f32 %v632_v39, %v572_v0  ;;  %v18947_v32 = vld [vmem:[#allocation11_spill] sm:$0xff]  ;;  %v18948_v38 = vld [vmem:[#allocation12_spill] sm:$0xff]  ;;  %v18954_v57 = vld [vmem:[#allocation33_spill] sm:$0xff] }
  0xdd   : > { %v661_v17 = vadd.f32 %v633_v40, %v573_v1  ;;  %v662_v28 = vadd.f32 %v634_v45, %v574_v11  ;;  %v695_v18 = vmul.f32 %v9591_v12, %v18941_v34  ;;  %v696_v24 = vmul.f32 %v9591_v12, %v18942_v19  ;;  %v18950_v11 = vld [vmem:[#allocation14_spill] sm:$0xff]  ;;  %v18951_v49 = vld [vmem:[#allocation15_spill] sm:$0xff]  ;;  %v15048_v56 = vld [vmem:[%s14780_s20 + $0x168] sm:$0xff] }
  0xde   : > { %v697_v25 = vmul.f32 %v9591_v12, %v18943_v2  ;;  %v698_v42 = vmul.f32 %v9591_v12, %v18944_v41  ;;  %v699_v44 = vmul.f32 %v9591_v12, %v18945_v43  ;;  %v700_v31 = vmul.f32 %v9591_v12, %v18946_v61  ;;  %18953 = vst [vmem:[#allocation21_spill] sm:$0xff] %v15048_v56  ;;  %v18955_v0 = vld [vmem:[#allocation19_spill] sm:$0xff]  ;;  %v18956_v62 = vld [vmem:[#allocation20_spill] sm:$0xff]  ;;  %v18959_v41 = vld [vmem:[#allocation25_spill] sm:$0xff] }
  0xdf   : > { %v701_v33 = vmul.f32 %v9591_v12, %v18947_v32  ;;  %v702_v39 = vmul.f32 %v9591_v12, %v18948_v38  ;;  %v703_v40 = vmul.f32 %v9591_v12, %v18949_v48  ;;  %v704_v45 = vmul.f32 %v9591_v12, %v18950_v11  ;;  %v18957_v23 = vld [vmem:[#allocation23_spill] sm:$0xff]  ;;  %v18958_v19 = vld [vmem:[#allocation24_spill] sm:$0xff]  ;;  %v18960_v61 = vld [vmem:[#allocation26_spill] sm:$0xff] }
  0xe0   : > { %v705_v50 = vmul.f32 %v9591_v12, %v18951_v49  ;;  %v706_v55 = vmul.f32 %v9591_v12, %v18952_v51  ;;  %v707_v58 = vmul.f32 %v9591_v12, %v18954_v57  ;;  %v708_v60 = vmul.f32 %v9591_v12, %v9576_v29  ;;  %v18961_v38 = vld [vmem:[#allocation27_spill] sm:$0xff]  ;;  %v18962_v11 = vld [vmem:[#allocation28_spill] sm:$0xff]  ;;  %v18963_v51 = vld [vmem:[#allocation29_spill] sm:$0xff] }
  0xe1   : > { %v709_v1 = vmul.f32 %v9591_v12, %v18955_v0  ;;  %v710_v16 = vmul.f32 %v9591_v12, %v18956_v62  ;;  %v711_v34 = vmul.f32 %v9591_v12, %v18957_v23  ;;  %v712_v2 = vmul.f32 %v9591_v12, %v18958_v19  ;;  %v18964_v57 = vld [vmem:[#allocation30_spill] sm:$0xff]  ;;  %v18966_v62 = vld [vmem:[#allocation32_spill] sm:$0xff] }
  0xe2   : > { %v713_v43 = vmul.f32 %v9591_v12, %v18959_v41  ;;  %v714_v32 = vmul.f32 %v9591_v12, %v18960_v61  ;;  %v715_v48 = vmul.f32 %v9591_v12, %v18961_v38  ;;  %v716_v49 = vmul.f32 %v9591_v12, %v18962_v11  ;;  %v18967_v19 = vld [vmem:[#allocation34_spill] sm:$0xff] }
  0xe3   : > { %v717_v56 = vmul.f32 %v9591_v12, %v18963_v51  ;;  %v718_v29 = vmul.f32 %v9591_v12, %v18964_v57  ;;  %v719_v0 = vmul.f32 %v9591_v12, %v18965_v4  ;;  %v720_v23 = vmul.f32 %v9591_v12, %v18966_v62 }
  0xe4   : > { %v721_v41 = vmul.f32 %v9591_v12, %v18967_v19  ;;  %v15065_v11 = vadd.f32 %v695_v18, %v635_v46  ;;  %v15067_v51 = vadd.f32 %v696_v24, %v636_v47  ;;  %v15069_v57 = vadd.f32 %v697_v25, %v637_v52  ;;  %v18979_v24 = vld [vmem:[#allocation18_spill] sm:$0xff]  ;;  %v18980_v25 = vld [vmem:[#allocation19_spill] sm:$0xff] }
  0xe5   : > { %v18968_v61 = vld [vmem:[#allocation21_spill] sm:$0xff]  ;;  %v15071_v4 = vadd.f32 %v698_v42, %v638_v53  ;;  %v15073_v62 = vadd.f32 %v699_v44, %v639_v36  ;;  %v15075_v19 = vadd.f32 %v700_v31, %v640_v54  ;;  %v15081_v18 = vadd.f32 %v703_v40, %v643_v63  ;;  %v18981_v42 = vld [vmem:[#allocation20_spill] sm:$0xff]  ;;  %v18985_v40 = vld [vmem:[#allocation23_spill] sm:$0xff] }
  0xe6   : > { %v722_v38 = vmul.f32 %v9591_v12, %v18968_v61  ;;  %18969 = vst [vmem:[#allocation22_spill] sm:$0xff] %v15065_v11  ;;  %v15077_v12 = vadd.f32 %v701_v33, %v641_v59  ;;  %v15079_v61 = vadd.f32 %v702_v39, %v642_v35  ;;  %v15083_v46 = vadd.f32 %v704_v45, %v644_v6  ;;  %v15144_v31 = vld [vmem:[%s14780_s20 + $0x208] sm:$0xff]  ;;  %v15147_v33 = vld [vmem:[%s14780_s20 + $0x210] sm:$0xff]  ;;  %v15150_v39 = vld [vmem:[%s14780_s20 + $0x218] sm:$0xff] }
  0xe7   : > { %v15085_v11 = vadd.f32 %v705_v50, %v645_v9  ;;  %v15087_v47 = vadd.f32 %v706_v55, %v646_v7  ;;  %v15089_v52 = vadd.f32 %v707_v58, %v647_v8  ;;  %v15091_v53 = vadd.f32 %v708_v60, %v648_v13  ;;  %v9622_v9 = vld [vmem:[%s18702_s1 + $0x18] sm:$0xff]  ;;  %18982 = vst [vmem:[#allocation13_spill] sm:$0xff] %v15144_v31  ;;  %v18986_v50 = vld [vmem:[#allocation24_spill] sm:$0xff] }
  0xe8   : > { %v15093_v36 = vadd.f32 %v709_v1, %v649_v14  ;;  %v15095_v54 = vadd.f32 %v710_v16, %v650_v15  ;;  %v15097_v35 = vadd.f32 %v711_v34, %v651_v30  ;;  %v15099_v59 = vadd.f32 %v712_v2, %v652_v20  ;;  %18983 = vst [vmem:[#allocation14_spill] sm:$0xff] %v15147_v33  ;;  %v18988_v60 = vld [vmem:[#allocation26_spill] sm:$0xff]  ;;  %v15157_v1 = vld [vmem:[%s14780_s20 + $0x220] sm:$0xff]  ;;  %v15160_v16 = vld [vmem:[%s14780_s20 + $0x228] sm:$0xff] }
  0xe9   : > { %v15101_v63 = vadd.f32 %v713_v43, %v653_v37  ;;  %v15103_v6 = vadd.f32 %v714_v32, %v654_v21  ;;  %v15108_v7 = vadd.f32 %v715_v48, %v655_v22  ;;  %v15110_v8 = vadd.f32 %v716_v49, %v656_v10  ;;  %v15125_v21 = vld [vmem:[%s14780_s20 + $0x1e0] sm:$0xff]  ;;  %v15128_v22 = vld [vmem:[%s14780_s20 + $0x1e8] sm:$0xff]  ;;  %v15131_v10 = vld [vmem:[%s14780_s20 + $0x1f0] sm:$0xff]  ;;  %18984 = vst [vmem:[#allocation15_spill] sm:$0xff] %v15150_v39 }
  0xea   : > { %v15112_v13 = vadd.f32 %v717_v56, %v657_v26  ;;  %v15114_v14 = vadd.f32 %v718_v29, %v658_v5  ;;  %v15116_v15 = vadd.f32 %v719_v0, %v659_v27  ;;  %v15118_v30 = vadd.f32 %v720_v23, %v660_v3  ;;  %18973 = vst [vmem:[#allocation8_spill] sm:$0xff] %v15125_v21  ;;  %v15134_v26 = vld [vmem:[%s14780_s20 + $0x1f8] sm:$0xff]  ;;  %v15137_v5 = vld [vmem:[%s14780_s20 + $0x200] sm:$0xff]  ;;  %v18978_v27 = vld [vmem:[#allocation17_spill] sm:$0xff] }
  0xeb   : > { %v15120_v20 = vadd.f32 %v721_v41, %v661_v17  ;;  %v15122_v37 = vadd.f32 %v722_v38, %v662_v28  ;;  %18974 = vst [vmem:[#allocation9_spill] sm:$0xff] %v15128_v22  ;;  %18975 = vst [vmem:[#allocation10_spill] sm:$0xff] %v15131_v10  ;;  %v784_v3 = vmul.f32 %v9622_v9, %v18978_v27  ;;  %v18987_v56 = vld [vmem:[#allocation25_spill] sm:$0xff]  ;;  %v18992_v34 = vld [vmem:[#allocation27_spill] sm:$0xff] }
  0xec   : > { %18970 = vst [vmem:[#allocation5_spill] sm:$0xff] %v15118_v30  ;;  %18976 = vst [vmem:[#allocation11_spill] sm:$0xff] %v15134_v26  ;;  %v785_v17 = vmul.f32 %v9622_v9, %v18979_v24  ;;  %v786_v28 = vmul.f32 %v9622_v9, %v18980_v25  ;;  %v787_v44 = vmul.f32 %v9622_v9, %v18981_v42  ;;  %v15163_v23 = vld [vmem:[%s14780_s20 + $0x230] sm:$0xff]  ;;  %v18993_v41 = vld [vmem:[#allocation28_spill] sm:$0xff] }
  0xed   : > { %18971 = vst [vmem:[#allocation6_spill] sm:$0xff] %v15120_v20  ;;  %18972 = vst [vmem:[#allocation7_spill] sm:$0xff] %v15122_v37  ;;  %v788_v45 = vmul.f32 %v9622_v9, %v18985_v40  ;;  %v789_v55 = vmul.f32 %v9622_v9, %v18986_v50  ;;  %v790_v58 = vmul.f32 %v9622_v9, %v18987_v56  ;;  %v18994_v32 = vld [vmem:[#allocation29_spill] sm:$0xff]  ;;  %v18995_v48 = vld [vmem:[#allocation30_spill] sm:$0xff] }
  0xee   : > { %18977 = vst [vmem:[#allocation12_spill] sm:$0xff] %v15137_v5  ;;  %v791_v0 = vmul.f32 %v9622_v9, %v18988_v60  ;;  %18989 = vst [vmem:[#allocation16_spill] sm:$0xff] %v15157_v1  ;;  %v792_v2 = vmul.f32 %v9622_v9, %v18992_v34  ;;  %v793_v43 = vmul.f32 %v9622_v9, %v18993_v41  ;;  %v15170_v29 = vld [vmem:[%s14780_s20 + $0x238] sm:$0xff]  ;;  %v15173_v27 = vld [vmem:[%s14780_s20 + $0x240] sm:$0xff] }
  0xef   : > { %18990 = vst [vmem:[#allocation33_spill] sm:$0xff] %v15160_v16  ;;  %18991 = vst [vmem:[#allocation17_spill] sm:$0xff] %v15163_v23  ;;  %v794_v38 = vmul.f32 %v9622_v9, %v18994_v32  ;;  %v795_v49 = vmul.f32 %v9622_v9, %v18995_v48  ;;  %v15176_v56 = vld [vmem:[%s14780_s20 + $0x248] sm:$0xff]  ;;  %v18999_v60 = vld [vmem:[#allocation31_spill] sm:$0xff]  ;;  %v798_v25 = vmul.f32 %v9622_v9, %v15125_v21 }
  0xf0   : > { %18996 = vst [vmem:[#allocation35_spill] sm:$0xff] %v15170_v29  ;;  %18997 = vst [vmem:[#allocation36_spill] sm:$0xff] %v15173_v27  ;;  %v796_v50 = vmul.f32 %v9622_v9, %v18999_v60  ;;  %v19000_v40 = vld [vmem:[#allocation32_spill] sm:$0xff]  ;;  %v799_v34 = vmul.f32 %v9622_v9, %v15128_v22  ;;  %v800_v41 = vmul.f32 %v9622_v9, %v15131_v10  ;;  %v19001_v30 = vld [vmem:[#allocation22_spill] sm:$0xff] }
  0xf1   : > { %18998 = vst [vmem:[#allocation37_spill] sm:$0xff] %v15176_v56  ;;  %v797_v42 = vmul.f32 %v9622_v9, %v19000_v40  ;;  %v801_v32 = vmul.f32 %v9622_v9, %v15134_v26  ;;  %v802_v48 = vmul.f32 %v9622_v9, %v15137_v5  ;;  %v803_v24 = vmul.f32 %v9622_v9, %v15144_v31 }
  0xf2   : > { %v804_v37 = vmul.f32 %v9622_v9, %v15147_v33  ;;  %v805_v20 = vmul.f32 %v9622_v9, %v15150_v39  ;;  %v806_v60 = vmul.f32 %v9622_v9, %v15157_v1  ;;  %v807_v40 = vmul.f32 %v9622_v9, %v15160_v16 }
  0xf3   : > { %v808_v21 = vmul.f32 %v9622_v9, %v15163_v23  ;;  %v809_v22 = vmul.f32 %v9622_v9, %v15170_v29  ;;  %v810_v10 = vmul.f32 %v9622_v9, %v15173_v27  ;;  %v811_v26 = vmul.f32 %v9622_v9, %v15176_v56 }
  0xf4   : > { %v812_v5 = vadd.f32 %v784_v3, %v19001_v30  ;;  %v813_v31 = vadd.f32 %v785_v17, %v15067_v51  ;;  %v814_v33 = vadd.f32 %v786_v28, %v15069_v57  ;;  %v815_v39 = vadd.f32 %v787_v44, %v15071_v4  ;;  %v19005_v17 = vld [vmem:[#allocation18_spill] sm:$0xff]  ;;  %v19006_v28 = vld [vmem:[#allocation19_spill] sm:$0xff] }
  0xf5   : > { %v816_v1 = vadd.f32 %v788_v45, %v15073_v62  ;;  %v817_v16 = vadd.f32 %v789_v55, %v15075_v19  ;;  %v818_v23 = vadd.f32 %v790_v58, %v15077_v12  ;;  %v819_v29 = vadd.f32 %v791_v0, %v15079_v61  ;;  %v19012_v45 = vld [vmem:[#allocation27_spill] sm:$0xff]  ;;  %v19014_v55 = vld [vmem:[#allocation29_spill] sm:$0xff]  ;;  %v19015_v58 = vld [vmem:[#allocation30_spill] sm:$0xff] }
  0xf6   : > { %v820_v27 = vadd.f32 %v792_v2, %v15081_v18  ;;  %v821_v9 = vadd.f32 %v793_v43, %v15083_v46  ;;  %v822_v30 = vadd.f32 %v794_v38, %v15085_v11  ;;  %v823_v51 = vadd.f32 %v795_v49, %v15087_v47  ;;  %v9653_v11 = vld [vmem:[%s18702_s1 + $0x20] sm:$0xff]  ;;  %v15238_v2 = vld [vmem:[%s14780_s20 + $0x250] sm:$0xff] }
  0xf7   : > { %v824_v57 = vadd.f32 %v796_v50, %v15089_v52  ;;  %v825_v4 = vadd.f32 %v797_v42, %v15091_v53  ;;  %v826_v62 = vadd.f32 %v798_v25, %v15093_v36  ;;  %v827_v19 = vadd.f32 %v799_v34, %v15095_v54  ;;  %v19013_v50 = vld [vmem:[#allocation28_spill] sm:$0xff]  ;;  %v19016_v0 = vld [vmem:[#allocation31_spill] sm:$0xff]  ;;  %19017 = vst [vmem:[#allocation22_spill] sm:$0xff] %v15238_v2  ;;  %v19029_v2 = vld [vmem:[#allocation17_spill] sm:$0xff] }
  0xf8   : > { %v828_v12 = vadd.f32 %v800_v41, %v15097_v35  ;;  %v829_v61 = vadd.f32 %v801_v32, %v15099_v59  ;;  %v830_v18 = vadd.f32 %v802_v48, %v15101_v63  ;;  %v831_v46 = vadd.f32 %v803_v24, %v15103_v6  ;;  %v19002_v35 = vld [vmem:[#allocation5_spill] sm:$0xff]  ;;  %v19003_v63 = vld [vmem:[#allocation6_spill] sm:$0xff]  ;;  %v19004_v6 = vld [vmem:[#allocation7_spill] sm:$0xff] }
  0xf9   : > { %v832_v47 = vadd.f32 %v804_v37, %v15108_v7  ;;  %v833_v52 = vadd.f32 %v805_v20, %v15110_v8  ;;  %v834_v53 = vadd.f32 %v806_v60, %v15112_v13  ;;  %v835_v36 = vadd.f32 %v807_v40, %v15114_v14  ;;  %v19007_v7 = vld [vmem:[#allocation20_spill] sm:$0xff]  ;;  %v19008_v8 = vld [vmem:[#allocation23_spill] sm:$0xff]  ;;  %v19010_v14 = vld [vmem:[#allocation25_spill] sm:$0xff] }
  0xfa   : > { %v836_v54 = vadd.f32 %v808_v21, %v15116_v15  ;;  %v837_v59 = vadd.f32 %v809_v22, %v19002_v35  ;;  %v838_v3 = vadd.f32 %v810_v10, %v19003_v63  ;;  %v839_v24 = vadd.f32 %v811_v26, %v19004_v6  ;;  %v19009_v13 = vld [vmem:[#allocation24_spill] sm:$0xff]  ;;  %v19011_v15 = vld [vmem:[#allocation26_spill] sm:$0xff]  ;;  %v19020_v48 = vld [vmem:[#allocation9_spill] sm:$0xff] }
  0xfb   : > { %v872_v25 = vmul.f32 %v9653_v11, %v19005_v17  ;;  %v873_v42 = vmul.f32 %v9653_v11, %v19006_v28  ;;  %v874_v37 = vmul.f32 %v9653_v11, %v19007_v7  ;;  %v875_v20 = vmul.f32 %v9653_v11, %v19008_v8  ;;  %v19018_v41 = vld [vmem:[#allocation32_spill] sm:$0xff]  ;;  %v19019_v32 = vld [vmem:[#allocation34_spill] sm:$0xff]  ;;  %v19022_v6 = vld [vmem:[#allocation11_spill] sm:$0xff] }
  0xfc   : > { %v876_v44 = vmul.f32 %v9653_v11, %v19009_v13  ;;  %v877_v40 = vmul.f32 %v9653_v11, %v19010_v14  ;;  %v878_v21 = vmul.f32 %v9653_v11, %v19011_v15  ;;  %v879_v22 = vmul.f32 %v9653_v11, %v19012_v45  ;;  %v19021_v35 = vld [vmem:[#allocation10_spill] sm:$0xff]  ;;  %v19023_v45 = vld [vmem:[#allocation12_spill] sm:$0xff]  ;;  %v19024_v15 = vld [vmem:[#allocation13_spill] sm:$0xff] }
  0xfd   : > { %v880_v10 = vmul.f32 %v9653_v11, %v19013_v50  ;;  %v881_v26 = vmul.f32 %v9653_v11, %v19014_v55  ;;  %v882_v60 = vmul.f32 %v9653_v11, %v19015_v58  ;;  %v883_v34 = vmul.f32 %v9653_v11, %v19016_v0  ;;  %v19025_v14 = vld [vmem:[#allocation14_spill] sm:$0xff]  ;;  %v19026_v13 = vld [vmem:[#allocation15_spill] sm:$0xff]  ;;  %v19027_v8 = vld [vmem:[#allocation16_spill] sm:$0xff] }
  0xfe   : > { %v884_v43 = vmul.f32 %v9653_v11, %v19018_v41  ;;  %v885_v38 = vmul.f32 %v9653_v11, %v19019_v32  ;;  %v886_v49 = vmul.f32 %v9653_v11, %v19020_v48  ;;  %v887_v63 = vmul.f32 %v9653_v11, %v19021_v35  ;;  %v19028_v28 = vld [vmem:[#allocation33_spill] sm:$0xff]  ;;  %v19030_v56 = vld [vmem:[#allocation35_spill] sm:$0xff]  ;;  %v19031_v35 = vld [vmem:[#allocation36_spill] sm:$0xff] }
  0xff   : > { %v888_v17 = vmul.f32 %v9653_v11, %v19022_v6  ;;  %v889_v50 = vmul.f32 %v9653_v11, %v19023_v45  ;;  %v890_v55 = vmul.f32 %v9653_v11, %v19024_v15  ;;  %v891_v58 = vmul.f32 %v9653_v11, %v19025_v14  ;;  %v19032_v45 = vld [vmem:[#allocation37_spill] sm:$0xff]  ;;  %v19033_v14 = vld [vmem:[#allocation22_spill] sm:$0xff] }
 0x100   : > { %v892_v0 = vmul.f32 %v9653_v11, %v19026_v13  ;;  %v893_v7 = vmul.f32 %v9653_v11, %v19027_v8  ;;  %v894_v41 = vmul.f32 %v9653_v11, %v19028_v28  ;;  %v895_v32 = vmul.f32 %v9653_v11, %v19029_v2 }
 0x101   : > { %v896_v48 = vmul.f32 %v9653_v11, %v19030_v56  ;;  %v897_v6 = vmul.f32 %v9653_v11, %v19031_v35  ;;  %v898_v15 = vmul.f32 %v9653_v11, %v19032_v45  ;;  %v899_v13 = vmul.f32 %v9653_v11, %v19033_v14 }
 0x102   : > { %v900_v8 = vadd.f32 %v872_v25, %v812_v5  ;;  %v901_v28 = vadd.f32 %v873_v42, %v813_v31  ;;  %v902_v2 = vadd.f32 %v874_v37, %v814_v33  ;;  %v903_v56 = vadd.f32 %v875_v20, %v815_v39 }
 0x103   : > { %v904_v35 = vadd.f32 %v876_v44, %v816_v1  ;;  %v905_v45 = vadd.f32 %v877_v40, %v817_v16  ;;  %v906_v11 = vadd.f32 %v878_v21, %v818_v23  ;;  %v907_v14 = vadd.f32 %v879_v22, %v819_v29  ;;  %v9684_v21 = vld [vmem:[%s18702_s1 + $0x28] sm:$0xff] }
 0x104   : > { %v908_v5 = vadd.f32 %v880_v10, %v820_v27  ;;  %v909_v25 = vadd.f32 %v881_v26, %v821_v9  ;;  %v910_v31 = vadd.f32 %v882_v60, %v822_v30  ;;  %v911_v42 = vadd.f32 %v883_v34, %v823_v51  ;;  %v19039_v26 = vld [vmem:[#allocation26_spill] sm:$0xff] }
 0x105   : > { %v912_v33 = vadd.f32 %v884_v43, %v824_v57  ;;  %v913_v37 = vadd.f32 %v885_v38, %v825_v4  ;;  %v914_v20 = vadd.f32 %v886_v49, %v826_v62  ;;  %v915_v39 = vadd.f32 %v887_v63, %v827_v19  ;;  %v19034_v57 = vld [vmem:[#allocation19_spill] sm:$0xff]  ;;  %v19035_v62 = vld [vmem:[#allocation20_spill] sm:$0xff]  ;;  %v19047_v34 = vld [vmem:[#allocation34_spill] sm:$0xff] }
 0x106   : > { %v916_v1 = vadd.f32 %v888_v17, %v828_v12  ;;  %v917_v44 = vadd.f32 %v889_v50, %v829_v61  ;;  %v918_v16 = vadd.f32 %v890_v55, %v830_v18  ;;  %v919_v40 = vadd.f32 %v891_v58, %v831_v46  ;;  %v19036_v12 = vld [vmem:[#allocation23_spill] sm:$0xff]  ;;  %v19037_v18 = vld [vmem:[#allocation24_spill] sm:$0xff]  ;;  %v19038_v50 = vld [vmem:[#allocation25_spill] sm:$0xff] }
 0x107   : > { %v920_v23 = vadd.f32 %v892_v0, %v832_v47  ;;  %v921_v22 = vadd.f32 %v893_v7, %v833_v52  ;;  %v922_v29 = vadd.f32 %v894_v41, %v834_v53  ;;  %v923_v10 = vadd.f32 %v895_v32, %v835_v36  ;;  %v19040_v52 = vld [vmem:[#allocation27_spill] sm:$0xff]  ;;  %v19041_v36 = vld [vmem:[#allocation28_spill] sm:$0xff]  ;;  %v19042_v7 = vld [vmem:[#allocation29_spill] sm:$0xff] }
 0x108   : > { %v924_v27 = vadd.f32 %v896_v48, %v836_v54  ;;  %v925_v9 = vadd.f32 %v897_v6, %v837_v59  ;;  %v926_v30 = vadd.f32 %v898_v15, %v838_v3  ;;  %v927_v51 = vadd.f32 %v899_v13, %v839_v24  ;;  %v19043_v3 = vld [vmem:[#allocation30_spill] sm:$0xff]  ;;  %v19044_v13 = vld [vmem:[#allocation31_spill] sm:$0xff]  ;;  %v19045_v58 = vld [vmem:[#allocation32_spill] sm:$0xff] }
 0x109   : > { %v960_v4 = vmul.f32 %v9684_v21, %v19034_v57  ;;  %v961_v19 = vmul.f32 %v9684_v21, %v19035_v62  ;;  %v962_v61 = vmul.f32 %v9684_v21, %v19036_v12  ;;  %v963_v46 = vmul.f32 %v9684_v21, %v19037_v18  ;;  %v15272_v0 = vld [vmem:[%s14780_s20 + $0x258] sm:$0xff]  ;;  %v19048_v43 = vld [vmem:[#allocation21_spill] sm:$0xff]  ;;  %v19050_v49 = vld [vmem:[#allocation11_spill] sm:$0xff] }
 0x10a   : > { %v964_v55 = vmul.f32 %v9684_v21, %v19038_v50  ;;  %v965_v47 = vmul.f32 %v9684_v21, %v19039_v26  ;;  %v966_v53 = vmul.f32 %v9684_v21, %v19040_v52  ;;  %v967_v54 = vmul.f32 %v9684_v21, %v19041_v36  ;;  %19046 = vst [vmem:[#allocation5_spill] sm:$0xff] %v15272_v0  ;;  %v19049_v38 = vld [vmem:[#allocation10_spill] sm:$0xff]  ;;  %v19051_v6 = vld [vmem:[#allocation12_spill] sm:$0xff]  ;;  %v19052_v57 = vld [vmem:[#allocation13_spill] sm:$0xff] }
 0x10b   : > { %v968_v59 = vmul.f32 %v9684_v21, %v19042_v7  ;;  %v969_v24 = vmul.f32 %v9684_v21, %v19043_v3  ;;  %v970_v15 = vmul.f32 %v9684_v21, %v19044_v13  ;;  %v971_v60 = vmul.f32 %v9684_v21, %v19045_v58  ;;  %v19053_v12 = vld [vmem:[#allocation14_spill] sm:$0xff]  ;;  %v19054_v50 = vld [vmem:[#allocation15_spill] sm:$0xff]  ;;  %v19055_v52 = vld [vmem:[#allocation16_spill] sm:$0xff] }
 0x10c   : > { %v972_v41 = vmul.f32 %v9684_v21, %v19047_v34  ;;  %v973_v32 = vmul.f32 %v9684_v21, %v19048_v43  ;;  %v974_v48 = vmul.f32 %v9684_v21, %v19049_v38  ;;  %v975_v63 = vmul.f32 %v9684_v21, %v19050_v49  ;;  %v19056_v7 = vld [vmem:[#allocation33_spill] sm:$0xff]  ;;  %v19058_v34 = vld [vmem:[#allocation35_spill] sm:$0xff]  ;;  %v19059_v0 = vld [vmem:[#allocation36_spill] sm:$0xff] }
 0x10d   : > { %v976_v17 = vmul.f32 %v9684_v21, %v19051_v6  ;;  %v977_v62 = vmul.f32 %v9684_v21, %v19052_v57  ;;  %v978_v18 = vmul.f32 %v9684_v21, %v19053_v12  ;;  %v979_v26 = vmul.f32 %v9684_v21, %v19054_v50  ;;  %v19057_v13 = vld [vmem:[#allocation17_spill] sm:$0xff]  ;;  %v19061_v57 = vld [vmem:[#allocation22_spill] sm:$0xff] }
 0x10e   : > { %v980_v36 = vmul.f32 %v9684_v21, %v19055_v52  ;;  %v981_v3 = vmul.f32 %v9684_v21, %v19056_v7  ;;  %v982_v58 = vmul.f32 %v9684_v21, %v19057_v13  ;;  %v983_v43 = vmul.f32 %v9684_v21, %v19058_v34  ;;  %v19060_v49 = vld [vmem:[#allocation37_spill] sm:$0xff] }
 0x10f   : > { %v984_v38 = vmul.f32 %v9684_v21, %v19059_v0  ;;  %v985_v6 = vmul.f32 %v9684_v21, %v19060_v49  ;;  %v986_v12 = vmul.f32 %v9684_v21, %v19061_v57  ;;  %v15290_v7 = vadd.f32 %v960_v4, %v900_v8 }
 0x110   : > { %v15292_v13 = vadd.f32 %v961_v19, %v901_v28  ;;  %v15294_v34 = vadd.f32 %v962_v61, %v902_v2  ;;  %v15296_v0 = vadd.f32 %v963_v46, %v903_v56  ;;  %v15298_v49 = vadd.f32 %v964_v55, %v904_v35 }
 0x111   : > { %v19062_v50 = vld [vmem:[#allocation5_spill] sm:$0xff]  ;;  %19063 = vst [vmem:[#allocation6_spill] sm:$0xff] %v15290_v7  ;;  %v15300_v57 = vadd.f32 %v965_v47, %v905_v45  ;;  %v15306_v4 = vadd.f32 %v968_v59, %v908_v5  ;;  %v15308_v8 = vadd.f32 %v969_v24, %v909_v25  ;;  %v15310_v7 = vadd.f32 %v970_v15, %v910_v31  ;;  %v15367_v47 = vld [vmem:[%s14780_s20 + $0x2f8] sm:$0xff]  ;;  %v19078_v59 = vld [vmem:[#allocation12_spill] sm:$0xff] }
 0x112   : > { %v987_v52 = vmul.f32 %v9684_v21, %v19062_v50  ;;  %v15302_v21 = vadd.f32 %v966_v53, %v906_v11  ;;  %v15304_v50 = vadd.f32 %v967_v54, %v907_v14  ;;  %v15312_v28 = vadd.f32 %v971_v60, %v911_v42  ;;  %v9715_v31 = vld [vmem:[%s18702_s1 + $0x30] sm:$0xff]  ;;  %19075 = vst [vmem:[#allocation26_spill] sm:$0xff] %v15367_v47  ;;  %v15370_v53 = vld [vmem:[%s14780_s20 + $0x300] sm:$0xff]  ;;  %v15373_v54 = vld [vmem:[%s14780_s20 + $0x308] sm:$0xff] }
 0x113   : > { %v15314_v2 = vadd.f32 %v972_v41, %v912_v33  ;;  %v15316_v56 = vadd.f32 %v973_v32, %v913_v37  ;;  %v15318_v35 = vadd.f32 %v974_v48, %v914_v20  ;;  %v15320_v45 = vadd.f32 %v975_v63, %v915_v39  ;;  %19076 = vst [vmem:[#allocation27_spill] sm:$0xff] %v15370_v53  ;;  %v19079_v15 = vld [vmem:[#allocation13_spill] sm:$0xff]  ;;  %v19080_v41 = vld [vmem:[#allocation14_spill] sm:$0xff] }
 0x114   : > { %v15322_v14 = vadd.f32 %v976_v17, %v916_v1  ;;  %v15324_v11 = vadd.f32 %v977_v62, %v917_v44  ;;  %v15326_v5 = vadd.f32 %v978_v18, %v918_v16  ;;  %v15328_v25 = vadd.f32 %v979_v26, %v919_v40  ;;  %v9701_v40 = vld [vmem:[%s14780_s20 + $0x2d0] sm:$0xff]  ;;  %19077 = vst [vmem:[#allocation28_spill] sm:$0xff] %v15373_v54  ;;  %v15386_v17 = vld [vmem:[%s14780_s20 + $0x320] sm:$0xff]  ;;  %v19085_v62 = vld [vmem:[#allocation16_spill] sm:$0xff] }
 0x115   : > { %v15333_v42 = vadd.f32 %v980_v36, %v920_v23  ;;  %v15335_v33 = vadd.f32 %v981_v3, %v921_v22  ;;  %v15337_v37 = vadd.f32 %v982_v58, %v922_v29  ;;  %v15339_v20 = vadd.f32 %v983_v43, %v923_v10  ;;  %v15351_v23 = vld [vmem:[%s14780_s20 + $0x2d8] sm:$0xff]  ;;  %v15354_v22 = vld [vmem:[%s14780_s20 + $0x2e0] sm:$0xff]  ;;  %v15357_v29 = vld [vmem:[%s14780_s20 + $0x2e8] sm:$0xff]  ;;  %19084 = vst [vmem:[#allocation31_spill] sm:$0xff] %v15386_v17 }
 0x116   : > { %v15341_v39 = vadd.f32 %v984_v38, %v924_v27  ;;  %v15343_v1 = vadd.f32 %v985_v6, %v925_v9  ;;  %v15345_v44 = vadd.f32 %v986_v12, %v926_v30  ;;  %v15347_v16 = vadd.f32 %v987_v52, %v927_v51  ;;  %19067 = vst [vmem:[#allocation20_spill] sm:$0xff] %v15351_v23  ;;  %v15360_v10 = vld [vmem:[%s14780_s20 + $0x2f0] sm:$0xff]  ;;  %v19071_v27 = vld [vmem:[#allocation8_spill] sm:$0xff]  ;;  %v19073_v30 = vld [vmem:[#allocation10_spill] sm:$0xff] }
 0x117   : > { %19068 = vst [vmem:[#allocation23_spill] sm:$0xff] %v15354_v22  ;;  %19069 = vst [vmem:[#allocation24_spill] sm:$0xff] %v15357_v29  ;;  %v1049_v19 = vmul.f32 %v9715_v31, %v19071_v27  ;;  %v19072_v9 = vld [vmem:[#allocation9_spill] sm:$0xff]  ;;  %v1051_v46 = vmul.f32 %v9715_v31, %v19073_v30  ;;  %v19074_v51 = vld [vmem:[#allocation11_spill] sm:$0xff]  ;;  %v1053_v24 = vmul.f32 %v9715_v31, %v19078_v59 }
 0x118   : > { %19064 = vst [vmem:[#allocation7_spill] sm:$0xff] %v15343_v1  ;;  %19065 = vst [vmem:[#allocation18_spill] sm:$0xff] %v15345_v44  ;;  %v1050_v61 = vmul.f32 %v9715_v31, %v19072_v9  ;;  %v1052_v55 = vmul.f32 %v9715_v31, %v19074_v51  ;;  %v1054_v60 = vmul.f32 %v9715_v31, %v19079_v15  ;;  %v19081_v38 = vld [vmem:[#allocation15_spill] sm:$0xff]  ;;  %v15380_v63 = vld [vmem:[%s14780_s20 + $0x310] sm:$0xff] }
 0x119   : > { %19066 = vst [vmem:[#allocation19_spill] sm:$0xff] %v15347_v16  ;;  %19070 = vst [vmem:[#allocation25_spill] sm:$0xff] %v15360_v10  ;;  %v1055_v32 = vmul.f32 %v9715_v31, %v19080_v41  ;;  %v1056_v48 = vmul.f32 %v9715_v31, %v19081_v38  ;;  %v15383_v6 = vld [vmem:[%s14780_s20 + $0x318] sm:$0xff]  ;;  %v1057_v12 = vmul.f32 %v9715_v31, %v19085_v62  ;;  %v19086_v18 = vld [vmem:[#allocation33_spill] sm:$0xff] }
 0x11a   : > { %19082 = vst [vmem:[#allocation29_spill] sm:$0xff] %v15380_v63  ;;  %19083 = vst [vmem:[#allocation30_spill] sm:$0xff] %v15383_v6  ;;  %v1058_v26 = vmul.f32 %v9715_v31, %v19086_v18  ;;  %v19087_v52 = vld [vmem:[#allocation17_spill] sm:$0xff]  ;;  %v19088_v3 = vld [vmem:[#allocation35_spill] sm:$0xff]  ;;  %v1063_v30 = vmul.f32 %v9715_v31, %v9701_v40  ;;  %v1064_v9 = vmul.f32 %v9715_v31, %v15351_v23 }
 0x11b   : > { %v1059_v36 = vmul.f32 %v9715_v31, %v19087_v52  ;;  %v1060_v58 = vmul.f32 %v9715_v31, %v19088_v3  ;;  %v15393_v43 = vld [vmem:[%s14780_s20 + $0x328] sm:$0xff]  ;;  %v15396_v27 = vld [vmem:[%s14780_s20 + $0x330] sm:$0xff]  ;;  %v15399_v41 = vld [vmem:[%s14780_s20 + $0x338] sm:$0xff]  ;;  %v1065_v62 = vmul.f32 %v9715_v31, %v15354_v22  ;;  %v1066_v18 = vmul.f32 %v9715_v31, %v15357_v29 }
 0x11c   : > { %19089 = vst [vmem:[#allocation32_spill] sm:$0xff] %v15393_v43  ;;  %19090 = vst [vmem:[#allocation34_spill] sm:$0xff] %v15396_v27  ;;  %v19092_v38 = vld [vmem:[#allocation36_spill] sm:$0xff]  ;;  %v19093_v59 = vld [vmem:[#allocation37_spill] sm:$0xff]  ;;  %v1067_v52 = vmul.f32 %v9715_v31, %v15360_v10  ;;  %v1068_v3 = vmul.f32 %v9715_v31, %v15367_v47  ;;  %v1069_v16 = vmul.f32 %v9715_v31, %v15370_v53 }
 0x11d   : > { %19091 = vst [vmem:[#allocation21_spill] sm:$0xff] %v15399_v41  ;;  %v1061_v15 = vmul.f32 %v9715_v31, %v19092_v38  ;;  %v1062_v51 = vmul.f32 %v9715_v31, %v19093_v59  ;;  %v1070_v44 = vmul.f32 %v9715_v31, %v15373_v54  ;;  %v1071_v1 = vmul.f32 %v9715_v31, %v15380_v63  ;;  %v19094_v59 = vld [vmem:[#allocation6_spill] sm:$0xff] }
 0x11e   : > { %v1072_v38 = vmul.f32 %v9715_v31, %v15383_v6  ;;  %v1073_v40 = vmul.f32 %v9715_v31, %v15386_v17  ;;  %v1074_v23 = vmul.f32 %v9715_v31, %v15393_v43  ;;  %v1075_v22 = vmul.f32 %v9715_v31, %v15396_v27 }
 0x11f   : > { %v1076_v29 = vmul.f32 %v9715_v31, %v15399_v41  ;;  %v1077_v10 = vadd.f32 %v1049_v19, %v19094_v59  ;;  %v1078_v47 = vadd.f32 %v1050_v61, %v15292_v13  ;;  %v1079_v53 = vadd.f32 %v1051_v46, %v15294_v34 }
 0x120   : > { %v1080_v54 = vadd.f32 %v1052_v55, %v15296_v0  ;;  %v1081_v63 = vadd.f32 %v1053_v24, %v15298_v49  ;;  %v1082_v6 = vadd.f32 %v1054_v60, %v15300_v57  ;;  %v1083_v17 = vadd.f32 %v1055_v32, %v15302_v21  ;;  %v19106_v60 = vld [vmem:[#allocation33_spill] sm:$0xff] }
 0x121   : > { %v1084_v43 = vadd.f32 %v1056_v48, %v15304_v50  ;;  %v1085_v27 = vadd.f32 %v1057_v12, %v15306_v4  ;;  %v1086_v31 = vadd.f32 %v1058_v26, %v15308_v8  ;;  %v1087_v19 = vadd.f32 %v1059_v36, %v15310_v7  ;;  %v9746_v7 = vld [vmem:[%s18702_s1 + $0x38] sm:$0xff]  ;;  %v19107_v32 = vld [vmem:[#allocation17_spill] sm:$0xff] }
 0x122   : > { %v1088_v13 = vadd.f32 %v1060_v58, %v15312_v28  ;;  %v1089_v34 = vadd.f32 %v1061_v15, %v15314_v2  ;;  %v1090_v0 = vadd.f32 %v1062_v51, %v15316_v56  ;;  %v1091_v49 = vadd.f32 %v1063_v30, %v15318_v35  ;;  %v19098_v30 = vld [vmem:[#allocation9_spill] sm:$0xff]  ;;  %v19099_v51 = vld [vmem:[#allocation10_spill] sm:$0xff]  ;;  %v19105_v15 = vld [vmem:[#allocation16_spill] sm:$0xff] }
 0x123   : > { %v1092_v57 = vadd.f32 %v1064_v9, %v15320_v45  ;;  %v1093_v21 = vadd.f32 %v1065_v62, %v15322_v14  ;;  %v1094_v50 = vadd.f32 %v1066_v18, %v15324_v11  ;;  %v1095_v4 = vadd.f32 %v1067_v52, %v15326_v5  ;;  %v19095_v14 = vld [vmem:[#allocation7_spill] sm:$0xff]  ;;  %v19096_v5 = vld [vmem:[#allocation18_spill] sm:$0xff]  ;;  %v19109_v62 = vld [vmem:[#allocation36_spill] sm:$0xff] }
 0x124   : > { %v1096_v8 = vadd.f32 %v1068_v3, %v15328_v25  ;;  %v1097_v28 = vadd.f32 %v1069_v16, %v15333_v42  ;;  %v1098_v2 = vadd.f32 %v1070_v44, %v15335_v33  ;;  %v1099_v56 = vadd.f32 %v1071_v1, %v15337_v37  ;;  %v19097_v25 = vld [vmem:[#allocation19_spill] sm:$0xff]  ;;  %v19101_v33 = vld [vmem:[#allocation12_spill] sm:$0xff]  ;;  %v19102_v37 = vld [vmem:[#allocation13_spill] sm:$0xff] }
 0x125   : > { %v1100_v35 = vadd.f32 %v1072_v38, %v15339_v20  ;;  %v1101_v45 = vadd.f32 %v1073_v40, %v15341_v39  ;;  %v1102_v11 = vadd.f32 %v1074_v23, %v19095_v14  ;;  %v1103_v9 = vadd.f32 %v1075_v22, %v19096_v5  ;;  %v19100_v42 = vld [vmem:[#allocation11_spill] sm:$0xff]  ;;  %v19103_v20 = vld [vmem:[#allocation14_spill] sm:$0xff]  ;;  %v19111_v26 = vld [vmem:[#allocation37_spill] sm:$0xff] }
 0x126   : > { %v1104_v61 = vadd.f32 %v1076_v29, %v19097_v25  ;;  %v1137_v46 = vmul.f32 %v9746_v7, %v19098_v30  ;;  %v1138_v55 = vmul.f32 %v9746_v7, %v19099_v51  ;;  %v1139_v16 = vmul.f32 %v9746_v7, %v19100_v42  ;;  %v19104_v39 = vld [vmem:[#allocation15_spill] sm:$0xff]  ;;  %v19112_v36 = vld [vmem:[#allocation22_spill] sm:$0xff]  ;;  %v19113_v58 = vld [vmem:[#allocation20_spill] sm:$0xff] }
 0x127   : > { %v1140_v44 = vmul.f32 %v9746_v7, %v19101_v33  ;;  %v1141_v1 = vmul.f32 %v9746_v7, %v19102_v37  ;;  %v1142_v59 = vmul.f32 %v9746_v7, %v19103_v20  ;;  %v1143_v24 = vmul.f32 %v9746_v7, %v19104_v39  ;;  %v19108_v38 = vld [vmem:[#allocation35_spill] sm:$0xff]  ;;  %v19115_v25 = vld [vmem:[#allocation24_spill] sm:$0xff]  ;;  %v19117_v39 = vld [vmem:[#allocation26_spill] sm:$0xff] }
 0x128   : > { %v1144_v23 = vmul.f32 %v9746_v7, %v19105_v15  ;;  %v1145_v22 = vmul.f32 %v9746_v7, %v19106_v60  ;;  %v1146_v29 = vmul.f32 %v9746_v7, %v19107_v32  ;;  %v1147_v48 = vmul.f32 %v9746_v7, %v19108_v38  ;;  %v15460_v18 = vld [vmem:[%s14780_s20 + $0x340] sm:$0xff]  ;;  %v19116_v15 = vld [vmem:[#allocation25_spill] sm:$0xff]  ;;  %v19119_v37 = vld [vmem:[#allocation28_spill] sm:$0xff] }
 0x129   : > { %v1148_v12 = vmul.f32 %v9746_v7, %v19109_v62  ;;  %19110 = vst [vmem:[#allocation8_spill] sm:$0xff] %v15460_v18  ;;  %v1149_v52 = vmul.f32 %v9746_v7, %v19111_v26  ;;  %v1150_v3 = vmul.f32 %v9746_v7, %v19112_v36  ;;  %v1151_v40 = vmul.f32 %v9746_v7, %v19113_v58  ;;  %v19114_v14 = vld [vmem:[#allocation23_spill] sm:$0xff]  ;;  %v19120_v33 = vld [vmem:[#allocation29_spill] sm:$0xff]  ;;  %v19121_v51 = vld [vmem:[#allocation30_spill] sm:$0xff] }
 0x12a   : > { %v1152_v5 = vmul.f32 %v9746_v7, %v19114_v14  ;;  %v1153_v30 = vmul.f32 %v9746_v7, %v19115_v25  ;;  %v1154_v60 = vmul.f32 %v9746_v7, %v19116_v15  ;;  %v1155_v32 = vmul.f32 %v9746_v7, %v19117_v39  ;;  %v19118_v20 = vld [vmem:[#allocation27_spill] sm:$0xff]  ;;  %v19123_v41 = vld [vmem:[#allocation32_spill] sm:$0xff]  ;;  %v19124_v14 = vld [vmem:[#allocation34_spill] sm:$0xff] }
 0x12b   : > { %v1156_v38 = vmul.f32 %v9746_v7, %v19118_v20  ;;  %v1157_v62 = vmul.f32 %v9746_v7, %v19119_v37  ;;  %v1158_v42 = vmul.f32 %v9746_v7, %v19120_v33  ;;  %v1159_v26 = vmul.f32 %v9746_v7, %v19121_v51  ;;  %v19122_v18 = vld [vmem:[#allocation31_spill] sm:$0xff]  ;;  %v19125_v15 = vld [vmem:[#allocation21_spill] sm:$0xff] }
 0x12c   : > { %v1160_v36 = vmul.f32 %v9746_v7, %v19122_v18  ;;  %v1161_v58 = vmul.f32 %v9746_v7, %v19123_v41  ;;  %v1162_v25 = vmul.f32 %v9746_v7, %v19124_v14  ;;  %v1163_v39 = vmul.f32 %v9746_v7, %v19125_v15 }
 0x12d   : > { %v1165_v33 = vadd.f32 %v1137_v46, %v1077_v10  ;;  %v1166_v51 = vadd.f32 %v1138_v55, %v1078_v47  ;;  %v1167_v18 = vadd.f32 %v1139_v16, %v1079_v53  ;;  %v1168_v41 = vadd.f32 %v1140_v44, %v1080_v54 }
 0x12e   : > { %v1169_v14 = vadd.f32 %v1141_v1, %v1081_v63  ;;  %v1170_v15 = vadd.f32 %v1142_v59, %v1082_v6  ;;  %v1173_v10 = vadd.f32 %v1145_v22, %v1085_v27  ;;  %v1174_v46 = vadd.f32 %v1146_v29, %v1086_v31  ;;  %v19132_v29 = vld [vmem:[#allocation15_spill] sm:$0xff] }
 0x12f   : > { %v1175_v47 = vadd.f32 %v1147_v48, %v1087_v19  ;;  %v1176_v55 = vadd.f32 %v1148_v12, %v1088_v13  ;;  %v1177_v16 = vadd.f32 %v1149_v52, %v1089_v34  ;;  %v1178_v53 = vadd.f32 %v1150_v3, %v1090_v0  ;;  %v19127_v34 = vld [vmem:[#allocation10_spill] sm:$0xff]  ;;  %v19140_v52 = vld [vmem:[#allocation5_spill] sm:$0xff]  ;;  %v19141_v3 = vld [vmem:[#allocation23_spill] sm:$0xff] }
 0x130   : > { %v19126_v20 = vld [vmem:[#allocation8_spill] sm:$0xff]  ;;  %v1179_v44 = vadd.f32 %v1151_v40, %v1091_v49  ;;  %v1180_v54 = vadd.f32 %v1152_v5, %v1092_v57  ;;  %v1181_v1 = vadd.f32 %v1153_v30, %v1093_v21  ;;  %v1182_v63 = vadd.f32 %v1154_v60, %v1094_v50  ;;  %v19128_v49 = vld [vmem:[#allocation11_spill] sm:$0xff]  ;;  %v19131_v60 = vld [vmem:[#allocation14_spill] sm:$0xff] }
 0x131   : > { %v1164_v37 = vmul.f32 %v9746_v7, %v19126_v20  ;;  %v1171_v7 = vadd.f32 %v1143_v24, %v1083_v17  ;;  %v1172_v20 = vadd.f32 %v1144_v23, %v1084_v43  ;;  %v1183_v6 = vadd.f32 %v1155_v32, %v1095_v4  ;;  %v9777_v17 = vld [vmem:[%s18702_s1 + $0x40] sm:$0xff]  ;;  %v19129_v21 = vld [vmem:[#allocation12_spill] sm:$0xff]  ;;  %v19130_v4 = vld [vmem:[#allocation13_spill] sm:$0xff] }
 0x132   : > { %v1184_v59 = vadd.f32 %v1156_v38, %v1096_v8  ;;  %v1185_v24 = vadd.f32 %v1157_v62, %v1097_v28  ;;  %v1186_v23 = vadd.f32 %v1158_v42, %v1098_v2  ;;  %v1187_v43 = vadd.f32 %v1159_v26, %v1099_v56  ;;  %v19133_v2 = vld [vmem:[#allocation16_spill] sm:$0xff]  ;;  %v19135_v42 = vld [vmem:[#allocation17_spill] sm:$0xff]  ;;  %v19139_v12 = vld [vmem:[#allocation22_spill] sm:$0xff] }
 0x133   : > { %v1188_v22 = vadd.f32 %v1160_v36, %v1100_v35  ;;  %v1189_v27 = vadd.f32 %v1161_v58, %v1101_v45  ;;  %v1190_v31 = vadd.f32 %v1162_v25, %v1102_v11  ;;  %v1191_v19 = vadd.f32 %v1163_v39, %v1103_v9  ;;  %v19134_v35 = vld [vmem:[#allocation33_spill] sm:$0xff]  ;;  %v19136_v9 = vld [vmem:[#allocation35_spill] sm:$0xff]  ;;  %v9776_v62 = vld [vmem:[%s14780_s20 + $0x348] sm:$0xff] }
 0x134   : > { %v1192_v13 = vadd.f32 %v1164_v37, %v1104_v61  ;;  %v1225_v0 = vmul.f32 %v9777_v17, %v19127_v34  ;;  %v1226_v57 = vmul.f32 %v9777_v17, %v19128_v49  ;;  %v1227_v50 = vmul.f32 %v9777_v17, %v19129_v21  ;;  %v19137_v37 = vld [vmem:[#allocation36_spill] sm:$0xff]  ;;  %v19138_v38 = vld [vmem:[#allocation37_spill] sm:$0xff]  ;;  %v19144_v34 = vld [vmem:[#allocation26_spill] sm:$0xff] }
 0x135   : > { %v1228_v8 = vmul.f32 %v9777_v17, %v19130_v4  ;;  %v1229_v32 = vmul.f32 %v9777_v17, %v19131_v60  ;;  %v1230_v28 = vmul.f32 %v9777_v17, %v19132_v29  ;;  %v1231_v56 = vmul.f32 %v9777_v17, %v19133_v2  ;;  %v19142_v5 = vld [vmem:[#allocation24_spill] sm:$0xff]  ;;  %v19143_v30 = vld [vmem:[#allocation25_spill] sm:$0xff]  ;;  %v19145_v21 = vld [vmem:[#allocation27_spill] sm:$0xff] }
 0x136   : > { %v1232_v45 = vmul.f32 %v9777_v17, %v19134_v35  ;;  %v1233_v11 = vmul.f32 %v9777_v17, %v19135_v42  ;;  %v1234_v61 = vmul.f32 %v9777_v17, %v19136_v9  ;;  %v1235_v39 = vmul.f32 %v9777_v17, %v19137_v37  ;;  %v19146_v60 = vld [vmem:[#allocation28_spill] sm:$0xff]  ;;  %v19147_v2 = vld [vmem:[#allocation29_spill] sm:$0xff]  ;;  %v19148_v42 = vld [vmem:[#allocation30_spill] sm:$0xff] }
 0x137   : > { %v1236_v48 = vmul.f32 %v9777_v17, %v19138_v38  ;;  %v1237_v26 = vmul.f32 %v9777_v17, %v19139_v12  ;;  %v1238_v36 = vmul.f32 %v9777_v17, %v19140_v52  ;;  %v1239_v40 = vmul.f32 %v9777_v17, %v19141_v3  ;;  %v19149_v37 = vld [vmem:[#allocation31_spill] sm:$0xff]  ;;  %v19150_v12 = vld [vmem:[#allocation32_spill] sm:$0xff]  ;;  %v19151_v3 = vld [vmem:[#allocation34_spill] sm:$0xff] }
 0x138   : > { %v1240_v25 = vmul.f32 %v9777_v17, %v19142_v5  ;;  %v1241_v58 = vmul.f32 %v9777_v17, %v19143_v30  ;;  %v1242_v49 = vmul.f32 %v9777_v17, %v19144_v34  ;;  %v1243_v4 = vmul.f32 %v9777_v17, %v19145_v21  ;;  %v19152_v30 = vld [vmem:[#allocation21_spill] sm:$0xff]  ;;  %v19153_v21 = vld [vmem:[#allocation8_spill] sm:$0xff] }
 0x139   : > { %v1244_v29 = vmul.f32 %v9777_v17, %v19146_v60  ;;  %v1245_v35 = vmul.f32 %v9777_v17, %v19147_v2  ;;  %v1246_v9 = vmul.f32 %v9777_v17, %v19148_v42  ;;  %v1247_v38 = vmul.f32 %v9777_v17, %v19149_v37 }
 0x13a   : > { %v1248_v52 = vmul.f32 %v9777_v17, %v19150_v12  ;;  %v1249_v5 = vmul.f32 %v9777_v17, %v19151_v3  ;;  %v1250_v34 = vmul.f32 %v9777_v17, %v19152_v30  ;;  %v1251_v60 = vmul.f32 %v9777_v17, %v19153_v21 }
 0x13b   : > { %v1252_v2 = vmul.f32 %v9777_v17, %v9776_v62  ;;  %v1253_v42 = vadd.f32 %v1225_v0, %v1165_v33  ;;  %v1254_v37 = vadd.f32 %v1226_v57, %v1166_v51  ;;  %v1255_v12 = vadd.f32 %v1227_v50, %v1167_v18 }
 0x13c   : > { %v1256_v3 = vadd.f32 %v1228_v8, %v1168_v41  ;;  %v1257_v30 = vadd.f32 %v1229_v32, %v1169_v14  ;;  %v1258_v21 = vadd.f32 %v1230_v28, %v1170_v15  ;;  %v1259_v17 = vadd.f32 %v1231_v56, %v1171_v7 }
 0x13d   : > { %v1260_v62 = vadd.f32 %v1232_v45, %v1172_v20  ;;  %v1261_v0 = vadd.f32 %v1233_v11, %v1173_v10  ;;  %v1262_v33 = vadd.f32 %v1234_v61, %v1174_v46  ;;  %v1263_v51 = vadd.f32 %v1235_v39, %v1175_v47 }
 0x13e   : > { %v1264_v57 = vadd.f32 %v1236_v48, %v1176_v55  ;;  %v1265_v18 = vadd.f32 %v1237_v26, %v1177_v16  ;;  %v1266_v50 = vadd.f32 %v1238_v36, %v1178_v53  ;;  %v1267_v8 = vadd.f32 %v1239_v40, %v1179_v44  ;;  %v15520_v48 = vld [vmem:[%s14780_s20 + $0x78] sm:$0xff] }
 0x13f   : > { %v1268_v41 = vadd.f32 %v1240_v25, %v1180_v54  ;;  %v1269_v14 = vadd.f32 %v1241_v58, %v1181_v1  ;;  %v1270_v32 = vadd.f32 %v1242_v49, %v1182_v63  ;;  %v1271_v15 = vadd.f32 %v1243_v4, %v1183_v6  ;;  %v15523_v58 = vld [vmem:[%s14780_s20 + $0x80] sm:$0xff]  ;;  %v15526_v49 = vld [vmem:[%s14780_s20 + $0x88] sm:$0xff]  ;;  %v15529_v4 = vld [vmem:[%s14780_s20 + $0x90] sm:$0xff] }
 0x140   : > { %v1272_v28 = vadd.f32 %v1244_v29, %v1184_v59  ;;  %v1273_v7 = vadd.f32 %v1245_v35, %v1185_v24  ;;  %v1274_v56 = vadd.f32 %v1246_v9, %v1186_v23  ;;  %v1275_v20 = vadd.f32 %v1247_v38, %v1187_v43  ;;  %v1302_v23 = vld [vmem:[%s18703_s2] sm:$0xff]  ;;  %v9786_v43 = vld [vmem:[%s14780_s20 + $0x70] sm:$0xff]  ;;  %19154 = vst [vmem:[#allocation6_spill] sm:$0xff] %v15523_v58  ;;  %v15532_v38 = vld [vmem:[%s14780_s20 + $0x98] sm:$0xff] }
 0x141   : > { %v1276_v45 = vadd.f32 %v1248_v52, %v1188_v22  ;;  %v1277_v10 = vadd.f32 %v1249_v5, %v1189_v27  ;;  %v1278_v11 = vadd.f32 %v1250_v34, %v1190_v31  ;;  %v1279_v46 = vadd.f32 %v1251_v60, %v1191_v19  ;;  %v15516_v22 = vld [vmem:[%s18702_s1] sm:$0xff]  ;;  %19155 = vst [vmem:[#allocation7_spill] sm:$0xff] %v15526_v49  ;;  %v15538_v5 = vld [vmem:[%s14780_s20 + $0xa8] sm:$0xff]  ;;  %v15541_v34 = vld [vmem:[%s14780_s20 + $0xb0] sm:$0xff] }
 0x142   : > { %v1280_v61 = vadd.f32 %v1252_v2, %v1192_v13  ;;  %v1281_v39 = vmax.f32 %v1253_v42, %v1267_v8  ;;  %v1282_v47 = vmax.f32 %v1254_v37, %v1268_v41  ;;  %v1283_v55 = vmax.f32 %v1255_v12, %v1269_v14  ;;  %19156 = vst [vmem:[#allocation18_spill] sm:$0xff] %v15529_v4  ;;  %v15535_v52 = vld [vmem:[%s14780_s20 + $0xa0] sm:$0xff] }
 0x143   : > { %v1284_v16 = vmax.f32 %v1256_v3, %v1270_v32  ;;  %v1285_v53 = vmax.f32 %v1257_v30, %v1271_v15  ;;  %v1286_v44 = vmax.f32 %v1258_v21, %v1272_v28  ;;  %v1287_v54 = vmax.f32 %v1259_v17, %v1273_v7  ;;  %19157 = vst [vmem:[#allocation19_spill] sm:$0xff] %v15532_v38  ;;  %v15547_v3 = vld [vmem:[%s14780_s20 + $0xb8] sm:$0xff]  ;;  %v15550_v30 = vld [vmem:[%s14780_s20 + $0xc0] sm:$0xff]  ;;  %v15553_v21 = vld [vmem:[%s14780_s20 + $0xc8] sm:$0xff] }
 0x144   : > { %v1288_v1 = vmax.f32 %v1260_v62, %v1274_v56  ;;  %v1289_v63 = vmax.f32 %v1261_v0, %v1275_v20  ;;  %v1290_v6 = vmax.f32 %v1262_v33, %v1276_v45  ;;  %v1291_v59 = vmax.f32 %v1263_v51, %v1277_v10  ;;  %19158 = vst [vmem:[#allocation9_spill] sm:$0xff] %v15535_v52  ;;  %v15556_v33 = vld [vmem:[%s14780_s20 + $0xd0] sm:$0xff]  ;;  %v15559_v51 = vld [vmem:[%s14780_s20 + $0xd8] sm:$0xff]  ;;  %v15569_v32 = vld [vmem:[%s14780_s20 + $0x168] sm:$0xff] }
 0x145   : > { %v1292_v24 = vmax.f32 %v1264_v57, %v1278_v11  ;;  %v1293_v27 = vmax.f32 %v1265_v18, %v1279_v46  ;;  %v1294_v31 = vmax.f32 %v1266_v50, %v1280_v61  ;;  %v1295_v19 = vmax.f32 %v1281_v39, %v1282_v47  ;;  %19159 = vst [vmem:[#allocation20_spill] sm:$0xff] %v15538_v5  ;;  %v15562_v57 = vld [vmem:[%s14780_s20 + $0x160] sm:$0xff]  ;;  %v15572_v15 = vld [vmem:[%s14780_s20 + $0x170] sm:$0xff]  ;;  %v15583_v7 = vld [vmem:[%s14780_s20 + $0x178] sm:$0xff] }
 0x146   : > { %v1296_v13 = vmax.f32 %v1283_v55, %v1284_v16  ;;  %v1297_v26 = vmax.f32 %v1285_v53, %v1286_v44  ;;  %v1298_v36 = vmax.f32 %v1287_v54, %v1288_v1  ;;  %v1299_v40 = vmax.f32 %v1289_v63, %v1290_v6  ;;  %19160 = vst [vmem:[#allocation10_spill] sm:$0xff] %v15541_v34  ;;  %v15586_v56 = vld [vmem:[%s14780_s20 + $0x180] sm:$0xff]  ;;  %v15589_v20 = vld [vmem:[%s14780_s20 + $0x188] sm:$0xff]  ;;  %v15612_v46 = vld [vmem:[%s14780_s20 + $0x190] sm:$0xff] }
 0x147   : > { %v1300_v25 = vmax.f32 %v1291_v59, %v1292_v24  ;;  %v1301_v29 = vmax.f32 %v1293_v27, %v1294_v31  ;;  %v1303_v35 = vadd.f32 %v1302_v23, %v1295_v19  ;;  %v15544_v60 = vmul.f32 %v9786_v43, %v15516_v22  ;;  %19161 = vst [vmem:[#allocation11_spill] sm:$0xff] %v15547_v3  ;;  %v15615_v61 = vld [vmem:[%s14780_s20 + $0x198] sm:$0xff]  ;;  %v15618_v39 = vld [vmem:[%s14780_s20 + $0x1a0] sm:$0xff]  ;;  %v15639_v44 = vld [vmem:[%s14780_s20 + $0x1a8] sm:$0xff] }
 0x148   : > { %v1304_v9 = vadd.f32 %v1302_v23, %v1296_v13  ;;  %v1305_v2 = vadd.f32 %v1302_v23, %v1297_v26  ;;  %v1306_v42 = vadd.f32 %v1302_v23, %v1298_v36  ;;  %v1307_v37 = vadd.f32 %v1302_v23, %v1299_v40  ;;  %19162 = vst [vmem:[#allocation12_spill] sm:$0xff] %v15550_v30  ;;  %v15642_v54 = vld [vmem:[%s14780_s20 + $0x1b0] sm:$0xff]  ;;  %v15645_v1 = vld [vmem:[%s14780_s20 + $0x1b8] sm:$0xff]  ;;  %v15659_v43 = vld [vmem:[%s14780_s20 + $0x1c8] sm:$0xff] }
 0x149   : > { %v1308_v12 = vadd.f32 %v1302_v23, %v1300_v25  ;;  %19163 = vst [vmem:[#allocation13_spill] sm:$0xff] %v15553_v21  ;;  %v1309_v17 = vadd.f32 %v1302_v23, %v1301_v29  ;;  %v1310_v62 = vmax.f32 %v1303_v35, 0.0  ;;  %19164 = vst [vmem:[#allocation14_spill] sm:$0xff] %v15556_v33  ;;  %v15566_v18 = vmul.f32 %v15520_v48, %v15516_v22  ;;  %v15656_v23 = vld [vmem:[%s14780_s20 + $0x1c0] sm:$0xff]  ;;  %v9842_v26 = vld [vmem:[%s18702_s1 + $0x8] sm:$0xff] }
 0x14a   : > { %v1311_v0 = vmax.f32 %v1304_v9, 0.0  ;;  %19165 = vst [vmem:[#allocation15_spill] sm:$0xff] %v15559_v51  ;;  %19166 = vst [vmem:[#allocation16_spill] sm:$0xff] %v15562_v57  ;;  %v1312_v50 = vmax.f32 %v1305_v2, 0.0  ;;  %v1313_v8 = vmax.f32 %v1306_v42, 0.0  ;;  %v1314_v41 = vmax.f32 %v1307_v37, 0.0 }
 0x14b   : > { %v1315_v14 = vmax.f32 %v1308_v12, 0.0  ;;  %19167 = vst [vmem:[#allocation33_spill] sm:$0xff] %v15569_v32  ;;  %19168 = vst [vmem:[#allocation17_spill] sm:$0xff] %v15572_v15  ;;  %v1316_v28 = vmax.f32 %v1309_v17, 0.0  ;;  %v15593_v45 = vmul.f32 %v15523_v58, %v15516_v22  ;;  %v15597_v10 = vmul.f32 %v15526_v49, %v15516_v22 }
 0x14c   : > { %9779 = vst.msk [vmem:[%s15576_s19 + $0x88] sm:$0xff] %vm221_vm0, %v1310_v62  ;;  %9780 = vst.msk [vmem:[%s15576_s19 + $0x90] sm:$0xff] %vm221_vm0, %v1311_v0  ;;  %v15601_v11 = vmul.f32 %v15529_v4, %v15516_v22  ;;  %v15622_v47 = vmul.f32 %v15532_v38, %v15516_v22  ;;  %v15626_v55 = vmul.f32 %v15535_v52, %v15516_v22  ;;  %v15696_v0 = vld [vmem:[%s14780_s20 + $0xe0] sm:$0xff] }
 0x14d   : > { %19169 = vst [vmem:[#allocation35_spill] sm:$0xff] %v15583_v7  ;;  %19170 = vst [vmem:[#allocation36_spill] sm:$0xff] %v15586_v56  ;;  %v15630_v16 = vmul.f32 %v15538_v5, %v15516_v22  ;;  %v15634_v53 = vmul.f32 %v15541_v34, %v15516_v22  ;;  %v1367_v63 = vmul.f32 %v15547_v3, %v15516_v22 }
 0x14e   : > { %19171 = vst [vmem:[#allocation37_spill] sm:$0xff] %v15589_v20  ;;  %9781 = vst.msk [vmem:[%s15576_s19 + $0x98] sm:$0xff] %vm221_vm0, %v1312_v50  ;;  %v1368_v6 = vmul.f32 %v15550_v30, %v15516_v22  ;;  %v1369_v59 = vmul.f32 %v15553_v21, %v15516_v22  ;;  %v1370_v24 = vmul.f32 %v15556_v33, %v15516_v22 }
 0x14f   : > { %9782 = vst.msk [vmem:[%s15576_s19 + $0xa0] sm:$0xff] %vm221_vm0, %v1313_v8  ;;  %9783 = vst.msk [vmem:[%s15576_s19 + $0xa8] sm:$0xff] %vm221_vm0, %v1314_v41  ;;  %v1371_v27 = vmul.f32 %v15559_v51, %v15516_v22  ;;  %v1372_v31 = vmul.f32 %v15562_v57, %v15516_v22  ;;  %v1373_v19 = vmul.f32 %v15569_v32, %v15516_v22 }
 0x150   : > { %9784 = vst.msk [vmem:[%s15576_s19 + $0xb0] sm:$0xff] %vm221_vm0, %v1315_v14  ;;  %19172 = vst [vmem:[#allocation22_spill] sm:$0xff] %v15612_v46  ;;  %v1374_v13 = vmul.f32 %v15572_v15, %v15516_v22  ;;  %v1375_v36 = vmul.f32 %v15583_v7, %v15516_v22  ;;  %v1376_v40 = vmul.f32 %v15586_v56, %v15516_v22 }
 0x151   : > { %19173 = vst [vmem:[#allocation5_spill] sm:$0xff] %v15615_v61  ;;  %19174 = vst [vmem:[#allocation23_spill] sm:$0xff] %v15618_v39  ;;  %v1377_v25 = vmul.f32 %v15589_v20, %v15516_v22  ;;  %v1378_v29 = vmul.f32 %v15612_v46, %v15516_v22  ;;  %v1379_v35 = vmul.f32 %v15615_v61, %v15516_v22 }
 0x152   : > { %19175 = vst [vmem:[#allocation24_spill] sm:$0xff] %v15626_v55  ;;  %19176 = vst [vmem:[#allocation25_spill] sm:$0xff] %v15630_v16  ;;  %v1380_v9 = vmul.f32 %v15618_v39, %v15516_v22  ;;  %v1381_v2 = vmul.f32 %v15639_v44, %v15516_v22  ;;  %v1382_v42 = vmul.f32 %v15642_v54, %v15516_v22  ;;  %v15711_v55 = vld [vmem:[%s14780_s20 + $0x1d0] sm:$0xff] }
 0x153   : > { %19177 = vst [vmem:[#allocation26_spill] sm:$0xff] %v15634_v53  ;;  %9785 = vst.msk [vmem:[%s15576_s19 + $0xb8] sm:$0xff] %vm221_vm0, %v1316_v28  ;;  %v1383_v37 = vmul.f32 %v15645_v1, %v15516_v22  ;;  %v1384_v12 = vmul.f32 %v15656_v23, %v15516_v22  ;;  %v1385_v17 = vmul.f32 %v15659_v43, %v15516_v22 }
 0x154   : > { %19178 = vst [vmem:[#allocation27_spill] sm:$0xff] %v15639_v44  ;;  %19179 = vst [vmem:[#allocation28_spill] sm:$0xff] %v15642_v54  ;;  %v1417_v62 = vmul.f32 %v9842_v26, %v15520_v48  ;;  %v1418_v50 = vmul.f32 %v9842_v26, %v15523_v58  ;;  %v1419_v8 = vmul.f32 %v9842_v26, %v15526_v49 }
 0x155   : > { %19180 = vst [vmem:[#allocation29_spill] sm:$0xff] %v15645_v1  ;;  %19181 = vst [vmem:[#allocation30_spill] sm:$0xff] %v15656_v23  ;;  %v1420_v41 = vmul.f32 %v9842_v26, %v15529_v4  ;;  %v1421_v14 = vmul.f32 %v9842_v26, %v15532_v38  ;;  %v1422_v28 = vmul.f32 %v9842_v26, %v15535_v52 }
 0x156   : > { %19182 = vst [vmem:[#allocation31_spill] sm:$0xff] %v15659_v43  ;;  %19183 = vst [vmem:[#allocation32_spill] sm:$0xff] %v15696_v0  ;;  %v1423_v57 = vmul.f32 %v9842_v26, %v15538_v5  ;;  %v1424_v53 = vmul.f32 %v9842_v26, %v15541_v34  ;;  %v1425_v22 = vmul.f32 %v9842_v26, %v15547_v3 }
 0x157   : > { %v1426_v48 = vmul.f32 %v9842_v26, %v15550_v30  ;;  %v1427_v16 = vmul.f32 %v9842_v26, %v15553_v21  ;;  %v1428_v58 = vmul.f32 %v9842_v26, %v15556_v33  ;;  %v1429_v49 = vmul.f32 %v9842_v26, %v15559_v51  ;;  %19184 = vst [vmem:[#allocation34_spill] sm:$0xff] %v15711_v55 }
 0x158   : > { %v1430_v38 = vmul.f32 %v9842_v26, %v15696_v0  ;;  %v1431_v52 = vmul.f32 %v9842_v26, %v15569_v32  ;;  %v1432_v5 = vmul.f32 %v9842_v26, %v15572_v15  ;;  %v1433_v34 = vmul.f32 %v9842_v26, %v15583_v7 }
 0x159   : > { %v1434_v3 = vmul.f32 %v9842_v26, %v15586_v56  ;;  %v1435_v30 = vmul.f32 %v9842_v26, %v15589_v20  ;;  %v1436_v21 = vmul.f32 %v9842_v26, %v15612_v46  ;;  %v1437_v33 = vmul.f32 %v9842_v26, %v15615_v61 }
 0x15a   : > { %v1438_v51 = vmul.f32 %v9842_v26, %v15618_v39  ;;  %v1439_v4 = vmul.f32 %v9842_v26, %v15639_v44  ;;  %v1440_v0 = vmul.f32 %v9842_v26, %v15642_v54  ;;  %v1441_v32 = vmul.f32 %v9842_v26, %v15645_v1  ;;  %v19185_v1 = vld [vmem:[#allocation24_spill] sm:$0xff] }
 0x15b   : > { %v1442_v15 = vmul.f32 %v9842_v26, %v15656_v23  ;;  %v1443_v7 = vmul.f32 %v9842_v26, %v15659_v43  ;;  %v1444_v56 = vmul.f32 %v9842_v26, %v15711_v55  ;;  %v1445_v20 = vadd.f32 %v1417_v62, %v15544_v60  ;;  %v19186_v43 = vld [vmem:[#allocation25_spill] sm:$0xff]  ;;  %v19187_v55 = vld [vmem:[#allocation26_spill] sm:$0xff] }
 0x15c   : > { %v1446_v46 = vadd.f32 %v1418_v50, %v15566_v18  ;;  %v1447_v61 = vadd.f32 %v1419_v8, %v15593_v45  ;;  %v1448_v39 = vadd.f32 %v1420_v41, %v15597_v10  ;;  %v1449_v44 = vadd.f32 %v1421_v14, %v15601_v11  ;;  %v9871_v14 = vld [vmem:[%s18702_s1 + $0x10] sm:$0xff] }
 0x15d   : > { %v1450_v54 = vadd.f32 %v1422_v28, %v15622_v47  ;;  %v1451_v23 = vadd.f32 %v1423_v57, %v19185_v1  ;;  %v1452_v26 = vadd.f32 %v1424_v53, %v19186_v43  ;;  %v1453_v60 = vadd.f32 %v1425_v22, %v19187_v55  ;;  %v19204_v22 = vld [vmem:[#allocation36_spill] sm:$0xff] }
 0x15e   : > { %v1454_v62 = vadd.f32 %v1426_v48, %v1367_v63  ;;  %v1455_v18 = vadd.f32 %v1427_v16, %v1368_v6  ;;  %v1456_v50 = vadd.f32 %v1428_v58, %v1369_v59  ;;  %v1457_v8 = vadd.f32 %v1429_v49, %v1370_v24  ;;  %v19190_v59 = vld [vmem:[#allocation18_spill] sm:$0xff] }
 0x15f   : > { %v1458_v45 = vadd.f32 %v1430_v38, %v1371_v27  ;;  %v1459_v10 = vadd.f32 %v1431_v52, %v1372_v31  ;;  %v1460_v41 = vadd.f32 %v1432_v5, %v1373_v19  ;;  %v1461_v11 = vadd.f32 %v1433_v34, %v1374_v13  ;;  %v19188_v38 = vld [vmem:[#allocation6_spill] sm:$0xff]  ;;  %v9856_v5 = vld [vmem:[%s14780_s20 + $0xe8] sm:$0xff]  ;;  %v19189_v34 = vld [vmem:[#allocation7_spill] sm:$0xff] }
 0x160   : > { %v1462_v47 = vadd.f32 %v1434_v3, %v1375_v36  ;;  %v1463_v28 = vadd.f32 %v1435_v30, %v1376_v40  ;;  %v1464_v57 = vadd.f32 %v1436_v21, %v1377_v25  ;;  %v1465_v1 = vadd.f32 %v1437_v33, %v1378_v29  ;;  %v19191_v27 = vld [vmem:[#allocation19_spill] sm:$0xff]  ;;  %v19192_v30 = vld [vmem:[#allocation9_spill] sm:$0xff]  ;;  %v19193_v33 = vld [vmem:[#allocation20_spill] sm:$0xff] }
 0x161   : > { %v1466_v53 = vadd.f32 %v1438_v51, %v1379_v35  ;;  %v1467_v43 = vadd.f32 %v1439_v4, %v1380_v9  ;;  %v1468_v55 = vadd.f32 %v1440_v0, %v1381_v2  ;;  %v1469_v63 = vadd.f32 %v1441_v32, %v1382_v42  ;;  %v19194_v4 = vld [vmem:[#allocation10_spill] sm:$0xff]  ;;  %v19195_v32 = vld [vmem:[#allocation11_spill] sm:$0xff]  ;;  %v19200_v35 = vld [vmem:[#allocation32_spill] sm:$0xff] }
 0x162   : > { %v1470_v16 = vadd.f32 %v1442_v15, %v1383_v37  ;;  %v1471_v58 = vadd.f32 %v1443_v7, %v1384_v12  ;;  %v1472_v49 = vadd.f32 %v1444_v56, %v1385_v17  ;;  %v1504_v52 = vmul.f32 %v9871_v14, %v19188_v38  ;;  %v19196_v7 = vld [vmem:[#allocation12_spill] sm:$0xff]  ;;  %v19197_v56 = vld [vmem:[#allocation13_spill] sm:$0xff]  ;;  %v19198_v36 = vld [vmem:[#allocation14_spill] sm:$0xff] }
 0x163   : > { %v1505_v6 = vmul.f32 %v9871_v14, %v19189_v34  ;;  %v1506_v24 = vmul.f32 %v9871_v14, %v19190_v59  ;;  %v1507_v3 = vmul.f32 %v9871_v14, %v19191_v27  ;;  %v1508_v21 = vmul.f32 %v9871_v14, %v19192_v30  ;;  %v19199_v25 = vld [vmem:[#allocation15_spill] sm:$0xff]  ;;  %v15755_v2 = vld [vmem:[%s14780_s20 + $0x1d8] sm:$0xff]  ;;  %v19202_v37 = vld [vmem:[#allocation17_spill] sm:$0xff] }
 0x164   : > { %v1509_v51 = vmul.f32 %v9871_v14, %v19193_v33  ;;  %v1510_v31 = vmul.f32 %v9871_v14, %v19194_v4  ;;  %v1511_v15 = vmul.f32 %v9871_v14, %v19195_v32  ;;  %v1512_v19 = vmul.f32 %v9871_v14, %v19196_v7  ;;  %19201 = vst [vmem:[#allocation21_spill] sm:$0xff] %v15755_v2  ;;  %v19203_v17 = vld [vmem:[#allocation35_spill] sm:$0xff]  ;;  %v19205_v38 = vld [vmem:[#allocation37_spill] sm:$0xff]  ;;  %v19206_v59 = vld [vmem:[#allocation22_spill] sm:$0xff] }
 0x165   : > { %v1513_v13 = vmul.f32 %v9871_v14, %v19197_v56  ;;  %v1514_v40 = vmul.f32 %v9871_v14, %v19198_v36  ;;  %v1515_v29 = vmul.f32 %v9871_v14, %v19199_v25  ;;  %v1516_v9 = vmul.f32 %v9871_v14, %v19200_v35  ;;  %v19207_v30 = vld [vmem:[#allocation5_spill] sm:$0xff]  ;;  %v19208_v4 = vld [vmem:[#allocation23_spill] sm:$0xff]  ;;  %v19210_v36 = vld [vmem:[#allocation28_spill] sm:$0xff] }
 0x166   : > { %v1517_v42 = vmul.f32 %v9871_v14, %v9856_v5  ;;  %v1518_v12 = vmul.f32 %v9871_v14, %v19202_v37  ;;  %v1519_v0 = vmul.f32 %v9871_v14, %v19203_v17  ;;  %v1520_v48 = vmul.f32 %v9871_v14, %v19204_v22  ;;  %v19209_v7 = vld [vmem:[#allocation27_spill] sm:$0xff]  ;;  %v19211_v35 = vld [vmem:[#allocation29_spill] sm:$0xff]  ;;  %v19212_v2 = vld [vmem:[#allocation30_spill] sm:$0xff] }
 0x167   : > { %v1521_v34 = vmul.f32 %v9871_v14, %v19205_v38  ;;  %v1522_v27 = vmul.f32 %v9871_v14, %v19206_v59  ;;  %v1523_v33 = vmul.f32 %v9871_v14, %v19207_v30  ;;  %v1524_v32 = vmul.f32 %v9871_v14, %v19208_v4  ;;  %v19213_v17 = vld [vmem:[#allocation31_spill] sm:$0xff]  ;;  %v19214_v38 = vld [vmem:[#allocation34_spill] sm:$0xff] }
 0x168   : > { %v1525_v56 = vmul.f32 %v9871_v14, %v19209_v7  ;;  %v1526_v25 = vmul.f32 %v9871_v14, %v19210_v36  ;;  %v1527_v5 = vmul.f32 %v9871_v14, %v19211_v35  ;;  %v1528_v37 = vmul.f32 %v9871_v14, %v19212_v2 }
 0x169   : > { %v1529_v22 = vmul.f32 %v9871_v14, %v19213_v17  ;;  %v1530_v59 = vmul.f32 %v9871_v14, %v19214_v38  ;;  %v15771_v7 = vadd.f32 %v1504_v52, %v1445_v20  ;;  %v15773_v36 = vadd.f32 %v1505_v6, %v1446_v46  ;;  %v15844_v6 = vld [vmem:[%s14780_s20 + $0x270] sm:$0xff] }
 0x16a   : > { %v15775_v35 = vadd.f32 %v1506_v24, %v1447_v61  ;;  %v15777_v2 = vadd.f32 %v1507_v3, %v1448_v39  ;;  %v15779_v17 = vadd.f32 %v1508_v21, %v1449_v44  ;;  %v15781_v38 = vadd.f32 %v1509_v51, %v1450_v54  ;;  %19225 = vst [vmem:[#allocation9_spill] sm:$0xff] %v15844_v6  ;;  %v19227_v24 = vld [vmem:[#allocation17_spill] sm:$0xff]  ;;  %v19228_v3 = vld [vmem:[#allocation35_spill] sm:$0xff]  ;;  %v19229_v51 = vld [vmem:[#allocation36_spill] sm:$0xff] }
 0x16b   : > { %v19215_v30 = vld [vmem:[#allocation21_spill] sm:$0xff]  ;;  %19216 = vst [vmem:[#allocation8_spill] sm:$0xff] %v15771_v7  ;;  %v15787_v20 = vadd.f32 %v1512_v19, %v1453_v60  ;;  %v15789_v52 = vadd.f32 %v1513_v13, %v1454_v62  ;;  %v15791_v7 = vadd.f32 %v1514_v40, %v1455_v18  ;;  %v15793_v46 = vadd.f32 %v1515_v29, %v1456_v50  ;;  %v15854_v19 = vld [vmem:[%s14780_s20 + $0x280] sm:$0xff]  ;;  %v15857_v13 = vld [vmem:[%s14780_s20 + $0x288] sm:$0xff] }
 0x16c   : > { %v1531_v4 = vmul.f32 %v9871_v14, %v19215_v30  ;;  %v15783_v14 = vadd.f32 %v1510_v31, %v1451_v23  ;;  %v15785_v30 = vadd.f32 %v1511_v15, %v1452_v26  ;;  %v15795_v61 = vadd.f32 %v1516_v9, %v1457_v8  ;;  %v9902_v26 = vld [vmem:[%s18702_s1 + $0x18] sm:$0xff]  ;;  %19231 = vst [vmem:[#allocation10_spill] sm:$0xff] %v15854_v19  ;;  %v19233_v40 = vld [vmem:[#allocation37_spill] sm:$0xff] }
 0x16d   : > { %v15797_v39 = vadd.f32 %v1517_v42, %v1458_v45  ;;  %v15799_v44 = vadd.f32 %v1518_v12, %v1459_v10  ;;  %v15801_v54 = vadd.f32 %v1519_v0, %v1460_v41  ;;  %v15803_v23 = vadd.f32 %v1520_v48, %v1461_v11  ;;  %v15851_v15 = vld [vmem:[%s14780_s20 + $0x278] sm:$0xff]  ;;  %19232 = vst [vmem:[#allocation11_spill] sm:$0xff] %v15857_v13  ;;  %v19236_v0 = vld [vmem:[#allocation23_spill] sm:$0xff]  ;;  %v15864_v48 = vld [vmem:[%s14780_s20 + $0x290] sm:$0xff] }
 0x16e   : > { %v15808_v60 = vadd.f32 %v1521_v34, %v1462_v47  ;;  %v15810_v62 = vadd.f32 %v1522_v27, %v1463_v28  ;;  %v15812_v18 = vadd.f32 %v1523_v33, %v1464_v57  ;;  %v15814_v50 = vadd.f32 %v1524_v32, %v1465_v1  ;;  %v15831_v57 = vld [vmem:[%s14780_s20 + $0x250] sm:$0xff]  ;;  %v15834_v1 = vld [vmem:[%s14780_s20 + $0x258] sm:$0xff]  ;;  %19230 = vst [vmem:[#allocation20_spill] sm:$0xff] %v15851_v15  ;;  %v19240_v27 = vld [vmem:[#allocation27_spill] sm:$0xff] }
 0x16f   : > { %v15816_v8 = vadd.f32 %v1525_v56, %v1466_v53  ;;  %v15818_v45 = vadd.f32 %v1526_v25, %v1467_v43  ;;  %v15820_v10 = vadd.f32 %v1527_v5, %v1468_v55  ;;  %v15822_v41 = vadd.f32 %v1528_v37, %v1469_v63  ;;  %19220 = vst [vmem:[#allocation6_spill] sm:$0xff] %v15831_v57  ;;  %v19222_v53 = vld [vmem:[#allocation16_spill] sm:$0xff]  ;;  %v15838_v55 = vld [vmem:[%s14780_s20 + $0x260] sm:$0xff]  ;;  %v19234_v9 = vld [vmem:[#allocation22_spill] sm:$0xff] }
 0x170   : > { %v15824_v11 = vadd.f32 %v1529_v22, %v1470_v16  ;;  %v15826_v47 = vadd.f32 %v1530_v59, %v1471_v58  ;;  %v15828_v28 = vadd.f32 %v1531_v4, %v1472_v49  ;;  %19221 = vst [vmem:[#allocation7_spill] sm:$0xff] %v15834_v1  ;;  %v1591_v43 = vmul.f32 %v9902_v26, %v19222_v53  ;;  %v15841_v63 = vld [vmem:[%s14780_s20 + $0x268] sm:$0xff]  ;;  %v19226_v16 = vld [vmem:[#allocation33_spill] sm:$0xff]  ;;  %v15867_v34 = vld [vmem:[%s14780_s20 + $0x298] sm:$0xff] }
 0x171   : > { %19223 = vst [vmem:[#allocation18_spill] sm:$0xff] %v15838_v55  ;;  %19224 = vst [vmem:[#allocation19_spill] sm:$0xff] %v15841_v63  ;;  %v1592_v58 = vmul.f32 %v9902_v26, %v19226_v16  ;;  %v1593_v49 = vmul.f32 %v9902_v26, %v19227_v24  ;;  %v1594_v21 = vmul.f32 %v9902_v26, %v19228_v3  ;;  %v19235_v37 = vld [vmem:[#allocation5_spill] sm:$0xff]  ;;  %v15870_v59 = vld [vmem:[%s14780_s20 + $0x2a0] sm:$0xff] }
 0x172   : > { %19217 = vst [vmem:[#allocation24_spill] sm:$0xff] %v15824_v11  ;;  %19218 = vst [vmem:[#allocation25_spill] sm:$0xff] %v15826_v47  ;;  %v1595_v31 = vmul.f32 %v9902_v26, %v19229_v51  ;;  %v1596_v29 = vmul.f32 %v9902_v26, %v19233_v40  ;;  %v1597_v42 = vmul.f32 %v9902_v26, %v19234_v9  ;;  %v19241_v4 = vld [vmem:[#allocation28_spill] sm:$0xff]  ;;  %v19242_v56 = vld [vmem:[#allocation29_spill] sm:$0xff] }
 0x173   : > { %19219 = vst [vmem:[#allocation26_spill] sm:$0xff] %v15828_v28  ;;  %v1598_v12 = vmul.f32 %v9902_v26, %v19235_v37  ;;  %v1599_v22 = vmul.f32 %v9902_v26, %v19236_v0  ;;  %19237 = vst [vmem:[#allocation12_spill] sm:$0xff] %v15864_v48  ;;  %v1600_v33 = vmul.f32 %v9902_v26, %v19240_v27  ;;  %v19243_v5 = vld [vmem:[#allocation30_spill] sm:$0xff]  ;;  %v15877_v40 = vld [vmem:[%s14780_s20 + $0x2a8] sm:$0xff] }
 0x174   : > { %19238 = vst [vmem:[#allocation13_spill] sm:$0xff] %v15867_v34  ;;  %19239 = vst [vmem:[#allocation14_spill] sm:$0xff] %v15870_v59  ;;  %v1601_v32 = vmul.f32 %v9902_v26, %v19241_v4  ;;  %v1602_v25 = vmul.f32 %v9902_v26, %v19242_v56  ;;  %v1603_v53 = vmul.f32 %v9902_v26, %v19243_v5  ;;  %v15880_v9 = vld [vmem:[%s14780_s20 + $0x2b0] sm:$0xff]  ;;  %v15883_v37 = vld [vmem:[%s14780_s20 + $0x2b8] sm:$0xff] }
 0x175   : > { %19244 = vst [vmem:[#allocation15_spill] sm:$0xff] %v15877_v40  ;;  %19245 = vst [vmem:[#allocation32_spill] sm:$0xff] %v15880_v9  ;;  %v19247_v0 = vld [vmem:[#allocation31_spill] sm:$0xff]  ;;  %v1605_v3 = vmul.f32 %v9902_v26, %v15831_v57  ;;  %v1606_v24 = vmul.f32 %v9902_v26, %v15834_v1  ;;  %v1607_v27 = vmul.f32 %v9902_v26, %v15838_v55  ;;  %v19248_v11 = vld [vmem:[#allocation8_spill] sm:$0xff] }
 0x176   : > { %19246 = vst [vmem:[#allocation16_spill] sm:$0xff] %v15883_v37  ;;  %v1604_v51 = vmul.f32 %v9902_v26, %v19247_v0  ;;  %v1608_v4 = vmul.f32 %v9902_v26, %v15841_v63  ;;  %v1609_v56 = vmul.f32 %v9902_v26, %v15844_v6  ;;  %v1610_v5 = vmul.f32 %v9902_v26, %v15851_v15 }
 0x177   : > { %v1611_v16 = vmul.f32 %v9902_v26, %v15854_v19  ;;  %v1612_v28 = vmul.f32 %v9902_v26, %v15857_v13  ;;  %v1613_v47 = vmul.f32 %v9902_v26, %v15864_v48  ;;  %v1614_v0 = vmul.f32 %v9902_v26, %v15867_v34 }
 0x178   : > { %v1615_v57 = vmul.f32 %v9902_v26, %v15870_v59  ;;  %v1616_v1 = vmul.f32 %v9902_v26, %v15877_v40  ;;  %v1617_v55 = vmul.f32 %v9902_v26, %v15880_v9  ;;  %v1618_v63 = vmul.f32 %v9902_v26, %v15883_v37 }
 0x179   : > { %v1619_v6 = vadd.f32 %v1591_v43, %v19248_v11  ;;  %v1620_v15 = vadd.f32 %v1592_v58, %v15773_v36  ;;  %v1621_v19 = vadd.f32 %v1593_v49, %v15775_v35  ;;  %v1622_v13 = vadd.f32 %v1594_v21, %v15777_v2  ;;  %v19250_v58 = vld [vmem:[#allocation25_spill] sm:$0xff] }
 0x17a   : > { %v1623_v48 = vadd.f32 %v1595_v31, %v15779_v17  ;;  %v1624_v34 = vadd.f32 %v1596_v29, %v15781_v38  ;;  %v1625_v59 = vadd.f32 %v1597_v42, %v15783_v14  ;;  %v1626_v40 = vadd.f32 %v1598_v12, %v15785_v30  ;;  %v9933_v30 = vld [vmem:[%s18702_s1 + $0x20] sm:$0xff]  ;;  %v19261_v42 = vld [vmem:[#allocation28_spill] sm:$0xff]  ;;  %v19262_v12 = vld [vmem:[#allocation29_spill] sm:$0xff] }
 0x17b   : > { %v1627_v9 = vadd.f32 %v1599_v22, %v15787_v20  ;;  %v1628_v26 = vadd.f32 %v1600_v33, %v15789_v52  ;;  %v1629_v11 = vadd.f32 %v1601_v32, %v15791_v7  ;;  %v1630_v36 = vadd.f32 %v1602_v25, %v15793_v46  ;;  %v19260_v29 = vld [vmem:[#allocation27_spill] sm:$0xff]  ;;  %v19263_v22 = vld [vmem:[#allocation30_spill] sm:$0xff] }
 0x17c   : > { %v1631_v35 = vadd.f32 %v1603_v53, %v15795_v61  ;;  %v1632_v2 = vadd.f32 %v1604_v51, %v15797_v39  ;;  %v1633_v17 = vadd.f32 %v1605_v3, %v15799_v44  ;;  %v1634_v38 = vadd.f32 %v1606_v24, %v15801_v54  ;;  %v19264_v33 = vld [vmem:[#allocation31_spill] sm:$0xff] }
 0x17d   : > { %v1635_v14 = vadd.f32 %v1607_v27, %v15803_v23  ;;  %v1636_v20 = vadd.f32 %v1608_v4, %v15808_v60  ;;  %v1637_v7 = vadd.f32 %v1609_v56, %v15810_v62  ;;  %v1638_v52 = vadd.f32 %v1610_v5, %v15812_v18  ;;  %v19249_v23 = vld [vmem:[#allocation24_spill] sm:$0xff]  ;;  %v19251_v60 = vld [vmem:[#allocation26_spill] sm:$0xff]  ;;  %v19252_v62 = vld [vmem:[#allocation33_spill] sm:$0xff] }
 0x17e   : > { %v1639_v46 = vadd.f32 %v1611_v16, %v15814_v50  ;;  %v1640_v61 = vadd.f32 %v1612_v28, %v15816_v8  ;;  %v1641_v39 = vadd.f32 %v1613_v47, %v15818_v45  ;;  %v1642_v44 = vadd.f32 %v1614_v0, %v15820_v10  ;;  %v19253_v18 = vld [vmem:[#allocation17_spill] sm:$0xff]  ;;  %v19254_v50 = vld [vmem:[#allocation35_spill] sm:$0xff]  ;;  %v19255_v8 = vld [vmem:[#allocation36_spill] sm:$0xff] }
 0x17f   : > { %v1643_v54 = vadd.f32 %v1615_v57, %v15822_v41  ;;  %v1644_v43 = vadd.f32 %v1616_v1, %v19249_v23  ;;  %v1645_v24 = vadd.f32 %v1617_v55, %v19250_v58  ;;  %v1646_v49 = vadd.f32 %v1618_v63, %v19251_v60  ;;  %v19256_v45 = vld [vmem:[#allocation37_spill] sm:$0xff]  ;;  %v19257_v10 = vld [vmem:[#allocation22_spill] sm:$0xff]  ;;  %v19259_v1 = vld [vmem:[#allocation23_spill] sm:$0xff] }
 0x180   : > { %v1678_v3 = vmul.f32 %v9933_v30, %v19252_v62  ;;  %v1679_v21 = vmul.f32 %v9933_v30, %v19253_v18  ;;  %v1680_v16 = vmul.f32 %v9933_v30, %v19254_v50  ;;  %v1681_v28 = vmul.f32 %v9933_v30, %v19255_v8  ;;  %v19258_v41 = vld [vmem:[#allocation5_spill] sm:$0xff]  ;;  %v15945_v32 = vld [vmem:[%s14780_s20 + $0x2c0] sm:$0xff]  ;;  %v19266_v56 = vld [vmem:[#allocation34_spill] sm:$0xff] }
 0x181   : > { %v1682_v47 = vmul.f32 %v9933_v30, %v19256_v45  ;;  %v1683_v51 = vmul.f32 %v9933_v30, %v19257_v10  ;;  %v1684_v57 = vmul.f32 %v9933_v30, %v19258_v41  ;;  %v1685_v31 = vmul.f32 %v9933_v30, %v19259_v1  ;;  %19265 = vst [vmem:[#allocation8_spill] sm:$0xff] %v15945_v32  ;;  %v19267_v5 = vld [vmem:[#allocation7_spill] sm:$0xff]  ;;  %v19268_v23 = vld [vmem:[#allocation18_spill] sm:$0xff]  ;;  %v19270_v1 = vld [vmem:[#allocation9_spill] sm:$0xff] }
 0x182   : > { %v1686_v55 = vmul.f32 %v9933_v30, %v19260_v29  ;;  %v1687_v63 = vmul.f32 %v9933_v30, %v19261_v42  ;;  %v1688_v0 = vmul.f32 %v9933_v30, %v19262_v12  ;;  %v1689_v27 = vmul.f32 %v9933_v30, %v19263_v22  ;;  %v19269_v60 = vld [vmem:[#allocation19_spill] sm:$0xff]  ;;  %v19271_v41 = vld [vmem:[#allocation20_spill] sm:$0xff]  ;;  %v19272_v10 = vld [vmem:[#allocation10_spill] sm:$0xff] }
 0x183   : > { %v1690_v4 = vmul.f32 %v9933_v30, %v19264_v33  ;;  %v1691_v25 = vmul.f32 %v9933_v30, %v19266_v56  ;;  %v1692_v53 = vmul.f32 %v9933_v30, %v19267_v5  ;;  %v1693_v58 = vmul.f32 %v9933_v30, %v19268_v23  ;;  %v19273_v45 = vld [vmem:[#allocation11_spill] sm:$0xff]  ;;  %v19274_v8 = vld [vmem:[#allocation12_spill] sm:$0xff]  ;;  %v19275_v50 = vld [vmem:[#allocation13_spill] sm:$0xff] }
 0x184   : > { %v1694_v62 = vmul.f32 %v9933_v30, %v19269_v60  ;;  %v1695_v29 = vmul.f32 %v9933_v30, %v19270_v1  ;;  %v1696_v42 = vmul.f32 %v9933_v30, %v19271_v41  ;;  %v1697_v12 = vmul.f32 %v9933_v30, %v19272_v10  ;;  %v19276_v32 = vld [vmem:[#allocation14_spill] sm:$0xff]  ;;  %v19277_v37 = vld [vmem:[#allocation15_spill] sm:$0xff]  ;;  %v19278_v23 = vld [vmem:[#allocation32_spill] sm:$0xff] }
 0x185   : > { %v1698_v22 = vmul.f32 %v9933_v30, %v19273_v45  ;;  %v1699_v33 = vmul.f32 %v9933_v30, %v19274_v8  ;;  %v1700_v18 = vmul.f32 %v9933_v30, %v19275_v50  ;;  %v1701_v56 = vmul.f32 %v9933_v30, %v19276_v32  ;;  %v19279_v1 = vld [vmem:[#allocation16_spill] sm:$0xff] }
 0x186   : > { %v1702_v5 = vmul.f32 %v9933_v30, %v19277_v37  ;;  %v1703_v60 = vmul.f32 %v9933_v30, %v19278_v23  ;;  %v1704_v41 = vmul.f32 %v9933_v30, %v19279_v1  ;;  %v1706_v8 = vadd.f32 %v1678_v3, %v1619_v6 }
 0x187   : > { %v1707_v50 = vadd.f32 %v1679_v21, %v1620_v15  ;;  %v1708_v32 = vadd.f32 %v1680_v16, %v1621_v19  ;;  %v1709_v37 = vadd.f32 %v1681_v28, %v1622_v13  ;;  %v1710_v23 = vadd.f32 %v1682_v47, %v1623_v48  ;;  %v9964_v48 = vld [vmem:[%s18702_s1 + $0x28] sm:$0xff] }
 0x188   : > { %v19280_v10 = vld [vmem:[#allocation8_spill] sm:$0xff]  ;;  %v1711_v1 = vadd.f32 %v1683_v51, %v1624_v34  ;;  %v1714_v3 = vadd.f32 %v1686_v55, %v1627_v9  ;;  %v1715_v6 = vadd.f32 %v1687_v63, %v1628_v26  ;;  %v1716_v15 = vadd.f32 %v1688_v0, %v1629_v11  ;;  %v19284_v0 = vld [vmem:[#allocation37_spill] sm:$0xff] }
 0x189   : > { %v1705_v45 = vmul.f32 %v9933_v30, %v19280_v10  ;;  %v1712_v10 = vadd.f32 %v1684_v57, %v1625_v59  ;;  %v1713_v30 = vadd.f32 %v1685_v31, %v1626_v40  ;;  %v1717_v21 = vadd.f32 %v1689_v27, %v1630_v36 }
 0x18a   : > { %v1718_v16 = vadd.f32 %v1690_v4, %v1631_v35  ;;  %v1719_v19 = vadd.f32 %v1691_v25, %v1632_v2  ;;  %v1720_v13 = vadd.f32 %v1692_v53, %v1633_v17  ;;  %v1721_v28 = vadd.f32 %v1693_v58, %v1634_v38  ;;  %v19281_v35 = vld [vmem:[#allocation17_spill] sm:$0xff]  ;;  %v19282_v17 = vld [vmem:[#allocation35_spill] sm:$0xff]  ;;  %v19296_v25 = vld [vmem:[#allocation18_spill] sm:$0xff] }
 0x18b   : > { %v1722_v47 = vadd.f32 %v1694_v62, %v1635_v14  ;;  %v1723_v34 = vadd.f32 %v1695_v29, %v1636_v20  ;;  %v1724_v51 = vadd.f32 %v1696_v42, %v1637_v7  ;;  %v1725_v57 = vadd.f32 %v1697_v12, %v1638_v52  ;;  %v19283_v14 = vld [vmem:[#allocation36_spill] sm:$0xff]  ;;  %v19285_v20 = vld [vmem:[#allocation22_spill] sm:$0xff]  ;;  %v19286_v52 = vld [vmem:[#allocation5_spill] sm:$0xff] }
 0x18c   : > { %v1726_v59 = vadd.f32 %v1698_v22, %v1639_v46  ;;  %v1727_v31 = vadd.f32 %v1699_v33, %v1640_v61  ;;  %v1728_v40 = vadd.f32 %v1700_v18, %v1641_v39  ;;  %v1729_v9 = vadd.f32 %v1701_v56, %v1642_v44  ;;  %v19287_v61 = vld [vmem:[#allocation23_spill] sm:$0xff]  ;;  %v19293_v12 = vld [vmem:[#allocation34_spill] sm:$0xff]  ;;  %v15979_v33 = vld [vmem:[%s14780_s20 + $0x2c8] sm:$0xff] }
 0x18d   : > { %v1730_v55 = vadd.f32 %v1702_v5, %v1643_v54  ;;  %v1731_v26 = vadd.f32 %v1703_v60, %v1644_v43  ;;  %v1732_v11 = vadd.f32 %v1704_v41, %v1645_v24  ;;  %v1733_v36 = vadd.f32 %v1705_v45, %v1646_v49  ;;  %v19288_v44 = vld [vmem:[#allocation27_spill] sm:$0xff]  ;;  %v19289_v43 = vld [vmem:[#allocation28_spill] sm:$0xff]  ;;  %v19290_v24 = vld [vmem:[#allocation29_spill] sm:$0xff]  ;;  %19294 = vst [vmem:[#allocation24_spill] sm:$0xff] %v15979_v33 }
 0x18e   : > { %v1765_v2 = vmul.f32 %v9964_v48, %v19281_v35  ;;  %v1766_v38 = vmul.f32 %v9964_v48, %v19282_v17  ;;  %v1767_v63 = vmul.f32 %v9964_v48, %v19283_v14  ;;  %v1768_v27 = vmul.f32 %v9964_v48, %v19284_v0  ;;  %v19291_v45 = vld [vmem:[#allocation30_spill] sm:$0xff]  ;;  %v19292_v29 = vld [vmem:[#allocation31_spill] sm:$0xff]  ;;  %v19295_v4 = vld [vmem:[#allocation21_spill] sm:$0xff] }
 0x18f   : > { %v1769_v7 = vmul.f32 %v9964_v48, %v19285_v20  ;;  %v1770_v46 = vmul.f32 %v9964_v48, %v19286_v52  ;;  %v1771_v39 = vmul.f32 %v9964_v48, %v19287_v61  ;;  %v1772_v54 = vmul.f32 %v9964_v48, %v19288_v44  ;;  %v19297_v53 = vld [vmem:[#allocation19_spill] sm:$0xff]  ;;  %v19298_v60 = vld [vmem:[#allocation9_spill] sm:$0xff]  ;;  %v19299_v35 = vld [vmem:[#allocation20_spill] sm:$0xff] }
 0x190   : > { %v1773_v18 = vmul.f32 %v9964_v48, %v19289_v43  ;;  %v1774_v49 = vmul.f32 %v9964_v48, %v19290_v24  ;;  %v1775_v41 = vmul.f32 %v9964_v48, %v19291_v45  ;;  %v1776_v42 = vmul.f32 %v9964_v48, %v19292_v29  ;;  %v19300_v14 = vld [vmem:[#allocation10_spill] sm:$0xff]  ;;  %v19301_v20 = vld [vmem:[#allocation11_spill] sm:$0xff]  ;;  %v19302_v61 = vld [vmem:[#allocation12_spill] sm:$0xff] }
 0x191   : > { %v1777_v22 = vmul.f32 %v9964_v48, %v19293_v12  ;;  %v1778_v56 = vmul.f32 %v9964_v48, %v19295_v4  ;;  %v1779_v5 = vmul.f32 %v9964_v48, %v19296_v25  ;;  %v1780_v58 = vmul.f32 %v9964_v48, %v19297_v53  ;;  %v19303_v43 = vld [vmem:[#allocation13_spill] sm:$0xff]  ;;  %v19304_v45 = vld [vmem:[#allocation14_spill] sm:$0xff]  ;;  %v19305_v12 = vld [vmem:[#allocation15_spill] sm:$0xff] }
 0x192   : > { %v1781_v62 = vmul.f32 %v9964_v48, %v19298_v60  ;;  %v1782_v17 = vmul.f32 %v9964_v48, %v19299_v35  ;;  %v1783_v0 = vmul.f32 %v9964_v48, %v19300_v14  ;;  %v1784_v52 = vmul.f32 %v9964_v48, %v19301_v20  ;;  %v19306_v33 = vld [vmem:[#allocation32_spill] sm:$0xff] }
 0x193   : > { %v1785_v44 = vmul.f32 %v9964_v48, %v19302_v61  ;;  %v1786_v24 = vmul.f32 %v9964_v48, %v19303_v43  ;;  %v1787_v29 = vmul.f32 %v9964_v48, %v19304_v45  ;;  %v1788_v4 = vmul.f32 %v9964_v48, %v19305_v12  ;;  %v19307_v53 = vld [vmem:[#allocation16_spill] sm:$0xff] }
 0x194   : > { %v1789_v25 = vmul.f32 %v9964_v48, %v19306_v33  ;;  %v1790_v60 = vmul.f32 %v9964_v48, %v19307_v53  ;;  %v19308_v35 = vld [vmem:[#allocation8_spill] sm:$0xff]  ;;  %v15996_v43 = vadd.f32 %v1765_v2, %v1706_v8  ;;  %v15998_v45 = vadd.f32 %v1766_v38, %v1707_v50  ;;  %v16061_v38 = vld [vmem:[%s14780_s20 + $0x350] sm:$0xff] }
 0x195   : > { %v1791_v14 = vmul.f32 %v9964_v48, %v19308_v35  ;;  %v19309_v20 = vld [vmem:[#allocation24_spill] sm:$0xff]  ;;  %v16000_v12 = vadd.f32 %v1767_v63, %v1708_v32  ;;  %v16002_v33 = vadd.f32 %v1768_v27, %v1709_v37  ;;  %v16004_v53 = vadd.f32 %v1769_v7, %v1710_v23  ;;  %19316 = vst [vmem:[#allocation36_spill] sm:$0xff] %v16061_v38 }
 0x196   : > { %v1792_v61 = vmul.f32 %v9964_v48, %v19309_v20  ;;  %19310 = vst [vmem:[#allocation25_spill] sm:$0xff] %v15996_v43  ;;  %v16006_v35 = vadd.f32 %v1770_v46, %v1711_v1  ;;  %v16008_v20 = vadd.f32 %v1771_v39, %v1712_v10  ;;  %v16010_v48 = vadd.f32 %v1772_v54, %v1713_v30  ;;  %v9995_v30 = vld [vmem:[%s18702_s1 + $0x30] sm:$0xff]  ;;  %v16074_v54 = vld [vmem:[%s14780_s20 + $0x368] sm:$0xff] }
 0x197   : > { %v16012_v2 = vadd.f32 %v1773_v18, %v1714_v3  ;;  %v16014_v8 = vadd.f32 %v1774_v49, %v1715_v6  ;;  %v16016_v43 = vadd.f32 %v1775_v41, %v1716_v15  ;;  %v16018_v50 = vadd.f32 %v1776_v42, %v1717_v21  ;;  %v19322_v46 = vld [vmem:[#allocation9_spill] sm:$0xff]  ;;  %19323 = vst [vmem:[#allocation5_spill] sm:$0xff] %v16074_v54  ;;  %v16080_v49 = vld [vmem:[%s14780_s20 + $0x378] sm:$0xff]  ;;  %v19326_v41 = vld [vmem:[#allocation20_spill] sm:$0xff] }
 0x198   : > { %v16020_v32 = vadd.f32 %v1777_v22, %v1718_v16  ;;  %v16022_v37 = vadd.f32 %v1778_v56, %v1719_v19  ;;  %v16024_v23 = vadd.f32 %v1779_v5, %v1720_v13  ;;  %v16026_v10 = vadd.f32 %v1780_v58, %v1721_v28  ;;  %v16077_v18 = vld [vmem:[%s14780_s20 + $0x370] sm:$0xff]  ;;  %19325 = vst [vmem:[#allocation27_spill] sm:$0xff] %v16080_v49  ;;  %v19327_v22 = vld [vmem:[#allocation10_spill] sm:$0xff]  ;;  %v19329_v58 = vld [vmem:[#allocation12_spill] sm:$0xff] }
 0x199   : > { %v16028_v1 = vadd.f32 %v1781_v62, %v1722_v47  ;;  %v16033_v3 = vadd.f32 %v1782_v17, %v1723_v34  ;;  %v16035_v6 = vadd.f32 %v1783_v0, %v1724_v51  ;;  %v16037_v15 = vadd.f32 %v1784_v52, %v1725_v57  ;;  %v9981_v57 = vld [vmem:[%s14780_s20 + $0x340] sm:$0xff]  ;;  %19324 = vst [vmem:[#allocation23_spill] sm:$0xff] %v16077_v18  ;;  %v16090_v17 = vld [vmem:[%s14780_s20 + $0x388] sm:$0xff]  ;;  %v19333_v0 = vld [vmem:[#allocation13_spill] sm:$0xff] }
 0x19a   : > { %v16039_v21 = vadd.f32 %v1785_v44, %v1726_v59  ;;  %v16041_v16 = vadd.f32 %v1786_v24, %v1727_v31  ;;  %v16043_v19 = vadd.f32 %v1787_v29, %v1728_v40  ;;  %v16045_v13 = vadd.f32 %v1788_v4, %v1729_v9  ;;  %v16057_v59 = vld [vmem:[%s14780_s20 + $0x348] sm:$0xff]  ;;  %v19315_v31 = vld [vmem:[#allocation6_spill] sm:$0xff]  ;;  %v16087_v62 = vld [vmem:[%s14780_s20 + $0x380] sm:$0xff]  ;;  %19331 = vst [vmem:[#allocation29_spill] sm:$0xff] %v16090_v17 }
 0x19b   : > { %v16047_v28 = vadd.f32 %v1789_v25, %v1730_v55  ;;  %v16049_v47 = vadd.f32 %v1790_v60, %v1731_v26  ;;  %v16051_v34 = vadd.f32 %v1791_v14, %v1732_v11  ;;  %v16053_v51 = vadd.f32 %v1792_v61, %v1733_v36  ;;  %19314 = vst [vmem:[#allocation35_spill] sm:$0xff] %v16057_v59  ;;  %v16064_v9 = vld [vmem:[%s14780_s20 + $0x358] sm:$0xff]  ;;  %v16067_v55 = vld [vmem:[%s14780_s20 + $0x360] sm:$0xff]  ;;  %v16093_v14 = vld [vmem:[%s14780_s20 + $0x390] sm:$0xff] }
 0x19c   : > { %v1852_v40 = vmul.f32 %v9995_v30, %v19315_v31  ;;  %19317 = vst [vmem:[#allocation37_spill] sm:$0xff] %v16064_v9  ;;  %19318 = vst [vmem:[#allocation22_spill] sm:$0xff] %v16067_v55  ;;  %v19319_v26 = vld [vmem:[#allocation7_spill] sm:$0xff]  ;;  %v19320_v11 = vld [vmem:[#allocation18_spill] sm:$0xff]  ;;  %v1856_v39 = vmul.f32 %v9995_v30, %v19322_v46  ;;  %v1857_v42 = vmul.f32 %v9995_v30, %v19326_v41 }
 0x19d   : > { %19311 = vst [vmem:[#allocation26_spill] sm:$0xff] %v16049_v47  ;;  %19312 = vst [vmem:[#allocation33_spill] sm:$0xff] %v16051_v34  ;;  %v1853_v63 = vmul.f32 %v9995_v30, %v19319_v26  ;;  %v1854_v27 = vmul.f32 %v9995_v30, %v19320_v11  ;;  %v19321_v36 = vld [vmem:[#allocation19_spill] sm:$0xff]  ;;  %v1858_v56 = vmul.f32 %v9995_v30, %v19327_v22  ;;  %v19334_v61 = vld [vmem:[#allocation14_spill] sm:$0xff] }
 0x19e   : > { %19313 = vst [vmem:[#allocation17_spill] sm:$0xff] %v16053_v51  ;;  %v1855_v7 = vmul.f32 %v9995_v30, %v19321_v36  ;;  %v19328_v25 = vld [vmem:[#allocation11_spill] sm:$0xff]  ;;  %v1860_v60 = vmul.f32 %v9995_v30, %v19329_v58  ;;  %19330 = vst [vmem:[#allocation28_spill] sm:$0xff] %v16087_v62  ;;  %v1861_v52 = vmul.f32 %v9995_v30, %v19333_v0  ;;  %v19336_v4 = vld [vmem:[#allocation32_spill] sm:$0xff] }
 0x19f   : > { %v1859_v5 = vmul.f32 %v9995_v30, %v19328_v25  ;;  %19332 = vst [vmem:[#allocation30_spill] sm:$0xff] %v16093_v14  ;;  %v1862_v44 = vmul.f32 %v9995_v30, %v19334_v61  ;;  %v19335_v24 = vld [vmem:[#allocation15_spill] sm:$0xff]  ;;  %v1864_v31 = vmul.f32 %v9995_v30, %v19336_v4  ;;  %v16100_v41 = vld [vmem:[%s14780_s20 + $0x398] sm:$0xff]  ;;  %v16106_v25 = vld [vmem:[%s14780_s20 + $0x3a8] sm:$0xff]  ;;  %v1866_v36 = vmul.f32 %v9995_v30, %v9981_v57 }
 0x1a0   : > { %v1863_v29 = vmul.f32 %v9995_v30, %v19335_v24  ;;  %19337 = vst [vmem:[#allocation31_spill] sm:$0xff] %v16100_v41  ;;  %v16103_v22 = vld [vmem:[%s14780_s20 + $0x3a0] sm:$0xff]  ;;  %19339 = vst [vmem:[#allocation21_spill] sm:$0xff] %v16106_v25  ;;  %v19340_v58 = vld [vmem:[#allocation16_spill] sm:$0xff]  ;;  %v1867_v11 = vmul.f32 %v9995_v30, %v16057_v59  ;;  %v1868_v26 = vmul.f32 %v9995_v30, %v16061_v38 }
 0x1a1   : > { %19338 = vst [vmem:[#allocation34_spill] sm:$0xff] %v16103_v22  ;;  %v1865_v46 = vmul.f32 %v9995_v30, %v19340_v58  ;;  %v1869_v0 = vmul.f32 %v9995_v30, %v16064_v9  ;;  %v1870_v61 = vmul.f32 %v9995_v30, %v16067_v55  ;;  %v1871_v24 = vmul.f32 %v9995_v30, %v16074_v54  ;;  %v19341_v58 = vld [vmem:[#allocation25_spill] sm:$0xff] }
 0x1a2   : > { %v1872_v4 = vmul.f32 %v9995_v30, %v16077_v18  ;;  %v1873_v51 = vmul.f32 %v9995_v30, %v16080_v49  ;;  %v1874_v34 = vmul.f32 %v9995_v30, %v16087_v62  ;;  %v1875_v47 = vmul.f32 %v9995_v30, %v16090_v17 }
 0x1a3   : > { %v1876_v57 = vmul.f32 %v9995_v30, %v16093_v14  ;;  %v1877_v59 = vmul.f32 %v9995_v30, %v16100_v41  ;;  %v1878_v38 = vmul.f32 %v9995_v30, %v16103_v22  ;;  %v1879_v9 = vmul.f32 %v9995_v30, %v16106_v25 }
 0x1a4   : > { %v1880_v55 = vadd.f32 %v1852_v40, %v19341_v58  ;;  %v1881_v54 = vadd.f32 %v1853_v63, %v15998_v45  ;;  %v1882_v18 = vadd.f32 %v1854_v27, %v16000_v12  ;;  %v1883_v49 = vadd.f32 %v1855_v7, %v16002_v33  ;;  %v19343_v63 = vld [vmem:[#allocation33_spill] sm:$0xff]  ;;  %v19355_v58 = vld [vmem:[#allocation15_spill] sm:$0xff] }
 0x1a5   : > { %v1884_v62 = vadd.f32 %v1856_v39, %v16004_v53  ;;  %v1885_v17 = vadd.f32 %v1857_v42, %v16006_v35  ;;  %v1886_v14 = vadd.f32 %v1858_v56, %v16008_v20  ;;  %v1887_v41 = vadd.f32 %v1859_v5, %v16010_v48  ;;  %v10026_v48 = vld [vmem:[%s18702_s1 + $0x38] sm:$0xff]  ;;  %v19353_v56 = vld [vmem:[#allocation13_spill] sm:$0xff] }
 0x1a6   : > { %v1888_v22 = vadd.f32 %v1860_v60, %v16012_v2  ;;  %v1889_v30 = vadd.f32 %v1861_v52, %v16014_v8  ;;  %v1890_v40 = vadd.f32 %v1862_v44, %v16016_v43  ;;  %v1891_v45 = vadd.f32 %v1863_v29, %v16018_v50  ;;  %v19354_v5 = vld [vmem:[#allocation14_spill] sm:$0xff]  ;;  %v19359_v29 = vld [vmem:[#allocation8_spill] sm:$0xff] }
 0x1a7   : > { %v1892_v12 = vadd.f32 %v1864_v31, %v16020_v32  ;;  %v1893_v33 = vadd.f32 %v1865_v46, %v16022_v37  ;;  %v1894_v53 = vadd.f32 %v1866_v36, %v16024_v23  ;;  %v1895_v35 = vadd.f32 %v1867_v11, %v16026_v10  ;;  %v19360_v31 = vld [vmem:[#allocation35_spill] sm:$0xff] }
 0x1a8   : > { %v1896_v20 = vadd.f32 %v1868_v26, %v16028_v1  ;;  %v1897_v2 = vadd.f32 %v1869_v0, %v16033_v3  ;;  %v1898_v43 = vadd.f32 %v1870_v61, %v16035_v6  ;;  %v1899_v8 = vadd.f32 %v1871_v24, %v16037_v15  ;;  %v19342_v1 = vld [vmem:[#allocation26_spill] sm:$0xff]  ;;  %v19344_v3 = vld [vmem:[#allocation17_spill] sm:$0xff]  ;;  %v19345_v6 = vld [vmem:[#allocation7_spill] sm:$0xff] }
 0x1a9   : > { %v1900_v50 = vadd.f32 %v1872_v4, %v16039_v21  ;;  %v1901_v32 = vadd.f32 %v1873_v51, %v16041_v16  ;;  %v1902_v37 = vadd.f32 %v1874_v34, %v16043_v19  ;;  %v1903_v23 = vadd.f32 %v1875_v47, %v16045_v13  ;;  %v19346_v15 = vld [vmem:[#allocation18_spill] sm:$0xff]  ;;  %v19347_v21 = vld [vmem:[#allocation19_spill] sm:$0xff]  ;;  %v19348_v16 = vld [vmem:[#allocation9_spill] sm:$0xff] }
 0x1aa   : > { %v1904_v10 = vadd.f32 %v1876_v57, %v16047_v28  ;;  %v1905_v26 = vadd.f32 %v1877_v59, %v19342_v1  ;;  %v1906_v11 = vadd.f32 %v1878_v38, %v19343_v63  ;;  %v1907_v27 = vadd.f32 %v1879_v9, %v19344_v3  ;;  %v19349_v19 = vld [vmem:[#allocation20_spill] sm:$0xff]  ;;  %v19350_v13 = vld [vmem:[#allocation10_spill] sm:$0xff]  ;;  %v19351_v28 = vld [vmem:[#allocation11_spill] sm:$0xff] }
 0x1ab   : > { %v1939_v36 = vmul.f32 %v10026_v48, %v19345_v6  ;;  %v1940_v7 = vmul.f32 %v10026_v48, %v19346_v15  ;;  %v1941_v46 = vmul.f32 %v10026_v48, %v19347_v21  ;;  %v1942_v51 = vmul.f32 %v10026_v48, %v19348_v16  ;;  %v19352_v59 = vld [vmem:[#allocation12_spill] sm:$0xff]  ;;  %v16167_v24 = vld [vmem:[%s14780_s20 + $0x3b0] sm:$0xff]  ;;  %v19370_v25 = vld [vmem:[#allocation31_spill] sm:$0xff] }
 0x1ac   : > { %v1943_v34 = vmul.f32 %v10026_v48, %v19349_v19  ;;  %v1944_v47 = vmul.f32 %v10026_v48, %v19350_v13  ;;  %v1945_v39 = vmul.f32 %v10026_v48, %v19351_v28  ;;  %v1946_v42 = vmul.f32 %v10026_v48, %v19352_v59  ;;  %v19356_v0 = vld [vmem:[#allocation32_spill] sm:$0xff]  ;;  %19358 = vst [vmem:[#allocation6_spill] sm:$0xff] %v16167_v24  ;;  %v19362_v3 = vld [vmem:[#allocation37_spill] sm:$0xff]  ;;  %v19363_v59 = vld [vmem:[#allocation22_spill] sm:$0xff] }
 0x1ad   : > { %v1947_v38 = vmul.f32 %v10026_v48, %v19353_v56  ;;  %v1948_v9 = vmul.f32 %v10026_v48, %v19354_v5  ;;  %v1949_v60 = vmul.f32 %v10026_v48, %v19355_v58  ;;  %v1950_v52 = vmul.f32 %v10026_v48, %v19356_v0  ;;  %v19357_v61 = vld [vmem:[#allocation16_spill] sm:$0xff]  ;;  %v19364_v28 = vld [vmem:[#allocation5_spill] sm:$0xff]  ;;  %v19365_v13 = vld [vmem:[#allocation23_spill] sm:$0xff] }
 0x1ae   : > { %v1951_v44 = vmul.f32 %v10026_v48, %v19357_v61  ;;  %v1952_v4 = vmul.f32 %v10026_v48, %v19359_v29  ;;  %v1953_v57 = vmul.f32 %v10026_v48, %v19360_v31  ;;  %v19361_v1 = vld [vmem:[#allocation36_spill] sm:$0xff]  ;;  %v1955_v6 = vmul.f32 %v10026_v48, %v19362_v3  ;;  %v19366_v19 = vld [vmem:[#allocation27_spill] sm:$0xff]  ;;  %v19368_v21 = vld [vmem:[#allocation29_spill] sm:$0xff] }
 0x1af   : > { %v1954_v63 = vmul.f32 %v10026_v48, %v19361_v1  ;;  %v1956_v56 = vmul.f32 %v10026_v48, %v19363_v59  ;;  %v1957_v5 = vmul.f32 %v10026_v48, %v19364_v28  ;;  %v1958_v58 = vmul.f32 %v10026_v48, %v19365_v13  ;;  %v19367_v16 = vld [vmem:[#allocation28_spill] sm:$0xff]  ;;  %v19369_v24 = vld [vmem:[#allocation30_spill] sm:$0xff]  ;;  %v19372_v59 = vld [vmem:[#allocation21_spill] sm:$0xff] }
 0x1b0   : > { %v1959_v0 = vmul.f32 %v10026_v48, %v19366_v19  ;;  %v1960_v61 = vmul.f32 %v10026_v48, %v19367_v16  ;;  %v1961_v15 = vmul.f32 %v10026_v48, %v19368_v21  ;;  %v1962_v29 = vmul.f32 %v10026_v48, %v19369_v24  ;;  %v19371_v1 = vld [vmem:[#allocation34_spill] sm:$0xff] }
 0x1b1   : > { %v1963_v31 = vmul.f32 %v10026_v48, %v19370_v25  ;;  %v1964_v3 = vmul.f32 %v10026_v48, %v19371_v1  ;;  %v1965_v28 = vmul.f32 %v10026_v48, %v19372_v59  ;;  %v1967_v16 = vadd.f32 %v1939_v36, %v1880_v55 }
 0x1b2   : > { %v1968_v21 = vadd.f32 %v1940_v7, %v1881_v54  ;;  %v1969_v24 = vadd.f32 %v1941_v46, %v1882_v18  ;;  %v1970_v25 = vadd.f32 %v1942_v51, %v1883_v49  ;;  %v1971_v1 = vadd.f32 %v1943_v34, %v1884_v62  ;;  %v10057_v62 = vld [vmem:[%s18702_s1 + $0x40] sm:$0xff] }
 0x1b3   : > { %v19373_v13 = vld [vmem:[#allocation6_spill] sm:$0xff]  ;;  %v1972_v59 = vadd.f32 %v1944_v47, %v1885_v17  ;;  %v1975_v36 = vadd.f32 %v1947_v38, %v1888_v22  ;;  %v1976_v55 = vadd.f32 %v1948_v9, %v1889_v30  ;;  %v1977_v7 = vadd.f32 %v1949_v60, %v1890_v40  ;;  %v19377_v60 = vld [vmem:[#allocation20_spill] sm:$0xff] }
 0x1b4   : > { %v1966_v19 = vmul.f32 %v10026_v48, %v19373_v13  ;;  %v1973_v13 = vadd.f32 %v1945_v39, %v1886_v14  ;;  %v1974_v48 = vadd.f32 %v1946_v42, %v1887_v41  ;;  %v1978_v54 = vadd.f32 %v1950_v52, %v1891_v45 }
 0x1b5   : > { %v1979_v18 = vadd.f32 %v1951_v44, %v1892_v12  ;;  %v1980_v46 = vadd.f32 %v1952_v4, %v1893_v33  ;;  %v1981_v49 = vadd.f32 %v1953_v57, %v1894_v53  ;;  %v1982_v51 = vadd.f32 %v1954_v63, %v1895_v35  ;;  %v19374_v12 = vld [vmem:[#allocation18_spill] sm:$0xff]  ;;  %v19375_v53 = vld [vmem:[#allocation19_spill] sm:$0xff]  ;;  %v19387_v44 = vld [vmem:[#allocation24_spill] sm:$0xff] }
 0x1b6   : > { %v1983_v34 = vadd.f32 %v1955_v6, %v1896_v20  ;;  %v1984_v17 = vadd.f32 %v1956_v56, %v1897_v2  ;;  %v1985_v47 = vadd.f32 %v1957_v5, %v1898_v43  ;;  %v1986_v14 = vadd.f32 %v1958_v58, %v1899_v8  ;;  %v19376_v20 = vld [vmem:[#allocation9_spill] sm:$0xff]  ;;  %v19378_v2 = vld [vmem:[#allocation10_spill] sm:$0xff]  ;;  %v19379_v8 = vld [vmem:[#allocation11_spill] sm:$0xff] }
 0x1b7   : > { %v1987_v39 = vadd.f32 %v1959_v0, %v1900_v50  ;;  %v1988_v41 = vadd.f32 %v1960_v61, %v1901_v32  ;;  %v1989_v42 = vadd.f32 %v1961_v15, %v1902_v37  ;;  %v1990_v22 = vadd.f32 %v1962_v29, %v1903_v23  ;;  %v19380_v32 = vld [vmem:[#allocation12_spill] sm:$0xff]  ;;  %v19381_v23 = vld [vmem:[#allocation13_spill] sm:$0xff]  ;;  %v10056_v61 = vld [vmem:[%s14780_s20 + $0x3b8] sm:$0xff] }
 0x1b8   : > { %v1991_v38 = vadd.f32 %v1963_v31, %v1904_v10  ;;  %v1992_v30 = vadd.f32 %v1964_v3, %v1905_v26  ;;  %v1993_v40 = vadd.f32 %v1965_v28, %v1906_v11  ;;  %v1994_v45 = vadd.f32 %v1966_v19, %v1907_v27  ;;  %v19382_v26 = vld [vmem:[#allocation14_spill] sm:$0xff]  ;;  %v19383_v11 = vld [vmem:[#allocation15_spill] sm:$0xff]  ;;  %v19384_v19 = vld [vmem:[#allocation32_spill] sm:$0xff] }
 0x1b9   : > { %v2026_v33 = vmul.f32 %v10057_v62, %v19374_v12  ;;  %v2027_v35 = vmul.f32 %v10057_v62, %v19375_v53  ;;  %v2028_v9 = vmul.f32 %v10057_v62, %v19376_v20  ;;  %v2029_v52 = vmul.f32 %v10057_v62, %v19377_v60  ;;  %v19385_v56 = vld [vmem:[#allocation16_spill] sm:$0xff]  ;;  %v19389_v63 = vld [vmem:[#allocation37_spill] sm:$0xff]  ;;  %v19390_v6 = vld [vmem:[#allocation22_spill] sm:$0xff] }
 0x1ba   : > { %v2030_v43 = vmul.f32 %v10057_v62, %v19378_v2  ;;  %v2031_v50 = vmul.f32 %v10057_v62, %v19379_v8  ;;  %v2032_v37 = vmul.f32 %v10057_v62, %v19380_v32  ;;  %v2033_v10 = vmul.f32 %v10057_v62, %v19381_v23  ;;  %v19386_v58 = vld [vmem:[#allocation8_spill] sm:$0xff]  ;;  %v19391_v12 = vld [vmem:[#allocation5_spill] sm:$0xff]  ;;  %v19392_v20 = vld [vmem:[#allocation23_spill] sm:$0xff] }
 0x1bb   : > { %v2034_v15 = vmul.f32 %v10057_v62, %v19382_v26  ;;  %v2035_v27 = vmul.f32 %v10057_v62, %v19383_v11  ;;  %v2036_v28 = vmul.f32 %v10057_v62, %v19384_v19  ;;  %v2037_v5 = vmul.f32 %v10057_v62, %v19385_v56  ;;  %v19388_v4 = vld [vmem:[#allocation36_spill] sm:$0xff]  ;;  %v19393_v2 = vld [vmem:[#allocation27_spill] sm:$0xff]  ;;  %v19395_v26 = vld [vmem:[#allocation29_spill] sm:$0xff] }
 0x1bc   : > { %v2038_v0 = vmul.f32 %v10057_v62, %v19386_v58  ;;  %v2039_v29 = vmul.f32 %v10057_v62, %v19387_v44  ;;  %v2040_v57 = vmul.f32 %v10057_v62, %v19388_v4  ;;  %v2041_v3 = vmul.f32 %v10057_v62, %v19389_v63  ;;  %v19394_v32 = vld [vmem:[#allocation28_spill] sm:$0xff]  ;;  %v19396_v19 = vld [vmem:[#allocation30_spill] sm:$0xff]  ;;  %v19397_v58 = vld [vmem:[#allocation31_spill] sm:$0xff] }
 0x1bd   : > { %v2042_v31 = vmul.f32 %v10057_v62, %v19390_v6  ;;  %v2043_v53 = vmul.f32 %v10057_v62, %v19391_v12  ;;  %v2044_v60 = vmul.f32 %v10057_v62, %v19392_v20  ;;  %v2045_v8 = vmul.f32 %v10057_v62, %v19393_v2  ;;  %v19398_v4 = vld [vmem:[#allocation34_spill] sm:$0xff]  ;;  %v19399_v6 = vld [vmem:[#allocation21_spill] sm:$0xff] }
 0x1be   : > { %v2046_v23 = vmul.f32 %v10057_v62, %v19394_v32  ;;  %v2047_v11 = vmul.f32 %v10057_v62, %v19395_v26  ;;  %v2048_v56 = vmul.f32 %v10057_v62, %v19396_v19  ;;  %v2049_v44 = vmul.f32 %v10057_v62, %v19397_v58  ;;  %v19400_v20 = vld [vmem:[#allocation6_spill] sm:$0xff] }
 0x1bf   : > { %v2050_v63 = vmul.f32 %v10057_v62, %v19398_v4  ;;  %v2051_v12 = vmul.f32 %v10057_v62, %v19399_v6  ;;  %v2052_v2 = vmul.f32 %v10057_v62, %v19400_v20  ;;  %v2053_v32 = vmul.f32 %v10057_v62, %v10056_v61 }
 0x1c0   : > { %v2054_v26 = vadd.f32 %v2026_v33, %v1967_v16  ;;  %v2055_v19 = vadd.f32 %v2027_v35, %v1968_v21  ;;  %v2056_v58 = vadd.f32 %v2028_v9, %v1969_v24  ;;  %v2057_v4 = vadd.f32 %v2029_v52, %v1970_v25 }
 0x1c1   : > { %v2058_v6 = vadd.f32 %v2030_v43, %v1971_v1  ;;  %v2059_v20 = vadd.f32 %v2031_v50, %v1972_v59  ;;  %v2060_v61 = vadd.f32 %v2032_v37, %v1973_v13  ;;  %v2061_v62 = vadd.f32 %v2033_v10, %v1974_v48 }
 0x1c2   : > { %v2062_v16 = vadd.f32 %v2034_v15, %v1975_v36  ;;  %v2063_v33 = vadd.f32 %v2035_v27, %v1976_v55  ;;  %v2064_v21 = vadd.f32 %v2036_v28, %v1977_v7  ;;  %v2065_v35 = vadd.f32 %v2037_v5, %v1978_v54 }
 0x1c3   : > { %v2066_v9 = vadd.f32 %v2038_v0, %v1979_v18  ;;  %v2067_v24 = vadd.f32 %v2039_v29, %v1980_v46  ;;  %v2068_v25 = vadd.f32 %v2040_v57, %v1981_v49  ;;  %v2069_v52 = vadd.f32 %v2041_v3, %v1982_v51 }
 0x1c4   : > { %v2070_v1 = vadd.f32 %v2042_v31, %v1983_v34  ;;  %v2071_v43 = vadd.f32 %v2043_v53, %v1984_v17  ;;  %v2072_v50 = vadd.f32 %v2044_v60, %v1985_v47  ;;  %v2073_v59 = vadd.f32 %v2045_v8, %v1986_v14 }
 0x1c5   : > { %v2074_v13 = vadd.f32 %v2046_v23, %v1987_v39  ;;  %v2075_v37 = vadd.f32 %v2047_v11, %v1988_v41  ;;  %v2076_v10 = vadd.f32 %v2048_v56, %v1989_v42  ;;  %v2077_v48 = vadd.f32 %v2049_v44, %v1990_v22  ;;  %v2103_v41 = vld [vmem:[%s18703_s2] sm:$0xff] }
 0x1c6   : > { %v2078_v15 = vadd.f32 %v2050_v63, %v1991_v38  ;;  %v2079_v36 = vadd.f32 %v2051_v12, %v1992_v30  ;;  %v2080_v27 = vadd.f32 %v2052_v2, %v1993_v40  ;;  %v2081_v55 = vadd.f32 %v2053_v32, %v1994_v45 }
 0x1c7   : > { %v2082_v7 = vmax.f32 %v2054_v26, %v2068_v25  ;;  %v2083_v28 = vmax.f32 %v2055_v19, %v2069_v52  ;;  %v2084_v5 = vmax.f32 %v2056_v58, %v2070_v1  ;;  %v2085_v54 = vmax.f32 %v2057_v4, %v2071_v43 }
 0x1c8   : > { %v2086_v18 = vmax.f32 %v2058_v6, %v2072_v50  ;;  %v2087_v46 = vmax.f32 %v2059_v20, %v2073_v59  ;;  %v2088_v49 = vmax.f32 %v2060_v61, %v2074_v13  ;;  %v2089_v51 = vmax.f32 %v2061_v62, %v2075_v37 }
 0x1c9   : > { %v2090_v34 = vmax.f32 %v2062_v16, %v2076_v10  ;;  %v2091_v17 = vmax.f32 %v2063_v33, %v2077_v48  ;;  %v2092_v47 = vmax.f32 %v2064_v21, %v2078_v15  ;;  %v2093_v14 = vmax.f32 %v2065_v35, %v2079_v36 }
 0x1ca   : > { %v2094_v39 = vmax.f32 %v2066_v9, %v2080_v27  ;;  %v2095_v42 = vmax.f32 %v2067_v24, %v2081_v55  ;;  %v2096_v22 = vmax.f32 %v2082_v7, %v2083_v28  ;;  %v2097_v38 = vmax.f32 %v2084_v5, %v2085_v54 }
 0x1cb   : > { %v2098_v30 = vmax.f32 %v2086_v18, %v2087_v46  ;;  %v2099_v40 = vmax.f32 %v2088_v49, %v2089_v51  ;;  %v2100_v45 = vmax.f32 %v2090_v34, %v2091_v17  ;;  %v2101_v0 = vmax.f32 %v2092_v47, %v2093_v14 }
 0x1cc   : > { %v2102_v29 = vmax.f32 %v2094_v39, %v2095_v42  ;;  %v2104_v57 = vadd.f32 %v2103_v41, %v2096_v22  ;;  %v2105_v3 = vadd.f32 %v2103_v41, %v2097_v38 }
 0x1cd   : > { %v2106_v31 = vadd.f32 %v2103_v41, %v2098_v30  ;;  %v2107_v53 = vadd.f32 %v2103_v41, %v2099_v40  ;;  %v2108_v60 = vadd.f32 %v2103_v41, %v2100_v45  ;;  %v2109_v8 = vadd.f32 %v2103_v41, %v2101_v0  ;;  %513 = sbr.rel (!%p511_p1) target bundleno = 190 (0xbe), region = 225 }
 0x1ce   : > { %v2110_v23 = vadd.f32 %v2103_v41, %v2102_v29  ;;  %v2111_v11 = vmax.f32 %v2104_v57, 0.0  ;;  %v2112_v56 = vmax.f32 %v2105_v3, 0.0 }
 0x1cf   : > { %v2113_v44 = vmax.f32 %v2106_v31, 0.0  ;;  %v2114_v63 = vmax.f32 %v2107_v53, 0.0  ;;  %v2115_v12 = vmax.f32 %v2108_v60, 0.0  ;;  %v2116_v2 = vmax.f32 %v2109_v8, 0.0 }
 0x1d0   : > { %v2117_v32 = vmax.f32 %v2110_v23, 0.0  ;;  %10058 = vst.msk [vmem:[%s15576_s19 + $0xc0] sm:$0xff] %vm221_vm0, %v2111_v11  ;;  %10059 = vst.msk [vmem:[%s15576_s19 + $0xc8] sm:$0xff] %vm221_vm0, %v2112_v56 }
 0x1d1   : > { %10060 = vst.msk [vmem:[%s15576_s19 + $0xd0] sm:$0xff] %vm221_vm0, %v2113_v44  ;;  %10061 = vst.msk [vmem:[%s15576_s19 + $0xd8] sm:$0xff] %vm221_vm0, %v2114_v63 }
 0x1d2   : > { %10062 = vst.msk [vmem:[%s15576_s19 + $0xe0] sm:$0xff] %vm221_vm0, %v2115_v12  ;;  %10063 = vst.msk [vmem:[%s15576_s19 + $0xe8] sm:$0xff] %vm221_vm0, %v2116_v2 }
 0x1d3   : > { %10064 = vst.msk [vmem:[%s15576_s19 + $0xf0] sm:$0xff] %vm221_vm0, %v2117_v32 }
 0x1d4 LB: > { %v10067_v26 = vld [vmem:[%s18704_s3 + $0x20] sm:$0xff]  ;;  %v10068_v19 = vld [vmem:[%s18704_s3 + $0x28] sm:$0xff]  ;;  %v10069_v20 = vld [vmem:[%s18704_s3 + $0x30] sm:$0xff]  ;;  %s10957_s11 = sshll.u32 %s14086_s17, 8  ;;  %s10523_s0 = smul.u32 56, %s14086_s17  ;;  %vm5168_vm1 = vcmask 523264   ;;  %s14086_s17 = sphi %s16235_s17, %s2130_s17  }
 0x1d5   : > { %v10249_v58 = vld [vmem:[%s18704_s3 + $0x80] sm:$0xff]  ;;  %v13122_v4 = vpack.c.bf16 %v10068_v19, %v10067_v26  ;;  %v10250_v6 = vld [vmem:[%s18704_s3 + $0x88] sm:$0xff]  ;;  %v10070_v61 = vld [vmem:[%s18704_s3 + $0x38] sm:$0xff]  ;;  %s16282_s22 = scalar_lea.vmem [#allocation3], %s10957_s11  ;;  %s2130_s17 = sadd.s32 1, %s14086_s17  }
 0x1d6   : > { %v16258_v62 = vpack.c.bf16 %v10250_v6, %v10249_v58  ;;  %v13126_v16 = vpack.c.bf16 %v10070_v61, %v10069_v20  ;;  %v10251_v33 = vld [vmem:[%s18704_s3 + $0x90] sm:$0xff]  ;;  %v10252_v21 = vld [vmem:[%s18704_s3 + $0x98] sm:$0xff]  ;;  %v2162_v35 = vld [vmem:[%s18704_s3] sm:$0xff]  ;;  %s17082_s25 = scalar_lea.vmem [#allocation4], %s10523_s0  ;;  %p2127_p2 = scmp.ge.s32.totalorder %s2130_s17, 7  }
 0x1d7   : > { %13123 = vmatprep.subr.bf16.mxu1 %v13122_v4  ;;  %v16270_v9 = vpack.c.bf16 %v10252_v21, %v10251_v33  ;;  %v2163_v24 = vld [vmem:[%s18704_s3 + $0x8] sm:$0xff]  ;;  %v10309_v25 = vld [vmem:[%s18704_s3 + $0xa0] sm:$0xff]  ;;  %v10311_v10 = vld [vmem:[%s18704_s3 + $0xb0] sm:$0xff]  ;;  %vm14091_vm2 = vmmov (%p2127_p2), 0  }
 0x1d8   : > { %v10310_v52 = vld [vmem:[%s18704_s3 + $0xa8] sm:$0xff]  ;;  %13155 = vmatprep.subr.bf16.mxu0 %v16258_v62  ;;  %13125 = vmatpush3.bf16.msra.mxu1 %v13122_v4  ;;  %v13130_v50 = vpack.c.bf16 %v2163_v24, %v2162_v35  ;;  %v10312_v48 = vld [vmem:[%s18704_s3 + $0xb8] sm:$0xff]  ;;  %v2164_v54 = vld [vmem:[%s18704_s3 + $0x10] sm:$0xff] }
 0x1d9   : > { %13157 = vmatpush3.bf16.msra.mxu0 %v16258_v62  ;;  %13127 = vmatprep.subr.bf16.mxu1 %v13126_v16  ;;  %v13162_v59 = vpack.c.bf16 %v10310_v52, %v10309_v25  ;;  %v13166_v36 = vpack.c.bf16 %v10312_v48, %v10311_v10  ;;  %v2165_v18 = vld [vmem:[%s18704_s3 + $0x18] sm:$0xff]  ;;  %v10371_v46 = vld [vmem:[%s18704_s3 + $0xc0] sm:$0xff]  ;;  %v10372_v51 = vld [vmem:[%s18704_s3 + $0xc8] sm:$0xff] }
 0x1da   : > { %v16285_v1 = vld [vmem:[%s16282_s22 + $0x8] sm:$0xff]  ;;  %13159 = vmatprep.subr.bf16.mxu0 %v16270_v9  ;;  %v16297_v13 = vld [vmem:[%s16282_s22 + $0x10] sm:$0xff]  ;;  %v16310_v15 = vld [vmem:[%s16282_s22 + $0x18] sm:$0xff]  ;;  %v13134_v49 = vpack.c.bf16 %v2165_v18, %v2164_v54  ;;  %v13170_v17 = vpack.c.bf16 %v10372_v51, %v10371_v46 }
 0x1db   : > { %v16288_v43 = vld [vmem:[%s16282_s22 + $0x88] sm:$0xff]  ;;  %11714 = vmatprep.mubr.msk.f32.mxu1 %vm221_vm0, %v16285_v1  ;;  %v16301_v37 = vld [vmem:[%s16282_s22 + $0x90] sm:$0xff]  ;;  %v16315_v27 = vld [vmem:[%s16282_s22 + $0x98] sm:$0xff] }
 0x1dc   : > { %11914 = vmatprep.mubr.msk.f32.mxu0 %vm221_vm0, %v16288_v43  ;;  %13129 = vmatpush3.bf16.msra.mxu1 %v13126_v16  ;;  %v16320_v55 = vld [vmem:[%s16282_s22 + $0x20] sm:$0xff]  ;;  %v16328_v28 = vld [vmem:[%s16282_s22 + $0x28] sm:$0xff]  ;;  %v16354_v34 = vld [vmem:[%s16282_s22 + $0x30] sm:$0xff] }
 0x1dd   : > { %13161 = vmatpush3.bf16.msra.mxu0 %v16270_v9  ;;  %13131 = vmatprep.subr.bf16.mxu1 %v13130_v50  ;;  %v16325_v7 = vld [vmem:[%s16282_s22 + $0xa0] sm:$0xff]  ;;  %v16331_v5 = vld [vmem:[%s16282_s22 + $0xa8] sm:$0xff]  ;;  %v16365_v39 = vld [vmem:[%s16282_s22 + $0xb0] sm:$0xff] }
 0x1de   : > { %13163 = vmatprep.subr.bf16.mxu0 %v13162_v59  ;;  %v10127_v47 = vld [vmem:[%s18704_s3 + $0x40] sm:$0xff]  ;;  %v10128_v14 = vld [vmem:[%s18704_s3 + $0x48] sm:$0xff]  ;;  %v16368_v41 = vld [vmem:[%s16282_s22 + $0x38] sm:$0xff] }
 0x1df   : > { %11715 = vmatmul.mubr.msk.f32.vlgmr.msra.gmra.mrb[0].mxu1 %vm221_vm0, %v16297_v13  ;;  %v16371_v42 = vld [vmem:[%s16282_s22 + $0xb8] sm:$0xff]  ;;  %v16373_v22 = vpack.c.bf16 %v10128_v14, %v10127_v47  ;;  %v16382_v38 = vld [vmem:[%s16282_s22 + $0x40] sm:$0xff]  ;;  %v16390_v40 = vld [vmem:[%s16282_s22 + $0x48] sm:$0xff] }
 0x1e0   : > { %11915 = vmatmul.mubr.msk.f32.vlgmr.msra.gmra.mrb[0].mxu0 %vm221_vm0, %v16301_v37  ;;  %13133 = vmatpush3.bf16.msra.mxu1 %v13130_v50  ;;  %v16387_v30 = vld [vmem:[%s16282_s22 + $0xc0] sm:$0xff]  ;;  %v16393_v45 = vld [vmem:[%s16282_s22 + $0xc8] sm:$0xff]  ;;  %v16403_v0 = vld [vmem:[%s16282_s22 + $0x50] sm:$0xff] }
 0x1e1   : > { %13165 = vmatpush3.bf16.msra.mxu0 %v13162_v59  ;;  %11717 = vmatprep.mubr.msk.f32.mxu1 %vm221_vm0, %v16310_v15  ;;  %v16408_v29 = vld [vmem:[%s16282_s22 + $0xd0] sm:$0xff]  ;;  %v16411_v57 = vld [vmem:[%s16282_s22 + $0x58] sm:$0xff]  ;;  %v16423_v31 = vld [vmem:[%s16282_s22 + $0x60] sm:$0xff] }
 0x1e2   : > { %11917 = vmatprep.mubr.msk.f32.mxu0 %vm221_vm0, %v16315_v27  ;;  %13167 = vmatprep.subr.bf16.mxu0 %v13166_v36  ;;  %v16414_v3 = vld [vmem:[%s16282_s22 + $0xd8] sm:$0xff]  ;;  %v16428_v53 = vld [vmem:[%s16282_s22 + $0xe0] sm:$0xff]  ;;  %v16431_v60 = vld [vmem:[%s16282_s22 + $0x68] sm:$0xff] }
 0x1e3   : > { %11718 = vmatmul.mubr.msk.f32.gmra.mrb[2].mxu1 %vm221_vm0, %v16320_v55  ;;  %13135 = vmatprep.subr.bf16.mxu1 %v13134_v49  ;;  %v16434_v8 = vld [vmem:[%s16282_s22 + $0xe8] sm:$0xff]  ;;  %v16443_v23 = vld [vmem:[%s16282_s22 + $0x70] sm:$0xff]  ;;  %v10374_v44 = vld [vmem:[%s18704_s3 + $0xd8] sm:$0xff] }
 0x1e4   : > { %11918 = vmatmul.mubr.msk.f32.gmra.mrb[2].mxu0 %vm221_vm0, %v16325_v7  ;;  %11720 = vmatprep.mubr.msk.f32.mxu1 %vm221_vm0, %v16328_v28  ;;  %v16448_v11 = vld [vmem:[%s16282_s22 + $0xf0] sm:$0xff]  ;;  %v10431_v12 = vld [vmem:[%s18704_s3 + $0xe0] sm:$0xff]  ;;  %v10432_v2 = vld [vmem:[%s18704_s3 + $0xe8] sm:$0xff] }
 0x1e5   : > { %11920 = vmatprep.mubr.msk.f32.mxu0 %vm221_vm0, %v16331_v5  ;;  %13169 = vmatpush3.bf16.msra.mxu0 %v13166_v36  ;;  %v10373_v56 = vld [vmem:[%s18704_s3 + $0xd0] sm:$0xff]  ;;  %v16478_v32 = vpack.c.bf16 %v10432_v2, %v10431_v12  ;;  %v16522_v26 = vld [vmem:[%s16282_s22 + $0xf8] sm:$0xff]  ;;  %v2134_v19 = vld [vmem:[%s16282_s22] sm:$0xff] }
 0x1e6   : > { %13171 = vmatprep.subr.bf16.mxu0 %v13170_v17  ;;  %13137 = vmatpush3.bf16.msra.mxu1 %v13134_v49  ;;  %v13174_v63 = vpack.c.bf16 %v10374_v44, %v10373_v56  ;;  %v16526_v58 = vld [vmem:[%s16282_s22 + $0x110] sm:$0xff]  ;;  %v10130_v6 = vld [vmem:[%s18704_s3 + $0x58] sm:$0xff]  ;;  %v16545_v61 = vld [vmem:[%s16282_s22 + $0x120] sm:$0xff] }
 0x1e7   : > { %11721 = vmatmul.mubr.msk.f32.gmra.mrb[4].mxu1 %vm221_vm0, %v16354_v34  ;;  %13139 = vmatprep.subr.bf16.mxu1 %v16373_v22  ;;  %v10129_v4 = vld [vmem:[%s18704_s3 + $0x50] sm:$0xff]  ;;  %v16542_v20 = vld [vmem:[%s16282_s22 + $0x118] sm:$0xff]  ;;  %v10189_v33 = vld [vmem:[%s18704_s3 + $0x60] sm:$0xff] }
 0x1e8   : > { %11921 = vmatmul.mubr.msk.f32.gmra.mrb[4].mxu0 %vm221_vm0, %v16365_v39  ;;  %11723 = vmatprep.mubr.msk.f32.mxu1 %vm221_vm0, %v16368_v41  ;;  %v13142_v16 = vpack.c.bf16 %v10130_v6, %v10129_v4  ;;  %v10190_v21 = vld [vmem:[%s18704_s3 + $0x68] sm:$0xff]  ;;  %v16566_v24 = vld [vmem:[%s16282_s22 + $0x130] sm:$0xff]  ;;  %v16579_v52 = vld [vmem:[%s16282_s22 + $0x138] sm:$0xff] }
 0x1e9   : > { %11923 = vmatprep.mubr.msk.f32.mxu0 %vm221_vm0, %v16371_v42  ;;  %v16563_v35 = vld [vmem:[%s16282_s22 + $0x128] sm:$0xff]  ;;  %v16568_v25 = vpack.c.bf16 %v10190_v21, %v10189_v33  ;;  %v16597_v59 = vld [vmem:[%s16282_s22 + $0x150] sm:$0xff]  ;;  %v16608_v10 = vld [vmem:[%s16282_s22 + $0x158] sm:$0xff] }
 0x1ea   : > { %v16594_v50 = vld [vmem:[%s16282_s22 + $0x148] sm:$0xff]  ;;  %v16611_v48 = vld [vmem:[%s16282_s22 + $0x160] sm:$0xff]  ;;  %v16625_v54 = vld [vmem:[%s16282_s22 + $0x170] sm:$0xff] }
 0x1eb   : > { %11724 = vmatmul.mubr.msk.f32.gmra.mrb[6].mxu1 %vm221_vm0, %v16382_v38  ;;  %v16622_v36 = vld [vmem:[%s16282_s22 + $0x168] sm:$0xff]  ;;  %v16636_v18 = vld [vmem:[%s16282_s22 + $0x178] sm:$0xff]  ;;  %v16639_v46 = vld [vmem:[%s16282_s22 + $0x80] sm:$0xff] }
 0x1ec   : > { %11924 = vmatmul.mubr.msk.f32.gmra.mrb[6].mxu0 %vm221_vm0, %v16387_v30  ;;  %11726 = vmatprep.mubr.msk.f32.mxu1 %vm221_vm0, %v16390_v40  ;;  %v16642_v49 = vld [vmem:[%s16282_s22 + $0x100] sm:$0xff]  ;;  %v10433_v51 = vld [vmem:[%s18704_s3 + $0xf0] sm:$0xff]  ;;  %v16659_v47 = vld [vmem:[%s16282_s22 + $0x108] sm:$0xff] }
 0x1ed   : > { %11926 = vmatprep.mubr.msk.f32.mxu0 %vm221_vm0, %v16393_v45  ;;  %v10492_v56 = vld [vmem:[%s18704_s3 + $0x108] sm:$0xff]  ;;  %v10191_v12 = vld [vmem:[%s18704_s3 + $0x70] sm:$0xff]  ;;  %v10192_v2 = vld [vmem:[%s18704_s3 + $0x78] sm:$0xff] }
 0x1ee   : > { %v13150_v4 = vpack.c.bf16 %v10192_v2, %v10191_v12  ;;  %v16752_v6 = vld [vmem:[%s16282_s22 + $0x1a0] sm:$0xff] }
 0x1ef   : > { %11727 = vmatmul.mubr.msk.f32.gmra.mrb[8].mxu1 %vm221_vm0, %v16403_v0 }
 0x1f0   : > { %11927 = vmatmul.mubr.msk.f32.gmra.mrb[8].mxu0 %vm221_vm0, %v16408_v29  ;;  %11729 = vmatprep.mubr.msk.f32.mxu1 %vm221_vm0, %v16411_v57 }
 0x1f1   : > { %11929 = vmatprep.mubr.msk.f32.mxu0 %vm221_vm0, %v16414_v3 }
 0x1f3   : > { %11730 = vmatmul.mubr.msk.f32.gmra.mrb[10].mxu1 %vm221_vm0, %v16423_v31 }
 0x1f4   : > { %11930 = vmatmul.mubr.msk.f32.gmra.mrb[10].mxu0 %vm221_vm0, %v16428_v53  ;;  %11732 = vmatprep.mubr.msk.f32.mxu1 %vm221_vm0, %v16431_v60 }
 0x1f5   : > { %11932 = vmatprep.mubr.msk.f32.mxu0 %vm221_vm0, %v16434_v8 }
 0x1f7   : > { %11733 = vmatmul.mubr.msk.f32.gmra.mrb[12].mxu1 %vm221_vm0, %v16443_v23 }
 0x1f8   : > { %11933 = vmatmul.mubr.msk.f32.gmra.mrb[12].mxu0 %vm221_vm0, %v16448_v11  ;;  %11735 = vmatprep.mubr.msk.f32.mxu1 %vm221_vm0, %v16288_v43 }
 0x1f9   : > { %11964 = vmatprep.mubr.msk.f32.mxu0 %vm221_vm0, %v16301_v37 }
 0x1fb   : > { %11736 = vmatmul.mubr.msk.f32.gmra.mrb[14].mxu1 %vm221_vm0, %v16301_v37 }
 0x1fc   : > { %11965 = vmatmul.mubr.msk.f32.vlgmr.msra.gmra.mrb[0].mxu0 %vm221_vm0, %v16315_v27  ;;  %11738 = vmatprep.mubr.msk.f32.mxu1 %vm221_vm0, %v16315_v27 }
 0x1fd   : > { %13173 = vmatpush3.bf16.msra.mxu0 %v13170_v17  ;;  %11967 = vmatprep.mubr.msk.f32.mxu0 %vm221_vm0, %v16325_v7  ;;  %v10434_v17 = vld [vmem:[%s18704_s3 + $0xf8] sm:$0xff] }
 0x1fe   : > { %13175 = vmatprep.subr.bf16.mxu0 %v13174_v63  ;;  %v13182_v14 = vpack.c.bf16 %v10434_v17, %v10433_v51 }
 0x1ff   : > { %11739 = vmatmul.mubr.msk.f32.gmra.mrb[16].mxu1 %vm221_vm0, %v16325_v7 }
 0x200   : > { %11968 = vmatmul.mubr.msk.f32.gmra.mrb[2].mxu0 %vm221_vm0, %v16331_v5  ;;  %11741 = vmatprep.mubr.msk.f32.mxu1 %vm221_vm0, %v16331_v5 }
 0x201   : > { %11970 = vmatprep.mubr.msk.f32.mxu0 %vm221_vm0, %v16365_v39  ;;  %13177 = vmatpush3.bf16.msra.mxu0 %v13174_v63  ;;  %v10357_v63 = vld [vmem:[%s16282_s22 + $0x180] sm:$0xff] }
 0x202   : > { %13179 = vmatprep.subr.bf16.mxu0 %v16478_v32 }
 0x203   : > { %11742 = vmatmul.mubr.msk.f32.gmra.mrb[18].mxu1 %vm221_vm0, %v16365_v39 }
 0x204   : > { %11971 = vmatmul.mubr.msk.f32.gmra.mrb[4].mxu0 %vm221_vm0, %v16371_v42  ;;  %11744 = vmatprep.mubr.msk.f32.mxu1 %vm221_vm0, %v16371_v42 }
 0x205   : > { %11973 = vmatprep.mubr.msk.f32.mxu0 %vm221_vm0, %v16387_v30 }
 0x207   : > { %11745 = vmatmul.mubr.msk.f32.gmra.mrb[20].mxu1 %vm221_vm0, %v16387_v30 }
 0x208   : > { %11974 = vmatmul.mubr.msk.f32.gmra.mrb[6].mxu0 %vm221_vm0, %v16393_v45  ;;  %11747 = vmatprep.mubr.msk.f32.mxu1 %vm221_vm0, %v16393_v45 }
 0x209   : > { %11976 = vmatprep.mubr.msk.f32.mxu0 %vm221_vm0, %v16408_v29 }
 0x20b   : > { %11748 = vmatmul.mubr.msk.f32.gmra.mrb[22].mxu1 %vm221_vm0, %v16408_v29 }
 0x20c   : > { %11977 = vmatmul.mubr.msk.f32.gmra.mrb[8].mxu0 %vm221_vm0, %v16414_v3  ;;  %11750 = vmatprep.mubr.msk.f32.mxu1 %vm221_vm0, %v16414_v3 }
 0x20d   : > { %11979 = vmatprep.mubr.msk.f32.mxu0 %vm221_vm0, %v16428_v53 }
 0x20f   : > { %11751 = vmatmul.mubr.msk.f32.gmra.mrb[24].mxu1 %vm221_vm0, %v16428_v53 }
 0x210   : > { %11980 = vmatmul.mubr.msk.f32.gmra.mrb[10].mxu0 %vm221_vm0, %v16434_v8  ;;  %11753 = vmatprep.mubr.msk.f32.mxu1 %vm221_vm0, %v16434_v8 }
 0x211   : > { %11982 = vmatprep.mubr.msk.f32.mxu0 %vm221_vm0, %v16448_v11 }
 0x213   : > { %11754 = vmatmul.mubr.msk.f32.gmra.mrb[26].mxu1 %vm221_vm0, %v16448_v11 }
 0x214   : > { %11983 = vmatmul.mubr.msk.f32.gmra.mrb[12].mxu0 %vm221_vm0, %v16522_v26  ;;  %11764 = vmatprep.mubr.msk.f32.mxu1 %vm221_vm0, %v2134_v19  ;;  %v16737_v19 = vld [vmem:[%s16282_s22 + $0x190] sm:$0xff] }
 0x215   : > { %11985 = vmatprep.mubr.msk.f32.mxu0 %vm221_vm0, %v16526_v58 }
 0x217   : > { %11765 = vmatmul.mubr.msk.f32.vlgmr.msra.gmra.mrb[0].mxu1 %vm221_vm0, %v16285_v1  ;;  %v16582_v1 = vld [vmem:[%s16282_s22 + $0x140] sm:$0xff] }
 0x218   : > { %11986 = vmatmul.mubr.msk.f32.gmra.mrb[14].mxu0 %vm221_vm0, %v16542_v20  ;;  %13141 = vmatpush3.bf16.msra.mxu1 %v16373_v22  ;;  %v10491_v22 = vld [vmem:[%s18704_s3 + $0x100] sm:$0xff] }
 0x219   : > { %11767 = vmatprep.mubr.msk.f32.mxu1 %vm221_vm0, %v16297_v13  ;;  %11988 = vmatprep.mubr.msk.f32.mxu0 %vm221_vm0, %v16545_v61  ;;  %v16676_v44 = vpack.c.bf16 %v10492_v56, %v10491_v22 }
 0x21a   : > { %13143 = vmatprep.subr.bf16.mxu1 %v13142_v16 }
 0x21b   : > { %11768 = vmatmul.mubr.msk.f32.gmra.mrb[2].mxu1 %vm221_vm0, %v16310_v15 }
 0x21c   : > { %11989 = vmatmul.mubr.msk.f32.gmra.mrb[16].mxu0 %vm221_vm0, %v16563_v35  ;;  %11770 = vmatprep.mubr.msk.f32.mxu1 %vm221_vm0, %v16320_v55 }
 0x21d   : > { %11991 = vmatprep.mubr.msk.f32.mxu0 %vm221_vm0, %v16566_v24  ;;  %13145 = vmatpush3.bf16.msra.mxu1 %v13142_v16  ;;  %v10493_v16 = vld [vmem:[%s18704_s3 + $0x110] sm:$0xff] }
 0x21e   : > { %13147 = vmatprep.subr.bf16.mxu1 %v16568_v25 }
 0x21f   : > { %11771 = vmatmul.mubr.msk.f32.gmra.mrb[4].mxu1 %vm221_vm0, %v16328_v28 }
 0x220   : > { %11992 = vmatmul.mubr.msk.f32.gmra.mrb[18].mxu0 %vm221_vm0, %v16579_v52  ;;  %11773 = vmatprep.mubr.msk.f32.mxu1 %vm221_vm0, %v16354_v34 }
 0x221   : > { %11994 = vmatprep.mubr.msk.f32.mxu0 %vm221_vm0, %v16582_v1 }
 0x223   : > { %11774 = vmatmul.mubr.msk.f32.gmra.mrb[6].mxu1 %vm221_vm0, %v16368_v41 }
 0x224   : > { %11995 = vmatmul.mubr.msk.f32.gmra.mrb[20].mxu0 %vm221_vm0, %v16594_v50  ;;  %11776 = vmatprep.mubr.msk.f32.mxu1 %vm221_vm0, %v16382_v38 }
 0x225   : > { %11997 = vmatprep.mubr.msk.f32.mxu0 %vm221_vm0, %v16597_v59 }
 0x227   : > { %11777 = vmatmul.mubr.msk.f32.gmra.mrb[8].mxu1 %vm221_vm0, %v16390_v40 }
 0x228   : > { %11998 = vmatmul.mubr.msk.f32.gmra.mrb[22].mxu0 %vm221_vm0, %v16608_v10  ;;  %11779 = vmatprep.mubr.msk.f32.mxu1 %vm221_vm0, %v16403_v0 }
 0x229   : > { %12000 = vmatprep.mubr.msk.f32.mxu0 %vm221_vm0, %v16611_v48 }
 0x22b   : > { %11780 = vmatmul.mubr.msk.f32.gmra.mrb[10].mxu1 %vm221_vm0, %v16411_v57 }
 0x22c   : > { %12001 = vmatmul.mubr.msk.f32.gmra.mrb[24].mxu0 %vm221_vm0, %v16622_v36  ;;  %11782 = vmatprep.mubr.msk.f32.mxu1 %vm221_vm0, %v16423_v31 }
 0x22d   : > { %12003 = vmatprep.mubr.msk.f32.mxu0 %vm221_vm0, %v16625_v54 }
 0x22f   : > { %11783 = vmatmul.mubr.msk.f32.gmra.mrb[12].mxu1 %vm221_vm0, %v16431_v60 }
 0x230   : > { %12004 = vmatmul.mubr.msk.f32.gmra.mrb[26].mxu0 %vm221_vm0, %v16636_v18  ;;  %11785 = vmatprep.mubr.msk.f32.mxu1 %vm221_vm0, %v16639_v46 }
 0x231   : > { %12014 = vmatprep.mubr.msk.f32.mxu0 %vm221_vm0, %v16642_v49 }
 0x233   : > { %11786 = vmatmul.mubr.msk.f32.gmra.mrb[14].mxu1 %vm221_vm0, %v16288_v43 }
 0x234   : > { %12015 = vmatmul.mubr.msk.f32.vlgmr.msra.gmra.mrb[0].mxu0 %vm221_vm0, %v16659_v47  ;;  %11788 = vmatprep.mubr.msk.f32.mxu1 %vm221_vm0, %v16301_v37 }
 0x235   : > { %13181 = vmatpush3.bf16.msra.mxu0 %v16478_v32  ;;  %12017 = vmatprep.mubr.msk.f32.mxu0 %vm221_vm0, %v16526_v58  ;;  %v16734_v32 = vld [vmem:[%s16282_s22 + $0x188] sm:$0xff] }
 0x236   : > { %13183 = vmatprep.subr.bf16.mxu0 %v13182_v14 }
 0x237   : > { %11789 = vmatmul.mubr.msk.f32.gmra.mrb[16].mxu1 %vm221_vm0, %v16315_v27 }
 0x238   : > { %12018 = vmatmul.mubr.msk.f32.gmra.mrb[2].mxu0 %vm221_vm0, %v16542_v20  ;;  %11791 = vmatprep.mubr.msk.f32.mxu1 %vm221_vm0, %v16325_v7 }
 0x239   : > { %12020 = vmatprep.mubr.msk.f32.mxu0 %vm221_vm0, %v16545_v61  ;;  %13185 = vmatpush3.bf16.msra.mxu0 %v13182_v14 }
 0x23a   : > { %13187 = vmatprep.subr.bf16.mxu0 %v16676_v44 }
 0x23b   : > { %11792 = vmatmul.mubr.msk.f32.gmra.mrb[18].mxu1 %vm221_vm0, %v16331_v5 }
 0x23c   : > { %12021 = vmatmul.mubr.msk.f32.gmra.mrb[4].mxu0 %vm221_vm0, %v16563_v35  ;;  %11794 = vmatprep.mubr.msk.f32.mxu1 %vm221_vm0, %v16365_v39 }
 0x23d   : > { %12023 = vmatprep.mubr.msk.f32.mxu0 %vm221_vm0, %v16566_v24 }
 0x23f   : > { %11795 = vmatmul.mubr.msk.f32.gmra.mrb[20].mxu1 %vm221_vm0, %v16371_v42 }
 0x240   : > { %12024 = vmatmul.mubr.msk.f32.gmra.mrb[6].mxu0 %vm221_vm0, %v16579_v52  ;;  %11797 = vmatprep.mubr.msk.f32.mxu1 %vm221_vm0, %v16387_v30 }
 0x241   : > { %12026 = vmatprep.mubr.msk.f32.mxu0 %vm221_vm0, %v16582_v1 }
 0x243   : > { %11798 = vmatmul.mubr.msk.f32.gmra.mrb[22].mxu1 %vm221_vm0, %v16393_v45 }
 0x244   : > { %12027 = vmatmul.mubr.msk.f32.gmra.mrb[8].mxu0 %vm221_vm0, %v16594_v50  ;;  %11800 = vmatprep.mubr.msk.f32.mxu1 %vm221_vm0, %v16408_v29 }
 0x245   : > { %12029 = vmatprep.mubr.msk.f32.mxu0 %vm221_vm0, %v16597_v59 }
 0x247   : > { %11801 = vmatmul.mubr.msk.f32.gmra.mrb[24].mxu1 %vm221_vm0, %v16414_v3 }
 0x248   : > { %12030 = vmatmul.mubr.msk.f32.gmra.mrb[10].mxu0 %vm221_vm0, %v16608_v10  ;;  %11803 = vmatprep.mubr.msk.f32.mxu1 %vm221_vm0, %v16428_v53 }
 0x249   : > { %12032 = vmatprep.mubr.msk.f32.mxu0 %vm221_vm0, %v16611_v48 }
 0x24b   : > { %11804 = vmatmul.mubr.msk.f32.gmra.mrb[26].mxu1 %vm221_vm0, %v16434_v8 }
 0x24c   : > { %12033 = vmatmul.mubr.msk.f32.gmra.mrb[12].mxu0 %vm221_vm0, %v16622_v36  ;;  %11814 = vmatprep.mubr.msk.f32.mxu1 %vm221_vm0, %v16297_v13  ;;  %v16749_v13 = vld [vmem:[%s16282_s22 + $0x198] sm:$0xff] }
 0x24d   : > { %12035 = vmatprep.mubr.msk.f32.mxu0 %vm221_vm0, %v10357_v63 }
 0x24f   : > { %11815 = vmatmul.mubr.msk.f32.vlgmr.msra.gmra.mrb[0].mxu1 %vm221_vm0, %v16310_v15  ;;  %v16763_v15 = vld [vmem:[%s16282_s22 + $0x1a8] sm:$0xff] }
 0x250   : > { %12036 = vmatmul.mubr.msk.f32.gmra.mrb[14].mxu0 %vm221_vm0, %v16734_v32  ;;  %13149 = vmatpush3.bf16.msra.mxu1 %v16568_v25 }
 0x251   : > { %11817 = vmatprep.mubr.msk.f32.mxu1 %vm221_vm0, %v16320_v55  ;;  %12038 = vmatprep.mubr.msk.f32.mxu0 %vm221_vm0, %v16737_v19  ;;  %v16766_v55 = vld [vmem:[%s16282_s22 + $0x1b0] sm:$0xff] }
 0x252   : > { %13151 = vmatprep.subr.bf16.mxu1 %v13150_v4 }
 0x253   : > { %11818 = vmatmul.mubr.msk.f32.gmra.mrb[2].mxu1 %vm221_vm0, %v16328_v28  ;;  %v16778_v28 = vld [vmem:[%s16282_s22 + $0x1b8] sm:$0xff] }
 0x254   : > { %12039 = vmatmul.mubr.msk.f32.gmra.mrb[16].mxu0 %vm221_vm0, %v16749_v13  ;;  %11820 = vmatprep.mubr.msk.f32.mxu1 %vm221_vm0, %v16354_v34  ;;  %v16781_v34 = vld [vmem:[%s16282_s22 + $0x1c0] sm:$0xff] }
 0x255   : > { %12041 = vmatprep.mubr.msk.f32.mxu0 %vm221_vm0, %v16752_v6  ;;  %13153 = vmatpush3.bf16.msra.mxu1 %v13150_v4 }
 0x256   : > { %13806 = vmatprep.subr.bf16.mxu1 %v16258_v62 }
 0x257   : > { %11821 = vmatmul.mubr.msk.f32.gmra.mrb[4].mxu1 %vm221_vm0, %v16368_v41  ;;  %v16792_v41 = vld [vmem:[%s16282_s22 + $0x1c8] sm:$0xff] }
 0x258   : > { %12042 = vmatmul.mubr.msk.f32.gmra.mrb[18].mxu0 %vm221_vm0, %v16763_v15  ;;  %11823 = vmatprep.mubr.msk.f32.mxu1 %vm221_vm0, %v16382_v38  ;;  %v16795_v38 = vld [vmem:[%s16282_s22 + $0x1d0] sm:$0xff] }
 0x259   : > { %12044 = vmatprep.mubr.msk.f32.mxu0 %vm221_vm0, %v16766_v55 }
 0x25b   : > { %11824 = vmatmul.mubr.msk.f32.gmra.mrb[6].mxu1 %vm221_vm0, %v16390_v40  ;;  %v16806_v40 = vld [vmem:[%s16282_s22 + $0x1d8] sm:$0xff] }
 0x25c   : > { %12045 = vmatmul.mubr.msk.f32.gmra.mrb[20].mxu0 %vm221_vm0, %v16778_v28  ;;  %11826 = vmatprep.mubr.msk.f32.mxu1 %vm221_vm0, %v16403_v0  ;;  %v16809_v0 = vld [vmem:[%s16282_s22 + $0x1e0] sm:$0xff] }
 0x25d   : > { %12047 = vmatprep.mubr.msk.f32.mxu0 %vm221_vm0, %v16781_v34 }
 0x25f   : > { %11827 = vmatmul.mubr.msk.f32.gmra.mrb[8].mxu1 %vm221_vm0, %v16411_v57  ;;  %v2686_v57 = vld [vmem:[%s16282_s22 + $0x78] sm:$0xff] }
 0x260   : > { %12048 = vmatmul.mubr.msk.f32.gmra.mrb[22].mxu0 %vm221_vm0, %v16792_v41  ;;  %11829 = vmatprep.mubr.msk.f32.mxu1 %vm221_vm0, %v16423_v31  ;;  %v16821_v31 = vld [vmem:[%s16282_s22 + $0x1e8] sm:$0xff] }
 0x261   : > { %12050 = vmatprep.mubr.msk.f32.mxu0 %vm221_vm0, %v16795_v38 }
 0x263   : > { %11830 = vmatmul.mubr.msk.f32.gmra.mrb[10].mxu1 %vm221_vm0, %v16431_v60  ;;  %v10494_v60 = vld [vmem:[%s18704_s3 + $0x118] sm:$0xff] }
 0x264   : > { %12051 = vmatmul.mubr.msk.f32.gmra.mrb[24].mxu0 %vm221_vm0, %v16806_v40  ;;  %11832 = vmatprep.mubr.msk.f32.mxu1 %vm221_vm0, %v16443_v23  ;;  %v13190_v23 = vpack.c.bf16 %v10494_v60, %v10493_v16 }
 0x265   : > { %12053 = vmatprep.mubr.msk.f32.mxu0 %vm221_vm0, %v16809_v0 }
 0x267   : > { %11833 = vmatmul.mubr.msk.f32.gmra.mrb[12].mxu1 %vm221_vm0, %v2686_v57 }
 0x268   : > { %12054 = vmatmul.mubr.msk.f32.gmra.mrb[26].mxu0 %vm221_vm0, %v16821_v31  ;;  %11835 = vmatprep.mubr.msk.f32.mxu1 %vm221_vm0, %v16301_v37 }
 0x269   : > { %12064 = vmatprep.mubr.msk.f32.mxu0 %vm221_vm0, %v16659_v47 }
 0x26b   : > { %11836 = vmatmul.mubr.msk.f32.gmra.mrb[14].mxu1 %vm221_vm0, %v16315_v27 }
 0x26c   : > { %12065 = vmatmul.mubr.msk.f32.vlgmr.msra.gmra.mrb[0].mxu0 %vm221_vm0, %v16526_v58  ;;  %11838 = vmatprep.mubr.msk.f32.mxu1 %vm221_vm0, %v16325_v7 }
 0x26d   : > { %13189 = vmatpush3.bf16.msra.mxu0 %v16676_v44  ;;  %12067 = vmatprep.mubr.msk.f32.mxu0 %vm221_vm0, %v16542_v20 }
 0x26e   : > { %13191 = vmatprep.subr.bf16.mxu0 %v13190_v23 }
 0x26f   : > { %11839 = vmatmul.mubr.msk.f32.gmra.mrb[16].mxu1 %vm221_vm0, %v16331_v5 }
 0x270   : > { %12068 = vmatmul.mubr.msk.f32.gmra.mrb[2].mxu0 %vm221_vm0, %v16545_v61  ;;  %11841 = vmatprep.mubr.msk.f32.mxu1 %vm221_vm0, %v16365_v39 }
 0x271   : > { %12070 = vmatprep.mubr.msk.f32.mxu0 %vm221_vm0, %v16563_v35  ;;  %13193 = vmatpush3.bf16.msra.mxu0 %v13190_v23 }
 0x273   : > { %11842 = vmatmul.mubr.msk.f32.gmra.mrb[18].mxu1 %vm221_vm0, %v16371_v42 }
 0x274   : > { %12071 = vmatmul.mubr.msk.f32.gmra.mrb[4].mxu0 %vm221_vm0, %v16566_v24  ;;  %11844 = vmatprep.mubr.msk.f32.mxu1 %vm221_vm0, %v16387_v30 }
 0x275   : > { %12073 = vmatprep.mubr.msk.f32.mxu0 %vm221_vm0, %v16579_v52 }
 0x277   : > { %11845 = vmatmul.mubr.msk.f32.gmra.mrb[20].mxu1 %vm221_vm0, %v16393_v45 }
 0x278   : > { %12074 = vmatmul.mubr.msk.f32.gmra.mrb[6].mxu0 %vm221_vm0, %v16582_v1  ;;  %11847 = vmatprep.mubr.msk.f32.mxu1 %vm221_vm0, %v16408_v29 }
 0x279   : > { %12076 = vmatprep.mubr.msk.f32.mxu0 %vm221_vm0, %v16594_v50 }
 0x27b   : > { %11848 = vmatmul.mubr.msk.f32.gmra.mrb[22].mxu1 %vm221_vm0, %v16414_v3 }
 0x27c   : > { %12077 = vmatmul.mubr.msk.f32.gmra.mrb[8].mxu0 %vm221_vm0, %v16597_v59  ;;  %11850 = vmatprep.mubr.msk.f32.mxu1 %vm221_vm0, %v16428_v53 }
 0x27d   : > { %12079 = vmatprep.mubr.msk.f32.mxu0 %vm221_vm0, %v16608_v10 }
 0x27f   : > { %11851 = vmatmul.mubr.msk.f32.gmra.mrb[24].mxu1 %vm221_vm0, %v16434_v8 }
 0x280   : > { %12080 = vmatmul.mubr.msk.f32.gmra.mrb[10].mxu0 %vm221_vm0, %v16611_v48  ;;  %11853 = vmatprep.mubr.msk.f32.mxu1 %vm221_vm0, %v16448_v11 }
 0x281   : > { %12082 = vmatprep.mubr.msk.f32.mxu0 %vm221_vm0, %v16622_v36 }
 0x283   : > { %11854 = vmatmul.mubr.msk.f32.gmra.mrb[26].mxu1 %vm221_vm0, %v16522_v26 }
 0x284   : > { %12083 = vmatmul.mubr.msk.f32.gmra.mrb[12].mxu0 %vm221_vm0, %v16625_v54  ;;  %11864 = vmatprep.mubr.msk.f32.mxu1 %vm221_vm0, %v16639_v46 }
 0x285   : > { %12085 = vmatprep.mubr.msk.f32.mxu0 %vm221_vm0, %v16734_v32 }
 0x287   : > { %11865 = vmatmul.mubr.msk.f32.vlgmr.msra.gmra.mrb[0].mxu1 %vm221_vm0, %v16288_v43 }
 0x288   : > { %12086 = vmatmul.mubr.msk.f32.gmra.mrb[14].mxu0 %vm221_vm0, %v16737_v19  ;;  %13808 = vmatpush3.bf16.msra.mxu1 %v16258_v62  ;;  %v10430_v62 = vld [vmem:[%s16282_s22 + $0x1f0] sm:$0xff] }
 0x289   : > { %11867 = vmatprep.mubr.msk.f32.mxu1 %vm221_vm0, %v16301_v37  ;;  %12088 = vmatprep.mubr.msk.f32.mxu0 %vm221_vm0, %v16749_v13 }
 0x28a   : > { %13807 = vmatprep.subr.bf16.mxu1 %v16270_v9 }
 0x28b   : > { %11868 = vmatmul.mubr.msk.f32.gmra.mrb[2].mxu1 %vm221_vm0, %v16315_v27 }
 0x28c   : > { %12089 = vmatmul.mubr.msk.f32.gmra.mrb[16].mxu0 %vm221_vm0, %v16752_v6  ;;  %11870 = vmatprep.mubr.msk.f32.mxu1 %vm221_vm0, %v16325_v7 }
 0x28d   : > { %12091 = vmatprep.mubr.msk.f32.mxu0 %vm221_vm0, %v16763_v15  ;;  %13809 = vmatpush3.bf16.msra.mxu1 %v16270_v9  ;;  %v10490_v9 = vld [vmem:[%s16282_s22 + $0x1f8] sm:$0xff] }
 0x28f   : > { %11871 = vmatmul.mubr.msk.f32.gmra.mrb[4].mxu1 %vm221_vm0, %v16331_v5 }
 0x290   : > { %12092 = vmatmul.mubr.msk.f32.gmra.mrb[18].mxu0 %vm221_vm0, %v16766_v55  ;;  %11873 = vmatprep.mubr.msk.f32.mxu1 %vm221_vm0, %v16365_v39 }
 0x291   : > { %12094 = vmatprep.mubr.msk.f32.mxu0 %vm221_vm0, %v16778_v28 }
 0x293   : > { %11874 = vmatmul.mubr.msk.f32.gmra.mrb[6].mxu1 %vm221_vm0, %v16371_v42 }
 0x294   : > { %12095 = vmatmul.mubr.msk.f32.gmra.mrb[20].mxu0 %vm221_vm0, %v16781_v34  ;;  %11876 = vmatprep.mubr.msk.f32.mxu1 %vm221_vm0, %v16387_v30 }
 0x295   : > { %12097 = vmatprep.mubr.msk.f32.mxu0 %vm221_vm0, %v16792_v41 }
 0x297   : > { %11877 = vmatmul.mubr.msk.f32.gmra.mrb[8].mxu1 %vm221_vm0, %v16393_v45 }
 0x298   : > { %12098 = vmatmul.mubr.msk.f32.gmra.mrb[22].mxu0 %vm221_vm0, %v16795_v38  ;;  %11879 = vmatprep.mubr.msk.f32.mxu1 %vm221_vm0, %v16408_v29 }
 0x299   : > { %12100 = vmatprep.mubr.msk.f32.mxu0 %vm221_vm0, %v16806_v40 }
 0x29b   : > { %11880 = vmatmul.mubr.msk.f32.gmra.mrb[10].mxu1 %vm221_vm0, %v16414_v3 }
 0x29c   : > { %12101 = vmatmul.mubr.msk.f32.gmra.mrb[24].mxu0 %vm221_vm0, %v16809_v0  ;;  %11882 = vmatprep.mubr.msk.f32.mxu1 %vm221_vm0, %v16428_v53 }
 0x29d   : > { %12103 = vmatprep.mubr.msk.f32.mxu0 %vm221_vm0, %v16821_v31 }
 0x29f   : > { %11883 = vmatmul.mubr.msk.f32.gmra.mrb[12].mxu1 %vm221_vm0, %v16434_v8 }
 0x2a0   : > { %12104 = vmatmul.mubr.msk.f32.gmra.mrb[26].mxu0 %vm221_vm0, %v10430_v62  ;;  %11885 = vmatprep.mubr.msk.f32.mxu1 %vm221_vm0, %v16642_v49 }
 0x2a1   : > { %12114 = vmatprep.mubr.msk.f32.mxu0 %vm221_vm0, %v16526_v58 }
 0x2a3   : > { %11886 = vmatmul.mubr.msk.f32.gmra.mrb[14].mxu1 %vm221_vm0, %v16659_v47 }
 0x2a4   : > { %12115 = vmatmul.mubr.msk.f32.vlgmr.msra.gmra.mrb[0].mxu0 %vm221_vm0, %v16542_v20  ;;  %11888 = vmatprep.mubr.msk.f32.mxu1 %vm221_vm0, %v16526_v58 }
 0x2a5   : > { %12117 = vmatprep.mubr.msk.f32.mxu0 %vm221_vm0, %v16545_v61 }
 0x2a7   : > { %11889 = vmatmul.mubr.msk.f32.gmra.mrb[16].mxu1 %vm221_vm0, %v16542_v20 }
 0x2a8   : > { %12118 = vmatmul.mubr.msk.f32.gmra.mrb[2].mxu0 %vm221_vm0, %v16563_v35  ;;  %11891 = vmatprep.mubr.msk.f32.mxu1 %vm221_vm0, %v16545_v61 }
 0x2a9   : > { %12120 = vmatprep.mubr.msk.f32.mxu0 %vm221_vm0, %v16566_v24 }
 0x2ab   : > { %11892 = vmatmul.mubr.msk.f32.gmra.mrb[18].mxu1 %vm221_vm0, %v16563_v35 }
 0x2ac   : > { %12121 = vmatmul.mubr.msk.f32.gmra.mrb[4].mxu0 %vm221_vm0, %v16579_v52  ;;  %11894 = vmatprep.mubr.msk.f32.mxu1 %vm221_vm0, %v16566_v24 }
 0x2ad   : > { %12123 = vmatprep.mubr.msk.f32.mxu0 %vm221_vm0, %v16582_v1 }
 0x2af   : > { %11895 = vmatmul.mubr.msk.f32.gmra.mrb[20].mxu1 %vm221_vm0, %v16579_v52 }
 0x2b0   : > { %12124 = vmatmul.mubr.msk.f32.gmra.mrb[6].mxu0 %vm221_vm0, %v16594_v50  ;;  %11897 = vmatprep.mubr.msk.f32.mxu1 %vm221_vm0, %v16582_v1 }
 0x2b1   : > { %12126 = vmatprep.mubr.msk.f32.mxu0 %vm221_vm0, %v16597_v59 }
 0x2b3   : > { %11898 = vmatmul.mubr.msk.f32.gmra.mrb[22].mxu1 %vm221_vm0, %v16594_v50 }
 0x2b4   : > { %12127 = vmatmul.mubr.msk.f32.gmra.mrb[8].mxu0 %vm221_vm0, %v16608_v10  ;;  %11900 = vmatprep.mubr.msk.f32.mxu1 %vm221_vm0, %v16597_v59 }
 0x2b5   : > { %12129 = vmatprep.mubr.msk.f32.mxu0 %vm221_vm0, %v16611_v48 }
 0x2b7   : > { %11901 = vmatmul.mubr.msk.f32.gmra.mrb[24].mxu1 %vm221_vm0, %v16608_v10 }
 0x2b8   : > { %12130 = vmatmul.mubr.msk.f32.gmra.mrb[10].mxu0 %vm221_vm0, %v16622_v36  ;;  %11903 = vmatprep.mubr.msk.f32.mxu1 %vm221_vm0, %v16611_v48 }
 0x2b9   : > { %12132 = vmatprep.mubr.msk.f32.mxu0 %vm221_vm0, %v16625_v54 }
 0x2bb   : > { %11904 = vmatmul.mubr.msk.f32.gmra.mrb[26].mxu1 %vm221_vm0, %v16622_v36 }
 0x2bc   : > { %12133 = vmatmul.mubr.msk.f32.gmra.mrb[12].mxu0 %vm221_vm0, %v16636_v18  ;;  %11935 = vmatprep.mubr.msk.f32.mxu1 %vm221_vm0, %v16659_v47 }
 0x2bd   : > { %12135 = vmatprep.mubr.msk.f32.mxu0 %vm221_vm0, %v16737_v19 }
 0x2bf   : > { %11936 = vmatmul.mubr.msk.f32.vlgmr.msra.gmra.mrb[14].mxu1 %vm221_vm0, %v16526_v58 }
 0x2c0   : > { %12136 = vmatmul.mubr.msk.f32.gmra.mrb[14].mxu0 %vm221_vm0, %v16749_v13  ;;  %11938 = vmatprep.mubr.msk.f32.mxu1 %vm221_vm0, %v16542_v20 }
 0x2c1   : > { %12138 = vmatprep.mubr.msk.f32.mxu0 %vm221_vm0, %v16752_v6 }
 0x2c3   : > { %11939 = vmatmul.mubr.msk.f32.gmra.mrb[16].mxu1 %vm221_vm0, %v16545_v61 }
 0x2c4   : > { %12139 = vmatmul.mubr.msk.f32.gmra.mrb[16].mxu0 %vm221_vm0, %v16763_v15  ;;  %11941 = vmatprep.mubr.msk.f32.mxu1 %vm221_vm0, %v16563_v35 }
 0x2c5   : > { %12141 = vmatprep.mubr.msk.f32.mxu0 %vm221_vm0, %v16766_v55 }
 0x2c7   : > { %11942 = vmatmul.mubr.msk.f32.gmra.mrb[18].mxu1 %vm221_vm0, %v16566_v24 }
 0x2c8   : > { %12142 = vmatmul.mubr.msk.f32.gmra.mrb[18].mxu0 %vm221_vm0, %v16778_v28  ;;  %11944 = vmatprep.mubr.msk.f32.mxu1 %vm221_vm0, %v16579_v52 }
 0x2c9   : > { %12144 = vmatprep.mubr.msk.f32.mxu0 %vm221_vm0, %v16781_v34 }
 0x2cb   : > { %11945 = vmatmul.mubr.msk.f32.gmra.mrb[20].mxu1 %vm221_vm0, %v16582_v1 }
 0x2cc   : > { %12145 = vmatmul.mubr.msk.f32.gmra.mrb[20].mxu0 %vm221_vm0, %v16792_v41  ;;  %11947 = vmatprep.mubr.msk.f32.mxu1 %vm221_vm0, %v16594_v50  ;;  %v17078_v41 = vld [vmem:[%s18705_s4] sm:$0xff] }
 0x2cd   : > { %12147 = vmatprep.mubr.msk.f32.mxu0 %vm221_vm0, %v16795_v38 }
 0x2cf   : > { %11948 = vmatmul.mubr.msk.f32.gmra.mrb[22].mxu1 %vm221_vm0, %v16597_v59 }
 0x2d0   : > { %12148 = vmatmul.mubr.msk.f32.gmra.mrb[22].mxu0 %vm221_vm0, %v16806_v40  ;;  %11950 = vmatprep.mubr.msk.f32.mxu1 %vm221_vm0, %v16608_v10 }
 0x2d1   : > { %12150 = vmatprep.mubr.msk.f32.mxu0 %vm221_vm0, %v16809_v0 }
 0x2d3   : > { %11951 = vmatmul.mubr.msk.f32.gmra.mrb[24].mxu1 %vm221_vm0, %v16611_v48 }
 0x2d4   : > { %12151 = vmatmul.mubr.msk.f32.gmra.mrb[24].mxu0 %vm221_vm0, %v16821_v31  ;;  %11953 = vmatprep.mubr.msk.f32.mxu1 %vm221_vm0, %v16622_v36 }
 0x2d5   : > { %12153 = vmatprep.mubr.msk.f32.mxu0 %vm221_vm0, %v10430_v62 }
 0x2d7   : > { %11954 = vmatmul.mubr.msk.f32.gmra.mrb[26].mxu1 %vm221_vm0, %v16625_v54 }
 0x2d8   : > { %12154 = vmatmul.mubr.msk.f32.gmra.mrb[26].mxu0 %vm221_vm0, %v10490_v9 }
 0x35a   : > { %v11866_v43 = vpop.f32.mrb[0].mxu1 }
 0x35b   : > { %v3209_v37 = vpop.f32.mrb[1].mxu1 }
 0x35e   : > { %v11869_v27 = vpop.f32.mrb[2].mxu1 }
 0x35f   : > { %v3219_v7 = vpop.f32.mrb[3].mxu1 }
 0x362   : > { %v11872_v5 = vpop.f32.mrb[4].mxu1 }
 0x363   : > { %v3229_v39 = vpop.f32.mrb[5].mxu1 }
 0x366   : > { %v11875_v42 = vpop.f32.mrb[6].mxu1 }
 0x367   : > { %v3239_v30 = vpop.f32.mrb[7].mxu1 }
 0x36a   : > { %v11878_v45 = vpop.f32.mrb[8].mxu1 }
 0x36b   : > { %v3249_v29 = vpop.f32.mrb[9].mxu1 }
 0x36e   : > { %v11881_v3 = vpop.f32.mrb[10].mxu1 }
 0x36f   : > { %v3259_v53 = vpop.f32.mrb[11].mxu1 }
 0x372   : > { %v11884_v8 = vpop.f32.mrb[12].mxu1 }
 0x373   : > { %v3269_v11 = vpop.f32.mrb[13].mxu1 }
 0x377   : > { %v12116_v26 = vpop.f32.mrb[0].mxu0 }
 0x378   : > { %v13810_v58 = vadd.f32 %v12116_v26, %v11866_v43  ;;  %v4962_v20 = vpop.f32.mrb[1].mxu0 }
 0x379   : > { %v13811_v61 = vadd.f32 %v4962_v20, %v3209_v37 }
 0x37b   : > { %v12119_v33 = vpop.f32.mrb[2].mxu0 }
 0x37c   : > { %v13812_v21 = vadd.f32 %v12119_v33, %v11869_v27  ;;  %v4972_v35 = vpop.f32.mrb[3].mxu0 }
 0x37d   : > { %v13813_v24 = vadd.f32 %v4972_v35, %v3219_v7 }
 0x37f   : > { %v12122_v25 = vpop.f32.mrb[4].mxu0 }
 0x380   : > { %v13814_v52 = vadd.f32 %v12122_v25, %v11872_v5  ;;  %v4982_v1 = vpop.f32.mrb[5].mxu0 }
 0x381   : > { %v13815_v50 = vadd.f32 %v4982_v1, %v3229_v39 }
 0x383   : > { %v12125_v59 = vpop.f32.mrb[6].mxu0 }
 0x384   : > { %v17059_v10 = vadd.f32 %v12125_v59, %v11875_v42  ;;  %v4992_v48 = vpop.f32.mrb[7].mxu0 }
 0x385   : > { %v17061_v36 = vadd.f32 %v4992_v48, %v3239_v30 }
 0x387   : > { %v12128_v54 = vpop.f32.mrb[8].mxu0 }
 0x388   : > { %v17063_v18 = vadd.f32 %v12128_v54, %v11878_v45  ;;  %v5002_v46 = vpop.f32.mrb[9].mxu0 }
 0x389   : > { %v17065_v49 = vadd.f32 %v5002_v46, %v3249_v29 }
 0x38b   : > { %v12131_v51 = vpop.f32.mrb[10].mxu0 }
 0x38c   : > { %v17067_v17 = vadd.f32 %v12131_v51, %v11881_v3  ;;  %v5012_v47 = vpop.f32.mrb[11].mxu0 }
 0x38d   : > { %v17069_v14 = vadd.f32 %v5012_v47, %v3259_v53 }
 0x38f   : > { %v12134_v22 = vpop.f32.mrb[12].mxu0 }
 0x390   : > { %v17071_v56 = vadd.f32 %v12134_v22, %v11884_v8  ;;  %v5022_v44 = vpop.f32.mrb[13].mxu0 }
 0x391   : > { %v17073_v63 = vadd.f32 %v5022_v44, %v3269_v11 }
 0x392   : > { %v11937_v12 = vpop.f32.mrb[14].mxu1 }
 0x393   : > { %v12137_v2 = vpop.f32.mrb[14].mxu0  ;;  %v3629_v32 = vpop.f32.mrb[15].mxu1 }
 0x394   : > { %v13824_v19 = vadd.f32 %v12137_v2, %v11937_v12  ;;  %v5032_v4 = vpop.f32.mrb[15].mxu0 }
 0x395   : > { %v13825_v13 = vadd.f32 %v5032_v4, %v3629_v32 }
 0x396   : > { %v5130_v6 = vmax.f32 %v13810_v58, %v13824_v19  ;;  %v11940_v15 = vpop.f32.mrb[16].mxu1 }
 0x397   : > { %v5129_v55 = vmax.f32 %v13811_v61, %v13825_v13  ;;  %v12140_v28 = vpop.f32.mrb[16].mxu0  ;;  %v3639_v34 = vpop.f32.mrb[17].mxu1 }
 0x398   : > { %v13826_v38 = vadd.f32 %v12140_v28, %v11940_v15  ;;  %v5042_v40 = vpop.f32.mrb[17].mxu0 }
 0x399   : > { %v5143_v0 = vmax.f32 %v5129_v55, %v5130_v6  ;;  %v13827_v57 = vadd.f32 %v5042_v40, %v3639_v34 }
 0x39a   : > { %v5132_v31 = vmax.f32 %v13812_v21, %v13826_v38  ;;  %v11943_v16 = vpop.f32.mrb[18].mxu1 }
 0x39b   : > { %v5151_v60 = vadd.f32 %v17078_v41, %v5143_v0  ;;  %v5131_v23 = vmax.f32 %v13813_v24, %v13827_v57  ;;  %v12143_v62 = vpop.f32.mrb[18].mxu0  ;;  %v3649_v9 = vpop.f32.mrb[19].mxu1 }
 0x39c   : > { %v13828_v43 = vadd.f32 %v12143_v62, %v11943_v16  ;;  %v5052_v37 = vpop.f32.mrb[19].mxu0  ;;  %v14090_v16 = vmov (%p2127_p2), 0.0|0.0   ;;  %v10526_v62 = vld [vmem:[%s18706_s5 + $0x50] sm:$0xff] (%p2127_p2) }
 0x39d   : > { %v5158_v27 = vmax.f32 %v5151_v60, 0.0  ;;  %v5144_v7 = vmax.f32 %v5131_v23, %v5132_v31  ;;  %v13829_v5 = vadd.f32 %v5052_v37, %v3649_v9  ;;  %13194 = vmatprep.subr.bf16.mxu0 (%p2127_p2), %v14090_v16  ;;  %13206 = vmatprep.subr.bf16.mxu1 (%p2127_p2), %v14090_v16  ;;  %v5178_v23 = vld [vmem:[%s18706_s5 + $0x8] sm:$0xff] (%p2127_p2)  ;;  %v10527_v9 = vld [vmem:[%s18706_s5 + $0x58] sm:$0xff] (%p2127_p2)  ;;  %v5179_v37 = vld [vmem:[%s18706_s5 + $0x10] sm:$0xff] (%p2127_p2) }
 0x39e   : > { %v5134_v39 = vmax.f32 %v13814_v52, %v13828_v43  ;;  %v11946_v42 = vpop.f32.mrb[20].mxu1 }
 0x39f   : > { %5169 = vst.msk [vmem:[%s17082_s25] sm:$0xff] %vm5168_vm1, %v5158_v27  ;;  %v5152_v30 = vadd.f32 %v17078_v41, %v5144_v7  ;;  %v5133_v45 = vmax.f32 %v13815_v50, %v13829_v5  ;;  %v12146_v29 = vpop.f32.mrb[20].mxu0  ;;  %v3659_v3 = vpop.f32.mrb[21].mxu1  ;;  %v5180_v27 = vld [vmem:[%s18706_s5 + $0x18] sm:$0xff] (%p2127_p2)  ;;  %v19401_v7 = vmov (%p2127_p2), 0.0   ;;  %v13198_v5 = vpack.c.bf16 (%p2127_p2), %v10527_v9, %v10526_v62  ;;  %v10566_v62 = vld [vmem:[%s18706_s5 + $0x168] sm:$0xff] (%p2127_p2) }
 0x3a0   : > { %v13830_v53 = vadd.f32 %v12146_v29, %v11946_v42  ;;  %v5062_v8 = vpop.f32.mrb[21].mxu0  ;;  %12172 = vmatprep.mubr.msk.f32.mxu0 (%p2127_p2), %vm14091_vm2, %v19401_v7  ;;  %12191 = vmatprep.mubr.msk.f32.mxu1 (%p2127_p2), %vm14091_vm2, %v19401_v7  ;;  %v10528_v42 = vld [vmem:[%s18706_s5 + $0x60] sm:$0xff] (%p2127_p2)  ;;  %v5182_v29 = vld [vmem:[%s18706_s5 + $0x28] sm:$0xff] (%p2127_p2) }
 0x3a1   : > { %v5159_v11 = vmax.f32 %v5152_v30, 0.0  ;;  %v5145_v26 = vmax.f32 %v5133_v45, %v5134_v39  ;;  %v13831_v58 = vadd.f32 %v5062_v8, %v3659_v3  ;;  %v13210_v39 = vpack.c.bf16 (%p2127_p2), %v5180_v27, %v5179_v37  ;;  %v10529_v30 = vld [vmem:[%s18706_s5 + $0x68] sm:$0xff] (%p2127_p2)  ;;  %v5181_v45 = vld [vmem:[%s18706_s5 + $0x20] sm:$0xff] (%p2127_p2)  ;;  %v10530_v8 = vld [vmem:[%s18706_s5 + $0x70] sm:$0xff] (%p2127_p2) }
 0x3a2   : > { %v5136_v20 = vmax.f32 %v17059_v10, %v13830_v53  ;;  %v11949_v61 = vpop.f32.mrb[22].mxu1  ;;  %v13201_v3 = vpack.c.bf16 (%p2127_p2), %v10529_v30, %v10528_v42  ;;  %v13213_v53 = vpack.c.bf16 (%p2127_p2), %v5182_v29, %v5181_v45  ;;  %v10558_v37 = vld [vmem:[%s18706_s5 + $0x130] sm:$0xff] (%p2127_p2)  ;;  %v10559_v27 = vld [vmem:[%s18706_s5 + $0x138] sm:$0xff] (%p2127_p2)  ;;  %v10570_v45 = vld [vmem:[%s18706_s5 + $0x180] sm:$0xff] (%p2127_p2) }
 0x3a3   : > { %5170 = vst.msk [vmem:[%s17082_s25 + $0x8] sm:$0xff] %vm5168_vm1, %v5159_v11  ;;  %v5153_v33 = vadd.f32 %v17078_v41, %v5145_v26  ;;  %v5135_v21 = vmax.f32 %v17061_v36, %v13831_v58  ;;  %v12149_v35 = vpop.f32.mrb[22].mxu0  ;;  %v3669_v24 = vpop.f32.mrb[23].mxu1  ;;  %v10531_v11 = vld [vmem:[%s18706_s5 + $0x78] sm:$0xff] (%p2127_p2)  ;;  %v5183_v26 = vld [vmem:[%s18706_s5 + $0x30] sm:$0xff] (%p2127_p2)  ;;  %v13252_v42 = vpack.c.bf16 (%p2127_p2), %v10559_v27, %v10558_v37  ;;  %v10571_v29 = vld [vmem:[%s18706_s5 + $0x188] sm:$0xff] (%p2127_p2) }
 0x3a4   : > { %v13832_v25 = vadd.f32 %v12149_v35, %v11949_v61  ;;  %v5072_v52 = vpop.f32.mrb[23].mxu0  ;;  %v5184_v58 = vld [vmem:[%s18706_s5 + $0x38] sm:$0xff] (%p2127_p2)  ;;  %v10543_v35 = vld [vmem:[%s18706_s5 + $0xc0] sm:$0xff] (%p2127_p2) }
 0x3a5   : > { %v5160_v1 = vmax.f32 %v5153_v33, 0.0  ;;  %v5146_v50 = vmax.f32 %v5135_v21, %v5136_v20  ;;  %v13833_v59 = vadd.f32 %v5072_v52, %v3669_v24  ;;  %v13204_v20 = vpack.c.bf16 (%p2127_p2), %v10531_v11, %v10530_v8  ;;  %v10534_v33 = vld [vmem:[%s18706_s5 + $0x80] sm:$0xff] (%p2127_p2)  ;;  %v10535_v21 = vld [vmem:[%s18706_s5 + $0x88] sm:$0xff] (%p2127_p2) }
 0x3a6   : > { %v5138_v48 = vmax.f32 %v17063_v18, %v13832_v25  ;;  %v11952_v54 = vpop.f32.mrb[24].mxu1  ;;  %v13216_v61 = vpack.c.bf16 (%p2127_p2), %v5184_v58, %v5183_v26  ;;  %v10544_v24 = vld [vmem:[%s18706_s5 + $0xc8] sm:$0xff] (%p2127_p2)  ;;  %v13219_v52 = vpack.c.bf16 (%p2127_p2), %v10535_v21, %v10534_v33  ;;  %v13267_v11 = vpack.c.bf16 (%p2127_p2), %v10571_v29, %v10570_v45  ;;  %v10581_v33 = vld [vmem:[%s18706_s5 + $0x1d0] sm:$0xff] (%p2127_p2)  ;;  %v10582_v21 = vld [vmem:[%s18706_s5 + $0x1d8] sm:$0xff] (%p2127_p2) }
 0x3a7   : > { %5171 = vst.msk [vmem:[%s17082_s25 + $0x10] sm:$0xff] %vm5168_vm1, %v5160_v1  ;;  %v5154_v10 = vadd.f32 %v17078_v41, %v5146_v50  ;;  %v5137_v46 = vmax.f32 %v17065_v49, %v13833_v59  ;;  %v12152_v51 = vpop.f32.mrb[24].mxu0  ;;  %v3679_v47 = vpop.f32.mrb[25].mxu1  ;;  %v13231_v50 = vpack.c.bf16 (%p2127_p2), %v10544_v24, %v10543_v35  ;;  %v10536_v59 = vld [vmem:[%s18706_s5 + $0x90] sm:$0xff] (%p2127_p2)  ;;  %v13282_v24 = vpack.c.bf16 (%p2127_p2), %v10582_v21, %v10581_v33  ;;  %v10618_v29 = vld [vmem:[%s18706_s5 + $0x2d8] sm:$0xff] (%p2127_p2) }
 0x3a8   : > { %v13834_v36 = vadd.f32 %v12152_v51, %v11952_v54  ;;  %v5082_v22 = vpop.f32.mrb[25].mxu0  ;;  %v10545_v54 = vld [vmem:[%s18706_s5 + $0xd0] sm:$0xff] (%p2127_p2)  ;;  %v10613_v21 = vld [vmem:[%s18706_s5 + $0x2b8] sm:$0xff] (%p2127_p2) }
 0x3a9   : > { %v5161_v44 = vmax.f32 %v5154_v10, 0.0  ;;  %v5147_v12 = vmax.f32 %v5137_v46, %v5138_v48  ;;  %v13835_v2 = vadd.f32 %v5082_v22, %v3679_v47  ;;  %v10537_v48 = vld [vmem:[%s18706_s5 + $0x98] sm:$0xff] (%p2127_p2)  ;;  %v10538_v47 = vld [vmem:[%s18706_s5 + $0xa0] sm:$0xff] (%p2127_p2)  ;;  %v10617_v45 = vld [vmem:[%s18706_s5 + $0x2d0] sm:$0xff] (%p2127_p2) }
 0x3aa   : > { %v5140_v32 = vmax.f32 %v17067_v17, %v13834_v36  ;;  %v11955_v19 = vpop.f32.mrb[26].mxu1  ;;  %v10546_v10 = vld [vmem:[%s18706_s5 + $0xd8] sm:$0xff] (%p2127_p2)  ;;  %v13222_v46 = vpack.c.bf16 (%p2127_p2), %v10537_v48, %v10536_v59  ;;  %v10539_v36 = vld [vmem:[%s18706_s5 + $0xa8] sm:$0xff] (%p2127_p2)  ;;  %v10547_v22 = vld [vmem:[%s18706_s5 + $0xe0] sm:$0xff] (%p2127_p2) }
 0x3ab   : > { %5172 = vst.msk [vmem:[%s17082_s25 + $0x18] sm:$0xff] %vm5168_vm1, %v5161_v44  ;;  %v5155_v18 = vadd.f32 %v17078_v41, %v5147_v12  ;;  %v5139_v4 = vmax.f32 %v17069_v14, %v13835_v2  ;;  %v12155_v13 = vpop.f32.mrb[26].mxu0  ;;  %v3689_v49 = vpop.f32.mrb[27].mxu1  ;;  %v13234_v51 = vpack.c.bf16 (%p2127_p2), %v10546_v10, %v10545_v54  ;;  %v10548_v44 = vld [vmem:[%s18706_s5 + $0xe8] sm:$0xff] (%p2127_p2)  ;;  %v13225_v12 = vpack.c.bf16 (%p2127_p2), %v10539_v36, %v10538_v47  ;;  %v10576_v54 = vld [vmem:[%s18706_s5 + $0x1b0] sm:$0xff] (%p2127_p2)  ;;  %v10577_v10 = vld [vmem:[%s18706_s5 + $0x1b8] sm:$0xff] (%p2127_p2) }
 0x3ac   : > { %v13836_v6 = vadd.f32 %v12155_v13, %v11955_v19  ;;  %v5092_v15 = vpop.f32.mrb[27].mxu0  ;;  %v13237_v2 = vpack.c.bf16 (%p2127_p2), %v10548_v44, %v10547_v22  ;;  %v10541_v19 = vld [vmem:[%s18706_s5 + $0xb8] sm:$0xff] (%p2127_p2)  ;;  %v13276_v47 = vpack.c.bf16 (%p2127_p2), %v10577_v10, %v10576_v54  ;;  %v10588_v22 = vld [vmem:[%s18706_s5 + $0x200] sm:$0xff] (%p2127_p2)  ;;  %v10589_v44 = vld [vmem:[%s18706_s5 + $0x208] sm:$0xff] (%p2127_p2) }
 0x3ad   : > { %v5162_v55 = vmax.f32 %v5155_v18, 0.0  ;;  %v5148_v28 = vmax.f32 %v5139_v4, %v5140_v32  ;;  %v13837_v34 = vadd.f32 %v5092_v15, %v3689_v49  ;;  %v10540_v32 = vld [vmem:[%s18706_s5 + $0xb0] sm:$0xff] (%p2127_p2)  ;;  %v10550_v4 = vld [vmem:[%s18706_s5 + $0xf8] sm:$0xff] (%p2127_p2)  ;;  %v10553_v15 = vld [vmem:[%s18706_s5 + $0x108] sm:$0xff] (%p2127_p2) }
 0x3ae   : > { %v5142_v38 = vmax.f32 %v17071_v56, %v13836_v6  ;;  %v10524_v56 = vld [vmem:[%s18706_s5 + $0x40] sm:$0xff] (%p2127_p2)  ;;  %v10549_v18 = vld [vmem:[%s18706_s5 + $0xf0] sm:$0xff] (%p2127_p2)  ;;  %v13228_v13 = vpack.c.bf16 (%p2127_p2), %v10541_v19, %v10540_v32  ;;  %v13291_v19 = vpack.c.bf16 (%p2127_p2), %v10589_v44, %v10588_v22  ;;  %v10636_v44 = vld [vmem:[%s18706_s5 + $0x358] sm:$0xff] (%p2127_p2) }
 0x3af   : > { %5173 = vst.msk [vmem:[%s17082_s25 + $0x20] sm:$0xff] %vm5168_vm1, %v5162_v55  ;;  %v5156_v17 = vadd.f32 %v17078_v41, %v5148_v28  ;;  %v5141_v40 = vmax.f32 %v17073_v63, %v13837_v34  ;;  %v10525_v63 = vld [vmem:[%s18706_s5 + $0x48] sm:$0xff] (%p2127_p2)  ;;  %v13240_v49 = vpack.c.bf16 (%p2127_p2), %v10550_v4, %v10549_v18  ;;  %v10552_v6 = vld [vmem:[%s18706_s5 + $0x100] sm:$0xff] (%p2127_p2)  ;;  %v10612_v33 = vld [vmem:[%s18706_s5 + $0x2b0] sm:$0xff] (%p2127_p2) }
 0x3b0   :  { %v13195_v60 = vpack.c.bf16 (%p2127_p2), %v10525_v63, %v10524_v56  ;;  %v10561_v55 = vld [vmem:[%s18706_s5 + $0x140] sm:$0xff] (%p2127_p2)  ;;  %v10562_v28 = vld [vmem:[%s18706_s5 + $0x148] sm:$0xff] (%p2127_p2)  ;;  %v10635_v22 = vld [vmem:[%s18706_s5 + $0x350] sm:$0xff] (%p2127_p2) }
 0x3b1   : > { %v5163_v0 = vmax.f32 %v5156_v17, 0.0  ;;  %v5149_v57 = vmax.f32 %v5141_v40, %v5142_v38  ;;  %2129 = sbr.rel (!%p2127_p2) target bundleno = 468 (0x1d4), region = 236  ;;  %v13243_v38 = vpack.c.bf16 (%p2127_p2), %v10553_v15, %v10552_v6  ;;  %v13255_v40 = vpack.c.bf16 (%p2127_p2), %v10562_v28, %v10561_v55  ;;  %v10599_v6 = vld [vmem:[%s18706_s5 + $0x250] sm:$0xff] (%p2127_p2)  ;;  %v10600_v15 = vld [vmem:[%s18706_s5 + $0x258] sm:$0xff] (%p2127_p2) }
 0x3b2   :  { %13196 = vmatpush3.bf16.msra.mxu0 (%p2127_p2), %v13195_v60  ;;  %v10557_v60 = vld [vmem:[%s18706_s5 + $0x128] sm:$0xff] (%p2127_p2)  ;;  %v13306_v28 = vpack.c.bf16 (%p2127_p2), %v10600_v15, %v10599_v6  ;;  %v10630_v6 = vld [vmem:[%s18706_s5 + $0x330] sm:$0xff] (%p2127_p2)  ;;  %v10631_v15 = vld [vmem:[%s18706_s5 + $0x338] sm:$0xff] (%p2127_p2) }
 0x3b3   : > { %5174 = vst.msk [vmem:[%s17082_s25 + $0x28] sm:$0xff] %vm5168_vm1, %v5163_v0  ;;  %v5157_v14 = vadd.f32 %v17078_v41, %v5149_v57  ;;  %v5177_v41 = vld [vmem:[%s18706_s5] sm:$0xff] (%p2127_p2)  ;;  %13197 = vmatprep.subr.bf16.mxu0 (%p2127_p2), %v14090_v16  ;;  %v10554_v0 = vld [vmem:[%s18706_s5 + $0x110] sm:$0xff] (%p2127_p2)  ;;  %v10555_v57 = vld [vmem:[%s18706_s5 + $0x118] sm:$0xff] (%p2127_p2) }
 0x3b4   :  { %v13207_v43 = vpack.c.bf16 (%p2127_p2), %v5178_v23, %v5177_v41  ;;  %v13246_v56 = vpack.c.bf16 (%p2127_p2), %v10555_v57, %v10554_v0  ;;  %v10556_v41 = vld [vmem:[%s18706_s5 + $0x120] sm:$0xff] (%p2127_p2) }
 0x3b5   : > { %v5164_v31 = vmax.f32 %v5157_v14, 0.0  ;;  %v10563_v14 = vld [vmem:[%s18706_s5 + $0x150] sm:$0xff] (%p2127_p2)  ;;  %v10565_v23 = vld [vmem:[%s18706_s5 + $0x160] sm:$0xff] (%p2127_p2)  ;;  %v13249_v9 = vpack.c.bf16 (%p2127_p2), %v10557_v60, %v10556_v41 }
 0x3b6   :  { %13208 = vmatpush3.bf16.msra.mxu1 (%p2127_p2), %v13207_v43  ;;  %13199 = vmatpush3.bf16.msra.mxu0 (%p2127_p2), %v13198_v5  ;;  %v13261_v43 = vpack.c.bf16 (%p2127_p2), %v10566_v62, %v10565_v23  ;;  %v10567_v5 = vld [vmem:[%s18706_s5 + $0x170] sm:$0xff] (%p2127_p2)  ;;  %v10606_v23 = vld [vmem:[%s18706_s5 + $0x280] sm:$0xff] (%p2127_p2)  ;;  %v10607_v62 = vld [vmem:[%s18706_s5 + $0x288] sm:$0xff] (%p2127_p2) }
 0x3b7   : > { %5175 = vst.msk [vmem:[%s17082_s25 + $0x30] sm:$0xff] %vm5168_vm1, %v5164_v31  ;;  %13209 = vmatprep.subr.bf16.mxu1 (%p2127_p2), %v14090_v16  ;;  %13200 = vmatprep.subr.bf16.mxu0 (%p2127_p2), %v14090_v16  ;;  %v10564_v31 = vld [vmem:[%s18706_s5 + $0x158] sm:$0xff] (%p2127_p2)  ;;  %v13315_v27 = vpack.c.bf16 (%p2127_p2), %v10607_v62, %v10606_v23  ;;  %v10653_v23 = vld [vmem:[%s18706_s5 + $0x3d0] sm:$0xff] (%p2127_p2) }
 0x3b8   :  { %v13258_v63 = vpack.c.bf16 %v10564_v31, %v10563_v14  ;;  %v10594_v14 = vld [vmem:[%s18706_s5 + $0x230] sm:$0xff]  ;;  %v10595_v31 = vld [vmem:[%s18706_s5 + $0x238] sm:$0xff] }
 0x3b9   :  { %v13300_v41 = vpack.c.bf16 %v10595_v31, %v10594_v14  ;;  %v10654_v62 = vld [vmem:[%s18706_s5 + $0x3d8] sm:$0xff] }
 0x3ba   :  { %13211 = vmatpush3.bf16.msra.mxu1 %v13210_v39  ;;  %13202 = vmatpush3.bf16.msra.mxu0 %v13201_v3  ;;  %v10568_v39 = vld [vmem:[%s18706_s5 + $0x178] sm:$0xff]  ;;  %v10579_v3 = vld [vmem:[%s18706_s5 + $0x1c0] sm:$0xff] }
 0x3bb   :  { %13212 = vmatprep.subr.bf16.mxu1 %v14090_v16  ;;  %13203 = vmatprep.subr.bf16.mxu0 %v14090_v16  ;;  %v13264_v30 = vpack.c.bf16 %v10568_v39, %v10567_v5 }
 0x3be   :  { %13214 = vmatpush3.bf16.msra.mxu1 %v13213_v53  ;;  %13205 = vmatpush3.bf16.msra.mxu0 %v13204_v20  ;;  %v5186_v25 = vld [vmem:[#allocation4 + $0x8] sm:$0xff]  ;;  %v5176_v1 = vld [vmem:[#allocation4] sm:$0xff]  ;;  %v5344_v34 = vld [vmem:[#allocation4 + $0x10] sm:$0xff] }
 0x3bf   :  { %13215 = vmatprep.subr.bf16.mxu1 %v14090_v16  ;;  %13218 = vmatprep.subr.bf16.mxu0 %v14090_v16  ;;  %v5429_v17 = vld [vmem:[#allocation4 + $0x18] sm:$0xff]  ;;  %v10580_v53 = vld [vmem:[%s18706_s5 + $0x1c8] sm:$0xff]  ;;  %v5599_v26 = vld [vmem:[#allocation4 + $0x28] sm:$0xff] }
 0x3c0   :  { %v5514_v8 = vld [vmem:[#allocation4 + $0x20] sm:$0xff]  ;;  %v13279_v58 = vpack.c.bf16 %v10580_v53, %v10579_v3  ;;  %v10572_v20 = vld [vmem:[%s18706_s5 + $0x190] sm:$0xff]  ;;  %v5684_v32 = vld [vmem:[#allocation4 + $0x30] sm:$0xff]  ;;  %v13330_v53 = vpack.c.bf16 %v10618_v29, %v10617_v45 }
 0x3c1   :  { %12173 = vmatmul.mubr.msk.f32.vlgmr.msra.gmra.mrb[0].mxu0 %vm5168_vm1, %v5186_v25  ;;  %v10574_v25 = vld [vmem:[%s18706_s5 + $0x1a0] sm:$0xff]  ;;  %v5854_v37 = vld [vmem:[#allocation4 + $0x40] sm:$0xff]  ;;  %v5939_v5 = vld [vmem:[#allocation4 + $0x48] sm:$0xff] }
 0x3c2   :  { %13217 = vmatpush3.bf16.msra.mxu1 %v13216_v61  ;;  %13220 = vmatpush3.bf16.msra.mxu0 %v13219_v52  ;;  %v10573_v61 = vld [vmem:[%s18706_s5 + $0x198] sm:$0xff]  ;;  %v10575_v52 = vld [vmem:[%s18706_s5 + $0x1a8] sm:$0xff]  ;;  %v5769_v18 = vld [vmem:[#allocation4 + $0x38] sm:$0xff] }
 0x3c3   :  { %13230 = vmatprep.subr.bf16.mxu1 %v14090_v16  ;;  %13221 = vmatprep.subr.bf16.mxu0 %v14090_v16  ;;  %v13270_v35 = vpack.c.bf16 %v10573_v61, %v10572_v20  ;;  %v13273_v59 = vpack.c.bf16 %v10575_v52, %v10574_v25  ;;  %v13324_v25 = vpack.c.bf16 %v10613_v21, %v10612_v33  ;;  %v6024_v54 = vld [vmem:[#allocation4 + $0x50] sm:$0xff]  ;;  %v6194_v14 = vld [vmem:[#allocation4 + $0x60] sm:$0xff]  ;;  %v10648_v45 = vld [vmem:[%s18706_s5 + $0x3b0] sm:$0xff] }
 0x3c4   :  { %12210 = vmatprep.mubr.msk.f32.mxu0 %vm14091_vm2, %v19401_v7  ;;  %v10649_v29 = vld [vmem:[%s18706_s5 + $0x3b8] sm:$0xff] }
 0x3c5   :  { %12192 = vmatmul.mubr.msk.f32.vlgmr.msra.gmra.mrb[0].mxu1 %vm5168_vm1, %v5176_v1  ;;  %v10583_v1 = vld [vmem:[%s18706_s5 + $0x1e0] sm:$0xff]  ;;  %v6364_v33 = vld [vmem:[#allocation4 + $0x70] sm:$0xff] }
 0x3c6   :  { %13232 = vmatpush3.bf16.msra.mxu1 %v13231_v50  ;;  %12229 = vmatprep.mubr.msk.f32.mxu1 %vm14091_vm2, %v19401_v7  ;;  %v10584_v50 = vld [vmem:[%s18706_s5 + $0x1e8] sm:$0xff] }
 0x3c7   :  { %13233 = vmatprep.subr.bf16.mxu1 %v14090_v16  ;;  %13223 = vmatpush3.bf16.msra.mxu0 %v13222_v46  ;;  %v13285_v48 = vpack.c.bf16 %v10584_v50, %v10583_v1  ;;  %v10585_v46 = vld [vmem:[%s18706_s5 + $0x1f0] sm:$0xff]  ;;  %v10624_v1 = vld [vmem:[%s18706_s5 + $0x300] sm:$0xff]  ;;  %v10625_v50 = vld [vmem:[%s18706_s5 + $0x308] sm:$0xff] }
 0x3c8   :  { %13224 = vmatprep.subr.bf16.mxu0 %v14090_v16  ;;  %v13339_v10 = vpack.c.bf16 %v10625_v50, %v10624_v1  ;;  %v10671_v1 = vld [vmem:[%s18706_s5 + $0x450] sm:$0xff]  ;;  %v10672_v50 = vld [vmem:[%s18706_s5 + $0x458] sm:$0xff] }
 0x3ca   :  { %13235 = vmatpush3.bf16.msra.mxu1 %v13234_v51  ;;  %v10586_v51 = vld [vmem:[%s18706_s5 + $0x1f8] sm:$0xff] }
 0x3cb   :  { %13236 = vmatprep.subr.bf16.mxu1 %v14090_v16  ;;  %13226 = vmatpush3.bf16.msra.mxu0 %v13225_v12  ;;  %v13288_v36 = vpack.c.bf16 %v10586_v51, %v10585_v46  ;;  %v10597_v12 = vld [vmem:[%s18706_s5 + $0x240] sm:$0xff] }
 0x3cc   :  { %13227 = vmatprep.subr.bf16.mxu0 %v14090_v16  ;;  %v6109_v46 = vld [vmem:[#allocation4 + $0x58] sm:$0xff] }
 0x3ce   :  { %13238 = vmatpush3.bf16.msra.mxu1 %v13237_v2  ;;  %v10598_v2 = vld [vmem:[%s18706_s5 + $0x248] sm:$0xff] }
 0x3cf   :  { %13239 = vmatprep.subr.bf16.mxu1 %v14090_v16  ;;  %13229 = vmatpush3.bf16.msra.mxu0 %v13228_v13  ;;  %v13303_v4 = vpack.c.bf16 %v10598_v2, %v10597_v12  ;;  %v10590_v13 = vld [vmem:[%s18706_s5 + $0x210] sm:$0xff]  ;;  %v13354_v2 = vpack.c.bf16 %v10636_v44, %v10635_v22  ;;  %v10667_v44 = vld [vmem:[%s18706_s5 + $0x438] sm:$0xff] }
 0x3d0   :  { %13242 = vmatprep.subr.bf16.mxu0 %v14090_v16  ;;  %v10666_v22 = vld [vmem:[%s18706_s5 + $0x430] sm:$0xff] }
 0x3d2   :  { %13241 = vmatpush3.bf16.msra.mxu1 %v13240_v49  ;;  %12211 = vmatmul.mubr.msk.f32.vlgmr.msra.gmra.mrb[2].mxu0 %vm5168_vm1, %v5344_v34  ;;  %v10591_v49 = vld [vmem:[%s18706_s5 + $0x218] sm:$0xff]  ;;  %v10592_v34 = vld [vmem:[%s18706_s5 + $0x220] sm:$0xff] }
 0x3d3   :  { %13254 = vmatprep.subr.bf16.mxu1 %v14090_v16  ;;  %13244 = vmatpush3.bf16.msra.mxu0 %v13243_v38  ;;  %v13294_v55 = vpack.c.bf16 %v10591_v49, %v10590_v13  ;;  %v10593_v38 = vld [vmem:[%s18706_s5 + $0x228] sm:$0xff] }
 0x3d4   :  { %13245 = vmatprep.subr.bf16.mxu0 %v14090_v16  ;;  %12248 = vmatprep.mubr.msk.f32.mxu0 %vm14091_vm2, %v19401_v7  ;;  %v13297_v0 = vpack.c.bf16 %v10593_v38, %v10592_v34  ;;  %v13348_v34 = vpack.c.bf16 %v10631_v15, %v10630_v6  ;;  %v6534_v6 = vld [vmem:[#allocation4 + $0x80] sm:$0xff] }
 0x3d5   :  { %12230 = vmatmul.mubr.msk.f32.vlgmr.msra.gmra.mrb[2].mxu1 %vm5168_vm1, %v5429_v17  ;;  %v10601_v17 = vld [vmem:[%s18706_s5 + $0x260] sm:$0xff] }
 0x3d6   :  { %13256 = vmatpush3.bf16.msra.mxu1 %v13255_v40  ;;  %12267 = vmatprep.mubr.msk.f32.mxu1 %vm14091_vm2, %v19401_v7  ;;  %v10602_v40 = vld [vmem:[%s18706_s5 + $0x268] sm:$0xff] }
 0x3d7   :  { %13257 = vmatprep.subr.bf16.mxu1 %v14090_v16  ;;  %13247 = vmatpush3.bf16.msra.mxu0 %v13246_v56  ;;  %v13309_v57 = vpack.c.bf16 %v10602_v40, %v10601_v17  ;;  %v10603_v56 = vld [vmem:[%s18706_s5 + $0x270] sm:$0xff]  ;;  %v10642_v17 = vld [vmem:[%s18706_s5 + $0x380] sm:$0xff]  ;;  %v10643_v40 = vld [vmem:[%s18706_s5 + $0x388] sm:$0xff] }
 0x3d8   :  { %13248 = vmatprep.subr.bf16.mxu0 %v14090_v16  ;;  %v13363_v31 = vpack.c.bf16 %v10643_v40, %v10642_v17  ;;  %v10689_v17 = vld [vmem:[%s18706_s5 + $0x4d0] sm:$0xff]  ;;  %v10690_v40 = vld [vmem:[%s18706_s5 + $0x4d8] sm:$0xff] }
 0x3da   :  { %13259 = vmatpush3.bf16.msra.mxu1 %v13258_v63  ;;  %v10604_v63 = vld [vmem:[%s18706_s5 + $0x278] sm:$0xff] }
 0x3db   :  { %13260 = vmatprep.subr.bf16.mxu1 %v14090_v16  ;;  %13250 = vmatpush3.bf16.msra.mxu0 %v13249_v9  ;;  %v13312_v60 = vpack.c.bf16 %v10604_v63, %v10603_v56  ;;  %v10615_v9 = vld [vmem:[%s18706_s5 + $0x2c0] sm:$0xff]  ;;  %v6279_v56 = vld [vmem:[#allocation4 + $0x68] sm:$0xff] }
 0x3dc   :  { %13251 = vmatprep.subr.bf16.mxu0 %v14090_v16 }
 0x3de   :  { %13262 = vmatpush3.bf16.msra.mxu1 %v13261_v43  ;;  %v10616_v43 = vld [vmem:[%s18706_s5 + $0x2c8] sm:$0xff] }
 0x3df   :  { %13263 = vmatprep.subr.bf16.mxu1 %v14090_v16  ;;  %13253 = vmatpush3.bf16.msra.mxu0 %v13252_v42  ;;  %v13327_v39 = vpack.c.bf16 %v10616_v43, %v10615_v9  ;;  %v10608_v42 = vld [vmem:[%s18706_s5 + $0x290] sm:$0xff]  ;;  %v13378_v43 = vpack.c.bf16 %v10654_v62, %v10653_v23  ;;  %v10685_v62 = vld [vmem:[%s18706_s5 + $0x4b8] sm:$0xff] }
 0x3e0   :  { %13266 = vmatprep.subr.bf16.mxu0 %v14090_v16  ;;  %v10684_v23 = vld [vmem:[%s18706_s5 + $0x4b0] sm:$0xff] }
 0x3e2   :  { %13265 = vmatpush3.bf16.msra.mxu1 %v13264_v30  ;;  %12249 = vmatmul.mubr.msk.f32.vlgmr.msra.gmra.mrb[4].mxu0 %vm5168_vm1, %v5514_v8  ;;  %v10609_v30 = vld [vmem:[%s18706_s5 + $0x298] sm:$0xff]  ;;  %v10610_v8 = vld [vmem:[%s18706_s5 + $0x2a0] sm:$0xff] }
 0x3e3   :  { %13278 = vmatprep.subr.bf16.mxu1 %v14090_v16  ;;  %13268 = vmatpush3.bf16.msra.mxu0 %v13267_v11  ;;  %v13318_v3 = vpack.c.bf16 %v10609_v30, %v10608_v42  ;;  %v10611_v11 = vld [vmem:[%s18706_s5 + $0x2a8] sm:$0xff] }
 0x3e4   :  { %13269 = vmatprep.subr.bf16.mxu0 %v14090_v16  ;;  %12286 = vmatprep.mubr.msk.f32.mxu0 %vm14091_vm2, %v19401_v7  ;;  %v13321_v20 = vpack.c.bf16 %v10611_v11, %v10610_v8  ;;  %v13372_v8 = vpack.c.bf16 %v10649_v29, %v10648_v45  ;;  %v6704_v45 = vld [vmem:[#allocation4 + $0x90] sm:$0xff] }
 0x3e5   :  { %12268 = vmatmul.mubr.msk.f32.vlgmr.msra.gmra.mrb[4].mxu1 %vm5168_vm1, %v5599_v26  ;;  %v10619_v26 = vld [vmem:[%s18706_s5 + $0x2e0] sm:$0xff] }
 0x3e6   :  { %13280 = vmatpush3.bf16.msra.mxu1 %v13279_v58  ;;  %12305 = vmatprep.mubr.msk.f32.mxu1 %vm14091_vm2, %v19401_v7  ;;  %v10620_v58 = vld [vmem:[%s18706_s5 + $0x2e8] sm:$0xff] }
 0x3e7   :  { %13281 = vmatprep.subr.bf16.mxu1 %v14090_v16  ;;  %13271 = vmatpush3.bf16.msra.mxu0 %v13270_v35  ;;  %v13333_v61 = vpack.c.bf16 %v10620_v58, %v10619_v26  ;;  %v10621_v35 = vld [vmem:[%s18706_s5 + $0x2f0] sm:$0xff]  ;;  %v10660_v26 = vld [vmem:[%s18706_s5 + $0x400] sm:$0xff]  ;;  %v10661_v58 = vld [vmem:[%s18706_s5 + $0x408] sm:$0xff] }
 0x3e8   :  { %13272 = vmatprep.subr.bf16.mxu0 %v14090_v16  ;;  %v13387_v21 = vpack.c.bf16 %v10661_v58, %v10660_v26  ;;  %v10707_v26 = vld [vmem:[%s18706_s5 + $0x550] sm:$0xff]  ;;  %v10708_v58 = vld [vmem:[%s18706_s5 + $0x558] sm:$0xff] }
 0x3ea   :  { %13283 = vmatpush3.bf16.msra.mxu1 %v13282_v24  ;;  %v10622_v24 = vld [vmem:[%s18706_s5 + $0x2f8] sm:$0xff] }
 0x3eb   :  { %13284 = vmatprep.subr.bf16.mxu1 %v14090_v16  ;;  %13274 = vmatpush3.bf16.msra.mxu0 %v13273_v59  ;;  %v13336_v52 = vpack.c.bf16 %v10622_v24, %v10621_v35  ;;  %v10633_v59 = vld [vmem:[%s18706_s5 + $0x340] sm:$0xff] }
 0x3ec   :  { %13275 = vmatprep.subr.bf16.mxu0 %v14090_v16  ;;  %v6449_v35 = vld [vmem:[#allocation4 + $0x78] sm:$0xff] }
 0x3ee   :  { %13286 = vmatpush3.bf16.msra.mxu1 %v13285_v48  ;;  %v10634_v48 = vld [vmem:[%s18706_s5 + $0x348] sm:$0xff] }
 0x3ef   :  { %13287 = vmatprep.subr.bf16.mxu1 %v14090_v16  ;;  %13277 = vmatpush3.bf16.msra.mxu0 %v13276_v47  ;;  %v13351_v51 = vpack.c.bf16 %v10634_v48, %v10633_v59  ;;  %v10626_v47 = vld [vmem:[%s18706_s5 + $0x310] sm:$0xff]  ;;  %v13402_v48 = vpack.c.bf16 %v10672_v50, %v10671_v1  ;;  %v10703_v50 = vld [vmem:[%s18706_s5 + $0x538] sm:$0xff] }
 0x3f0   :  { %13290 = vmatprep.subr.bf16.mxu0 %v14090_v16  ;;  %v10702_v1 = vld [vmem:[%s18706_s5 + $0x530] sm:$0xff] }
 0x3f2   :  { %13289 = vmatpush3.bf16.msra.mxu1 %v13288_v36  ;;  %12287 = vmatmul.mubr.msk.f32.vlgmr.msra.gmra.mrb[6].mxu0 %vm5168_vm1, %v5684_v32  ;;  %v10627_v36 = vld [vmem:[%s18706_s5 + $0x318] sm:$0xff]  ;;  %v10628_v32 = vld [vmem:[%s18706_s5 + $0x320] sm:$0xff] }
 0x3f3   :  { %13302 = vmatprep.subr.bf16.mxu1 %v14090_v16  ;;  %13292 = vmatpush3.bf16.msra.mxu0 %v13291_v19  ;;  %v13342_v12 = vpack.c.bf16 %v10627_v36, %v10626_v47  ;;  %v10629_v19 = vld [vmem:[%s18706_s5 + $0x328] sm:$0xff] }
 0x3f4   :  { %13293 = vmatprep.subr.bf16.mxu0 %v14090_v16  ;;  %12324 = vmatprep.mubr.msk.f32.mxu0 %vm14091_vm2, %v19401_v7  ;;  %v13345_v13 = vpack.c.bf16 %v10629_v19, %v10628_v32  ;;  %v13396_v32 = vpack.c.bf16 %v10667_v44, %v10666_v22  ;;  %v6874_v22 = vld [vmem:[#allocation4 + $0xa0] sm:$0xff] }
 0x3f5   :  { %12306 = vmatmul.mubr.msk.f32.vlgmr.msra.gmra.mrb[6].mxu1 %vm5168_vm1, %v5769_v18  ;;  %v10637_v18 = vld [vmem:[%s18706_s5 + $0x360] sm:$0xff] }
 0x3f6   :  { %13304 = vmatpush3.bf16.msra.mxu1 %v13303_v4  ;;  %12343 = vmatprep.mubr.msk.f32.mxu1 %vm14091_vm2, %v19401_v7  ;;  %v10638_v4 = vld [vmem:[%s18706_s5 + $0x368] sm:$0xff] }
 0x3f7   :  { %13305 = vmatprep.subr.bf16.mxu1 %v14090_v16  ;;  %13295 = vmatpush3.bf16.msra.mxu0 %v13294_v55  ;;  %v13357_v49 = vpack.c.bf16 %v10638_v4, %v10637_v18  ;;  %v10639_v55 = vld [vmem:[%s18706_s5 + $0x370] sm:$0xff]  ;;  %v10678_v18 = vld [vmem:[%s18706_s5 + $0x480] sm:$0xff]  ;;  %v10679_v4 = vld [vmem:[%s18706_s5 + $0x488] sm:$0xff] }
 0x3f8   :  { %13296 = vmatprep.subr.bf16.mxu0 %v14090_v16  ;;  %v13411_v15 = vpack.c.bf16 %v10679_v4, %v10678_v18  ;;  %v10725_v18 = vld [vmem:[%s18706_s5 + $0x5d0] sm:$0xff]  ;;  %v10726_v4 = vld [vmem:[%s18706_s5 + $0x5d8] sm:$0xff] }
 0x3fa   :  { %13307 = vmatpush3.bf16.msra.mxu1 %v13306_v28  ;;  %v10640_v28 = vld [vmem:[%s18706_s5 + $0x378] sm:$0xff] }
 0x3fb   :  { %13308 = vmatprep.subr.bf16.mxu1 %v14090_v16  ;;  %13298 = vmatpush3.bf16.msra.mxu0 %v13297_v0  ;;  %v13360_v38 = vpack.c.bf16 %v10640_v28, %v10639_v55  ;;  %v10651_v0 = vld [vmem:[%s18706_s5 + $0x3c0] sm:$0xff]  ;;  %v6619_v55 = vld [vmem:[#allocation4 + $0x88] sm:$0xff] }
 0x3fc   :  { %13299 = vmatprep.subr.bf16.mxu0 %v14090_v16 }
 0x3fe   :  { %13310 = vmatpush3.bf16.msra.mxu1 %v13309_v57  ;;  %v10652_v57 = vld [vmem:[%s18706_s5 + $0x3c8] sm:$0xff] }
 0x3ff   :  { %13311 = vmatprep.subr.bf16.mxu1 %v14090_v16  ;;  %13301 = vmatpush3.bf16.msra.mxu0 %v13300_v41  ;;  %v13375_v63 = vpack.c.bf16 %v10652_v57, %v10651_v0  ;;  %v10644_v41 = vld [vmem:[%s18706_s5 + $0x390] sm:$0xff]  ;;  %v13426_v57 = vpack.c.bf16 %v10690_v40, %v10689_v17  ;;  %v10721_v40 = vld [vmem:[%s18706_s5 + $0x5b8] sm:$0xff] }
 0x400   :  { %13314 = vmatprep.subr.bf16.mxu0 %v14090_v16  ;;  %v10720_v17 = vld [vmem:[%s18706_s5 + $0x5b0] sm:$0xff] }
 0x402   :  { %13313 = vmatpush3.bf16.msra.mxu1 %v13312_v60  ;;  %12325 = vmatmul.mubr.msk.f32.vlgmr.msra.gmra.mrb[8].mxu0 %vm5168_vm1, %v5854_v37  ;;  %v10645_v60 = vld [vmem:[%s18706_s5 + $0x398] sm:$0xff]  ;;  %v10646_v37 = vld [vmem:[%s18706_s5 + $0x3a0] sm:$0xff] }
 0x403   :  { %13326 = vmatprep.subr.bf16.mxu1 %v14090_v16  ;;  %13316 = vmatpush3.bf16.msra.mxu0 %v13315_v27  ;;  %v13366_v9 = vpack.c.bf16 %v10645_v60, %v10644_v41  ;;  %v10647_v27 = vld [vmem:[%s18706_s5 + $0x3a8] sm:$0xff] }
 0x404   :  { %13317 = vmatprep.subr.bf16.mxu0 %v14090_v16  ;;  %12362 = vmatprep.mubr.msk.f32.mxu0 %vm14091_vm2, %v19401_v7  ;;  %v13369_v42 = vpack.c.bf16 %v10647_v27, %v10646_v37  ;;  %v13420_v37 = vpack.c.bf16 %v10685_v62, %v10684_v23  ;;  %v7044_v23 = vld [vmem:[#allocation4 + $0xb0] sm:$0xff] }
 0x405   :  { %12344 = vmatmul.mubr.msk.f32.vlgmr.msra.gmra.mrb[8].mxu1 %vm5168_vm1, %v5939_v5  ;;  %v10655_v5 = vld [vmem:[%s18706_s5 + $0x3e0] sm:$0xff] }
 0x406   :  { %13328 = vmatpush3.bf16.msra.mxu1 %v13327_v39  ;;  %12381 = vmatprep.mubr.msk.f32.mxu1 %vm14091_vm2, %v19401_v7  ;;  %v10656_v39 = vld [vmem:[%s18706_s5 + $0x3e8] sm:$0xff] }
 0x407   :  { %13329 = vmatprep.subr.bf16.mxu1 %v14090_v16  ;;  %13319 = vmatpush3.bf16.msra.mxu0 %v13318_v3  ;;  %v13381_v30 = vpack.c.bf16 %v10656_v39, %v10655_v5  ;;  %v10657_v3 = vld [vmem:[%s18706_s5 + $0x3f0] sm:$0xff]  ;;  %v10696_v5 = vld [vmem:[%s18706_s5 + $0x500] sm:$0xff]  ;;  %v10697_v39 = vld [vmem:[%s18706_s5 + $0x508] sm:$0xff] }
 0x408   :  { %13320 = vmatprep.subr.bf16.mxu0 %v14090_v16  ;;  %v13435_v29 = vpack.c.bf16 %v10697_v39, %v10696_v5  ;;  %v10743_v5 = vld [vmem:[%s18706_s5 + $0x650] sm:$0xff]  ;;  %v10744_v39 = vld [vmem:[%s18706_s5 + $0x658] sm:$0xff] }
 0x40a   :  { %13331 = vmatpush3.bf16.msra.mxu1 %v13330_v53  ;;  %v10658_v53 = vld [vmem:[%s18706_s5 + $0x3f8] sm:$0xff] }
 0x40b   :  { %13332 = vmatprep.subr.bf16.mxu1 %v14090_v16  ;;  %13322 = vmatpush3.bf16.msra.mxu0 %v13321_v20  ;;  %v13384_v11 = vpack.c.bf16 %v10658_v53, %v10657_v3  ;;  %v10669_v20 = vld [vmem:[%s18706_s5 + $0x440] sm:$0xff] }
 0x40c   :  { %13323 = vmatprep.subr.bf16.mxu0 %v14090_v16  ;;  %v6789_v3 = vld [vmem:[#allocation4 + $0x98] sm:$0xff] }
 0x40e   :  { %13334 = vmatpush3.bf16.msra.mxu1 %v13333_v61  ;;  %v10670_v61 = vld [vmem:[%s18706_s5 + $0x448] sm:$0xff] }
 0x40f   :  { %13335 = vmatprep.subr.bf16.mxu1 %v14090_v16  ;;  %13325 = vmatpush3.bf16.msra.mxu0 %v13324_v25  ;;  %v13399_v24 = vpack.c.bf16 %v10670_v61, %v10669_v20  ;;  %v10662_v25 = vld [vmem:[%s18706_s5 + $0x410] sm:$0xff]  ;;  %v13450_v61 = vpack.c.bf16 %v10708_v58, %v10707_v26  ;;  %v10739_v58 = vld [vmem:[%s18706_s5 + $0x638] sm:$0xff] }
 0x410   :  { %13338 = vmatprep.subr.bf16.mxu0 %v14090_v16  ;;  %v10738_v26 = vld [vmem:[%s18706_s5 + $0x630] sm:$0xff] }
 0x412   :  { %13337 = vmatpush3.bf16.msra.mxu1 %v13336_v52  ;;  %12363 = vmatmul.mubr.msk.f32.vlgmr.msra.gmra.mrb[10].mxu0 %vm5168_vm1, %v6024_v54  ;;  %v10663_v52 = vld [vmem:[%s18706_s5 + $0x418] sm:$0xff]  ;;  %v10664_v54 = vld [vmem:[%s18706_s5 + $0x420] sm:$0xff] }
 0x413   :  { %13350 = vmatprep.subr.bf16.mxu1 %v14090_v16  ;;  %13340 = vmatpush3.bf16.msra.mxu0 %v13339_v10  ;;  %v13390_v59 = vpack.c.bf16 %v10663_v52, %v10662_v25  ;;  %v10665_v10 = vld [vmem:[%s18706_s5 + $0x428] sm:$0xff] }
 0x414   :  { %13341 = vmatprep.subr.bf16.mxu0 %v14090_v16  ;;  %12400 = vmatprep.mubr.msk.f32.mxu0 %vm14091_vm2, %v19401_v7  ;;  %v13393_v47 = vpack.c.bf16 %v10665_v10, %v10664_v54  ;;  %v13444_v54 = vpack.c.bf16 %v10703_v50, %v10702_v1  ;;  %v7214_v1 = vld [vmem:[#allocation4 + $0xc0] sm:$0xff] }
 0x415   :  { %12382 = vmatmul.mubr.msk.f32.vlgmr.msra.gmra.mrb[10].mxu1 %vm5168_vm1, %v6109_v46  ;;  %v10673_v46 = vld [vmem:[%s18706_s5 + $0x460] sm:$0xff] }
 0x416   :  { %13352 = vmatpush3.bf16.msra.mxu1 %v13351_v51  ;;  %12419 = vmatprep.mubr.msk.f32.mxu1 %vm14091_vm2, %v19401_v7  ;;  %v10674_v51 = vld [vmem:[%s18706_s5 + $0x468] sm:$0xff] }
 0x417   :  { %13353 = vmatprep.subr.bf16.mxu1 %v14090_v16  ;;  %13343 = vmatpush3.bf16.msra.mxu0 %v13342_v12  ;;  %v13405_v36 = vpack.c.bf16 %v10674_v51, %v10673_v46  ;;  %v10675_v12 = vld [vmem:[%s18706_s5 + $0x470] sm:$0xff]  ;;  %v10714_v46 = vld [vmem:[%s18706_s5 + $0x580] sm:$0xff]  ;;  %v10715_v51 = vld [vmem:[%s18706_s5 + $0x588] sm:$0xff] }
 0x418   :  { %13344 = vmatprep.subr.bf16.mxu0 %v14090_v16  ;;  %v13459_v44 = vpack.c.bf16 %v10715_v51, %v10714_v46  ;;  %v10761_v46 = vld [vmem:[%s18706_s5 + $0x6d0] sm:$0xff]  ;;  %v10762_v51 = vld [vmem:[%s18706_s5 + $0x6d8] sm:$0xff] }
 0x41a   :  { %13355 = vmatpush3.bf16.msra.mxu1 %v13354_v2  ;;  %v10676_v2 = vld [vmem:[%s18706_s5 + $0x478] sm:$0xff] }
 0x41b   :  { %13356 = vmatprep.subr.bf16.mxu1 %v14090_v16  ;;  %13346 = vmatpush3.bf16.msra.mxu0 %v13345_v13  ;;  %v13408_v19 = vpack.c.bf16 %v10676_v2, %v10675_v12  ;;  %v10687_v13 = vld [vmem:[%s18706_s5 + $0x4c0] sm:$0xff]  ;;  %v6959_v12 = vld [vmem:[#allocation4 + $0xa8] sm:$0xff] }
 0x41c   :  { %13347 = vmatprep.subr.bf16.mxu0 %v14090_v16 }
 0x41e   :  { %13358 = vmatpush3.bf16.msra.mxu1 %v13357_v49  ;;  %v10688_v49 = vld [vmem:[%s18706_s5 + $0x4c8] sm:$0xff] }
 0x41f   :  { %13359 = vmatprep.subr.bf16.mxu1 %v14090_v16  ;;  %13349 = vmatpush3.bf16.msra.mxu0 %v13348_v34  ;;  %v13423_v28 = vpack.c.bf16 %v10688_v49, %v10687_v13  ;;  %v10680_v34 = vld [vmem:[%s18706_s5 + $0x490] sm:$0xff]  ;;  %v13474_v49 = vpack.c.bf16 %v10726_v4, %v10725_v18  ;;  %v10757_v4 = vld [vmem:[%s18706_s5 + $0x6b8] sm:$0xff] }
 0x420   :  { %13362 = vmatprep.subr.bf16.mxu0 %v14090_v16  ;;  %v10756_v18 = vld [vmem:[%s18706_s5 + $0x6b0] sm:$0xff] }
 0x422   :  { %13361 = vmatpush3.bf16.msra.mxu1 %v13360_v38  ;;  %12401 = vmatmul.mubr.msk.f32.vlgmr.msra.gmra.mrb[12].mxu0 %vm5168_vm1, %v6194_v14  ;;  %v10681_v38 = vld [vmem:[%s18706_s5 + $0x498] sm:$0xff]  ;;  %v10682_v14 = vld [vmem:[%s18706_s5 + $0x4a0] sm:$0xff] }
 0x423   :  { %13374 = vmatprep.subr.bf16.mxu1 %v14090_v16  ;;  %13364 = vmatpush3.bf16.msra.mxu0 %v13363_v31  ;;  %v13414_v0 = vpack.c.bf16 %v10681_v38, %v10680_v34  ;;  %v10683_v31 = vld [vmem:[%s18706_s5 + $0x4a8] sm:$0xff] }
 0x424   :  { %13365 = vmatprep.subr.bf16.mxu0 %v14090_v16  ;;  %12438 = vmatprep.mubr.msk.f32.mxu0 %vm14091_vm2, %v19401_v7  ;;  %v13417_v41 = vpack.c.bf16 %v10683_v31, %v10682_v14  ;;  %v13468_v14 = vpack.c.bf16 %v10721_v40, %v10720_v17  ;;  %v7384_v17 = vld [vmem:[#allocation4 + $0xd0] sm:$0xff] }
 0x425   :  { %12420 = vmatmul.mubr.msk.f32.vlgmr.msra.gmra.mrb[12].mxu1 %vm5168_vm1, %v6279_v56  ;;  %v10691_v56 = vld [vmem:[%s18706_s5 + $0x4e0] sm:$0xff] }
 0x426   :  { %13376 = vmatpush3.bf16.msra.mxu1 %v13375_v63  ;;  %12457 = vmatprep.mubr.msk.f32.mxu1 %vm14091_vm2, %v19401_v7  ;;  %v10692_v63 = vld [vmem:[%s18706_s5 + $0x4e8] sm:$0xff] }
 0x427   :  { %13377 = vmatprep.subr.bf16.mxu1 %v14090_v16  ;;  %13367 = vmatpush3.bf16.msra.mxu0 %v13366_v9  ;;  %v13429_v60 = vpack.c.bf16 %v10692_v63, %v10691_v56  ;;  %v10693_v9 = vld [vmem:[%s18706_s5 + $0x4f0] sm:$0xff]  ;;  %v10732_v56 = vld [vmem:[%s18706_s5 + $0x600] sm:$0xff]  ;;  %v10733_v63 = vld [vmem:[%s18706_s5 + $0x608] sm:$0xff] }
 0x428   :  { %13368 = vmatprep.subr.bf16.mxu0 %v14090_v16  ;;  %v13483_v62 = vpack.c.bf16 %v10733_v63, %v10732_v56  ;;  %v10779_v56 = vld [vmem:[%s18706_s5 + $0x750] sm:$0xff]  ;;  %v10780_v63 = vld [vmem:[%s18706_s5 + $0x758] sm:$0xff] }
 0x42a   :  { %13379 = vmatpush3.bf16.msra.mxu1 %v13378_v43  ;;  %v10694_v43 = vld [vmem:[%s18706_s5 + $0x4f8] sm:$0xff] }
 0x42b   :  { %13380 = vmatprep.subr.bf16.mxu1 %v14090_v16  ;;  %13370 = vmatpush3.bf16.msra.mxu0 %v13369_v42  ;;  %v13432_v27 = vpack.c.bf16 %v10694_v43, %v10693_v9  ;;  %v10705_v42 = vld [vmem:[%s18706_s5 + $0x540] sm:$0xff] }
 0x42c   :  { %13371 = vmatprep.subr.bf16.mxu0 %v14090_v16  ;;  %v7129_v9 = vld [vmem:[#allocation4 + $0xb8] sm:$0xff] }
 0x42e   :  { %13382 = vmatpush3.bf16.msra.mxu1 %v13381_v30  ;;  %v10706_v30 = vld [vmem:[%s18706_s5 + $0x548] sm:$0xff] }
 0x42f   :  { %13383 = vmatprep.subr.bf16.mxu1 %v14090_v16  ;;  %13373 = vmatpush3.bf16.msra.mxu0 %v13372_v8  ;;  %v13447_v53 = vpack.c.bf16 %v10706_v30, %v10705_v42  ;;  %v10698_v8 = vld [vmem:[%s18706_s5 + $0x510] sm:$0xff]  ;;  %v13498_v30 = vpack.c.bf16 %v10744_v39, %v10743_v5 }
 0x430   :  { %13386 = vmatprep.subr.bf16.mxu0 %v14090_v16 }
 0x432   :  { %13385 = vmatpush3.bf16.msra.mxu1 %v13384_v11  ;;  %12439 = vmatmul.mubr.msk.f32.vlgmr.msra.gmra.mrb[14].mxu0 %vm5168_vm1, %v6364_v33  ;;  %v10699_v11 = vld [vmem:[%s18706_s5 + $0x518] sm:$0xff]  ;;  %v10700_v33 = vld [vmem:[%s18706_s5 + $0x520] sm:$0xff] }
 0x433   :  { %13398 = vmatprep.subr.bf16.mxu1 %v14090_v16  ;;  %13388 = vmatpush3.bf16.msra.mxu0 %v13387_v21  ;;  %v13438_v20 = vpack.c.bf16 %v10699_v11, %v10698_v8  ;;  %v10701_v21 = vld [vmem:[%s18706_s5 + $0x528] sm:$0xff] }
 0x434   :  { %13389 = vmatprep.subr.bf16.mxu0 %v14090_v16  ;;  %12476 = vmatprep.mubr.msk.f32.mxu0 %vm14091_vm2, %v19401_v7  ;;  %v13441_v25 = vpack.c.bf16 %v10701_v21, %v10700_v33  ;;  %v13492_v33 = vpack.c.bf16 %v10739_v58, %v10738_v26  ;;  %v10786_v58 = vld [vmem:[%s18706_s5 + $0x780] sm:$0xff] }
 0x435   :  { %12458 = vmatmul.mubr.msk.f32.vlgmr.msra.gmra.mrb[14].mxu1 %vm5168_vm1, %v6449_v35  ;;  %v10709_v35 = vld [vmem:[%s18706_s5 + $0x560] sm:$0xff] }
 0x436   :  { %13400 = vmatpush3.bf16.msra.mxu1 %v13399_v24  ;;  %12495 = vmatprep.mubr.msk.f32.mxu1 %vm14091_vm2, %v19401_v7  ;;  %v10710_v24 = vld [vmem:[%s18706_s5 + $0x568] sm:$0xff] }
 0x437   :  { %13401 = vmatprep.subr.bf16.mxu1 %v14090_v16  ;;  %13391 = vmatpush3.bf16.msra.mxu0 %v13390_v59  ;;  %v13453_v52 = vpack.c.bf16 %v10710_v24, %v10709_v35  ;;  %v10711_v59 = vld [vmem:[%s18706_s5 + $0x570] sm:$0xff]  ;;  %v10750_v35 = vld [vmem:[%s18706_s5 + $0x680] sm:$0xff]  ;;  %v10751_v24 = vld [vmem:[%s18706_s5 + $0x688] sm:$0xff] }
 0x438   :  { %13392 = vmatprep.subr.bf16.mxu0 %v14090_v16  ;;  %v13507_v50 = vpack.c.bf16 %v10751_v24, %v10750_v35  ;;  %v7639_v24 = vld [vmem:[#allocation4 + $0xe8] sm:$0xff] }
 0x43a   :  { %13403 = vmatpush3.bf16.msra.mxu1 %v13402_v48  ;;  %v10712_v48 = vld [vmem:[%s18706_s5 + $0x578] sm:$0xff] }
 0x43b   :  { %13404 = vmatprep.subr.bf16.mxu1 %v14090_v16  ;;  %13394 = vmatpush3.bf16.msra.mxu0 %v13393_v47  ;;  %v13456_v10 = vpack.c.bf16 %v10712_v48, %v10711_v59  ;;  %v10723_v47 = vld [vmem:[%s18706_s5 + $0x5c0] sm:$0xff]  ;;  %v7299_v59 = vld [vmem:[#allocation4 + $0xc8] sm:$0xff] }
 0x43c   :  { %13395 = vmatprep.subr.bf16.mxu0 %v14090_v16 }
 0x43e   :  { %13406 = vmatpush3.bf16.msra.mxu1 %v13405_v36  ;;  %v10724_v36 = vld [vmem:[%s18706_s5 + $0x5c8] sm:$0xff] }
 0x43f   :  { %13407 = vmatprep.subr.bf16.mxu1 %v14090_v16  ;;  %13397 = vmatpush3.bf16.msra.mxu0 %v13396_v32  ;;  %v13471_v2 = vpack.c.bf16 %v10724_v36, %v10723_v47  ;;  %v10716_v32 = vld [vmem:[%s18706_s5 + $0x590] sm:$0xff]  ;;  %v13522_v36 = vpack.c.bf16 %v10762_v51, %v10761_v46  ;;  %v10791_v46 = vld [vmem:[%s18706_s5 + $0x7a8] sm:$0xff] }
 0x440   :  { %13410 = vmatprep.subr.bf16.mxu0 %v14090_v16 }
 0x442   :  { %13409 = vmatpush3.bf16.msra.mxu1 %v13408_v19  ;;  %12477 = vmatmul.mubr.msk.f32.vlgmr.msra.gmra.mrb[16].mxu0 %vm5168_vm1, %v6534_v6  ;;  %v10717_v19 = vld [vmem:[%s18706_s5 + $0x598] sm:$0xff]  ;;  %v10718_v6 = vld [vmem:[%s18706_s5 + $0x5a0] sm:$0xff] }
 0x443   :  { %13422 = vmatprep.subr.bf16.mxu1 %v14090_v16  ;;  %13412 = vmatpush3.bf16.msra.mxu0 %v13411_v15  ;;  %v13462_v13 = vpack.c.bf16 %v10717_v19, %v10716_v32  ;;  %v10719_v15 = vld [vmem:[%s18706_s5 + $0x5a8] sm:$0xff] }
 0x444   :  { %13413 = vmatprep.subr.bf16.mxu0 %v14090_v16  ;;  %12514 = vmatprep.mubr.msk.f32.mxu0 %vm14091_vm2, %v19401_v7  ;;  %v13465_v34 = vpack.c.bf16 %v10719_v15, %v10718_v6  ;;  %v13516_v6 = vpack.c.bf16 %v10757_v4, %v10756_v18  ;;  %v10792_v4 = vld [vmem:[%s18706_s5 + $0x7b0] sm:$0xff] }
 0x445   :  { %12496 = vmatmul.mubr.msk.f32.vlgmr.msra.gmra.mrb[16].mxu1 %vm5168_vm1, %v6619_v55  ;;  %v10727_v55 = vld [vmem:[%s18706_s5 + $0x5e0] sm:$0xff] }
 0x446   :  { %13424 = vmatpush3.bf16.msra.mxu1 %v13423_v28  ;;  %12533 = vmatprep.mubr.msk.f32.mxu1 %vm14091_vm2, %v19401_v7  ;;  %v10728_v28 = vld [vmem:[%s18706_s5 + $0x5e8] sm:$0xff] }
 0x447   :  { %13425 = vmatprep.subr.bf16.mxu1 %v14090_v16  ;;  %13415 = vmatpush3.bf16.msra.mxu0 %v13414_v0  ;;  %v13477_v38 = vpack.c.bf16 %v10728_v28, %v10727_v55  ;;  %v10729_v0 = vld [vmem:[%s18706_s5 + $0x5f0] sm:$0xff]  ;;  %v10768_v55 = vld [vmem:[%s18706_s5 + $0x700] sm:$0xff]  ;;  %v10769_v28 = vld [vmem:[%s18706_s5 + $0x708] sm:$0xff] }
 0x448   :  { %13416 = vmatprep.subr.bf16.mxu0 %v14090_v16  ;;  %v13531_v40 = vpack.c.bf16 %v10769_v28, %v10768_v55  ;;  %v10804_v28 = vld [vmem:[%s18706_s5 + $0x800] sm:$0xff] }
 0x44a   :  { %13427 = vmatpush3.bf16.msra.mxu1 %v13426_v57  ;;  %v10730_v57 = vld [vmem:[%s18706_s5 + $0x5f8] sm:$0xff] }
 0x44b   :  { %13428 = vmatprep.subr.bf16.mxu1 %v14090_v16  ;;  %13418 = vmatpush3.bf16.msra.mxu0 %v13417_v41  ;;  %v13480_v31 = vpack.c.bf16 %v10730_v57, %v10729_v0  ;;  %v10741_v41 = vld [vmem:[%s18706_s5 + $0x640] sm:$0xff] }
 0x44c   :  { %13419 = vmatprep.subr.bf16.mxu0 %v14090_v16  ;;  %v7469_v0 = vld [vmem:[#allocation4 + $0xd8] sm:$0xff] }
 0x44e   :  { %13430 = vmatpush3.bf16.msra.mxu1 %v13429_v60  ;;  %v10742_v60 = vld [vmem:[%s18706_s5 + $0x648] sm:$0xff] }
 0x44f   :  { %13431 = vmatprep.subr.bf16.mxu1 %v14090_v16  ;;  %13421 = vmatpush3.bf16.msra.mxu0 %v13420_v37  ;;  %v13495_v43 = vpack.c.bf16 %v10742_v60, %v10741_v41  ;;  %v10734_v37 = vld [vmem:[%s18706_s5 + $0x610] sm:$0xff]  ;;  %v13546_v60 = vpack.c.bf16 %v10780_v63, %v10779_v56  ;;  %v10807_v56 = vld [vmem:[%s18706_s5 + $0x818] sm:$0xff] }
 0x450   :  { %13434 = vmatprep.subr.bf16.mxu0 %v14090_v16  ;;  %v10815_v63 = vld [vmem:[%s18706_s5 + $0x850] sm:$0xff] }
 0x452   :  { %13433 = vmatpush3.bf16.msra.mxu1 %v13432_v27  ;;  %12515 = vmatmul.mubr.msk.f32.vlgmr.msra.gmra.mrb[18].mxu0 %vm5168_vm1, %v6704_v45  ;;  %v10735_v27 = vld [vmem:[%s18706_s5 + $0x618] sm:$0xff]  ;;  %v10736_v45 = vld [vmem:[%s18706_s5 + $0x620] sm:$0xff] }
 0x453   :  { %13446 = vmatprep.subr.bf16.mxu1 %v14090_v16  ;;  %13436 = vmatpush3.bf16.msra.mxu0 %v13435_v29  ;;  %v13486_v42 = vpack.c.bf16 %v10735_v27, %v10734_v37  ;;  %v10737_v29 = vld [vmem:[%s18706_s5 + $0x628] sm:$0xff] }
 0x454   :  { %13437 = vmatprep.subr.bf16.mxu0 %v14090_v16  ;;  %12552 = vmatprep.mubr.msk.f32.mxu0 %vm14091_vm2, %v19401_v7  ;;  %v13489_v8 = vpack.c.bf16 %v10737_v29, %v10736_v45  ;;  %v10782_v37 = vld [vmem:[%s18706_s5 + $0x768] sm:$0xff]  ;;  %v10774_v29 = vld [vmem:[%s18706_s5 + $0x730] sm:$0xff] }
 0x455   :  { %12534 = vmatmul.mubr.msk.f32.vlgmr.msra.gmra.mrb[18].mxu1 %vm5168_vm1, %v6789_v3  ;;  %v10745_v3 = vld [vmem:[%s18706_s5 + $0x660] sm:$0xff] }
 0x456   :  { %13448 = vmatpush3.bf16.msra.mxu1 %v13447_v53  ;;  %12571 = vmatprep.mubr.msk.f32.mxu1 %vm14091_vm2, %v19401_v7  ;;  %v10746_v53 = vld [vmem:[%s18706_s5 + $0x668] sm:$0xff] }
 0x457   :  { %13449 = vmatprep.subr.bf16.mxu1 %v14090_v16  ;;  %13439 = vmatpush3.bf16.msra.mxu0 %v13438_v20  ;;  %v13501_v11 = vpack.c.bf16 %v10746_v53, %v10745_v3  ;;  %v10747_v20 = vld [vmem:[%s18706_s5 + $0x670] sm:$0xff]  ;;  %v10775_v3 = vld [vmem:[%s18706_s5 + $0x738] sm:$0xff] }
 0x458   :  { %13440 = vmatprep.subr.bf16.mxu0 %v14090_v16  ;;  %v10783_v53 = vld [vmem:[%s18706_s5 + $0x770] sm:$0xff] }
 0x45a   :  { %13451 = vmatpush3.bf16.msra.mxu1 %v13450_v61  ;;  %v10748_v61 = vld [vmem:[%s18706_s5 + $0x678] sm:$0xff] }
 0x45b   :  { %13452 = vmatprep.subr.bf16.mxu1 %v14090_v16  ;;  %13442 = vmatpush3.bf16.msra.mxu0 %v13441_v25  ;;  %v13504_v21 = vpack.c.bf16 %v10748_v61, %v10747_v20  ;;  %v10759_v25 = vld [vmem:[%s18706_s5 + $0x6c0] sm:$0xff]  ;;  %v10787_v20 = vld [vmem:[%s18706_s5 + $0x788] sm:$0xff] }
 0x45c   :  { %13443 = vmatprep.subr.bf16.mxu0 %v14090_v16  ;;  %v10795_v61 = vld [vmem:[%s18706_s5 + $0x7c0] sm:$0xff]  ;;  %v13555_v35 = vpack.c.bf16 %v10787_v20, %v10786_v58 }
 0x45e   :  { %13454 = vmatpush3.bf16.msra.mxu1 %v13453_v52  ;;  %v10760_v52 = vld [vmem:[%s18706_s5 + $0x6c8] sm:$0xff] }
 0x45f   :  { %13455 = vmatprep.subr.bf16.mxu1 %v14090_v16  ;;  %13445 = vmatpush3.bf16.msra.mxu0 %v13444_v54  ;;  %v13519_v48 = vpack.c.bf16 %v10760_v52, %v10759_v25  ;;  %v10752_v54 = vld [vmem:[%s18706_s5 + $0x690] sm:$0xff] }
 0x460   :  { %13458 = vmatprep.subr.bf16.mxu0 %v14090_v16  ;;  %v10788_v52 = vld [vmem:[%s18706_s5 + $0x790] sm:$0xff] }
 0x462   :  { %13457 = vmatpush3.bf16.msra.mxu1 %v13456_v10  ;;  %12553 = vmatmul.mubr.msk.f32.vlgmr.msra.gmra.mrb[20].mxu0 %vm5168_vm1, %v6874_v22  ;;  %v10753_v10 = vld [vmem:[%s18706_s5 + $0x698] sm:$0xff]  ;;  %v10754_v22 = vld [vmem:[%s18706_s5 + $0x6a0] sm:$0xff] }
 0x463   :  { %13470 = vmatprep.subr.bf16.mxu1 %v14090_v16  ;;  %13460 = vmatpush3.bf16.msra.mxu0 %v13459_v44  ;;  %v13510_v47 = vpack.c.bf16 %v10753_v10, %v10752_v54  ;;  %v10755_v44 = vld [vmem:[%s18706_s5 + $0x6a8] sm:$0xff]  ;;  %v10790_v10 = vld [vmem:[%s18706_s5 + $0x7a0] sm:$0xff] }
 0x464   :  { %13461 = vmatprep.subr.bf16.mxu0 %v14090_v16  ;;  %12590 = vmatprep.mubr.msk.f32.mxu0 %vm14091_vm2, %v19401_v7  ;;  %v13513_v32 = vpack.c.bf16 %v10755_v44, %v10754_v22 }
 0x465   :  { %12572 = vmatmul.mubr.msk.f32.vlgmr.msra.gmra.mrb[20].mxu1 %vm5168_vm1, %v6959_v12  ;;  %v10763_v12 = vld [vmem:[%s18706_s5 + $0x6e0] sm:$0xff] }
 0x466   :  { %13472 = vmatpush3.bf16.msra.mxu1 %v13471_v2  ;;  %12609 = vmatprep.mubr.msk.f32.mxu1 %vm14091_vm2, %v19401_v7  ;;  %v10764_v2 = vld [vmem:[%s18706_s5 + $0x6e8] sm:$0xff] }
 0x467   :  { %13473 = vmatprep.subr.bf16.mxu1 %v14090_v16  ;;  %13463 = vmatpush3.bf16.msra.mxu0 %v13462_v13  ;;  %v13525_v19 = vpack.c.bf16 %v10764_v2, %v10763_v12  ;;  %v10765_v13 = vld [vmem:[%s18706_s5 + $0x6f0] sm:$0xff]  ;;  %v13561_v2 = vpack.c.bf16 %v10791_v46, %v10790_v10 }
 0x468   :  { %13464 = vmatprep.subr.bf16.mxu0 %v14090_v16 }
 0x46a   :  { %13475 = vmatpush3.bf16.msra.mxu1 %v13474_v49  ;;  %v10766_v49 = vld [vmem:[%s18706_s5 + $0x6f8] sm:$0xff] }
 0x46b   :  { %13476 = vmatprep.subr.bf16.mxu1 %v14090_v16  ;;  %13466 = vmatpush3.bf16.msra.mxu0 %v13465_v34  ;;  %v13528_v15 = vpack.c.bf16 %v10766_v49, %v10765_v13  ;;  %v10777_v34 = vld [vmem:[%s18706_s5 + $0x740] sm:$0xff]  ;;  %v10793_v13 = vld [vmem:[%s18706_s5 + $0x7b8] sm:$0xff]  ;;  %v10801_v49 = vld [vmem:[%s18706_s5 + $0x7f0] sm:$0xff] }
 0x46c   :  { %13467 = vmatprep.subr.bf16.mxu0 %v14090_v16 }
 0x46e   :  { %13478 = vmatpush3.bf16.msra.mxu1 %v13477_v38  ;;  %v10778_v38 = vld [vmem:[%s18706_s5 + $0x748] sm:$0xff] }
 0x46f   :  { %13479 = vmatprep.subr.bf16.mxu1 %v14090_v16  ;;  %13469 = vmatpush3.bf16.msra.mxu0 %v13468_v14  ;;  %v13543_v57 = vpack.c.bf16 %v10778_v38, %v10777_v34  ;;  %v10770_v14 = vld [vmem:[%s18706_s5 + $0x710] sm:$0xff]  ;;  %v10805_v34 = vld [vmem:[%s18706_s5 + $0x808] sm:$0xff]  ;;  %v10813_v38 = vld [vmem:[%s18706_s5 + $0x840] sm:$0xff] }
 0x470   :  { %13482 = vmatprep.subr.bf16.mxu0 %v14090_v16 }
 0x472   :  { %13481 = vmatpush3.bf16.msra.mxu1 %v13480_v31  ;;  %12591 = vmatmul.mubr.msk.f32.vlgmr.msra.gmra.mrb[22].mxu0 %vm5168_vm1, %v7044_v23  ;;  %v10771_v31 = vld [vmem:[%s18706_s5 + $0x718] sm:$0xff]  ;;  %v10772_v23 = vld [vmem:[%s18706_s5 + $0x720] sm:$0xff] }
 0x473   :  { %13494 = vmatprep.subr.bf16.mxu1 %v14090_v16  ;;  %13484 = vmatpush3.bf16.msra.mxu0 %v13483_v62  ;;  %v13534_v41 = vpack.c.bf16 %v10771_v31, %v10770_v14  ;;  %v10773_v62 = vld [vmem:[%s18706_s5 + $0x728] sm:$0xff]  ;;  %v10806_v31 = vld [vmem:[%s18706_s5 + $0x810] sm:$0xff] }
 0x474   :  { %13485 = vmatprep.subr.bf16.mxu0 %v14090_v16  ;;  %12628 = vmatprep.mubr.msk.f32.mxu0 %vm14091_vm2, %v19401_v7 }
 0x475   :  { %12610 = vmatmul.mubr.msk.f32.vlgmr.msra.gmra.mrb[22].mxu1 %vm5168_vm1, %v7129_v9 }
 0x476   :  { %13496 = vmatpush3.bf16.msra.mxu1 %v13495_v43  ;;  %12647 = vmatprep.mubr.msk.f32.mxu1 %vm14091_vm2, %v19401_v7  ;;  %v10781_v43 = vld [vmem:[%s18706_s5 + $0x760] sm:$0xff] }
 0x477   :  { %13497 = vmatprep.subr.bf16.mxu1 %v14090_v16  ;;  %13487 = vmatpush3.bf16.msra.mxu0 %v13486_v42  ;;  %v13537_v42 = vpack.c.bf16 %v10773_v62, %v10772_v23  ;;  %v13549_v45 = vpack.c.bf16 %v10782_v37, %v10781_v43  ;;  %v10808_v62 = vld [vmem:[%s18706_s5 + $0x820] sm:$0xff] }
 0x478   :  { %13488 = vmatprep.subr.bf16.mxu0 %v14090_v16  ;;  %v10817_v37 = vld [vmem:[%s18706_s5 + $0x860] sm:$0xff] }
 0x47a   :  { %13499 = vmatpush3.bf16.msra.mxu1 %v13498_v30 }
 0x47b   :  { %13500 = vmatprep.subr.bf16.mxu1 %v14090_v16  ;;  %13490 = vmatpush3.bf16.msra.mxu0 %v13489_v8  ;;  %v10784_v8 = vld [vmem:[%s18706_s5 + $0x778] sm:$0xff] }
 0x47c   :  { %13491 = vmatprep.subr.bf16.mxu0 %v14090_v16  ;;  %v13552_v26 = vpack.c.bf16 %v10784_v8, %v10783_v53  ;;  %v10810_v53 = vld [vmem:[%s18706_s5 + $0x830] sm:$0xff]  ;;  %v10811_v8 = vld [vmem:[%s18706_s5 + $0x838] sm:$0xff] }
 0x47d   :  { %v13588_v58 = vpack.c.bf16 %v10811_v8, %v10810_v53 }
 0x47e   :  { %13502 = vmatpush3.bf16.msra.mxu1 %v13501_v11  ;;  %v13540_v11 = vpack.c.bf16 %v10775_v3, %v10774_v29 }
 0x47f   :  { %13503 = vmatprep.subr.bf16.mxu1 %v14090_v16  ;;  %13493 = vmatpush3.bf16.msra.mxu0 %v13492_v33  ;;  %v10796_v33 = vld [vmem:[%s18706_s5 + $0x7c8] sm:$0xff] }
 0x480   :  { %13506 = vmatprep.subr.bf16.mxu0 %v14090_v16  ;;  %v13567_v25 = vpack.c.bf16 %v10796_v33, %v10795_v61  ;;  %v10822_v61 = vld [vmem:[%s18706_s5 + $0x880] sm:$0xff]  ;;  %v10823_v33 = vld [vmem:[%s18706_s5 + $0x888] sm:$0xff] }
 0x482   :  { %13505 = vmatpush3.bf16.msra.mxu1 %v13504_v21  ;;  %12629 = vmatmul.mubr.msk.f32.vlgmr.msra.gmra.mrb[24].mxu0 %vm5168_vm1, %v7214_v1  ;;  %v7554_v21 = vld [vmem:[#allocation4 + $0xe0] sm:$0xff]  ;;  %v10789_v1 = vld [vmem:[%s18706_s5 + $0x798] sm:$0xff] }
 0x483   :  { %13518 = vmatprep.subr.bf16.mxu1 %v14090_v16  ;;  %13508 = vmatpush3.bf16.msra.mxu0 %v13507_v50  ;;  %v10797_v50 = vld [vmem:[%s18706_s5 + $0x7d0] sm:$0xff] }
 0x484   :  { %13509 = vmatprep.subr.bf16.mxu0 %v14090_v16  ;;  %12666 = vmatprep.mubr.msk.f32.mxu0 %vm14091_vm2, %v19401_v7 }
 0x485   :  { %12648 = vmatmul.mubr.msk.f32.vlgmr.msra.gmra.mrb[24].mxu1 %vm5168_vm1, %v7299_v59  ;;  %v10798_v59 = vld [vmem:[%s18706_s5 + $0x7d8] sm:$0xff] }
 0x486   :  { %13520 = vmatpush3.bf16.msra.mxu1 %v13519_v48  ;;  %12685 = vmatprep.mubr.msk.f32.mxu1 %vm14091_vm2, %v19401_v7  ;;  %v13558_v48 = vpack.c.bf16 %v10789_v1, %v10788_v52  ;;  %v13570_v54 = vpack.c.bf16 %v10798_v59, %v10797_v50  ;;  %v7979_v52 = vld [vmem:[#allocation4 + $0x108] sm:$0xff]  ;;  %v10825_v59 = vld [vmem:[%s18706_s5 + $0x898] sm:$0xff] }
 0x487   :  { %13521 = vmatprep.subr.bf16.mxu1 %v14090_v16  ;;  %13511 = vmatpush3.bf16.msra.mxu0 %v13510_v47  ;;  %v10799_v47 = vld [vmem:[%s18706_s5 + $0x7e0] sm:$0xff]  ;;  %v10824_v50 = vld [vmem:[%s18706_s5 + $0x890] sm:$0xff] }
 0x488   :  { %13512 = vmatprep.subr.bf16.mxu0 %v14090_v16  ;;  %v13606_v10 = vpack.c.bf16 %v10825_v59, %v10824_v50  ;;  %v8319_v50 = vld [vmem:[#allocation4 + $0x128] sm:$0xff] }
 0x48a   :  { %13523 = vmatpush3.bf16.msra.mxu1 %v13522_v36  ;;  %v10800_v36 = vld [vmem:[%s18706_s5 + $0x7e8] sm:$0xff] }
 0x48b   :  { %13524 = vmatprep.subr.bf16.mxu1 %v14090_v16  ;;  %13514 = vmatpush3.bf16.msra.mxu0 %v13513_v32  ;;  %v13573_v18 = vpack.c.bf16 %v10800_v36, %v10799_v47  ;;  %v10827_v47 = vld [vmem:[%s18706_s5 + $0x8a8] sm:$0xff] }
 0x48c   :  { %13515 = vmatprep.subr.bf16.mxu0 %v14090_v16 }
 0x48e   :  { %13526 = vmatpush3.bf16.msra.mxu1 %v13525_v19 }
 0x48f   :  { %13527 = vmatprep.subr.bf16.mxu1 %v14090_v16  ;;  %13517 = vmatpush3.bf16.msra.mxu0 %v13516_v6  ;;  %v10802_v6 = vld [vmem:[%s18706_s5 + $0x7f8] sm:$0xff] }
 0x490   :  { %13530 = vmatprep.subr.bf16.mxu0 %v14090_v16  ;;  %v13576_v55 = vpack.c.bf16 %v10802_v6, %v10801_v49  ;;  %v10828_v49 = vld [vmem:[%s18706_s5 + $0x8b0] sm:$0xff]  ;;  %v10829_v6 = vld [vmem:[%s18706_s5 + $0x8b8] sm:$0xff] }
 0x492   :  { %13529 = vmatpush3.bf16.msra.mxu1 %v13528_v15  ;;  %12667 = vmatmul.mubr.msk.f32.vlgmr.msra.gmra.mrb[26].mxu0 %vm5168_vm1, %v7384_v17  ;;  %v13564_v15 = vpack.c.bf16 %v10793_v13, %v10792_v4  ;;  %v10814_v17 = vld [vmem:[%s18706_s5 + $0x848] sm:$0xff] }
 0x493   :  { %13542 = vmatprep.subr.bf16.mxu1 %v14090_v16  ;;  %13532 = vmatpush3.bf16.msra.mxu0 %v13531_v40  ;;  %v7724_v40 = vld [vmem:[#allocation4 + $0xf0] sm:$0xff]  ;;  %v13591_v14 = vpack.c.bf16 %v10814_v17, %v10813_v38  ;;  %v10840_v38 = vld [vmem:[%s18706_s5 + $0x900] sm:$0xff]  ;;  %v10841_v17 = vld [vmem:[%s18706_s5 + $0x908] sm:$0xff] }
 0x494   :  { %13533 = vmatprep.subr.bf16.mxu0 %v14090_v16  ;;  %v5266_v9 = vpop.f32.mrb[0].mxu0  ;;  %12704 = vmatprep.mubr.msk.f32.mxu0 %vm14091_vm2, %v19401_v7 }
 0x495   :  { %12686 = vmatmul.mubr.msk.f32.vlgmr.msra.gmra.mrb[26].mxu1 %vm5168_vm1, %v7469_v0  ;;  %v12174_v27 = vpop.f32.mrb[1].mxu0  ;;  %v13579_v0 = vpack.c.bf16 %v10805_v34, %v10804_v28  ;;  %v13612_v28 = vpack.c.bf16 %v10829_v6, %v10828_v49 }
 0x496   :  { %13544 = vmatpush3.bf16.msra.mxu1 %v13543_v57  ;;  %12723 = vmatprep.mubr.msk.f32.mxu1 %vm14091_vm2, %v19401_v7  ;;  %v7809_v57 = vld [vmem:[#allocation4 + $0xf8] sm:$0xff]  ;;  %v10818_v27 = vld [vmem:[%s18706_s5 + $0x868] sm:$0xff] }
 0x497   :  { %13545 = vmatprep.subr.bf16.mxu1 %v14090_v16  ;;  %13535 = vmatpush3.bf16.msra.mxu0 %v13534_v41  ;;  %v10816_v41 = vld [vmem:[%s18706_s5 + $0x858] sm:$0xff]  ;;  %v13597_v3 = vpack.c.bf16 %v10818_v27, %v10817_v37  ;;  %v10845_v37 = vld [vmem:[%s18706_s5 + $0x928] sm:$0xff] }
 0x498   :  { %v5339_v5 = vpop.f32.mrb[0].mxu1  ;;  %13536 = vmatprep.subr.bf16.mxu0 %v14090_v16  ;;  %v13594_v23 = vpack.c.bf16 %v10816_v41, %v10815_v63  ;;  %v10842_v63 = vld [vmem:[%s18706_s5 + $0x910] sm:$0xff]  ;;  %v10843_v41 = vld [vmem:[%s18706_s5 + $0x918] sm:$0xff] }
 0x499   :  { %v5340_v39 = vadd.f32 %v5339_v5, %v5266_v9  ;;  %v12193_v30 = vpop.f32.mrb[1].mxu1  ;;  %v10809_v9 = vld [vmem:[%s18706_s5 + $0x828] sm:$0xff] }
 0x49a   :  { %13547 = vmatpush3.bf16.msra.mxu1 %v13546_v60  ;;  %v13582_v60 = vpack.c.bf16 %v10807_v56, %v10806_v31  ;;  %v13585_v30 = vpack.c.bf16 %v10809_v9, %v10808_v62  ;;  %v8149_v31 = vld [vmem:[#allocation4 + $0x118] sm:$0xff]  ;;  %v13630_v62 = vpack.c.bf16 %v10843_v41, %v10842_v63 }
 0x49b   :  { %13548 = vmatprep.subr.bf16.mxu1 %v14090_v16  ;;  %13538 = vmatpush3.bf16.msra.mxu0 %v13537_v42  ;;  %v8489_v63 = vld [vmem:[#allocation4 + $0x138] sm:$0xff] }
 0x49c   :  { %13539 = vmatprep.subr.bf16.mxu0 %v14090_v16 }
 0x49e   :  { %13550 = vmatpush3.bf16.msra.mxu1 %v13549_v45 }
 0x49f   :  { %13551 = vmatprep.subr.bf16.mxu1 %v14090_v16  ;;  %13541 = vmatpush3.bf16.msra.mxu0 %v13540_v11  ;;  %v10819_v11 = vld [vmem:[%s18706_s5 + $0x870] sm:$0xff] }
 0x4a0   :  { %13554 = vmatprep.subr.bf16.mxu0 %v14090_v16 }
 0x4a2   :  { %13553 = vmatpush3.bf16.msra.mxu1 %v13552_v26  ;;  %12705 = vmatmul.mubr.msk.f32.vlgmr.msra.gmra.mrb[28].mxu0 %vm5168_vm1, %v7554_v21  ;;  %v10820_v26 = vld [vmem:[%s18706_s5 + $0x878] sm:$0xff]  ;;  %v10831_v21 = vld [vmem:[%s18706_s5 + $0x8c0] sm:$0xff] }
 0x4a3   :  { %13566 = vmatprep.subr.bf16.mxu1 %v14090_v16  ;;  %13556 = vmatpush3.bf16.msra.mxu0 %v13555_v35  ;;  %v13600_v20 = vpack.c.bf16 %v10820_v26, %v10819_v11  ;;  %v10832_v35 = vld [vmem:[%s18706_s5 + $0x8c8] sm:$0xff]  ;;  %v10846_v11 = vld [vmem:[%s18706_s5 + $0x930] sm:$0xff]  ;;  %v10847_v26 = vld [vmem:[%s18706_s5 + $0x938] sm:$0xff] }
 0x4a4   :  { %13557 = vmatprep.subr.bf16.mxu0 %v14090_v16  ;;  %12742 = vmatprep.mubr.msk.f32.mxu0 %vm14091_vm2, %v19401_v7  ;;  %v13615_v1 = vpack.c.bf16 %v10832_v35, %v10831_v21  ;;  %v10858_v21 = vld [vmem:[%s18706_s5 + $0x980] sm:$0xff]  ;;  %v10859_v35 = vld [vmem:[%s18706_s5 + $0x988] sm:$0xff] }
 0x4a5   :  { %12724 = vmatmul.mubr.msk.f32.vlgmr.msra.gmra.mrb[28].mxu1 %vm5168_vm1, %v7639_v24  ;;  %v5423_v51 = vpop.f32.mrb[2].mxu0  ;;  %v7894_v24 = vld [vmem:[#allocation4 + $0x100] sm:$0xff] }
 0x4a6   :  { %13568 = vmatpush3.bf16.msra.mxu1 %v13567_v25  ;;  %v5427_v22 = vadd.f32 %v5423_v51, %v5340_v39  ;;  %v12212_v44 = vpop.f32.mrb[3].mxu0  ;;  %12761 = vmatprep.mubr.msk.f32.mxu1 %vm14091_vm2, %v19401_v7  ;;  %v13603_v25 = vpack.c.bf16 %v10823_v33, %v10822_v61  ;;  %v10826_v51 = vld [vmem:[%s18706_s5 + $0x8a0] sm:$0xff]  ;;  %v13636_v61 = vpack.c.bf16 %v10847_v26, %v10846_v11 }
 0x4a7   :  { %13569 = vmatprep.subr.bf16.mxu1 %v14090_v16  ;;  %13559 = vmatpush3.bf16.msra.mxu0 %v13558_v48  ;;  %v10833_v48 = vld [vmem:[%s18706_s5 + $0x8d0] sm:$0xff]  ;;  %v10836_v44 = vld [vmem:[%s18706_s5 + $0x8e8] sm:$0xff] }
 0x4a8   :  { %v5508_v12 = vpop.f32.mrb[2].mxu1  ;;  %13560 = vmatprep.subr.bf16.mxu0 %v14090_v16 }
 0x4a9   :  { %v12231_v32 = vpop.f32.mrb[3].mxu1  ;;  %v5512_v19 = vadd.f32 %v5508_v12, %v5427_v22  ;;  %v10835_v22 = vld [vmem:[%s18706_s5 + $0x8e0] sm:$0xff] }
 0x4aa   :  { %13571 = vmatpush3.bf16.msra.mxu1 %v13570_v54  ;;  %v10834_v54 = vld [vmem:[%s18706_s5 + $0x8d8] sm:$0xff]  ;;  %v13621_v13 = vpack.c.bf16 %v10836_v44, %v10835_v22  ;;  %v10863_v22 = vld [vmem:[%s18706_s5 + $0x9a8] sm:$0xff] }
 0x4ab   :  { %13572 = vmatprep.subr.bf16.mxu1 %v14090_v16  ;;  %13562 = vmatpush3.bf16.msra.mxu0 %v13561_v2  ;;  %v13618_v46 = vpack.c.bf16 %v10834_v54, %v10833_v48  ;;  %v10860_v48 = vld [vmem:[%s18706_s5 + $0x990] sm:$0xff]  ;;  %v10861_v54 = vld [vmem:[%s18706_s5 + $0x998] sm:$0xff] }
 0x4ac   :  { %13563 = vmatprep.subr.bf16.mxu0 %v14090_v16 }
 0x4ae   :  { %13574 = vmatpush3.bf16.msra.mxu1 %v13573_v18 }
 0x4af   :  { %13575 = vmatprep.subr.bf16.mxu1 %v14090_v16  ;;  %13565 = vmatpush3.bf16.msra.mxu0 %v13564_v15  ;;  %v10837_v15 = vld [vmem:[%s18706_s5 + $0x8f0] sm:$0xff] }
 0x4b0   :  { %13578 = vmatprep.subr.bf16.mxu0 %v14090_v16 }
 0x4b2   :  { %13577 = vmatpush3.bf16.msra.mxu1 %v13576_v55  ;;  %12743 = vmatmul.mubr.msk.f32.vlgmr.msra.gmra.mrb[30].mxu0 %vm5168_vm1, %v7724_v40  ;;  %v10838_v55 = vld [vmem:[%s18706_s5 + $0x8f8] sm:$0xff]  ;;  %v10849_v40 = vld [vmem:[%s18706_s5 + $0x940] sm:$0xff] }
 0x4b3   :  { %13590 = vmatprep.subr.bf16.mxu1 %v14090_v16  ;;  %13580 = vmatpush3.bf16.msra.mxu0 %v13579_v0  ;;  %v13624_v34 = vpack.c.bf16 %v10838_v55, %v10837_v15  ;;  %v10850_v0 = vld [vmem:[%s18706_s5 + $0x948] sm:$0xff]  ;;  %v10864_v15 = vld [vmem:[%s18706_s5 + $0x9b0] sm:$0xff]  ;;  %v10865_v55 = vld [vmem:[%s18706_s5 + $0x9b8] sm:$0xff] }
 0x4b4   :  { %13581 = vmatprep.subr.bf16.mxu0 %v14090_v16  ;;  %12780 = vmatprep.mubr.msk.f32.mxu0 %vm14091_vm2, %v19401_v7  ;;  %v13639_v56 = vpack.c.bf16 %v10850_v0, %v10849_v40  ;;  %v10876_v40 = vld [vmem:[%s18706_s5 + $0xa00] sm:$0xff]  ;;  %v10877_v0 = vld [vmem:[%s18706_s5 + $0xa08] sm:$0xff] }
 0x4b5   :  { %12762 = vmatmul.mubr.msk.f32.vlgmr.msra.gmra.mrb[30].mxu1 %vm5168_vm1, %v7809_v57  ;;  %v5593_v43 = vpop.f32.mrb[4].mxu0  ;;  %v8064_v57 = vld [vmem:[#allocation4 + $0x110] sm:$0xff] }
 0x4b6   :  { %13592 = vmatpush3.bf16.msra.mxu1 %v13591_v14  ;;  %v5597_v5 = vadd.f32 %v5593_v43, %v5512_v19  ;;  %v12250_v39 = vpop.f32.mrb[5].mxu0  ;;  %12799 = vmatprep.mubr.msk.f32.mxu1 %vm14091_vm2, %v19401_v7  ;;  %v13609_v19 = vpack.c.bf16 %v10827_v47, %v10826_v51  ;;  %v13627_v14 = vpack.c.bf16 %v10841_v17, %v10840_v38  ;;  %v10844_v43 = vld [vmem:[%s18706_s5 + $0x920] sm:$0xff] }
 0x4b7   :  { %13593 = vmatprep.subr.bf16.mxu1 %v14090_v16  ;;  %13583 = vmatpush3.bf16.msra.mxu0 %v13582_v60  ;;  %v10851_v60 = vld [vmem:[%s18706_s5 + $0x950] sm:$0xff]  ;;  %v10854_v39 = vld [vmem:[%s18706_s5 + $0x968] sm:$0xff]  ;;  %v13654_v51 = vpack.c.bf16 %v10861_v54, %v10860_v48  ;;  %v13660_v38 = vpack.c.bf16 %v10865_v55, %v10864_v15 }
 0x4b8   :  { %v5678_v42 = vpop.f32.mrb[4].mxu1  ;;  %13584 = vmatprep.subr.bf16.mxu0 %v14090_v16  ;;  %v8659_v48 = vld [vmem:[#allocation4 + $0x148] sm:$0xff] }
 0x4b9   :  { %v12269_v45 = vpop.f32.mrb[5].mxu1  ;;  %v5682_v29 = vadd.f32 %v5678_v42, %v5597_v5  ;;  %v10853_v5 = vld [vmem:[%s18706_s5 + $0x960] sm:$0xff] }
 0x4ba   :  { %13595 = vmatpush3.bf16.msra.mxu1 %v13594_v23  ;;  %v10852_v23 = vld [vmem:[%s18706_s5 + $0x958] sm:$0xff]  ;;  %v13645_v8 = vpack.c.bf16 %v10854_v39, %v10853_v5  ;;  %v10881_v5 = vld [vmem:[%s18706_s5 + $0xa28] sm:$0xff] }
 0x4bb   :  { %13596 = vmatprep.subr.bf16.mxu1 %v14090_v16  ;;  %13586 = vmatpush3.bf16.msra.mxu0 %v13585_v30  ;;  %v13642_v9 = vpack.c.bf16 %v10852_v23, %v10851_v60  ;;  %v10878_v60 = vld [vmem:[%s18706_s5 + $0xa10] sm:$0xff]  ;;  %v10879_v23 = vld [vmem:[%s18706_s5 + $0xa18] sm:$0xff] }
 0x4bc   :  { %13587 = vmatprep.subr.bf16.mxu0 %v14090_v16 }
 0x4be   :  { %13598 = vmatpush3.bf16.msra.mxu1 %v13597_v3 }
 0x4bf   :  { %13599 = vmatprep.subr.bf16.mxu1 %v14090_v16  ;;  %13589 = vmatpush3.bf16.msra.mxu0 %v13588_v58  ;;  %v10855_v58 = vld [vmem:[%s18706_s5 + $0x970] sm:$0xff] }
 0x4c0   :  { %13602 = vmatprep.subr.bf16.mxu0 %v14090_v16 }
 0x4c2   :  { %13601 = vmatpush3.bf16.msra.mxu1 %v13600_v20  ;;  %12781 = vmatmul.mubr.msk.f32.vlgmr.msra.gmra.mrb[32].mxu0 %vm5168_vm1, %v7894_v24  ;;  %v10856_v20 = vld [vmem:[%s18706_s5 + $0x978] sm:$0xff]  ;;  %v10867_v24 = vld [vmem:[%s18706_s5 + $0x9c0] sm:$0xff] }
 0x4c3   :  { %13614 = vmatprep.subr.bf16.mxu1 %v14090_v16  ;;  %13604 = vmatpush3.bf16.msra.mxu0 %v13603_v25  ;;  %v13648_v33 = vpack.c.bf16 %v10856_v20, %v10855_v58  ;;  %v10868_v25 = vld [vmem:[%s18706_s5 + $0x9c8] sm:$0xff]  ;;  %v10882_v58 = vld [vmem:[%s18706_s5 + $0xa30] sm:$0xff]  ;;  %v10883_v20 = vld [vmem:[%s18706_s5 + $0xa38] sm:$0xff] }
 0x4c4   :  { %13605 = vmatprep.subr.bf16.mxu0 %v14090_v16  ;;  %12818 = vmatprep.mubr.msk.f32.mxu0 %vm14091_vm2, %v19401_v7  ;;  %v13663_v59 = vpack.c.bf16 %v10868_v25, %v10867_v24  ;;  %v10894_v24 = vld [vmem:[%s18706_s5 + $0xa80] sm:$0xff]  ;;  %v10895_v25 = vld [vmem:[%s18706_s5 + $0xa88] sm:$0xff] }
 0x4c5   :  { %12800 = vmatmul.mubr.msk.f32.vlgmr.msra.gmra.mrb[32].mxu1 %vm5168_vm1, %v7979_v52  ;;  %v5763_v36 = vpop.f32.mrb[6].mxu0  ;;  %v8234_v52 = vld [vmem:[#allocation4 + $0x120] sm:$0xff] }
 0x4c6   :  { %13616 = vmatpush3.bf16.msra.mxu1 %v13615_v1  ;;  %v5767_v12 = vadd.f32 %v5763_v36, %v5682_v29  ;;  %v12288_v2 = vpop.f32.mrb[7].mxu0  ;;  %12837 = vmatprep.mubr.msk.f32.mxu1 %vm14091_vm2, %v19401_v7  ;;  %v13633_v29 = vpack.c.bf16 %v10845_v37, %v10844_v43  ;;  %v13651_v1 = vpack.c.bf16 %v10859_v35, %v10858_v21  ;;  %v10862_v36 = vld [vmem:[%s18706_s5 + $0x9a0] sm:$0xff] }
 0x4c7   :  { %13617 = vmatprep.subr.bf16.mxu1 %v14090_v16  ;;  %13607 = vmatpush3.bf16.msra.mxu0 %v13606_v10  ;;  %v10869_v10 = vld [vmem:[%s18706_s5 + $0x9d0] sm:$0xff]  ;;  %v10872_v2 = vld [vmem:[%s18706_s5 + $0x9e8] sm:$0xff]  ;;  %v13678_v43 = vpack.c.bf16 %v10879_v23, %v10878_v60  ;;  %v13684_v21 = vpack.c.bf16 %v10883_v20, %v10882_v58  ;;  %v8829_v60 = vld [vmem:[#allocation4 + $0x158] sm:$0xff] }
 0x4c8   :  { %v5848_v32 = vpop.f32.mrb[6].mxu1  ;;  %13608 = vmatprep.subr.bf16.mxu0 %v14090_v16 }
 0x4c9   :  { %v12307_v18 = vpop.f32.mrb[7].mxu1  ;;  %v5852_v4 = vadd.f32 %v5848_v32, %v5767_v12  ;;  %v10871_v12 = vld [vmem:[%s18706_s5 + $0x9e0] sm:$0xff] }
 0x4ca   :  { %13619 = vmatpush3.bf16.msra.mxu1 %v13618_v46  ;;  %v10870_v46 = vld [vmem:[%s18706_s5 + $0x9d8] sm:$0xff]  ;;  %v13669_v6 = vpack.c.bf16 %v10872_v2, %v10871_v12  ;;  %v10899_v12 = vld [vmem:[%s18706_s5 + $0xaa8] sm:$0xff] }
 0x4cb   :  { %13620 = vmatprep.subr.bf16.mxu1 %v14090_v16  ;;  %13610 = vmatpush3.bf16.msra.mxu0 %v13609_v19  ;;  %v13666_v47 = vpack.c.bf16 %v10870_v46, %v10869_v10  ;;  %v10896_v10 = vld [vmem:[%s18706_s5 + $0xa90] sm:$0xff]  ;;  %v10897_v46 = vld [vmem:[%s18706_s5 + $0xa98] sm:$0xff] }
 0x4cc   :  { %13611 = vmatprep.subr.bf16.mxu0 %v14090_v16 }
 0x4ce   :  { %13622 = vmatpush3.bf16.msra.mxu1 %v13621_v13 }
 0x4cf   :  { %13623 = vmatprep.subr.bf16.mxu1 %v14090_v16  ;;  %13613 = vmatpush3.bf16.msra.mxu0 %v13612_v28  ;;  %v10873_v28 = vld [vmem:[%s18706_s5 + $0x9f0] sm:$0xff] }
 0x4d0   :  { %13626 = vmatprep.subr.bf16.mxu0 %v14090_v16 }
 0x4d2   :  { %13625 = vmatpush3.bf16.msra.mxu1 %v13624_v34  ;;  %12819 = vmatmul.mubr.msk.f32.vlgmr.msra.gmra.mrb[34].mxu0 %vm5168_vm1, %v8064_v57  ;;  %v10874_v34 = vld [vmem:[%s18706_s5 + $0x9f8] sm:$0xff]  ;;  %v10885_v57 = vld [vmem:[%s18706_s5 + $0xa40] sm:$0xff] }
 0x4d3   :  { %13638 = vmatprep.subr.bf16.mxu1 %v14090_v16  ;;  %13628 = vmatpush3.bf16.msra.mxu0 %v13627_v14  ;;  %v13672_v17 = vpack.c.bf16 %v10874_v34, %v10873_v28  ;;  %v10886_v14 = vld [vmem:[%s18706_s5 + $0xa48] sm:$0xff]  ;;  %v10900_v28 = vld [vmem:[%s18706_s5 + $0xab0] sm:$0xff]  ;;  %v10901_v34 = vld [vmem:[%s18706_s5 + $0xab8] sm:$0xff] }
 0x4d4   :  { %13629 = vmatprep.subr.bf16.mxu0 %v14090_v16  ;;  %12856 = vmatprep.mubr.msk.f32.mxu0 %vm14091_vm2, %v19401_v7  ;;  %v13687_v41 = vpack.c.bf16 %v10886_v14, %v10885_v57  ;;  %v10912_v57 = vld [vmem:[%s18706_s5 + $0xb00] sm:$0xff]  ;;  %v10913_v14 = vld [vmem:[%s18706_s5 + $0xb08] sm:$0xff] }
 0x4d5   :  { %12838 = vmatmul.mubr.msk.f32.vlgmr.msra.gmra.mrb[34].mxu1 %vm5168_vm1, %v8149_v31  ;;  %v5933_v27 = vpop.f32.mrb[8].mxu0  ;;  %v8404_v31 = vld [vmem:[#allocation4 + $0x130] sm:$0xff] }
 0x4d6   :  { %13640 = vmatpush3.bf16.msra.mxu1 %v13639_v56  ;;  %v5937_v42 = vadd.f32 %v5933_v27, %v5852_v4  ;;  %v12326_v30 = vpop.f32.mrb[9].mxu0  ;;  %12875 = vmatprep.mubr.msk.f32.mxu1 %vm14091_vm2, %v19401_v7  ;;  %v13657_v4 = vpack.c.bf16 %v10863_v22, %v10862_v36  ;;  %v13675_v56 = vpack.c.bf16 %v10877_v0, %v10876_v40  ;;  %v10880_v27 = vld [vmem:[%s18706_s5 + $0xa20] sm:$0xff] }
 0x4d7   :  { %13641 = vmatprep.subr.bf16.mxu1 %v14090_v16  ;;  %13631 = vmatpush3.bf16.msra.mxu0 %v13630_v62  ;;  %v10887_v62 = vld [vmem:[%s18706_s5 + $0xa50] sm:$0xff]  ;;  %v10890_v30 = vld [vmem:[%s18706_s5 + $0xa68] sm:$0xff]  ;;  %v13702_v36 = vpack.c.bf16 %v10897_v46, %v10896_v10  ;;  %v13708_v40 = vpack.c.bf16 %v10901_v34, %v10900_v28 }
 0x4d8   :  { %v6018_v45 = vpop.f32.mrb[8].mxu1  ;;  %13632 = vmatprep.subr.bf16.mxu0 %v14090_v16  ;;  %v8999_v10 = vld [vmem:[#allocation4 + $0x168] sm:$0xff] }
 0x4d9   :  { %v12345_v3 = vpop.f32.mrb[9].mxu1  ;;  %v6022_v53 = vadd.f32 %v6018_v45, %v5937_v42  ;;  %v10889_v42 = vld [vmem:[%s18706_s5 + $0xa60] sm:$0xff] }
 0x4da   :  { %13643 = vmatpush3.bf16.msra.mxu1 %v13642_v9  ;;  %v10888_v9 = vld [vmem:[%s18706_s5 + $0xa58] sm:$0xff]  ;;  %v13693_v26 = vpack.c.bf16 %v10890_v30, %v10889_v42  ;;  %v10917_v42 = vld [vmem:[%s18706_s5 + $0xb28] sm:$0xff] }
 0x4db   :  { %13644 = vmatprep.subr.bf16.mxu1 %v14090_v16  ;;  %13634 = vmatpush3.bf16.msra.mxu0 %v13633_v29  ;;  %v13690_v37 = vpack.c.bf16 %v10888_v9, %v10887_v62  ;;  %v10914_v62 = vld [vmem:[%s18706_s5 + $0xb10] sm:$0xff]  ;;  %v10915_v9 = vld [vmem:[%s18706_s5 + $0xb18] sm:$0xff] }
 0x4dc   :  { %13635 = vmatprep.subr.bf16.mxu0 %v14090_v16 }
 0x4de   :  { %13646 = vmatpush3.bf16.msra.mxu1 %v13645_v8 }
 0x4df   :  { %13647 = vmatprep.subr.bf16.mxu1 %v14090_v16  ;;  %13637 = vmatpush3.bf16.msra.mxu0 %v13636_v61  ;;  %v10891_v61 = vld [vmem:[%s18706_s5 + $0xa70] sm:$0xff] }
 0x4e0   :  { %13650 = vmatprep.subr.bf16.mxu0 %v14090_v16 }
 0x4e2   :  { %13649 = vmatpush3.bf16.msra.mxu1 %v13648_v33  ;;  %12857 = vmatmul.mubr.msk.f32.vlgmr.msra.gmra.mrb[36].mxu0 %vm5168_vm1, %v8234_v52  ;;  %v10892_v33 = vld [vmem:[%s18706_s5 + $0xa78] sm:$0xff]  ;;  %v10903_v52 = vld [vmem:[%s18706_s5 + $0xac0] sm:$0xff] }
 0x4e3   :  { %13662 = vmatprep.subr.bf16.mxu1 %v14090_v16  ;;  %13652 = vmatpush3.bf16.msra.mxu0 %v13651_v1  ;;  %v13696_v35 = vpack.c.bf16 %v10892_v33, %v10891_v61  ;;  %v10904_v1 = vld [vmem:[%s18706_s5 + $0xac8] sm:$0xff]  ;;  %v10918_v61 = vld [vmem:[%s18706_s5 + $0xb30] sm:$0xff]  ;;  %v10919_v33 = vld [vmem:[%s18706_s5 + $0xb38] sm:$0xff] }
 0x4e4   :  { %13653 = vmatprep.subr.bf16.mxu0 %v14090_v16  ;;  %12894 = vmatprep.mubr.msk.f32.mxu0 %vm14091_vm2, %v19401_v7  ;;  %v13711_v54 = vpack.c.bf16 %v10904_v1, %v10903_v52  ;;  %v10930_v52 = vld [vmem:[%s18706_s5 + $0xb80] sm:$0xff]  ;;  %v10931_v1 = vld [vmem:[%s18706_s5 + $0xb88] sm:$0xff] }
 0x4e5   :  { %12876 = vmatmul.mubr.msk.f32.vlgmr.msra.gmra.mrb[36].mxu1 %vm5168_vm1, %v8319_v50  ;;  %v6103_v44 = vpop.f32.mrb[10].mxu0  ;;  %v8574_v50 = vld [vmem:[#allocation4 + $0x140] sm:$0xff] }
 0x4e6   :  { %13664 = vmatpush3.bf16.msra.mxu1 %v13663_v59  ;;  %v6107_v32 = vadd.f32 %v6103_v44, %v6022_v53  ;;  %v12364_v19 = vpop.f32.mrb[11].mxu0  ;;  %12913 = vmatprep.mubr.msk.f32.mxu1 %vm14091_vm2, %v19401_v7  ;;  %v13681_v53 = vpack.c.bf16 %v10881_v5, %v10880_v27  ;;  %v13699_v59 = vpack.c.bf16 %v10895_v25, %v10894_v24  ;;  %v10898_v44 = vld [vmem:[%s18706_s5 + $0xaa0] sm:$0xff] }
 0x4e7   :  { %13665 = vmatprep.subr.bf16.mxu1 %v14090_v16  ;;  %13655 = vmatpush3.bf16.msra.mxu0 %v13654_v51  ;;  %v10905_v51 = vld [vmem:[%s18706_s5 + $0xad0] sm:$0xff]  ;;  %v10908_v19 = vld [vmem:[%s18706_s5 + $0xae8] sm:$0xff]  ;;  %v13726_v27 = vpack.c.bf16 %v10915_v9, %v10914_v62  ;;  %v13732_v24 = vpack.c.bf16 %v10919_v33, %v10918_v61  ;;  %v10951_v62 = vld [vmem:[%s18706_s5 + $0xc18] sm:$0xff] }
 0x4e8   :  { %v6188_v18 = vpop.f32.mrb[10].mxu1  ;;  %13656 = vmatprep.subr.bf16.mxu0 %v14090_v16 }
 0x4e9   :  { %v12383_v13 = vpop.f32.mrb[11].mxu1  ;;  %v6192_v49 = vadd.f32 %v6188_v18, %v6107_v32  ;;  %v10907_v32 = vld [vmem:[%s18706_s5 + $0xae0] sm:$0xff] }
 0x4ea   :  { %13667 = vmatpush3.bf16.msra.mxu1 %v13666_v47  ;;  %v10906_v47 = vld [vmem:[%s18706_s5 + $0xad8] sm:$0xff]  ;;  %v13717_v55 = vpack.c.bf16 %v10908_v19, %v10907_v32  ;;  %v10935_v32 = vld [vmem:[%s18706_s5 + $0xba8] sm:$0xff] }
 0x4eb   :  { %13668 = vmatprep.subr.bf16.mxu1 %v14090_v16  ;;  %13658 = vmatpush3.bf16.msra.mxu0 %v13657_v4  ;;  %v13714_v22 = vpack.c.bf16 %v10906_v47, %v10905_v51  ;;  %v10932_v51 = vld [vmem:[%s18706_s5 + $0xb90] sm:$0xff]  ;;  %v10933_v47 = vld [vmem:[%s18706_s5 + $0xb98] sm:$0xff] }
 0x4ec   :  { %13659 = vmatprep.subr.bf16.mxu0 %v14090_v16 }
 0x4ee   :  { %13670 = vmatpush3.bf16.msra.mxu1 %v13669_v6 }
 0x4ef   :  { %13671 = vmatprep.subr.bf16.mxu1 %v14090_v16  ;;  %13661 = vmatpush3.bf16.msra.mxu0 %v13660_v38  ;;  %v10909_v38 = vld [vmem:[%s18706_s5 + $0xaf0] sm:$0xff] }
 0x4f0   :  { %13674 = vmatprep.subr.bf16.mxu0 %v14090_v16 }
 0x4f2   :  { %13673 = vmatpush3.bf16.msra.mxu1 %v13672_v17  ;;  %12895 = vmatmul.mubr.msk.f32.vlgmr.msra.gmra.mrb[38].mxu0 %vm5168_vm1, %v8404_v31  ;;  %v10910_v17 = vld [vmem:[%s18706_s5 + $0xaf8] sm:$0xff]  ;;  %v10921_v31 = vld [vmem:[%s18706_s5 + $0xb40] sm:$0xff] }
 0x4f3   :  { %13686 = vmatprep.subr.bf16.mxu1 %v14090_v16  ;;  %13676 = vmatpush3.bf16.msra.mxu0 %v13675_v56  ;;  %v13720_v0 = vpack.c.bf16 %v10910_v17, %v10909_v38  ;;  %v10922_v56 = vld [vmem:[%s18706_s5 + $0xb48] sm:$0xff]  ;;  %v10936_v38 = vld [vmem:[%s18706_s5 + $0xbb0] sm:$0xff]  ;;  %v10937_v17 = vld [vmem:[%s18706_s5 + $0xbb8] sm:$0xff] }
 0x4f4   :  { %13677 = vmatprep.subr.bf16.mxu0 %v14090_v16  ;;  %12932 = vmatprep.mubr.msk.f32.mxu0 %vm14091_vm2, %v19401_v7  ;;  %v13735_v23 = vpack.c.bf16 %v10922_v56, %v10921_v31  ;;  %v10948_v31 = vld [vmem:[%s18706_s5 + $0xc00] sm:$0xff]  ;;  %v10949_v56 = vld [vmem:[%s18706_s5 + $0xc08] sm:$0xff] }
 0x4f5   :  { %12914 = vmatmul.mubr.msk.f32.vlgmr.msra.gmra.mrb[38].mxu1 %vm5168_vm1, %v8489_v63  ;;  %v6273_v39 = vpop.f32.mrb[12].mxu0  ;;  %v8744_v63 = vld [vmem:[#allocation4 + $0x150] sm:$0xff] }
 0x4f6   :  { %13688 = vmatpush3.bf16.msra.mxu1 %v13687_v41  ;;  %v6277_v45 = vadd.f32 %v6273_v39, %v6192_v49  ;;  %v12402_v29 = vpop.f32.mrb[13].mxu0  ;;  %12951 = vmatprep.mubr.msk.f32.mxu1 %vm14091_vm2, %v19401_v7  ;;  %v13705_v49 = vpack.c.bf16 %v10899_v12, %v10898_v44  ;;  %v13723_v41 = vpack.c.bf16 %v10913_v14, %v10912_v57  ;;  %v10916_v39 = vld [vmem:[%s18706_s5 + $0xb20] sm:$0xff] }
 0x4f7   :  { %13689 = vmatprep.subr.bf16.mxu1 %v14090_v16  ;;  %13679 = vmatpush3.bf16.msra.mxu0 %v13678_v43  ;;  %v10923_v43 = vld [vmem:[%s18706_s5 + $0xb50] sm:$0xff]  ;;  %v10926_v29 = vld [vmem:[%s18706_s5 + $0xb68] sm:$0xff]  ;;  %v13750_v44 = vpack.c.bf16 %v10933_v47, %v10932_v51  ;;  %v13756_v57 = vpack.c.bf16 %v10937_v17, %v10936_v38 }
 0x4f8   :  { %v6358_v3 = vpop.f32.mrb[12].mxu1  ;;  %13680 = vmatprep.subr.bf16.mxu0 %v14090_v16  ;;  %v9347_v17 = vld [vmem:[%s18708_s7 + $0x30] sm:$0xff] }
 0x4f9   :  { %v12421_v8 = vpop.f32.mrb[13].mxu1  ;;  %v6362_v11 = vadd.f32 %v6358_v3, %v6277_v45  ;;  %v10925_v45 = vld [vmem:[%s18706_s5 + $0xb60] sm:$0xff] }
 0x4fa   :  { %13691 = vmatpush3.bf16.msra.mxu1 %v13690_v37  ;;  %v10924_v37 = vld [vmem:[%s18706_s5 + $0xb58] sm:$0xff]  ;;  %v13741_v20 = vpack.c.bf16 %v10926_v29, %v10925_v45 }
 0x4fb   :  { %13692 = vmatprep.subr.bf16.mxu1 %v14090_v16  ;;  %13682 = vmatpush3.bf16.msra.mxu0 %v13681_v53  ;;  %v13738_v5 = vpack.c.bf16 %v10924_v37, %v10923_v43  ;;  %v10952_v43 = vld [vmem:[%s18706_s5 + $0xc20] sm:$0xff]  ;;  %v10953_v37 = vld [vmem:[%s18706_s5 + $0xc28] sm:$0xff] }
 0x4fc   :  { %13683 = vmatprep.subr.bf16.mxu0 %v14090_v16 }
 0x4fe   :  { %13694 = vmatpush3.bf16.msra.mxu1 %v13693_v26 }
 0x4ff   :  { %13695 = vmatprep.subr.bf16.mxu1 %v14090_v16  ;;  %13685 = vmatpush3.bf16.msra.mxu0 %v13684_v21  ;;  %v10927_v21 = vld [vmem:[%s18706_s5 + $0xb70] sm:$0xff] }
 0x500   :  { %13698 = vmatprep.subr.bf16.mxu0 %v14090_v16 }
 0x502   :  { %13697 = vmatpush3.bf16.msra.mxu1 %v13696_v35  ;;  %12933 = vmatmul.mubr.msk.f32.vlgmr.msra.gmra.mrb[40].mxu0 %vm5168_vm1, %v8574_v50  ;;  %v10928_v35 = vld [vmem:[%s18706_s5 + $0xb78] sm:$0xff]  ;;  %v10939_v50 = vld [vmem:[%s18706_s5 + $0xbc0] sm:$0xff] }
 0x503   :  { %13710 = vmatprep.subr.bf16.mxu1 %v14090_v16  ;;  %13700 = vmatpush3.bf16.msra.mxu0 %v13699_v59  ;;  %v13744_v25 = vpack.c.bf16 %v10928_v35, %v10927_v21  ;;  %v10940_v59 = vld [vmem:[%s18706_s5 + $0xbc8] sm:$0xff] }
 0x504   :  { %13701 = vmatprep.subr.bf16.mxu0 %v14090_v16  ;;  %12970 = vmatprep.mubr.msk.f32.mxu0 %vm14091_vm2, %v19401_v7  ;;  %v13759_v46 = vpack.c.bf16 %v10940_v59, %v10939_v50 }
 0x505   :  { %12952 = vmatmul.mubr.msk.f32.vlgmr.msra.gmra.mrb[40].mxu1 %vm5168_vm1, %v8659_v48  ;;  %v6443_v2 = vpop.f32.mrb[14].mxu0  ;;  %v8914_v48 = vld [vmem:[#allocation4 + $0x160] sm:$0xff] }
 0x506   :  { %13712 = vmatpush3.bf16.msra.mxu1 %v13711_v54  ;;  %v6447_v18 = vadd.f32 %v6443_v2, %v6362_v11  ;;  %v12440_v4 = vpop.f32.mrb[15].mxu0  ;;  %12989 = vmatprep.mubr.msk.f32.mxu1 %vm14091_vm2, %v19401_v7  ;;  %v13729_v11 = vpack.c.bf16 %v10917_v42, %v10916_v39  ;;  %v13747_v54 = vpack.c.bf16 %v10931_v1, %v10930_v52  ;;  %v10934_v2 = vld [vmem:[%s18706_s5 + $0xba0] sm:$0xff] }
 0x507   :  { %13713 = vmatprep.subr.bf16.mxu1 %v14090_v16  ;;  %13703 = vmatpush3.bf16.msra.mxu0 %v13702_v36  ;;  %v10941_v36 = vld [vmem:[%s18706_s5 + $0xbd0] sm:$0xff]  ;;  %v10944_v4 = vld [vmem:[%s18706_s5 + $0xbe8] sm:$0xff] }
 0x508   :  { %v6528_v13 = vpop.f32.mrb[14].mxu1  ;;  %13704 = vmatprep.subr.bf16.mxu0 %v14090_v16 }
 0x509   :  { %v12459_v6 = vpop.f32.mrb[15].mxu1  ;;  %v6532_v15 = vadd.f32 %v6528_v13, %v6447_v18  ;;  %v10943_v18 = vld [vmem:[%s18706_s5 + $0xbe0] sm:$0xff] }
 0x50a   :  { %13715 = vmatpush3.bf16.msra.mxu1 %v13714_v22  ;;  %v10942_v22 = vld [vmem:[%s18706_s5 + $0xbd8] sm:$0xff]  ;;  %v13765_v34 = vpack.c.bf16 %v10944_v4, %v10943_v18 }
 0x50b   :  { %13716 = vmatprep.subr.bf16.mxu1 %v14090_v16  ;;  %13706 = vmatpush3.bf16.msra.mxu0 %v13705_v49  ;;  %v13762_v12 = vpack.c.bf16 %v10942_v22, %v10941_v36  ;;  %v9344_v4 = vld [vmem:[%s18708_s7 + $0x18] sm:$0xff] }
 0x50c   :  { %13707 = vmatprep.subr.bf16.mxu0 %v14090_v16 }
 0x50e   :  { %13718 = vmatpush3.bf16.msra.mxu1 %v13717_v55 }
 0x50f   :  { %13719 = vmatprep.subr.bf16.mxu1 %v14090_v16  ;;  %13709 = vmatpush3.bf16.msra.mxu0 %v13708_v40  ;;  %v10945_v40 = vld [vmem:[%s18706_s5 + $0xbf0] sm:$0xff] }
 0x510   :  { %13722 = vmatprep.subr.bf16.mxu0 %v14090_v16 }
 0x512   :  { %13721 = vmatpush3.bf16.msra.mxu1 %v13720_v0  ;;  %12971 = vmatmul.mubr.msk.f32.vlgmr.msra.gmra.mrb[42].mxu0 %vm5168_vm1, %v8744_v63  ;;  %v10946_v0 = vld [vmem:[%s18706_s5 + $0xbf8] sm:$0xff] }
 0x513   :  { %13734 = vmatprep.subr.bf16.mxu1 %v14090_v16  ;;  %13724 = vmatpush3.bf16.msra.mxu0 %v13723_v41  ;;  %v13768_v14 = vpack.c.bf16 %v10946_v0, %v10945_v40  ;;  %v9084_v63 = vld [vmem:[#allocation4 + $0x170] sm:$0xff]  ;;  %v13771_v41 = vpack.c.bf16 %v10949_v56, %v10948_v31  ;;  %v9349_v31 = vld [vmem:[%s18708_s7 + $0x40] sm:$0xff]  ;;  %v9350_v56 = vld [vmem:[%s18708_s7 + $0x48] sm:$0xff] }
 0x514   :  { %13725 = vmatprep.subr.bf16.mxu0 %v14090_v16  ;;  %13008 = vmatprep.mubr.msk.f32.mxu0 %vm14091_vm2, %v19401_v7  ;;  %v9348_v40 = vld [vmem:[%s18708_s7 + $0x38] sm:$0xff] }
 0x515   :  { %12990 = vmatmul.mubr.msk.f32.vlgmr.msra.gmra.mrb[42].mxu1 %vm5168_vm1, %v8829_v60  ;;  %v6613_v30 = vpop.f32.mrb[16].mxu0  ;;  %v9169_v60 = vld [vmem:[#allocation4 + $0x178] sm:$0xff] }
 0x516   :  { %13736 = vmatpush3.bf16.msra.mxu1 %v13735_v23  ;;  %v6617_v3 = vadd.f32 %v6613_v30, %v6532_v15  ;;  %v12478_v53 = vpop.f32.mrb[17].mxu0  ;;  %13027 = vmatprep.mubr.msk.f32.mxu1 %vm14091_vm2, %v19401_v7  ;;  %v13753_v15 = vpack.c.bf16 %v10935_v32, %v10934_v2  ;;  %v10950_v23 = vld [vmem:[%s18706_s5 + $0xc10] sm:$0xff]  ;;  %v13777_v30 = vpack.c.bf16 %v10953_v37, %v10952_v43  ;;  %v9341_v2 = vld [vmem:[%s18708_s7] sm:$0xff]  ;;  %v9342_v32 = vld [vmem:[%s18708_s7 + $0x8] sm:$0xff] }
 0x517   :  { %13737 = vmatprep.subr.bf16.mxu1 %v14090_v16  ;;  %13727 = vmatpush3.bf16.msra.mxu0 %v13726_v27  ;;  %v13774_v9 = vpack.c.bf16 %v10951_v62, %v10950_v23  ;;  %v10955_v53 = vld [vmem:[%s18706_s5 + $0xc38] sm:$0xff]  ;;  %v13783_v18 = vpack.c.bf16 %v9342_v32, %v9341_v2  ;;  %v9353_v62 = vld [vmem:[%s18708_s7 + $0x60] sm:$0xff] }
 0x518   :  { %v6698_v8 = vpop.f32.mrb[16].mxu1  ;;  %13728 = vmatprep.subr.bf16.mxu0 %v14090_v16 }
 0x519   :  { %v12497_v26 = vpop.f32.mrb[17].mxu1  ;;  %v6702_v58 = vadd.f32 %v6698_v8, %v6617_v3  ;;  %v10954_v3 = vld [vmem:[%s18706_s5 + $0xc30] sm:$0xff] }
 0x51a   :  { %13739 = vmatpush3.bf16.msra.mxu1 %v13738_v5  ;;  %v13780_v8 = vpack.c.bf16 %v10955_v53, %v10954_v3 }
 0x51b   :  { %13740 = vmatprep.subr.bf16.mxu1 %v14090_v16  ;;  %13730 = vmatpush3.bf16.msra.mxu0 %v13729_v11 }
 0x51c   :  { %13731 = vmatprep.subr.bf16.mxu0 %v14090_v16 }
 0x51e   :  { %13742 = vmatpush3.bf16.msra.mxu1 %v13741_v20 }
 0x51f   :  { %13743 = vmatprep.subr.bf16.mxu1 %v14090_v16  ;;  %13733 = vmatpush3.bf16.msra.mxu0 %v13732_v24 }
 0x520   :  { %13746 = vmatprep.subr.bf16.mxu0 %v14090_v16 }
 0x522   :  { %13745 = vmatpush3.bf16.msra.mxu1 %v13744_v25  ;;  %13009 = vmatmul.mubr.msk.f32.vlgmr.msra.gmra.mrb[44].mxu0 %vm5168_vm1, %v8914_v48 }
 0x523   :  { %13758 = vmatprep.subr.bf16.mxu1 %v14090_v16  ;;  %13748 = vmatpush3.bf16.msra.mxu0 %v13747_v54 }
 0x524   :  { %13749 = vmatprep.subr.bf16.mxu0 %v14090_v16  ;;  %13046 = vmatprep.mubr.msk.f32.mxu0 %vm14091_vm2, %v19401_v7 }
 0x525   :  { %13028 = vmatmul.mubr.msk.f32.vlgmr.msra.gmra.mrb[44].mxu1 %vm5168_vm1, %v8999_v10  ;;  %v6783_v19 = vpop.f32.mrb[18].mxu0 }
 0x526   :  { %13760 = vmatpush3.bf16.msra.mxu1 %v13759_v46  ;;  %v6787_v13 = vadd.f32 %v6783_v19, %v6702_v58  ;;  %v12516_v49 = vpop.f32.mrb[19].mxu0  ;;  %13065 = vmatprep.mubr.msk.f32.mxu1 %vm14091_vm2, %v19401_v7  ;;  %v9343_v19 = vld [vmem:[%s18708_s7 + $0x10] sm:$0xff] }
 0x527   :  { %13761 = vmatprep.subr.bf16.mxu1 %v14090_v16  ;;  %13751 = vmatpush3.bf16.msra.mxu0 %v13750_v44  ;;  %v9345_v49 = vld [vmem:[%s18708_s7 + $0x20] sm:$0xff] }
 0x528   :  { %v6868_v6 = vpop.f32.mrb[18].mxu1  ;;  %13752 = vmatprep.subr.bf16.mxu0 %v14090_v16 }
 0x529   :  { %v12535_v55 = vpop.f32.mrb[19].mxu1  ;;  %v6872_v28 = vadd.f32 %v6868_v6, %v6787_v13  ;;  %v13786_v13 = vpack.c.bf16 %v9344_v4, %v9343_v19  ;;  %v9346_v6 = vld [vmem:[%s18708_s7 + $0x28] sm:$0xff] }
 0x52a   :  { %13763 = vmatpush3.bf16.msra.mxu1 %v13762_v12 }
 0x52b   :  { %13764 = vmatprep.subr.bf16.mxu1 %v14090_v16  ;;  %13754 = vmatpush3.bf16.msra.mxu0 %v13753_v15  ;;  %v13789_v15 = vpack.c.bf16 %v9346_v6, %v9345_v49 }
 0x52c   :  { %13755 = vmatprep.subr.bf16.mxu0 %v14090_v16 }
 0x52e   :  { %13766 = vmatpush3.bf16.msra.mxu1 %v13765_v34 }
 0x52f   :  { %13767 = vmatprep.subr.bf16.mxu1 %v14090_v16  ;;  %13757 = vmatpush3.bf16.msra.mxu0 %v13756_v57  ;;  %v13792_v57 = vpack.c.bf16 %v9348_v40, %v9347_v17 }
 0x530   :  { %13770 = vmatprep.subr.bf16.mxu0 %v14090_v16 }
 0x532   :  { %13769 = vmatpush3.bf16.msra.mxu1 %v13768_v14  ;;  %13047 = vmatmul.mubr.msk.f32.vlgmr.msra.gmra.mrb[46].mxu0 %vm5168_vm1, %v9084_v63  ;;  %v13795_v63 = vpack.c.bf16 %v9350_v56, %v9349_v31 }
 0x533   :  { %13782 = vmatprep.subr.bf16.mxu1 %v14090_v16  ;;  %13772 = vmatpush3.bf16.msra.mxu0 %v13771_v41  ;;  %v9351_v41 = vld [vmem:[%s18708_s7 + $0x50] sm:$0xff] }
 0x534   :  { %13773 = vmatprep.subr.bf16.mxu0 %v14090_v16  ;;  %13084 = vmatprep.mubr.msk.f32.mxu0 %vm14091_vm2, %v19401_v7 }
 0x535   :  { %13066 = vmatmul.mubr.msk.f32.vlgmr.msra.gmra.mrb[46].mxu1 %vm5168_vm1, %v9169_v60  ;;  %v6953_v27 = vpop.f32.mrb[20].mxu0  ;;  %v9352_v60 = vld [vmem:[%s18708_s7 + $0x58] sm:$0xff] }
 0x536   :  { %13119 = vmatprep.mubr.msk.f32.mxu1 %vm14091_vm2, %v19401_v7  ;;  %v6957_v5 = vadd.f32 %v6953_v27, %v6872_v28  ;;  %v12554_v39 = vpop.f32.mrb[21].mxu0  ;;  %v9254_v7 = vld [vmem:[#allocation4 + $0x180] sm:$0xff]  ;;  %13784 = vmatpush3.bf16.msra.mxu1 %v13783_v18  ;;  %v13798_v23 = vpack.c.bf16 %v9352_v60, %v9351_v41 }
 0x537   :  { %13775 = vmatpush3.bf16.msra.mxu0 %v13774_v9  ;;  %13785 = vmatprep.subr.bf16.mxu1 %v14090_v16  ;;  %v9354_v9 = vld [vmem:[%s18708_s7 + $0x68] sm:$0xff] }
 0x538   :  { %v7038_v42 = vpop.f32.mrb[20].mxu1  ;;  %13776 = vmatprep.subr.bf16.mxu0 %v14090_v16  ;;  %v13801_v43 = vpack.c.bf16 %v9354_v9, %v9353_v62 }
 0x539   :  { %v12573_v45 = vpop.f32.mrb[21].mxu1  ;;  %v7042_v29 = vadd.f32 %v7038_v42, %v6957_v5  ;;  %v9355_v42 = vld [vmem:[%s18708_s7 + $0x70] sm:$0xff] }
 0x53a   :  { %13787 = vmatpush3.bf16.msra.mxu1 %v13786_v13 }
 0x53b   :  { %13778 = vmatpush3.bf16.msra.mxu0 %v13777_v30  ;;  %13788 = vmatprep.subr.bf16.mxu1 %v14090_v16  ;;  %v9356_v30 = vld [vmem:[%s18708_s7 + $0x78] sm:$0xff] }
 0x53c   :  { %13779 = vmatprep.subr.bf16.mxu0 %v14090_v16 }
 0x53e   :  { %13790 = vmatpush3.bf16.msra.mxu1 %v13789_v15 }
 0x53f   :  { %13781 = vmatpush3.bf16.msra.mxu0 %v13780_v8  ;;  %13791 = vmatprep.subr.bf16.mxu1 %v14090_v16 }
 0x542   :  { %13085 = vmatmul.mubr.msk.f32.vlgmr.msra.gmra.mrb[48].mxu0 %vm5168_vm1, %v9254_v7  ;;  %13793 = vmatpush3.bf16.msra.mxu1 %v13792_v57 }
 0x543   :  { %13794 = vmatprep.subr.bf16.mxu1 %v14090_v16 }
 0x545   :  { %v7123_v11 = vpop.f32.mrb[22].mxu0 }
 0x546   :  { %v7127_v26 = vadd.f32 %v7123_v11, %v7042_v29  ;;  %v12592_v58 = vpop.f32.mrb[23].mxu0  ;;  %13796 = vmatpush3.bf16.msra.mxu1 %v13795_v63  ;;  %v13804_v29 = vpack.c.bf16 %v9356_v30, %v9355_v42  ;;  %v9357_v63 = vld [vmem:[%s18709_s8] sm:$0xff] }
 0x547   :  { %13797 = vmatprep.subr.bf16.mxu1 %v14090_v16 }
 0x548   :  { %v7208_v20 = vpop.f32.mrb[22].mxu1 }
 0x549   :  { %v12611_v61 = vpop.f32.mrb[23].mxu1  ;;  %v7212_v33 = vadd.f32 %v7208_v20, %v7127_v26 }
 0x54a   :  { %13799 = vmatpush3.bf16.msra.mxu1 %v13798_v23 }
 0x54b   :  { %13800 = vmatprep.subr.bf16.mxu1 %v14090_v16 }
 0x54e   :  { %13802 = vmatpush3.bf16.msra.mxu1 %v13801_v43 }
 0x54f   :  { %13803 = vmatprep.subr.bf16.mxu1 %v14090_v16 }
 0x552   :  { %13805 = vmatpush3.bf16.msra.mxu1 %v13804_v29 }
 0x555   :  { %v7293_v21 = vpop.f32.mrb[24].mxu0 }
 0x556   :  { %v7297_v35 = vadd.f32 %v7293_v21, %v7212_v33  ;;  %v12630_v24 = vpop.f32.mrb[25].mxu0 }
 0x558   :  { %v7378_v25 = vpop.f32.mrb[24].mxu1 }
 0x559   :  { %v12649_v52 = vpop.f32.mrb[25].mxu1  ;;  %v7382_v1 = vadd.f32 %v7378_v25, %v7297_v35 }
 0x565   :  { %v7463_v50 = vpop.f32.mrb[26].mxu0 }
 0x566   :  { %v7467_v59 = vadd.f32 %v7463_v50, %v7382_v1  ;;  %v12668_v48 = vpop.f32.mrb[27].mxu0 }
 0x568   :  { %v7548_v54 = vpop.f32.mrb[26].mxu1 }
 0x569   :  { %v12687_v10 = vpop.f32.mrb[27].mxu1  ;;  %v7552_v46 = vadd.f32 %v7548_v54, %v7467_v59 }
 0x575   :  { %v7633_v51 = vpop.f32.mrb[28].mxu0 }
 0x576   :  { %v7637_v47 = vadd.f32 %v7633_v51, %v7552_v46  ;;  %v12706_v36 = vpop.f32.mrb[29].mxu0 }
 0x578   :  { %v7718_v22 = vpop.f32.mrb[28].mxu1 }
 0x579   :  { %v12725_v44 = vpop.f32.mrb[29].mxu1  ;;  %v7722_v12 = vadd.f32 %v7718_v22, %v7637_v47 }
 0x585   :  { %v7803_v55 = vpop.f32.mrb[30].mxu0 }
 0x586   :  { %v7807_v28 = vadd.f32 %v7803_v55, %v7722_v12  ;;  %v12744_v34 = vpop.f32.mrb[31].mxu0 }
 0x588   :  { %v7888_v38 = vpop.f32.mrb[30].mxu1 }
 0x589   :  { %v12763_v0 = vpop.f32.mrb[31].mxu1  ;;  %v7892_v14 = vadd.f32 %v7888_v38, %v7807_v28 }
 0x58a   :  { %v9338_v0 = vld [vmem:[%s18707_s6] sm:$0xff] }
 0x595   :  { %v7973_v37 = vpop.f32.mrb[32].mxu0 }
 0x596   :  { %v7977_v27 = vadd.f32 %v7973_v37, %v7892_v14  ;;  %v12782_v5 = vpop.f32.mrb[33].mxu0 }
 0x598   :  { %v8058_v39 = vpop.f32.mrb[32].mxu1 }
 0x599   :  { %v12801_v45 = vpop.f32.mrb[33].mxu1  ;;  %v8062_v3 = vadd.f32 %v8058_v39, %v7977_v27 }
 0x5a5   :  { %v8143_v53 = vpop.f32.mrb[34].mxu0 }
 0x5a6   :  { %v8147_v8 = vadd.f32 %v8143_v53, %v8062_v3  ;;  %v12820_v7 = vpop.f32.mrb[35].mxu0 }
 0x5a8   :  { %v8228_v11 = vpop.f32.mrb[34].mxu1 }
 0x5a9   :  { %v12839_v26 = vpop.f32.mrb[35].mxu1  ;;  %v8232_v58 = vadd.f32 %v8228_v11, %v8147_v8 }
 0x5b5   :  { %v8313_v20 = vpop.f32.mrb[36].mxu0 }
 0x5b6   :  { %v8317_v16 = vadd.f32 %v8313_v20, %v8232_v58  ;;  %v12858_v61 = vpop.f32.mrb[37].mxu0 }
 0x5b8   :  { %v8398_v33 = vpop.f32.mrb[36].mxu1 }
 0x5b9   :  { %v12877_v21 = vpop.f32.mrb[37].mxu1  ;;  %v8402_v35 = vadd.f32 %v8398_v33, %v8317_v16 }
 0x5c5   :  { %v8483_v24 = vpop.f32.mrb[38].mxu0 }
 0x5c6   :  { %v8487_v25 = vadd.f32 %v8483_v24, %v8402_v35  ;;  %v12896_v52 = vpop.f32.mrb[39].mxu0 }
 0x5c8   :  { %v8568_v1 = vpop.f32.mrb[38].mxu1 }
 0x5c9   :  { %v12915_v50 = vpop.f32.mrb[39].mxu1  ;;  %v8572_v59 = vadd.f32 %v8568_v1, %v8487_v25 }
 0x5d5   :  { %v8653_v48 = vpop.f32.mrb[40].mxu0 }
 0x5d6   :  { %v8657_v54 = vadd.f32 %v8653_v48, %v8572_v59  ;;  %v12934_v10 = vpop.f32.mrb[41].mxu0 }
 0x5d8   :  { %v8738_v46 = vpop.f32.mrb[40].mxu1 }
 0x5d9   :  { %v12953_v51 = vpop.f32.mrb[41].mxu1  ;;  %v8742_v47 = vadd.f32 %v8738_v46, %v8657_v54 }
 0x5e5   :  { %v8823_v36 = vpop.f32.mrb[42].mxu0 }
 0x5e6   :  { %v8827_v22 = vadd.f32 %v8823_v36, %v8742_v47  ;;  %v12972_v44 = vpop.f32.mrb[43].mxu0 }
 0x5e8   :  { %v8908_v12 = vpop.f32.mrb[42].mxu1 }
 0x5e9   :  { %v12991_v2 = vpop.f32.mrb[43].mxu1  ;;  %v8912_v32 = vadd.f32 %v8908_v12, %v8827_v22 }
 0x5f5   :  { %v8993_v19 = vpop.f32.mrb[44].mxu0 }
 0x5f6   :  { %v8997_v18 = vadd.f32 %v8993_v19, %v8912_v32  ;;  %v13010_v4 = vpop.f32.mrb[45].mxu0 }
 0x5f8   :  { %v9078_v13 = vpop.f32.mrb[44].mxu1 }
 0x5f9   :  { %v13029_v49 = vpop.f32.mrb[45].mxu1  ;;  %v9082_v6 = vadd.f32 %v9078_v13, %v8997_v18 }
 0x605   :  { %v9163_v15 = vpop.f32.mrb[46].mxu0 }
 0x606   :  { %v9167_v55 = vadd.f32 %v9163_v15, %v9082_v6  ;;  %v13048_v28 = vpop.f32.mrb[47].mxu0 }
 0x608   :  { %v9248_v34 = vpop.f32.mrb[46].mxu1 }
 0x609   :  { %v13067_v38 = vpop.f32.mrb[47].mxu1  ;;  %v9252_v17 = vadd.f32 %v9248_v34, %v9167_v55 }
 0x615   :  { %v9333_v40 = vpop.f32.mrb[48].mxu0 }
 0x616   :  { %v9337_v57 = vadd.f32 %v9333_v40, %v9252_v17  ;;  %v13086_v14 = vpop.f32.mrb[49].mxu0 }
 0x618   :  { %v9339_v31 = vadd.f32 %v9338_v0, %v9337_v57 }
 0x61a   :  { %v9340_v56 = vmax.f32 %v9339_v31, 0.0 }
 0x61c   :  { %13120 = vmatmul.mubr.f32.vlgmr.msra.gmra.mrb[48].mxu1 %v9340_v56 }
 0x6ef   :  { %v9424_v41 = vpop.f32.mrb[48].mxu1 }
 0x6f0   :  { %v9425_v60 = vadd.f32 %v9424_v41, %v9357_v63  ;;  %v13121_v23 = vpop.f32.mrb[49].mxu1 }
 0x6f2   :  { %9428 = vst [vmem:[%s18710_s9] sm:$0xff] %v9425_v60 }

</bundles_post_ra>
